<compile_context>
chip_gen: v5e
topology: v5e:2x2
jax: 0.10.0
libtpu: 0.0.40
codegen_flags: <defaults>
</compile_context>

<pallas_src>
import functools

import jax
import jax.numpy as jnp
from jax.experimental import pallas as pl
from jax.experimental.pallas import tpu as pltpu

OUT_W = 128  # lane-dense packed output width: [u | mean | std | zero padding]


def _round_up(x, m):
    return ((x + m - 1) // m) * m


def _vae_kernel(sa_ref, eps_ref, w1_ref, w2q_ref, wd1_ref, wd2q_ref,
                wsm_ref, consts_ref, out_ref, *,
                max_action: float, state_dim: int, action_dim: int,
                latent_dim: int):
    f32, bf16 = jnp.float32, jnp.bfloat16
    two_l = 2 * latent_dim

    sa = sa_ref[...]                      # [B, sd+ad] bf16 (host-cast)
    s = sa[:, :state_dim]                 # [B, sd]    bf16 (prefix slice)
    eps = eps_ref[...]                    # [B, L]     f32

    # One DMA for every small operand: 4 hidden biases, packed small biases,
    # and the two int8 dequant scale rows.
    consts = consts_ref[...]              # [7, 768] f32
    b1 = consts[0:1, :]
    b2 = consts[1:2, :]
    bd1 = consts[2:3, :]
    bd2 = consts[3:4, :]
    b_ml = consts[4:5, :two_l]
    b_d3 = consts[4:5, two_l:two_l + action_dim]
    w2_scale = consts[5:6, :]
    wd2_scale = consts[6:7, :]

    # Dequantize the two dominant int8 weights to bf16 (per-output-channel
    # scales).  Storage is int8 in HBM -> half the dominant weight DMA bytes.
    w2 = (w2q_ref[...].astype(f32) * w2_scale).astype(bf16)    # [768, 768]
    wd2 = (wd2q_ref[...].astype(f32) * wd2_scale).astype(bf16)  # [768, 768]

    wsm = wsm_ref[...]                    # [768, 2L+ad] bf16 (wmean|wlog_std|wd3)

    # ----- encoder -----
    # z = relu(e1(cat([state, action], 1)))
    h = jnp.dot(sa, w1_ref[...], preferred_element_type=f32) + b1
    h = jnp.maximum(h, 0.0)
    # z = relu(e2(z))
    h = jnp.dot(h.astype(bf16), w2, preferred_element_type=f32) + b2
    h = jnp.maximum(h, 0.0)

    # mean / log_std via a single merged [768, 2L] matmul.
    ml = jnp.dot(h.astype(bf16), wsm[:, :two_l], preferred_element_type=f32) + b_ml
    mean = ml[:, :latent_dim]
    log_std = jnp.clip(ml[:, latent_dim:two_l], -4.0, 15.0)
    std = jnp.exp(log_std)

    # reparameterize: z = mean + std * eps   (eps supplied by caller)
    z = mean + std * eps

    # ----- decoder (decode) -----
    # a = relu(d1(cat([state, z], 1)))  -- single merged matmul on [state|z].
    sz = jnp.concatenate([s.astype(f32), z], axis=1).astype(bf16)  # [B, sd+L]
    d = jnp.dot(sz, wd1_ref[...], preferred_element_type=f32) + bd1
    d = jnp.maximum(d, 0.0)
    # a = relu(d2(a))
    d = jnp.dot(d.astype(bf16), wd2, preferred_element_type=f32) + bd2
    d = jnp.maximum(d, 0.0)
    # u = max_action * tanh(d3(a))
    u = max_action * jnp.tanh(
        jnp.dot(d.astype(bf16), wsm[:, two_l:two_l + action_dim],
                preferred_element_type=f32) + b_d3)

    # Single full-width lane-dense store: [u | mean | std | zeros].
    pad_w = OUT_W - (action_dim + two_l)
    out_ref[...] = jnp.concatenate(
        [u, mean, std, jnp.zeros((u.shape[0], pad_w), f32)], axis=1)


def _const_spec(shape, multi_block):
    """BlockSpec for a grid-invariant (constant) operand.

    When the grid has >1 step, request a single VMEM buffer (the index_map is
    constant, so double-buffering only wastes VMEM — matters most on v7x)."""
    index_map = lambda i: (0,) * len(shape)
    if multi_block:
        try:
            return pl.BlockSpec(shape, index_map, pipeline_mode=pl.Buffered(1))
        except Exception:  # older jax without pipeline_mode support
            pass
    return pl.BlockSpec(shape, index_map)


def vae_forward(state, action, eps, params, max_action):
    """Runs the VAE forward pass; returns (u, mean, std)."""
    B, state_dim = state.shape
    action_dim = action.shape[1]
    latent_dim = eps.shape[1]
    sa_dim = state_dim + action_dim
    assert action_dim + 2 * latent_dim <= OUT_W

    # Small batches -> a single block (grid = 1): this problem is weight-DMA
    # bound, so sharding a tiny batch across TensorCores only doubles weight
    # traffic.  Large batches -> 512-row blocks (per-grid-step overhead <10%).
    if B <= 512:
        b_pad = max(8, _round_up(B, 8))
        block_b = b_pad
    else:
        block_b = 512
        b_pad = _round_up(B, block_b)
    pad = b_pad - B
    n_blocks = b_pad // block_b

    sa = jnp.concatenate([state, action], axis=1).astype(jnp.bfloat16)
    sa = jnp.pad(sa, ((0, pad), (0, 0)))
    eps_p = jnp.pad(eps, ((0, pad), (0, 0)))

    w1, w2q = params["w1"], params["w2q"]
    wd1, wd2q = params["wd1"], params["wd2q"]
    wsm, consts = params["w_small"], params["consts"]

    out = pl.pallas_call(
        functools.partial(_vae_kernel, max_action=float(max_action),
                          state_dim=state_dim, action_dim=action_dim,
                          latent_dim=latent_dim),
        out_shape=jax.ShapeDtypeStruct((b_pad, OUT_W), jnp.float32),
        grid=(n_blocks,),
        in_specs=[
            pl.BlockSpec((block_b, sa_dim), lambda i: (i, 0)),       # state||action
            pl.BlockSpec((block_b, latent_dim), lambda i: (i, 0)),   # eps
            _const_spec(w1.shape, n_blocks > 1),                     # e1 weight
            _const_spec(w2q.shape, n_blocks > 1),                    # e2 weight (int8)
            _const_spec(wd1.shape, n_blocks > 1),                    # d1 weight (merged)
            _const_spec(wd2q.shape, n_blocks > 1),                   # d2 weight (int8)
            _const_spec(wsm.shape, n_blocks > 1),                    # mean|log_std|d3
            _const_spec(consts.shape, n_blocks > 1),                 # biases + scales
        ],
        out_specs=pl.BlockSpec((block_b, OUT_W), lambda i: (i, 0)),
        compiler_params=pltpu.CompilerParams(
            dimension_semantics=("parallel",),
            vmem_limit_bytes=32 << 20),
    )(sa, eps_p, w1, w2q, wd1, wd2q, wsm, consts)

    u = out[:B, :action_dim]
    mean = out[:B, action_dim:action_dim + latent_dim]
    std = out[:B, action_dim + latent_dim:action_dim + 2 * latent_dim]
    return u, mean, std


def _quantize_per_channel_int8(w):
    """Symmetric per-output-channel int8 quantization of an [in, out] weight."""
    amax = jnp.max(jnp.abs(w), axis=0)
    scale = jnp.where(amax > 0, amax / 127.0, 1.0).astype(jnp.float32)
    q = jnp.clip(jnp.round(w / scale), -127.0, 127.0).astype(jnp.int8)
    return q, scale


def init_params(key, state_dim, action_dim, latent_dim, hidden=750,
                hidden_pad=768):
    """PyTorch-Linear-style init (uniform +-1/sqrt(fan_in)), then packed:
       * hidden zero-padded 750 -> 768 everywhere (numerically inert),
       * w1 / wd1 / w_small stored bf16 ([in, out]),
       * w2 / wd2 stored int8 with per-output-channel f32 scales,
       * all biases + the two scale rows packed into one [7, 768] f32 array."""
    def linear(k, fan_in, fan_out):
        kw, kb = jax.random.split(k)
        bound = fan_in ** -0.5
        w = jax.random.uniform(kw, (fan_in, fan_out), jnp.float32, -bound, bound)
        b = jax.random.uniform(kb, (fan_out,), jnp.float32, -bound, bound)
        return w, b

    keys = jax.random.split(key, 7)
    w1, b1 = linear(keys[0], state_dim + action_dim, hidden)
    w2, b2 = linear(keys[1], hidden, hidden)
    wm, bm = linear(keys[2], hidden, latent_dim)
    wls, bls = linear(keys[3], hidden, latent_dim)
    wd1, bd1 = linear(keys[4], state_dim + latent_dim, hidden)
    wd2, bd2 = linear(keys[5], hidden, hidden)
    wd3, bd3 = linear(keys[6], hidden, action_dim)

    hp = hidden_pad - hidden
    pad_cols = lambda w: jnp.pad(w, ((0, 0), (0, hp)))
    pad_rows = lambda w: jnp.pad(w, ((0, hp), (0, 0)))
    pad_vec = lambda b: jnp.pad(b, ((0, hp),))
    bf16 = jnp.bfloat16

    w2q, w2_scale = _quantize_per_channel_int8(pad_rows(pad_cols(w2)))
    wd2q, wd2_scale = _quantize_per_channel_int8(pad_rows(pad_cols(wd2)))

    small_bias = jnp.zeros((hidden_pad,), jnp.float32)
    small_bias = small_bias.at[:2 * latent_dim + action_dim].set(
        jnp.concatenate([bm, bls, bd3]))

    consts = jnp.stack(
        [pad_vec(b1), pad_vec(b2), pad_vec(bd1), pad_vec(bd2),
         small_bias, w2_scale, wd2_scale], axis=0)                    # [7, 768] f32

    return {
        "w1": pad_cols(w1).astype(bf16),                              # [sd+ad, 768]
        "w2q": w2q,                                                   # [768, 768] int8
        "wd1": pad_cols(wd1).astype(bf16),                            # [sd+L, 768]
        "wd2q": wd2q,                                                 # [768, 768] int8
        "w_small": pad_rows(
            jnp.concatenate([wm, wls, wd3], axis=1)).astype(bf16),    # [768, 2L+ad]
        "consts": consts,
    }


def vae_forward_ref(state, action, eps, p, max_action,
                    state_dim, action_dim, latent_dim):
    """Pure-JAX reference using the SAME packed/quantized params as the kernel."""
    f32, bf16 = jnp.float32, jnp.bfloat16
    two_l = 2 * latent_dim
    consts = p["consts"]
    b1, b2, bd1, bd2 = (consts[i:i + 1, :] for i in range(4))
    b_ml = consts[4:5, :two_l]
    b_d3 = consts[4:5, two_l:two_l + action_dim]
    w2 = (p["w2q"].astype(f32) * consts[5:6, :]).astype(bf16)
    wd2 = (p["wd2q"].astype(f32) * consts[6:7, :]).astype(bf16)
    wsm = p["w_small"]

    sa = jnp.concatenate([state, action], axis=1).astype(bf16)
    s = sa[:, :state_dim]

    h = jax.nn.relu(jnp.dot(sa, p["w1"], preferred_element_type=f32) + b1)
    h = jax.nn.relu(jnp.dot(h.astype(bf16), w2, preferred_element_type=f32) + b2)
    ml = jnp.dot(h.astype(bf16), wsm[:, :two_l], preferred_element_type=f32) + b_ml
    mean = ml[:, :latent_dim]
    log_std = jnp.clip(ml[:, latent_dim:two_l], -4.0, 15.0)
    std = jnp.exp(log_std)
    z = mean + std * eps
    sz = jnp.concatenate([s.astype(f32), z], axis=1).astype(bf16)
    d = jax.nn.relu(jnp.dot(sz, p["wd1"], preferred_element_type=f32) + bd1)
    d = jax.nn.relu(jnp.dot(d.astype(bf16), wd2, preferred_element_type=f32) + bd2)
    u = max_action * jnp.tanh(
        jnp.dot(d.astype(bf16), wsm[:, two_l:two_l + action_dim],
                preferred_element_type=f32) + b_d3)
    return u, mean, std


if __name__ == "__main__":
    # Small, forward-consistent shapes: state_dim=17, action_dim=6,
    # latent_dim=12 (= 2*action_dim as in BCQ), batch=4, hidden=750
    # (padded to 768 internally).
    state_dim, action_dim, latent_dim = 17, 6, 12
    batch = 4
    max_action = 1.0

    key = jax.random.PRNGKey(0)
    k_params, k_state, k_action, k_eps = jax.random.split(key, 4)

    params = init_params(k_params, state_dim, action_dim, latent_dim)
    state = jax.random.normal(k_state, (batch, state_dim), jnp.float32)
    action = jax.random.normal(k_action, (batch, action_dim), jnp.float32)
    # Reparameterization noise (plays the role of np.random.normal in torch).
    # TODO(synk): decode_* / decode_multiple variants reuse this decoder path
    # but are not separately exposed; noise is an explicit input, not in-kernel RNG.
    eps = jax.random.normal(k_eps, (batch, latent_dim), jnp.float32)

    u, mean, std = vae_forward(state, action, eps, params, max_action)
    jax.block_until_ready((u, mean, std))

    u_r, mean_r, std_r = vae_forward_ref(state, action, eps, params, max_action,
                                         state_dim, action_dim, latent_dim)
    assert u.shape == (batch, action_dim)
    assert mean.shape == (batch, latent_dim)
    assert std.shape == (batch, latent_dim)
    assert jnp.allclose(u, u_r, atol=2e-3, rtol=2e-3)
    assert jnp.allclose(mean, mean_r, atol=2e-3, rtol=2e-3)
    assert jnp.allclose(std, std_r, atol=2e-3, rtol=2e-3)

    print("KERNEL_OK")
</pallas_src>

<mosaic_0001>
module attributes {stable_mosaic.version = 11 : i64} {
  func.func @_vae_kernel(%arg0: i32, %arg1: memref<8x23xbf16, #tpu.memory_space<vmem>>, %arg2: memref<8x12xf32, #tpu.memory_space<vmem>>, %arg3: memref<23x768xbf16, #tpu.memory_space<vmem>>, %arg4: memref<768x768xi8, #tpu.memory_space<vmem>>, %arg5: memref<29x768xbf16, #tpu.memory_space<vmem>>, %arg6: memref<768x768xi8, #tpu.memory_space<vmem>>, %arg7: memref<768x30xbf16, #tpu.memory_space<vmem>>, %arg8: memref<7x768xf32, #tpu.memory_space<vmem>>, %arg9: memref<8x128xf32, #tpu.memory_space<vmem>>) attributes {dimension_semantics = [#tpu.dimension_semantics<parallel>], iteration_bounds = array<i64: 1>, scalar_prefetch = 0 : i64, scratch_operands = 0 : i64, tpu.core_type = #tpu.core_type<tc>, window_params = [{transform_indices = @transform_0, window_bounds = array<i64: 8, 23>}, {transform_indices = @transform_1, window_bounds = array<i64: 8, 12>}, {pipeline_mode = #tpu.pipeline_mode<synchronous>, transform_indices = @transform_2, window_bounds = array<i64: 23, 768>}, {pipeline_mode = #tpu.pipeline_mode<synchronous>, transform_indices = @transform_3, window_bounds = array<i64: 768, 768>}, {pipeline_mode = #tpu.pipeline_mode<synchronous>, transform_indices = @transform_4, window_bounds = array<i64: 29, 768>}, {pipeline_mode = #tpu.pipeline_mode<synchronous>, transform_indices = @transform_5, window_bounds = array<i64: 768, 768>}, {pipeline_mode = #tpu.pipeline_mode<synchronous>, transform_indices = @transform_6, window_bounds = array<i64: 768, 30>}, {pipeline_mode = #tpu.pipeline_mode<synchronous>, transform_indices = @transform_7, window_bounds = array<i64: 7, 768>}, {transform_indices = @transform_8, window_bounds = array<i64: 8, 128>}]} {
    %c0 = arith.constant 0 : index
    %c0_0 = arith.constant 0 : index
    %0 = vector.load %arg1[%c0, %c0_0] : memref<8x23xbf16, #tpu.memory_space<vmem>>, vector<8x23xbf16>
    %1 = vector.extract_strided_slice %0 {offsets = [0, 0], sizes = [8, 17], strides = [1, 1]} : vector<8x23xbf16> to vector<8x17xbf16>
    %c0_1 = arith.constant 0 : index
    %c0_2 = arith.constant 0 : index
    %2 = vector.load %arg2[%c0_1, %c0_2] : memref<8x12xf32, #tpu.memory_space<vmem>>, vector<8x12xf32>
    %c0_3 = arith.constant 0 : index
    %c0_4 = arith.constant 0 : index
    %3 = vector.load %arg8[%c0_3, %c0_4] : memref<7x768xf32, #tpu.memory_space<vmem>>, vector<7x768xf32>
    %4 = vector.extract_strided_slice %3 {offsets = [0, 0], sizes = [1, 768], strides = [1, 1]} : vector<7x768xf32> to vector<1x768xf32>
    %5 = vector.extract_strided_slice %3 {offsets = [1, 0], sizes = [1, 768], strides = [1, 1]} : vector<7x768xf32> to vector<1x768xf32>
    %6 = vector.extract_strided_slice %3 {offsets = [2, 0], sizes = [1, 768], strides = [1, 1]} : vector<7x768xf32> to vector<1x768xf32>
    %7 = vector.extract_strided_slice %3 {offsets = [3, 0], sizes = [1, 768], strides = [1, 1]} : vector<7x768xf32> to vector<1x768xf32>
    %8 = vector.extract_strided_slice %3 {offsets = [4, 0], sizes = [1, 24], strides = [1, 1]} : vector<7x768xf32> to vector<1x24xf32>
    %9 = vector.extract_strided_slice %3 {offsets = [4, 24], sizes = [1, 6], strides = [1, 1]} : vector<7x768xf32> to vector<1x6xf32>
    %10 = vector.extract_strided_slice %3 {offsets = [5, 0], sizes = [1, 768], strides = [1, 1]} : vector<7x768xf32> to vector<1x768xf32>
    %11 = vector.extract_strided_slice %3 {offsets = [6, 0], sizes = [1, 768], strides = [1, 1]} : vector<7x768xf32> to vector<1x768xf32>
    %c0_5 = arith.constant 0 : index
    %c0_6 = arith.constant 0 : index
    %12 = vector.load %arg4[%c0_5, %c0_6] : memref<768x768xi8, #tpu.memory_space<vmem>>, vector<768x768xi8>
    %13 = arith.sitofp %12 : vector<768x768xi8> to vector<768x768xf32>
    %14 = vector.broadcast %10 : vector<1x768xf32> to vector<768x768xf32>
    %15 = arith.mulf %13, %14 : vector<768x768xf32>
    %16 = arith.truncf %15 : vector<768x768xf32> to vector<768x768xbf16>
    %c0_7 = arith.constant 0 : index
    %c0_8 = arith.constant 0 : index
    %17 = vector.load %arg6[%c0_7, %c0_8] : memref<768x768xi8, #tpu.memory_space<vmem>>, vector<768x768xi8>
    %18 = arith.sitofp %17 : vector<768x768xi8> to vector<768x768xf32>
    %19 = vector.broadcast %11 : vector<1x768xf32> to vector<768x768xf32>
    %20 = arith.mulf %18, %19 : vector<768x768xf32>
    %21 = arith.truncf %20 : vector<768x768xf32> to vector<768x768xbf16>
    %c0_9 = arith.constant 0 : index
    %c0_10 = arith.constant 0 : index
    %22 = vector.load %arg7[%c0_9, %c0_10] : memref<768x30xbf16, #tpu.memory_space<vmem>>, vector<768x30xbf16>
    %c0_11 = arith.constant 0 : index
    %c0_12 = arith.constant 0 : index
    %23 = vector.load %arg3[%c0_11, %c0_12] : memref<23x768xbf16, #tpu.memory_space<vmem>>, vector<23x768xbf16>
    %cst = arith.constant dense<0.000000e+00> : vector<8x768xf32>
    %24 = tpu.matmul %0, %23, %cst {dimension_numbers = #tpu.dot_dimension_numbers<[1], [0], [0], [1], [0, 0, 1, 1], [], []>} : vector<8x23xbf16>, vector<23x768xbf16>, vector<8x768xf32> -> vector<8x768xf32>
    %25 = vector.broadcast %4 : vector<1x768xf32> to vector<8x768xf32>
    %26 = arith.addf %24, %25 : vector<8x768xf32>
    %cst_13 = arith.constant 0.000000e+00 : f32
    %27 = vector.broadcast %cst_13 : f32 to vector<8x768xf32>
    %28 = arith.maximumf %26, %27 : vector<8x768xf32>
    %29 = arith.truncf %28 : vector<8x768xf32> to vector<8x768xbf16>
    %cst_14 = arith.constant dense<0.000000e+00> : vector<8x768xf32>
    %30 = tpu.matmul %29, %16, %cst_14 {dimension_numbers = #tpu.dot_dimension_numbers<[1], [0], [0], [1], [0, 0, 1, 1], [], []>} : vector<8x768xbf16>, vector<768x768xbf16>, vector<8x768xf32> -> vector<8x768xf32>
    %31 = vector.broadcast %5 : vector<1x768xf32> to vector<8x768xf32>
    %32 = arith.addf %30, %31 : vector<8x768xf32>
    %cst_15 = arith.constant 0.000000e+00 : f32
    %33 = vector.broadcast %cst_15 : f32 to vector<8x768xf32>
    %34 = arith.maximumf %32, %33 : vector<8x768xf32>
    %35 = arith.truncf %34 : vector<8x768xf32> to vector<8x768xbf16>
    %36 = vector.extract_strided_slice %22 {offsets = [0, 0], sizes = [768, 24], strides = [1, 1]} : vector<768x30xbf16> to vector<768x24xbf16>
    %cst_16 = arith.constant dense<0.000000e+00> : vector<8x24xf32>
    %37 = tpu.matmul %35, %36, %cst_16 {dimension_numbers = #tpu.dot_dimension_numbers<[1], [0], [0], [1], [0, 0, 1, 1], [], []>} : vector<8x768xbf16>, vector<768x24xbf16>, vector<8x24xf32> -> vector<8x24xf32>
    %38 = vector.broadcast %8 : vector<1x24xf32> to vector<8x24xf32>
    %39 = arith.addf %37, %38 : vector<8x24xf32>
    %40 = vector.extract_strided_slice %39 {offsets = [0, 0], sizes = [8, 12], strides = [1, 1]} : vector<8x24xf32> to vector<8x12xf32>
    %41 = vector.extract_strided_slice %39 {offsets = [0, 12], sizes = [8, 12], strides = [1, 1]} : vector<8x24xf32> to vector<8x12xf32>
    %cst_17 = arith.constant -4.000000e+00 : f32
    %cst_18 = arith.constant 1.500000e+01 : f32
    %42 = vector.broadcast %cst_17 : f32 to vector<8x12xf32>
    %43 = arith.maximumf %42, %41 : vector<8x12xf32>
    %44 = vector.broadcast %cst_18 : f32 to vector<8x12xf32>
    %45 = arith.minimumf %44, %43 : vector<8x12xf32>
    %46 = math.exp %45 : vector<8x12xf32>
    %47 = arith.mulf %46, %2 : vector<8x12xf32>
    %48 = arith.addf %40, %47 : vector<8x12xf32>
    %49 = arith.extf %1 : vector<8x17xbf16> to vector<8x17xf32>
    %50 = tpu.concatenate %49, %48 in 1 : vector<8x17xf32>, vector<8x12xf32> -> vector<8x29xf32>
    %51 = arith.truncf %50 : vector<8x29xf32> to vector<8x29xbf16>
    %c0_19 = arith.constant 0 : index
    %c0_20 = arith.constant 0 : index
    %52 = vector.load %arg5[%c0_19, %c0_20] : memref<29x768xbf16, #tpu.memory_space<vmem>>, vector<29x768xbf16>
    %cst_21 = arith.constant dense<0.000000e+00> : vector<8x768xf32>
    %53 = tpu.matmul %51, %52, %cst_21 {dimension_numbers = #tpu.dot_dimension_numbers<[1], [0], [0], [1], [0, 0, 1, 1], [], []>} : vector<8x29xbf16>, vector<29x768xbf16>, vector<8x768xf32> -> vector<8x768xf32>
    %54 = vector.broadcast %6 : vector<1x768xf32> to vector<8x768xf32>
    %55 = arith.addf %53, %54 : vector<8x768xf32>
    %cst_22 = arith.constant 0.000000e+00 : f32
    %56 = vector.broadcast %cst_22 : f32 to vector<8x768xf32>
    %57 = arith.maximumf %55, %56 : vector<8x768xf32>
    %58 = arith.truncf %57 : vector<8x768xf32> to vector<8x768xbf16>
    %cst_23 = arith.constant dense<0.000000e+00> : vector<8x768xf32>
    %59 = tpu.matmul %58, %21, %cst_23 {dimension_numbers = #tpu.dot_dimension_numbers<[1], [0], [0], [1], [0, 0, 1, 1], [], []>} : vector<8x768xbf16>, vector<768x768xbf16>, vector<8x768xf32> -> vector<8x768xf32>
    %60 = vector.broadcast %7 : vector<1x768xf32> to vector<8x768xf32>
    %61 = arith.addf %59, %60 : vector<8x768xf32>
    %cst_24 = arith.constant 0.000000e+00 : f32
    %62 = vector.broadcast %cst_24 : f32 to vector<8x768xf32>
    %63 = arith.maximumf %61, %62 : vector<8x768xf32>
    %64 = arith.truncf %63 : vector<8x768xf32> to vector<8x768xbf16>
    %65 = vector.extract_strided_slice %22 {offsets = [0, 24], sizes = [768, 6], strides = [1, 1]} : vector<768x30xbf16> to vector<768x6xbf16>
    %cst_25 = arith.constant dense<0.000000e+00> : vector<8x6xf32>
    %66 = tpu.matmul %64, %65, %cst_25 {dimension_numbers = #tpu.dot_dimension_numbers<[1], [0], [0], [1], [0, 0, 1, 1], [], []>} : vector<8x768xbf16>, vector<768x6xbf16>, vector<8x6xf32> -> vector<8x6xf32>
    %67 = vector.broadcast %9 : vector<1x6xf32> to vector<8x6xf32>
    %68 = arith.addf %66, %67 : vector<8x6xf32>
    %69 = math.tanh %68 : vector<8x6xf32>
    %cst_26 = arith.constant 1.000000e+00 : f32
    %70 = vector.broadcast %cst_26 : f32 to vector<8x6xf32>
    %71 = arith.mulf %70, %69 : vector<8x6xf32>
    %cst_27 = arith.constant 0.000000e+00 : f32
    %72 = vector.broadcast %cst_27 : f32 to vector<8x98xf32>
    %73 = tpu.concatenate %71, %40, %46, %72 in 1 : vector<8x6xf32>, vector<8x12xf32>, vector<8x12xf32>, vector<8x98xf32> -> vector<8x128xf32>
    %c0_28 = arith.constant 0 : index
    %c0_29 = arith.constant 0 : index
    %74 = vector.load %arg9[%c0_28, %c0_29] : memref<8x128xf32, #tpu.memory_space<vmem>>, vector<8x128xf32>
    tpu.vector_store %arg9[%c0_28, %c0_29], %73 {strides = array<i32>} : memref<8x128xf32, #tpu.memory_space<vmem>>, vector<8x128xf32>,
    return
  }
  func.func @transform_0(%arg0: i32) -> (i32, i32) {
    %c0_i32 = arith.constant 0 : i32
    %c0_i32_0 = arith.constant 0 : i32
    return %arg0, %c0_i32 : i32, i32
  }
  func.func @transform_1(%arg0: i32) -> (i32, i32) {
    %c0_i32 = arith.constant 0 : i32
    %c0_i32_0 = arith.constant 0 : i32
    return %arg0, %c0_i32 : i32, i32
  }
  func.func @transform_2(%arg0: i32) -> (i32, i32) {
    %c0_i32 = arith.constant 0 : i32
    %c0_i32_0 = arith.constant 0 : i32
    %c0_i32_1 = arith.constant 0 : i32
    return %c0_i32, %c0_i32_0 : i32, i32
  }
  func.func @transform_3(%arg0: i32) -> (i32, i32) {
    %c0_i32 = arith.constant 0 : i32
    %c0_i32_0 = arith.constant 0 : i32
    %c0_i32_1 = arith.constant 0 : i32
    return %c0_i32, %c0_i32_0 : i32, i32
  }
  func.func @transform_4(%arg0: i32) -> (i32, i32) {
    %c0_i32 = arith.constant 0 : i32
    %c0_i32_0 = arith.constant 0 : i32
    %c0_i32_1 = arith.constant 0 : i32
    return %c0_i32, %c0_i32_0 : i32, i32
  }
  func.func @transform_5(%arg0: i32) -> (i32, i32) {
    %c0_i32 = arith.constant 0 : i32
    %c0_i32_0 = arith.constant 0 : i32
    %c0_i32_1 = arith.constant 0 : i32
    return %c0_i32, %c0_i32_0 : i32, i32
  }
  func.func @transform_6(%arg0: i32) -> (i32, i32) {
    %c0_i32 = arith.constant 0 : i32
    %c0_i32_0 = arith.constant 0 : i32
    %c0_i32_1 = arith.constant 0 : i32
    return %c0_i32, %c0_i32_0 : i32, i32
  }
  func.func @transform_7(%arg0: i32) -> (i32, i32) {
    %c0_i32 = arith.constant 0 : i32
    %c0_i32_0 = arith.constant 0 : i32
    %c0_i32_1 = arith.constant 0 : i32
    return %c0_i32, %c0_i32_0 : i32, i32
  }
  func.func @transform_8(%arg0: i32) -> (i32, i32) {
    %c0_i32 = arith.constant 0 : i32
    %c0_i32_0 = arith.constant 0 : i32
    return %arg0, %c0_i32 : i32, i32
  }
}

</mosaic_0001>

<bundles_post_ra>
// kernel: tpu_custom_call.1
= control target key start
LH: loop header
LB: loop body
LE: loop exit
PB: predicated region body
PF: predicated region fallthrough
CT: control target
= control target key end

     0   :  { %13 = vsyncpa [#allocation3], 0  ;;  %s10182_s0 = inlined_call_operand.vmem [shape: bf16[8,23], index: 0, kind: input, shape index: {}]   ;;  %s10183_s1 = inlined_call_operand.vmem [shape: f32[8,12], index: 1, kind: input, shape index: {}]   ;;  %s10184_s2 = inlined_call_operand.vmem [shape: bf16[23,768], index: 2, kind: input, shape index: {}]   ;;  %s10185_s3 = inlined_call_operand.hbm [shape: s8[768,768], index: 3, kind: input, shape index: {}]   ;;  %s10186_s4 = inlined_call_operand.vmem [shape: bf16[29,768], index: 4, kind: input, shape index: {}]   ;;  %s10187_s5 = inlined_call_operand.hbm [shape: s8[768,768], index: 5, kind: input, shape index: {}]   ;;  %s10188_s6 = inlined_call_operand.vmem [shape: bf16[768,30], index: 6, kind: input, shape index: {}]   ;;  %s10189_s7 = inlined_call_operand.vmem [shape: f32[7,768], index: 7, kind: input, shape index: {}]   ;;  %s10190_s8 = inlined_call_operand.hbm [shape: f32[8,128], index: 8, kind: output, shape index: {}]  }
   0x1   :  { %14 = vsyncpa [#allocation6], 0 }
   0x2   :  { %15 = vsyncpa [#allocation4], 0  ;;  %s26_s29 = sshll.u32 %s10185_s3, 4  ;;  %s6943_s30 = smov [#allocation2]   ;;  %s27_s29 = int_to_ptr.hbm [resolvable:$true] %s26_s29 }
   0x3   :  { %s28_s9 = sshll.u32 %s6943_s30, 4  ;;  %s41_s12 = sshll.u32 %s10187_s5, 4  ;;  %s29_s9 = int_to_ptr.vmem [resolvable:$true] %s28_s9  ;;  %s42_s12 = int_to_ptr.hbm [resolvable:$true] %s41_s12 }
   0x4   :  { %s6944_s13 = smov 768   ;;  %s6945_s14 = smov 48  }
   0x5   :  { %34 = dma.hbm_to_vmem [thread:$0]  %s27_s29, 18432, %s29_s9, [#allocation3], %s6944_s13, %s6944_s13, %s6945_s14  }
   0x6   :  { %s6946_s15 = smov [#allocation5]  }
   0x7   :  { %s43_s16 = sshll.u32 %s6946_s15, 4  ;;  %s44_s16 = int_to_ptr.vmem [resolvable:$true] %s43_s16 }
   0x8   :  { %49 = dma.hbm_to_vmem [thread:$0]  %s42_s12, 18432, %s44_s16, [#allocation6], %s6944_s13, %s6944_s13, %s6945_s14  }
   0x9   :  { %6937 = dma.done.wait [#allocation3], 18432  }
   0xa   :  { %6938 = vsyncadd [#allocation3], 4294948864 }
   0xb   :  { %6939 = dma.done.wait [#allocation6], 18432  }
   0xc   :  { %6940 = vsyncadd [#allocation6], 4294948864  ;;  %vm4563_vm0 = vcmask 1042432   ;;  %vm4564_vm1 = vcmask 1043456   ;;  %v6947_v0 = vmov 65535   ;;  %v4505_v2 = vld [vmem:[%s10184_s2 + $0x30] sm:$0xff] }
   0xd   :  { %v4565_v1 = vsel %vm4563_vm0, 4294967295, %v6947_v0  ;;  %v6486_v3 = vld [vmem:[%s10184_s2] sm:$0xf]  ;;  %v6811_v4 = vld [vmem:[%s10184_s2 + $0x14] sm:$0xf0]  ;;  %v4535_v5 = vunpack.c.l.b16 %v4505_v2  ;;  %v4536_v6 = vunpack.c.h.b16 %v4505_v2  ;;  %vm4559_vm2 = vcmask 187392  }
   0xe   :  { %v6808_v7 = vld [vmem:[%s10184_s2 + $0x4] sm:$0xf]  ;;  %v6488_v8 = vld [vmem:[%s10184_s2 + $0x18] sm:$0xf0]  ;;  %v4566_v9 = vsel %vm4564_vm1, %v4565_v1, 0  ;;  %v6487_v10 = vor.u32 %v6811_v4, %v6486_v3  ;;  %v89_v35 = vld [vmem:[#allocation2 + $0x90] sm:$0xff] }
   0xf   :  { %v6491_v11 = vor.u32 %v6808_v7, %v6488_v8  ;;  %v4506_v12 = vld [vmem:[%s10184_s2 + $0x38] sm:$0xff]  ;;  %v7027_v13 = vld [vmem:[%s10184_s2 + $0x8] sm:$0xf]  ;;  %v7032_v14 = vld [vmem:[%s10184_s2 + $0x1c] sm:$0xf0]  ;;  %v4547_v15 = vpack.c.b16 %v4535_v5, %v4535_v5  ;;  %v4548_v16 = vpack.c.b16 %v4536_v6, %v4536_v6  ;;  %v299_v43 = vunpack.c.2.s8 %v89_v35  ;;  %s6948_s15 = smov 104  }
  0x10   :  { %v4537_v17 = vunpack.c.l.b16 %v4506_v12  ;;  %v4538_v18 = vunpack.c.h.b16 %v4506_v12  ;;  %v7037_v19 = vld [vmem:[%s10184_s2 + $0xc] sm:$0xf]  ;;  %v7042_v20 = vld [vmem:[%s10184_s2 + $0x20] sm:$0xf0]  ;;  %v6495_v22 = vor.u32 %v7032_v14, %v7027_v13  ;;  %v6502_v26 = vld [vmem:[%s10184_s2 + $0x10] sm:$0xf]  ;;  %v305_v44 = vunpack.c.3.s8 %v89_v35 }
  0x11   :  { %v4507_v21 = vld [vmem:[%s10184_s2 + $0x40] sm:$0xff]  ;;  %v6499_v23 = vor.u32 %v7037_v19, %v7042_v20  ;;  %v6813_v27 = vld [vmem:[%s10184_s2 + $0x24] sm:$0xf0]  ;;  %v6810_v28 = vld [vmem:[%s10184_s2 + $0x14] sm:$0xf]  ;;  %v4568_v29 = vand.u32 %v4566_v9, %v4547_v15  ;;  %v4571_v30 = vand.u32 %v4566_v9, %v4548_v16  ;;  %v875_v49 = vcvt.s32.f32 %v299_v43  ;;  %s6949_s24 = smov 12  }
  0x12   :  { %v4539_v24 = vunpack.c.l.b16 %v4507_v21  ;;  %v4540_v25 = vunpack.c.h.b16 %v4507_v21  ;;  %v4549_v31 = vpack.c.b16 %v4537_v17, %v4537_v17  ;;  %v4550_v32 = vpack.c.b16 %v4538_v18, %v4538_v18  ;;  %v6504_v33 = vld [vmem:[%s10184_s2 + $0x28] sm:$0xf0]  ;;  %v65_v34 = vld [vmem:[%s10189_s7] sm:$0x7f]  ;;  %v113_v40 = vld [vmem:[#allocation2 + $0x150] sm:$0xff]  ;;  %s6951_s27 = smov 116  }
  0x13   :  { %v6503_v38 = vor.u32 %v6813_v27, %v6502_v26  ;;  %v6507_v39 = vor.u32 %v6810_v28, %v6504_v33  ;;  %4591 = vmatpush.bf16.msra.mxu2 %v4568_v29  ;;  %4604 = vmatpush.bf16.msra.mxu3 %v4571_v30  ;;  %v7066_v47 = vperm.slane %v65_v34, 5  ;;  %v395_v48 = vunpack.c.2.s8 %v113_v40  ;;  %v83_v57 = vld [vmem:[#allocation2 + $0x60] sm:$0xff]  ;;  %v7091_v27 = vld [vmem:[#allocation2 + $0x30] sm:$0xff]  ;;  %s6952_s28 = smov 17  }
  0x14   :  { %v4551_v36 = vpack.c.b16 %v4539_v24, %v4539_v24  ;;  %v4552_v37 = vpack.c.b16 %v4540_v25, %v4540_v25  ;;  %v4574_v41 = vand.u32 %v4566_v9, %v4549_v31  ;;  %v4577_v42 = vand.u32 %v4566_v9, %v4550_v32  ;;  %v7071_v58 = vld [vmem:[%s10182_s0] sm:$0xf]  ;;  %v101_v34 = vld [vmem:[#allocation2 + $0xf0] sm:$0xff] }
  0x15   :  { %v881_v50 = vcvt.s32.f32 %v305_v44  ;;  %v401_v51 = vunpack.c.3.s8 %v113_v40  ;;  %v287_v52 = vunpack.c.0.s8 %v89_v35  ;;  %v971_v53 = vcvt.s32.f32 %v395_v48  ;;  %v107_v4 = vld [vmem:[#allocation2 + $0x120] sm:$0xff] }
  0x16   :  { %v4580_v45 = vand.u32 %v4566_v9, %v4551_v36  ;;  %v4583_v46 = vand.u32 %v4566_v9, %v4552_v37  ;;  %v293_v54 = vunpack.c.1.s8 %v89_v35  ;;  %v383_v55 = vunpack.c.0.s8 %v113_v40 }
  0x17   :  { %v389_v56 = vunpack.c.1.s8 %v113_v40  ;;  %4592 = vmatpush.bf16.msra.mxu2 %v6487_v10  ;;  %4605 = vmatpush.bf16.msra.mxu3 %v6491_v11  ;;  %v1457_v59 = vmul.f32 %v7066_v47, %v875_v49  ;;  %v1463_v60 = vmul.f32 %v7066_v47, %v881_v50  ;;  %v977_v61 = vcvt.s32.f32 %v401_v51  ;;  %v161_v49 = vld [vmem:[#allocation2 + $0x2d0] sm:$0xff] }
  0x18   :  { %4643 = vmatpush.bf16.msra.mxu0 %v4580_v45  ;;  %4656 = vmatpush.bf16.msra.mxu1 %v4583_v46  ;;  %v863_v62 = vcvt.s32.f32 %v287_v52  ;;  %v1553_v63 = vmul.f32 %v7066_v47, %v971_v53  ;;  %v869_v1 = vcvt.s32.f32 %v293_v54  ;;  %v959_v2 = vcvt.s32.f32 %v383_v55 }
  0x19   :  { %v965_v3 = vcvt.s32.f32 %v389_v56  ;;  %v1991_v5 = vpack.c.bf16 %v1463_v60, %v1457_v59  ;;  %v1559_v6 = vmul.f32 %v7066_v47, %v977_v61  ;;  %v275_v8 = vunpack.c.2.s8 %v83_v57 }
  0x1a   :  { %v1445_v7 = vmul.f32 %v7066_v47, %v863_v62  ;;  %6508 = vmatmul.msk.bf16.vlgmr.msra.gmra.mxu2 %vm4559_vm2, %v7071_v58  ;;  %6509 = vmatmul.msk.bf16.vlgmr.msra.gmra.mxu3 %vm4559_vm2, %v7071_v58  ;;  %v1451_v9 = vmul.f32 %v7066_v47, %v869_v1  ;;  %v1541_v10 = vmul.f32 %v7066_v47, %v959_v2  ;;  %v281_v12 = vunpack.c.3.s8 %v83_v57 }
  0x1b   :  { %4617 = vmatpush.bf16.msrb.mxu2 %v4574_v41  ;;  %4630 = vmatpush.bf16.msrb.mxu3 %v4577_v42  ;;  %v1547_v11 = vmul.f32 %v7066_v47, %v965_v3  ;;  %v2039_v15 = vpack.c.bf16 %v1559_v6, %v1553_v63  ;;  %v851_v16 = vcvt.s32.f32 %v275_v8  ;;  %v371_v17 = vunpack.c.2.s8 %v107_v4 }
  0x1c   :  { %4644 = vmatpush.bf16.msra.mxu0 %v6503_v38  ;;  %4657 = vmatpush.bf16.msra.mxu1 %v6507_v39  ;;  %v377_v18 = vunpack.c.3.s8 %v107_v4  ;;  %v1985_v21 = vpack.c.bf16 %v1451_v9, %v1445_v7  ;;  %v857_v25 = vcvt.s32.f32 %v281_v12  ;;  %v263_v26 = vunpack.c.0.s8 %v83_v57  ;;  %v7103_v39 = vld [vmem:[#allocation2 + $0x210] sm:$0xff] }
  0x1d   :  { %v2033_v24 = vpack.c.bf16 %v1547_v11, %v1541_v10  ;;  %v1433_v28 = vmul.f32 %v7066_v47, %v851_v16  ;;  %v947_v29 = vcvt.s32.f32 %v371_v17  ;;  %v269_v31 = vunpack.c.1.s8 %v83_v57 }
  0x1e   :  { %v953_v30 = vcvt.s32.f32 %v377_v18  ;;  %v1439_v13 = vmul.f32 %v7066_v47, %v857_v25  ;;  %v839_v14 = vcvt.s32.f32 %v263_v26  ;;  %v359_v19 = vunpack.c.0.s8 %v107_v4  ;;  %v7127_v26 = vld [vmem:[#allocation2] sm:$0xff] }
  0x1f   :  { %4618 = vmatpush.bf16.msrb.mxu2 %v6495_v22  ;;  %4631 = vmatpush.bf16.msrb.mxu3 %v6499_v23  ;;  %v365_v20 = vunpack.c.1.s8 %v107_v4  ;;  %v1529_v22 = vmul.f32 %v7066_v47, %v947_v29  ;;  %v845_v32 = vcvt.s32.f32 %v269_v31  ;;  %v251_v33 = vunpack.c.2.s8 %v7091_v27 }
  0x20   :  { %6512 = vmatmul.msk.bf16.vlgmr.msra.gmra.mxu0 %vm4559_vm2, %v7071_v58  ;;  %6513 = vmatmul.msk.bf16.vlgmr.msra.gmra.mxu1 %vm4559_vm2, %v7071_v58  ;;  %v1535_v23 = vmul.f32 %v7066_v47, %v953_v30  ;;  %v1979_v35 = vpack.c.bf16 %v1439_v13, %v1433_v28  ;;  %v1421_v36 = vmul.f32 %v7066_v47, %v839_v14  ;;  %v935_v37 = vcvt.s32.f32 %v359_v19 }
  0x21   :  { %v941_v38 = vcvt.s32.f32 %v365_v20  ;;  %v1427_v41 = vmul.f32 %v7066_v47, %v845_v32  ;;  %v257_v42 = vunpack.c.3.s8 %v7091_v27  ;;  %v827_v43 = vcvt.s32.f32 %v251_v33  ;;  %v95_v32 = vld [vmem:[#allocation2 + $0xc0] sm:$0xff] }
  0x22   :  { %v2027_v40 = vpack.c.bf16 %v1535_v23, %v1529_v22  ;;  %v1517_v44 = vmul.f32 %v7066_v47, %v935_v37  ;;  %v347_v46 = vunpack.c.2.s8 %v101_v34  ;;  %v353_v48 = vunpack.c.3.s8 %v101_v34  ;;  %v131_v37 = vld [vmem:[#allocation2 + $0x1e0] sm:$0xff] }
  0x23   :  { %4681 = vmatpush.bf16.msra.mxu2 %v1991_v5  ;;  %4694 = vmatpush.bf16.msra.mxu3 %v2039_v15  ;;  %v1523_v45 = vmul.f32 %v7066_v47, %v941_v38  ;;  %v1973_v50 = vpack.c.bf16 %v1427_v41, %v1421_v36  ;;  %v833_v51 = vcvt.s32.f32 %v257_v42  ;;  %v1409_v52 = vmul.f32 %v7066_v47, %v827_v43 }
  0x24   :  { %v491_v53 = vunpack.c.2.s8 %v7103_v39  ;;  %v923_v55 = vcvt.s32.f32 %v347_v46  ;;  %v929_v56 = vcvt.s32.f32 %v353_v48  ;;  %v497_v57 = vunpack.c.3.s8 %v7103_v39  ;;  %v155_v46 = vld [vmem:[#allocation2 + $0x2a0] sm:$0xff] }
  0x25   :  { %v2021_v54 = vpack.c.bf16 %v1523_v45, %v1517_v44  ;;  %v1415_v59 = vmul.f32 %v7066_v47, %v833_v51  ;;  %v587_v61 = vunpack.c.2.s8 %v161_v49  ;;  %v593_v62 = vunpack.c.3.s8 %v161_v49 }
  0x26   :  { %v1067_v60 = vcvt.s32.f32 %v491_v53  ;;  %v1505_v63 = vmul.f32 %v7066_v47, %v923_v55  ;;  %v1511_v1 = vmul.f32 %v7066_v47, %v929_v56  ;;  %v1073_v2 = vcvt.s32.f32 %v497_v57 }
  0x27   :  { %4682 = vmatpush.bf16.msra.mxu2 %v1985_v21  ;;  %4695 = vmatpush.bf16.msra.mxu3 %v2033_v24  ;;  %v239_v3 = vunpack.c.0.s8 %v7091_v27  ;;  %v1967_v4 = vpack.c.bf16 %v1415_v59, %v1409_v52  ;;  %v1163_v6 = vcvt.s32.f32 %v587_v61  ;;  %v1169_v7 = vcvt.s32.f32 %v593_v62 }
  0x28   :  { %v1649_v5 = vmul.f32 %v7066_v47, %v1067_v60  ;;  %v2015_v8 = vpack.c.bf16 %v1511_v1, %v1505_v63  ;;  %v1655_v9 = vmul.f32 %v7066_v47, %v1073_v2  ;;  %v245_v10 = vunpack.c.1.s8 %v7091_v27 }
  0x29   :  { %v815_v11 = vcvt.s32.f32 %v239_v3  ;;  %v1745_v12 = vmul.f32 %v7066_v47, %v1163_v6  ;;  %v1751_v15 = vmul.f32 %v7066_v47, %v1169_v7  ;;  %v335_v16 = vunpack.c.0.s8 %v101_v34 }
  0x2a   :  { %v341_v17 = vunpack.c.1.s8 %v101_v34  ;;  %6510 = vmatmul.msk.bf16.vlgmr.msrb.gmra.mxu2 %vm4559_vm2, %v7071_v58  ;;  %6511 = vmatmul.msk.bf16.vlgmr.msrb.gmra.mxu3 %vm4559_vm2, %v7071_v58  ;;  %v2087_v18 = vpack.c.bf16 %v1655_v9, %v1649_v5  ;;  %v821_v21 = vcvt.s32.f32 %v245_v10  ;;  %v479_v25 = vunpack.c.0.s8 %v7103_v39 }
  0x2b   :  { %4683 = vmatpush.bf16.msra.mxu2 %v1979_v35  ;;  %4696 = vmatpush.bf16.msra.mxu3 %v2027_v40  ;;  %v1397_v24 = vmul.f32 %v7066_v47, %v815_v11  ;;  %v2135_v27 = vpack.c.bf16 %v1751_v15, %v1745_v12  ;;  %v911_v28 = vcvt.s32.f32 %v335_v16  ;;  %v485_v30 = vunpack.c.1.s8 %v7103_v39 }
  0x2c   :  { %v917_v29 = vcvt.s32.f32 %v341_v17  ;;  %4707 = vmatpush.bf16.msrb.mxu0 %v2087_v18  ;;  %v1403_v31 = vmul.f32 %v7066_v47, %v821_v21  ;;  %v1055_v13 = vcvt.s32.f32 %v479_v25  ;;  %v575_v14 = vunpack.c.0.s8 %v161_v49 }
  0x2d   :  { %v581_v19 = vunpack.c.1.s8 %v161_v49  ;;  %v1493_v58 = vmul.f32 %v7066_v47, %v911_v28  ;;  %v1061_v22 = vcvt.s32.f32 %v485_v30  ;;  %v227_v23 = vunpack.c.2.s8 %v7127_v26  ;;  %4720 = vmatpush.bf16.msrb.mxu1 %v2135_v27 }
  0x2e   :  { %v1499_v20 = vmul.f32 %v7066_v47, %v917_v29  ;;  %v1961_v33 = vpack.c.bf16 %v1403_v31, %v1397_v24  ;;  %v1637_v34 = vmul.f32 %v7066_v47, %v1055_v13  ;;  %v1151_v35 = vcvt.s32.f32 %v575_v14  ;;  %v7150_v24 = vld [vmem:[#allocation2 + $0x390] sm:$0xff] }
  0x2f   :  { %4684 = vmatpush.bf16.msra.mxu2 %v1973_v50  ;;  %4697 = vmatpush.bf16.msra.mxu3 %v2021_v54  ;;  %v1157_v36 = vcvt.s32.f32 %v581_v19  ;;  %v1643_v39 = vmul.f32 %v7066_v47, %v1061_v22  ;;  %v233_v40 = vunpack.c.3.s8 %v7127_v26  ;;  %v803_v41 = vcvt.s32.f32 %v227_v23  ;;  %v209_v22 = vld [vmem:[#allocation2 + $0x450] sm:$0xff] }
  0x30   :  { %v2009_v38 = vpack.c.bf16 %v1499_v20, %v1493_v58  ;;  %v1733_v42 = vmul.f32 %v7066_v47, %v1151_v35  ;;  %v323_v44 = vunpack.c.2.s8 %v95_v32  ;;  %v329_v45 = vunpack.c.3.s8 %v95_v32  ;;  %v125_v35 = vld [vmem:[#allocation2 + $0x1b0] sm:$0xff] }
  0x31   :  { %v1739_v43 = vmul.f32 %v7066_v47, %v1157_v36  ;;  %v2081_v48 = vpack.c.bf16 %v1643_v39, %v1637_v34  ;;  %v809_v49 = vcvt.s32.f32 %v233_v40  ;;  %v1385_v50 = vmul.f32 %v7066_v47, %v803_v41 }
  0x32   :  { %v467_v51 = vunpack.c.2.s8 %v131_v37  ;;  %v899_v53 = vcvt.s32.f32 %v323_v44  ;;  %v905_v54 = vcvt.s32.f32 %v329_v45  ;;  %v473_v55 = vunpack.c.3.s8 %v131_v37  ;;  %v149_v44 = vld [vmem:[#allocation2 + $0x270] sm:$0xff] }
  0x33   :  { %4685 = vmatpush.bf16.msra.mxu2 %v1967_v4  ;;  %4698 = vmatpush.bf16.msra.mxu3 %v2015_v8  ;;  %v2129_v52 = vpack.c.bf16 %v1739_v43, %v1733_v42  ;;  %v1391_v56 = vmul.f32 %v7066_v47, %v809_v49  ;;  %v563_v59 = vunpack.c.2.s8 %v155_v46  ;;  %v569_v60 = vunpack.c.3.s8 %v155_v46 }
  0x34   :  { %4708 = vmatpush.bf16.msrb.mxu0 %v2081_v48  ;;  %v1043_v57 = vcvt.s32.f32 %v467_v51  ;;  %v1481_v61 = vmul.f32 %v7066_v47, %v899_v53  ;;  %v1487_v62 = vmul.f32 %v7066_v47, %v905_v54  ;;  %v1049_v63 = vcvt.s32.f32 %v473_v55 }
  0x35   :  { %4721 = vmatpush.bf16.msrb.mxu1 %v2129_v52  ;;  %v215_v1 = vunpack.c.0.s8 %v7127_v26  ;;  %v1955_v2 = vpack.c.bf16 %v1391_v56, %v1385_v50  ;;  %v1139_v4 = vcvt.s32.f32 %v563_v59  ;;  %v1145_v5 = vcvt.s32.f32 %v569_v60 }
  0x36   :  { %v1625_v3 = vmul.f32 %v7066_v47, %v1043_v57  ;;  %v2003_v6 = vpack.c.bf16 %v1487_v62, %v1481_v61  ;;  %v1631_v7 = vmul.f32 %v7066_v47, %v1049_v63  ;;  %v221_v8 = vunpack.c.1.s8 %v7127_v26 }
  0x37   :  { %4686 = vmatpush.bf16.msra.mxu2 %v1961_v33  ;;  %4699 = vmatpush.bf16.msra.mxu3 %v2009_v38  ;;  %v791_v9 = vcvt.s32.f32 %v215_v1  ;;  %v1721_v10 = vmul.f32 %v7066_v47, %v1139_v4  ;;  %v1727_v11 = vmul.f32 %v7066_v47, %v1145_v5  ;;  %v311_v12 = vunpack.c.0.s8 %v95_v32 }
  0x38   :  { %v317_v15 = vunpack.c.1.s8 %v95_v32  ;;  %v2075_v16 = vpack.c.bf16 %v1631_v7, %v1625_v3  ;;  %v797_v17 = vcvt.s32.f32 %v221_v8  ;;  %v455_v21 = vunpack.c.0.s8 %v131_v37 }
  0x39   :  { %v1373_v18 = vmul.f32 %v7066_v47, %v791_v9  ;;  %v2123_v25 = vpack.c.bf16 %v1727_v11, %v1721_v10  ;;  %v887_v27 = vcvt.s32.f32 %v311_v12  ;;  %v461_v26 = vunpack.c.1.s8 %v131_v37 }
  0x3a   :  { %v893_v28 = vcvt.s32.f32 %v317_v15  ;;  %4709 = vmatpush.bf16.msrb.mxu0 %v2075_v16  ;;  %v1379_v29 = vmul.f32 %v7066_v47, %v797_v17  ;;  %v1031_v30 = vcvt.s32.f32 %v455_v21  ;;  %v551_v31 = vunpack.c.0.s8 %v155_v46 }
  0x3b   :  { %4687 = vmatpush.bf16.msra.mxu2 %v1955_v2  ;;  %4700 = vmatpush.bf16.msra.mxu3 %v2003_v6  ;;  %v557_v13 = vunpack.c.1.s8 %v155_v46  ;;  %v1469_v14 = vmul.f32 %v7066_v47, %v887_v27  ;;  %v1037_v58 = vcvt.s32.f32 %v461_v26  ;;  %v683_v20 = vunpack.c.2.s8 %v7150_v24 }
  0x3c   :  { %4722 = vmatpush.bf16.msrb.mxu1 %v2123_v25  ;;  %v1475_v19 = vmul.f32 %v7066_v47, %v893_v28  ;;  %v1949_v23 = vpack.c.bf16 %v1379_v29, %v1373_v18  ;;  %v1613_v32 = vmul.f32 %v7066_v47, %v1031_v30  ;;  %v1127_v33 = vcvt.s32.f32 %v551_v31  ;;  %v7172_v18 = vld [vmem:[#allocation2 + $0x360] sm:$0xff] }
  0x3d   :  { %v1133_v34 = vcvt.s32.f32 %v557_v13  ;;  %v1619_v37 = vmul.f32 %v7066_v47, %v1037_v58  ;;  %v689_v38 = vunpack.c.3.s8 %v7150_v24  ;;  %v1259_v39 = vcvt.s32.f32 %v683_v20  ;;  %v203_v58 = vld [vmem:[#allocation2 + $0x420] sm:$0xff] }
  0x3e   :  { %v1997_v36 = vpack.c.bf16 %v1475_v19, %v1469_v14  ;;  %v1709_v40 = vmul.f32 %v7066_v47, %v1127_v33  ;;  %v779_v42 = vunpack.c.2.s8 %v209_v22  ;;  %v785_v43 = vunpack.c.3.s8 %v209_v22  ;;  %v119_v33 = vld [vmem:[#allocation2 + $0x180] sm:$0xff] }
  0x3f   :  { %4688 = vmatpush.bf16.msra.mxu2 %v1949_v23  ;;  %v1715_v41 = vmul.f32 %v7066_v47, %v1133_v34  ;;  %v2069_v45 = vpack.c.bf16 %v1619_v37, %v1613_v32  ;;  %v1265_v46 = vcvt.s32.f32 %v689_v38  ;;  %v1841_v48 = vmul.f32 %v7066_v47, %v1259_v39 }
  0x40   :  { %4701 = vmatpush.bf16.msra.mxu3 %v1997_v36  ;;  %v443_v49 = vunpack.c.2.s8 %v125_v35  ;;  %v1355_v51 = vcvt.s32.f32 %v779_v42  ;;  %v1361_v52 = vcvt.s32.f32 %v785_v43  ;;  %v449_v53 = vunpack.c.3.s8 %v125_v35  ;;  %v143_v42 = vld [vmem:[#allocation2 + $0x240] sm:$0xff] }
  0x41   :  { %v2117_v50 = vpack.c.bf16 %v1715_v41, %v1709_v40  ;;  %4710 = vmatpush.bf16.msrb.mxu0 %v2069_v45  ;;  %v1847_v54 = vmul.f32 %v7066_v47, %v1265_v46  ;;  %v539_v56 = vunpack.c.2.s8 %v149_v44  ;;  %v545_v57 = vunpack.c.3.s8 %v149_v44 }
  0x42   :  { %v1019_v55 = vcvt.s32.f32 %v443_v49  ;;  %v1937_v59 = vmul.f32 %v7066_v47, %v1355_v51  ;;  %v1943_v60 = vmul.f32 %v7066_v47, %v1361_v52  ;;  %v1025_v61 = vcvt.s32.f32 %v449_v53 }
  0x43   :  { %4723 = vmatpush.bf16.msrb.mxu1 %v2117_v50  ;;  %v671_v62 = vunpack.c.0.s8 %v7150_v24  ;;  %v2183_v63 = vpack.c.bf16 %v1847_v54, %v1841_v48  ;;  %v1115_v2 = vcvt.s32.f32 %v539_v56  ;;  %v1121_v3 = vcvt.s32.f32 %v545_v57 }
  0x44   :  { %v1601_v1 = vmul.f32 %v7066_v47, %v1019_v55  ;;  %v2231_v4 = vpack.c.bf16 %v1943_v60, %v1937_v59  ;;  %v1607_v5 = vmul.f32 %v7066_v47, %v1025_v61  ;;  %v677_v6 = vunpack.c.1.s8 %v7150_v24 }
  0x45   :  { %v1247_v7 = vcvt.s32.f32 %v671_v62  ;;  %4733 = vmatpush.bf16.msrb.mxu2 %v2183_v63  ;;  %v1697_v8 = vmul.f32 %v7066_v47, %v1115_v2  ;;  %v1703_v9 = vmul.f32 %v7066_v47, %v1121_v3  ;;  %v767_v10 = vunpack.c.0.s8 %v209_v22 }
  0x46   :  { %v773_v11 = vunpack.c.1.s8 %v209_v22  ;;  %4746 = vmatpush.bf16.msrb.mxu3 %v2231_v4  ;;  %v2063_v12 = vpack.c.bf16 %v1607_v5, %v1601_v1  ;;  %v1253_v15 = vcvt.s32.f32 %v677_v6  ;;  %v431_v17 = vunpack.c.0.s8 %v125_v35 }
  0x47   :  { %v1829_v16 = vmul.f32 %v7066_v47, %v1247_v7  ;;  %v2111_v21 = vpack.c.bf16 %v1703_v9, %v1697_v8  ;;  %v1343_v25 = vcvt.s32.f32 %v767_v10  ;;  %v437_v24 = vunpack.c.1.s8 %v125_v35 }
  0x48   :  { %v1349_v27 = vcvt.s32.f32 %v773_v11  ;;  %4711 = vmatpush.bf16.msrb.mxu0 %v2063_v12  ;;  %v1835_v28 = vmul.f32 %v7066_v47, %v1253_v15  ;;  %v1007_v26 = vcvt.s32.f32 %v431_v17  ;;  %v527_v29 = vunpack.c.0.s8 %v149_v44 }
  0x49   :  { %v533_v30 = vunpack.c.1.s8 %v149_v44  ;;  %4724 = vmatpush.bf16.msrb.mxu1 %v2111_v21  ;;  %v1925_v31 = vmul.f32 %v7066_v47, %v1343_v25  ;;  %v1013_v14 = vcvt.s32.f32 %v437_v24  ;;  %v659_v19 = vunpack.c.2.s8 %v7172_v18 }
  0x4a   :  { %v1931_v13 = vmul.f32 %v7066_v47, %v1349_v27  ;;  %v2177_v20 = vpack.c.bf16 %v1835_v28, %v1829_v16  ;;  %v1589_v22 = vmul.f32 %v7066_v47, %v1007_v26  ;;  %v1103_v23 = vcvt.s32.f32 %v527_v29  ;;  %v7194_v16 = vld [vmem:[#allocation2 + $0x330] sm:$0xff] }
  0x4b   :  { %v1109_v32 = vcvt.s32.f32 %v533_v30  ;;  %v1595_v35 = vmul.f32 %v7066_v47, %v1013_v14  ;;  %v665_v36 = vunpack.c.3.s8 %v7172_v18  ;;  %v1235_v37 = vcvt.s32.f32 %v659_v19  ;;  %v197_v14 = vld [vmem:[#allocation2 + $0x3f0] sm:$0xff] }
  0x4c   :  { %v2225_v34 = vpack.c.bf16 %v1931_v13, %v1925_v31  ;;  %4734 = vmatpush.bf16.msrb.mxu2 %v2177_v20  ;;  %v1685_v38 = vmul.f32 %v7066_v47, %v1103_v23  ;;  %v755_v40 = vunpack.c.2.s8 %v203_v58  ;;  %v761_v41 = vunpack.c.3.s8 %v203_v58  ;;  %v90_v23 = vld [vmem:[#allocation2 + $0x98] sm:$0xff] }
  0x4d   :  { %v1691_v39 = vmul.f32 %v7066_v47, %v1109_v32  ;;  %v2057_v43 = vpack.c.bf16 %v1595_v35, %v1589_v22  ;;  %v1241_v44 = vcvt.s32.f32 %v665_v36  ;;  %v1817_v45 = vmul.f32 %v7066_v47, %v1235_v37 }
  0x4e   :  { %4747 = vmatpush.bf16.msrb.mxu3 %v2225_v34  ;;  %v419_v46 = vunpack.c.2.s8 %v119_v33  ;;  %v1331_v49 = vcvt.s32.f32 %v755_v40  ;;  %v1337_v50 = vcvt.s32.f32 %v761_v41  ;;  %v425_v51 = vunpack.c.3.s8 %v119_v33  ;;  %v7208_v40 = vld [vmem:[%s10189_s7 + $0x8] sm:$0x7f]  ;;  %v114_v41 = vld [vmem:[#allocation2 + $0x158] sm:$0xff] }
  0x4f   :  { %v2105_v48 = vpack.c.bf16 %v1691_v39, %v1685_v38  ;;  %4712 = vmatpush.bf16.msrb.mxu0 %v2057_v43  ;;  %v1823_v52 = vmul.f32 %v7066_v47, %v1241_v44  ;;  %v515_v54 = vunpack.c.2.s8 %v143_v42  ;;  %v521_v55 = vunpack.c.3.s8 %v143_v42 }
  0x50   :  { %v995_v53 = vcvt.s32.f32 %v419_v46  ;;  %v1913_v56 = vmul.f32 %v7066_v47, %v1331_v49  ;;  %v1919_v57 = vmul.f32 %v7066_v47, %v1337_v50  ;;  %v1001_v59 = vcvt.s32.f32 %v425_v51 }
  0x51   :  { %4725 = vmatpush.bf16.msrb.mxu1 %v2105_v48  ;;  %v647_v60 = vunpack.c.0.s8 %v7172_v18  ;;  %v2171_v61 = vpack.c.bf16 %v1823_v52, %v1817_v45  ;;  %v1091_v63 = vcvt.s32.f32 %v515_v54  ;;  %v1097_v1 = vcvt.s32.f32 %v521_v55 }
  0x52   :  { %v1577_v62 = vmul.f32 %v7066_v47, %v995_v53  ;;  %v2219_v2 = vpack.c.bf16 %v1919_v57, %v1913_v56  ;;  %v1583_v3 = vmul.f32 %v7066_v47, %v1001_v59  ;;  %v653_v4 = vunpack.c.1.s8 %v7172_v18 }
  0x53   :  { %v1223_v5 = vcvt.s32.f32 %v647_v60  ;;  %4735 = vmatpush.bf16.msrb.mxu2 %v2171_v61  ;;  %v1673_v6 = vmul.f32 %v7066_v47, %v1091_v63  ;;  %v1679_v7 = vmul.f32 %v7066_v47, %v1097_v1  ;;  %v743_v8 = vunpack.c.0.s8 %v203_v58 }
  0x54   :  { %v749_v9 = vunpack.c.1.s8 %v203_v58  ;;  %4748 = vmatpush.bf16.msrb.mxu3 %v2219_v2  ;;  %v2051_v10 = vpack.c.bf16 %v1583_v3, %v1577_v62  ;;  %v1229_v11 = vcvt.s32.f32 %v653_v4  ;;  %v407_v15 = vunpack.c.0.s8 %v119_v33 }
  0x55   :  { %v1805_v12 = vmul.f32 %v7066_v47, %v1223_v5  ;;  %v2099_v17 = vpack.c.bf16 %v1679_v7, %v1673_v6  ;;  %v1319_v21 = vcvt.s32.f32 %v743_v8  ;;  %v413_v18 = vunpack.c.1.s8 %v119_v33 }
  0x56   :  { %v1325_v25 = vcvt.s32.f32 %v749_v9  ;;  %4713 = vmatpush.bf16.msrb.mxu0 %v2051_v10  ;;  %v1811_v27 = vmul.f32 %v7066_v47, %v1229_v11  ;;  %v983_v24 = vcvt.s32.f32 %v407_v15  ;;  %v503_v28 = vunpack.c.0.s8 %v143_v42 }
  0x57   :  { %v509_v26 = vunpack.c.1.s8 %v143_v42  ;;  %4726 = vmatpush.bf16.msrb.mxu1 %v2099_v17  ;;  %v1901_v29 = vmul.f32 %v7066_v47, %v1319_v21  ;;  %v989_v31 = vcvt.s32.f32 %v413_v18  ;;  %v635_v13 = vunpack.c.2.s8 %v7194_v16 }
  0x58   :  { %v1907_v30 = vmul.f32 %v7066_v47, %v1325_v25  ;;  %v2165_v19 = vpack.c.bf16 %v1811_v27, %v1805_v12  ;;  %v1565_v58 = vmul.f32 %v7066_v47, %v983_v24  ;;  %v1079_v20 = vcvt.s32.f32 %v503_v28 }
  0x59   :  { %v1085_v22 = vcvt.s32.f32 %v509_v26  ;;  %v1571_v33 = vmul.f32 %v7066_v47, %v989_v31  ;;  %v641_v34 = vunpack.c.3.s8 %v7194_v16  ;;  %v1211_v35 = vcvt.s32.f32 %v635_v13 }
  0x5a   :  { %v2213_v32 = vpack.c.bf16 %v1907_v30, %v1901_v29  ;;  %4736 = vmatpush.bf16.msrb.mxu2 %v2165_v19  ;;  %v1661_v36 = vmul.f32 %v7066_v47, %v1079_v20  ;;  %v731_v38 = vunpack.c.2.s8 %v197_v14  ;;  %v737_v39 = vunpack.c.3.s8 %v197_v14 }
  0x5b   :  { %v1667_v37 = vmul.f32 %v7066_v47, %v1085_v22  ;;  %v2045_v42 = vpack.c.bf16 %v1571_v33, %v1565_v58  ;;  %v1217_v43 = vcvt.s32.f32 %v641_v34  ;;  %v1793_v44 = vmul.f32 %v7066_v47, %v1211_v35  ;;  %v167_v34 = vld [vmem:[#allocation2 + $0x300] sm:$0xff] }
  0x5c   :  { %4749 = vmatpush.bf16.msrb.mxu3 %v2213_v32  ;;  %v300_v45 = vunpack.c.2.s8 %v90_v23  ;;  %v1307_v48 = vcvt.s32.f32 %v731_v38  ;;  %v1313_v49 = vcvt.s32.f32 %v737_v39  ;;  %v306_v50 = vunpack.c.3.s8 %v90_v23  ;;  %v191_v35 = vld [vmem:[#allocation2 + $0x3c0] sm:$0xff] }
  0x5d   :  { %v2093_v46 = vpack.c.bf16 %v1667_v37, %v1661_v36  ;;  %4714 = vmatpush.bf16.msrb.mxu0 %v2045_v42  ;;  %v1799_v51 = vmul.f32 %v7066_v47, %v1217_v43  ;;  %v7213_v53 = vperm.slane %v7208_v40, 5  ;;  %v396_v54 = vunpack.c.2.s8 %v114_v41  ;;  %v84_v36 = vld [vmem:[#allocation2 + $0x68] sm:$0xff] }
  0x5e   :  { %v876_v52 = vcvt.s32.f32 %v300_v45  ;;  %v1889_v55 = vmul.f32 %v7066_v47, %v1307_v48  ;;  %v1895_v56 = vmul.f32 %v7066_v47, %v1313_v49  ;;  %v882_v57 = vcvt.s32.f32 %v306_v50  ;;  %v108_v42 = vld [vmem:[#allocation2 + $0x128] sm:$0xff] }
  0x5f   :  { %4727 = vmatpush.bf16.msrb.mxu1 %v2093_v46  ;;  %v402_v59 = vunpack.c.3.s8 %v114_v41  ;;  %v2159_v60 = vpack.c.bf16 %v1799_v51, %v1793_v44  ;;  %v972_v62 = vcvt.s32.f32 %v396_v54  ;;  %v623_v63 = vunpack.c.0.s8 %v7194_v16 }
  0x60   :  { %v1458_v61 = vmul.f32 %v7213_v53, %v876_v52  ;;  %v2207_v1 = vpack.c.bf16 %v1895_v56, %v1889_v55  ;;  %v1464_v2 = vmul.f32 %v7213_v53, %v882_v57  ;;  %v629_v4 = vunpack.c.1.s8 %v7194_v16 }
  0x61   :  { %v978_v3 = vcvt.s32.f32 %v402_v59  ;;  %4737 = vmatpush.bf16.msrb.mxu2 %v2159_v60  ;;  %v1554_v5 = vmul.f32 %v7213_v53, %v972_v62  ;;  %v1199_v6 = vcvt.s32.f32 %v623_v63  ;;  %v719_v7 = vunpack.c.0.s8 %v197_v14 }
  0x62   :  { %v725_v8 = vunpack.c.1.s8 %v197_v14  ;;  %4750 = vmatpush.bf16.msrb.mxu3 %v2207_v1  ;;  %v1992_v9 = vpack.c.bf16 %v1464_v2, %v1458_v61  ;;  %v1205_v11 = vcvt.s32.f32 %v629_v4  ;;  %v288_v12 = vunpack.c.0.s8 %v90_v23 }
  0x63   :  { %v1560_v10 = vmul.f32 %v7213_v53, %v978_v3  ;;  %v1781_v15 = vmul.f32 %v7066_v47, %v1199_v6  ;;  %v1295_v17 = vcvt.s32.f32 %v719_v7  ;;  %v294_v25 = vunpack.c.1.s8 %v90_v23 }
  0x64   :  { %v1301_v21 = vcvt.s32.f32 %v725_v8  ;;  %4759 = vmatpush.bf16.msra.mxu0 %v1992_v9  ;;  %v1787_v16 = vmul.f32 %v7066_v47, %v1205_v11  ;;  %v864_v27 = vcvt.s32.f32 %v288_v12  ;;  %v384_v24 = vunpack.c.0.s8 %v114_v41 }
  0x65   :  { %v2040_v18 = vpack.c.bf16 %v1560_v10, %v1554_v5  ;;  %v1877_v28 = vmul.f32 %v7066_v47, %v1295_v17  ;;  %v870_v29 = vcvt.s32.f32 %v294_v25  ;;  %v390_v30 = vunpack.c.1.s8 %v114_v41 }
  0x66   :  { %v1883_v26 = vmul.f32 %v7066_v47, %v1301_v21  ;;  %v2153_v31 = vpack.c.bf16 %v1787_v16, %v1781_v15  ;;  %v1446_v13 = vmul.f32 %v7213_v53, %v864_v27  ;;  %v960_v14 = vcvt.s32.f32 %v384_v24  ;;  %v138_v16 = vld [vmem:[#allocation2 + $0x218] sm:$0xff] }
  0x67   :  { %4772 = vmatpush.bf16.msra.mxu1 %v2040_v18  ;;  %v1452_v58 = vmul.f32 %v7213_v53, %v870_v29  ;;  %v966_v20 = vcvt.s32.f32 %v390_v30  ;;  %v611_v37 = vunpack.c.2.s8 %v167_v34  ;;  %v617_v38 = vunpack.c.3.s8 %v167_v34 }
  0x68   :  { %v2201_v19 = vpack.c.bf16 %v1883_v26, %v1877_v28  ;;  %4738 = vmatpush.bf16.msrb.mxu2 %v2153_v31  ;;  %v1542_v22 = vmul.f32 %v7213_v53, %v960_v14  ;;  %v707_v39 = vunpack.c.2.s8 %v191_v35  ;;  %v713_v41 = vunpack.c.3.s8 %v191_v35  ;;  %v162_v14 = vld [vmem:[#allocation2 + $0x2d8] sm:$0xff] }
  0x69   :  { %v1986_v23 = vpack.c.bf16 %v1452_v58, %v1446_v13  ;;  %v1548_v32 = vmul.f32 %v7213_v53, %v966_v20  ;;  %v276_v43 = vunpack.c.2.s8 %v84_v36  ;;  %v282_v44 = vunpack.c.3.s8 %v84_v36 }
  0x6a   :  { %4751 = vmatpush.bf16.msrb.mxu3 %v2201_v19  ;;  %v372_v45 = vunpack.c.2.s8 %v108_v42  ;;  %v378_v46 = vunpack.c.3.s8 %v108_v42  ;;  %v1187_v48 = vcvt.s32.f32 %v611_v37  ;;  %v1193_v49 = vcvt.s32.f32 %v617_v38 }
  0x6b   :  { %4760 = vmatpush.bf16.msra.mxu0 %v1986_v23  ;;  %v2034_v33 = vpack.c.bf16 %v1548_v32, %v1542_v22  ;;  %v1283_v50 = vcvt.s32.f32 %v707_v39  ;;  %v1289_v51 = vcvt.s32.f32 %v713_v41  ;;  %v852_v52 = vcvt.s32.f32 %v276_v43  ;;  %v78_v23 = vld [vmem:[#allocation2 + $0x38] sm:$0xff] }
  0x6c   :  { %v858_v54 = vcvt.s32.f32 %v282_v44  ;;  %v948_v55 = vcvt.s32.f32 %v372_v45  ;;  %v954_v56 = vcvt.s32.f32 %v378_v46  ;;  %v1769_v57 = vmul.f32 %v7066_v47, %v1187_v48  ;;  %v7250_v48 = vld [vmem:[%s10189_s7] sm:$0x7f] }
  0x6d   :  { %4773 = vmatpush.bf16.msra.mxu1 %v2034_v33  ;;  %v1775_v59 = vmul.f32 %v7066_v47, %v1193_v49  ;;  %v1865_v60 = vmul.f32 %v7066_v47, %v1283_v50  ;;  %v1871_v61 = vmul.f32 %v7066_v47, %v1289_v51  ;;  %v1434_v62 = vmul.f32 %v7213_v53, %v852_v52 }
  0x6e   :  { %v1440_v63 = vmul.f32 %v7213_v53, %v858_v54  ;;  %v1530_v1 = vmul.f32 %v7213_v53, %v948_v55  ;;  %v1536_v4 = vmul.f32 %v7213_v53, %v954_v56  ;;  %v599_v5 = vunpack.c.0.s8 %v167_v34 }
  0x6f   :  { %v2147_v2 = vpack.c.bf16 %v1775_v59, %v1769_v57  ;;  %v2195_v3 = vpack.c.bf16 %v1871_v61, %v1865_v60  ;;  %v605_v7 = vunpack.c.1.s8 %v167_v34  ;;  %v695_v8 = vunpack.c.0.s8 %v191_v35 }
  0x70   :  { %v1980_v6 = vpack.c.bf16 %v1440_v63, %v1434_v62  ;;  %v701_v9 = vunpack.c.1.s8 %v191_v35  ;;  %v2028_v10 = vpack.c.bf16 %v1536_v4, %v1530_v1  ;;  %v1175_v11 = vcvt.s32.f32 %v599_v5 }
  0x71   :  { %4739 = vmatpush.bf16.msrb.mxu2 %v2147_v2  ;;  %4752 = vmatpush.bf16.msrb.mxu3 %v2195_v3  ;;  %v264_v12 = vunpack.c.0.s8 %v84_v36  ;;  %v270_v15 = vunpack.c.1.s8 %v84_v36  ;;  %v1181_v17 = vcvt.s32.f32 %v605_v7  ;;  %v1271_v21 = vcvt.s32.f32 %v695_v8  ;;  %v102_v36 = vld [vmem:[#allocation2 + $0xf8] sm:$0xff] }
  0x72   :  { %4761 = vmatpush.bf16.msra.mxu0 %v1980_v6  ;;  %v1277_v25 = vcvt.s32.f32 %v701_v9  ;;  %v360_v18 = vunpack.c.0.s8 %v108_v42  ;;  %4774 = vmatpush.bf16.msra.mxu1 %v2028_v10  ;;  %v1757_v27 = vmul.f32 %v7066_v47, %v1175_v11  ;;  %v366_v26 = vunpack.c.1.s8 %v108_v42 }
  0x73   :  { %v840_v24 = vcvt.s32.f32 %v264_v12  ;;  %v846_v28 = vcvt.s32.f32 %v270_v15  ;;  %v1763_v29 = vmul.f32 %v7066_v47, %v1181_v17  ;;  %v1853_v30 = vmul.f32 %v7066_v47, %v1271_v21  ;;  %v7266_v21 = vld [vmem:[#allocation2 + $0x1e8] sm:$0xff] }
  0x74   :  { %v1859_v31 = vmul.f32 %v7066_v47, %v1277_v25  ;;  %v936_v13 = vcvt.s32.f32 %v360_v18  ;;  %v942_v20 = vcvt.s32.f32 %v366_v26  ;;  %v492_v22 = vunpack.c.2.s8 %v138_v16 }
  0x75   :  { %v1422_v19 = vmul.f32 %v7213_v53, %v840_v24  ;;  %v1428_v58 = vmul.f32 %v7213_v53, %v846_v28  ;;  %v2141_v32 = vpack.c.bf16 %v1763_v29, %v1757_v27  ;;  %v498_v35 = vunpack.c.3.s8 %v138_v16 }
  0x76   :  { %v2189_v33 = vpack.c.bf16 %v1859_v31, %v1853_v30  ;;  %v1518_v34 = vmul.f32 %v7213_v53, %v936_v13  ;;  %v1524_v38 = vmul.f32 %v7213_v53, %v942_v20  ;;  %v588_v39 = vunpack.c.2.s8 %v162_v14  ;;  %v7277_v30 = vld [vmem:[#allocation2 + $0x2a8] sm:$0xff] }
  0x77   :  { %v1974_v37 = vpack.c.bf16 %v1428_v58, %v1422_v19  ;;  %4740 = vmatpush.bf16.msrb.mxu2 %v2141_v32  ;;  %v1068_v47 = vcvt.s32.f32 %v492_v22  ;;  %v1074_v41 = vcvt.s32.f32 %v498_v35  ;;  %v252_v42 = vunpack.c.2.s8 %v78_v23 }
  0x78   :  { %4753 = vmatpush.bf16.msrb.mxu3 %v2189_v33  ;;  %v258_v43 = vunpack.c.3.s8 %v78_v23  ;;  %v2022_v44 = vpack.c.bf16 %v1524_v38, %v1518_v34  ;;  %v594_v45 = vunpack.c.3.s8 %v162_v14  ;;  %v348_v46 = vunpack.c.2.s8 %v102_v36 }
  0x79   :  { %4762 = vmatpush.bf16.msra.mxu0 %v1974_v37  ;;  %v4508_v49 = vperm.slane %v7250_v48, 0  ;;  %v828_v50 = vcvt.s32.f32 %v252_v42  ;;  %v1164_v52 = vcvt.s32.f32 %v588_v39  ;;  %v354_v54 = vunpack.c.3.s8 %v102_v36 }
  0x7a   :  { %v834_v51 = vcvt.s32.f32 %v258_v43  ;;  %4775 = vmatpush.bf16.msra.mxu1 %v2022_v44  ;;  %v924_v55 = vcvt.s32.f32 %v348_v46  ;;  %v480_v56 = vunpack.c.0.s8 %v138_v16  ;;  %v7254_v57 = vmul.f32 %v7213_v53, %v1068_v47  ;;  %v7299_v47 = vld [vmem:[%s10189_s7 + $0x10] sm:$0x7f] }
  0x7b   :  { %v7257_v59 = vmul.f32 %v7213_v53, %v1074_v41  ;;  %v1410_v60 = vmul.f32 %v7213_v53, %v828_v50  ;;  %v1170_v62 = vcvt.s32.f32 %v594_v45  ;;  %v930_v63 = vcvt.s32.f32 %v354_v54  ;;  %v69_v45 = vld [vmem:[%s10189_s7 + $0x20] sm:$0x7f]  ;;  %v70_v54 = vld [vmem:[%s10189_s7 + $0x28] sm:$0x7f] }
  0x7c   :  { %v1416_v61 = vmul.f32 %v7213_v53, %v834_v51  ;;  %v1506_v1 = vmul.f32 %v7213_v53, %v924_v55  ;;  %v486_v2 = vunpack.c.1.s8 %v138_v16  ;;  %v1056_v4 = vcvt.s32.f32 %v480_v56  ;;  %v7324_v55 = vld [vmem:[#allocation2 + $0x8] sm:$0xff] }
  0x7d   :  { %v576_v5 = vunpack.c.0.s8 %v162_v14  ;;  %v582_v6 = vunpack.c.1.s8 %v162_v14  ;;  %v7263_v7 = vmul.f32 %v7213_v53, %v1164_v52  ;;  %v1512_v8 = vmul.f32 %v7213_v53, %v930_v63  ;;  %v7336_v63 = vld [vmem:[#allocation2 + $0xc8] sm:$0xff] }
  0x7e   :  { %v1968_v3 = vpack.c.bf16 %v1416_v61, %v1410_v60  ;;  %v1062_v9 = vcvt.s32.f32 %v486_v2  ;;  %v240_v10 = vunpack.c.0.s8 %v78_v23  ;;  %v246_v15 = vunpack.c.1.s8 %v78_v23 }
  0x7f   :  { %v1152_v11 = vcvt.s32.f32 %v576_v5  ;;  %v1158_v12 = vcvt.s32.f32 %v582_v6  ;;  %v336_v17 = vunpack.c.0.s8 %v102_v36  ;;  %v7269_v25 = vmul.f32 %v7213_v53, %v1170_v62 }
  0x80   :  { %4763 = vmatpush.bf16.msra.mxu0 %v1968_v3  ;;  %v2016_v18 = vpack.c.bf16 %v1512_v8, %v1506_v1  ;;  %v816_v16 = vcvt.s32.f32 %v240_v10  ;;  %v342_v27 = vunpack.c.1.s8 %v102_v36  ;;  %v7272_v24 = vmul.f32 %v7213_v53, %v1056_v4 }
  0x81   :  { %v7275_v28 = vmul.f32 %v7213_v53, %v1062_v9  ;;  %v822_v26 = vcvt.s32.f32 %v246_v15  ;;  %v912_v29 = vcvt.s32.f32 %v336_v17  ;;  %v7280_v31 = vmul.f32 %v7213_v53, %v1152_v11 }
  0x82   :  { %4776 = vmatpush.bf16.msra.mxu1 %v2016_v18  ;;  %v1398_v13 = vmul.f32 %v7213_v53, %v816_v16  ;;  %v918_v14 = vcvt.s32.f32 %v342_v27  ;;  %v468_v19 = vunpack.c.2.s8 %v7266_v21  ;;  %v7285_v58 = vmul.f32 %v7213_v53, %v1158_v12 }
  0x83   :  { %v1404_v20 = vmul.f32 %v7213_v53, %v822_v26  ;;  %v1494_v22 = vmul.f32 %v7213_v53, %v912_v29  ;;  %v474_v23 = vunpack.c.3.s8 %v7266_v21  ;;  %v564_v34 = vunpack.c.2.s8 %v7277_v30 }
  0x84   :  { %v1500_v32 = vmul.f32 %v7213_v53, %v918_v14  ;;  %v1044_v33 = vcvt.s32.f32 %v468_v19  ;;  %v570_v35 = vunpack.c.3.s8 %v7277_v30  ;;  %v4509_v36 = vperm.slane %v7208_v40, 0  ;;  %v7307_v40 = vld [vmem:[%s10189_s7 + $0x18] sm:$0x7f] }
  0x85   :  { %v2088_v37 = vpack.c.bf16 %v7257_v59, %v7254_v57  ;;  %v1962_v38 = vpack.c.bf16 %v1404_v20, %v1398_v13  ;;  %v1050_v39 = vcvt.s32.f32 %v474_v23  ;;  %v1140_v43 = vcvt.s32.f32 %v564_v34 }
  0x86   :  { %v2010_v41 = vpack.c.bf16 %v1500_v32, %v1494_v22  ;;  %v7302_v42 = vmul.f32 %v7213_v53, %v1044_v33  ;;  %v1146_v44 = vcvt.s32.f32 %v570_v35  ;;  %v2136_v46 = vpack.c.bf16 %v7269_v25, %v7263_v7 }
  0x87   :  { %v2082_v50 = vpack.c.bf16 %v7275_v28, %v7272_v24  ;;  %v2130_v51 = vpack.c.bf16 %v7285_v58, %v7280_v31  ;;  %4764 = vmatpush.bf16.msra.mxu0 %v1962_v38  ;;  %v7319_v52 = vmul.f32 %v7213_v53, %v1050_v39  ;;  %v7327_v56 = vmul.f32 %v7213_v53, %v1140_v43 }
  0x88   :  { %4777 = vmatpush.bf16.msra.mxu1 %v2010_v41  ;;  %v7330_v60 = vmul.f32 %v7213_v53, %v1146_v44  ;;  %v7333_v61 = vperm.slane %v7299_v47, 5  ;;  %v4510_v62 = vperm.slane %v7299_v47, 0  ;;  %v7339_v1 = vperm.slane %v7307_v40, 5 }
  0x89   :  { %v4511_v2 = vperm.slane %v7307_v40, 0  ;;  %v7342_v3 = vperm.slane %v69_v45, 5  ;;  %v4512_v4 = vperm.slane %v69_v45, 0  ;;  %v2076_v5 = vpack.c.bf16 %v7319_v52, %v7302_v42 }
  0x8a   :  { %v2124_v6 = vpack.c.bf16 %v7330_v60, %v7327_v56  ;;  %v4513_v8 = vperm.slane %v70_v54, 0  ;;  %v228_v9 = vunpack.c.2.s8 %v7324_v55  ;;  %v234_v10 = vunpack.c.3.s8 %v7324_v55 }
  0x8b   :  { %v324_v11 = vunpack.c.2.s8 %v7336_v63  ;;  %v330_v12 = vunpack.c.3.s8 %v7336_v63  ;;  %v456_v15 = vunpack.c.0.s8 %v7266_v21  ;;  %v462_v27 = vunpack.c.1.s8 %v7266_v21 }
  0x8c   :  { %v804_v16 = vcvt.s32.f32 %v228_v9  ;;  %v552_v26 = vunpack.c.0.s8 %v7277_v30  ;;  %v558_v29 = vunpack.c.1.s8 %v7277_v30  ;;  %v810_v19 = vcvt.s32.f32 %v234_v10 }
  0x8d   :  { %v900_v20 = vcvt.s32.f32 %v324_v11  ;;  %v906_v33 = vcvt.s32.f32 %v330_v12  ;;  %v1032_v34 = vcvt.s32.f32 %v456_v15  ;;  %v1038_v35 = vcvt.s32.f32 %v462_v27  ;;  %v7372_v11 = vld [vmem:[#allocation2 + $0x1b8] sm:$0xff] }
  0x8e   :  { %v1386_v32 = vmul.f32 %v7213_v53, %v804_v16  ;;  %v1392_v43 = vmul.f32 %v7213_v53, %v810_v19  ;;  %v1128_v10 = vcvt.s32.f32 %v552_v26  ;;  %v7379_v16 = vld [vmem:[#allocation2 + $0x278] sm:$0xff]  ;;  %v222_v26 = vunpack.c.1.s8 %v7324_v55 }
  0x8f   :  { %v1482_v30 = vmul.f32 %v7213_v53, %v900_v20  ;;  %v1488_v44 = vmul.f32 %v7213_v53, %v906_v33  ;;  %v7363_v45 = vmul.f32 %v7213_v53, %v1032_v34  ;;  %vm5626_vm3 = vcmask 1045504  }
  0x90   :  { %v1956_v48 = vpack.c.bf16 %v1392_v43, %v1386_v32  ;;  %v444_v32 = vunpack.c.2.s8 %v7372_v11  ;;  %v798_v34 = vcvt.s32.f32 %v222_v26  ;;  %v7411_v43 = vld [vmem:[#allocation2 + $0x458] sm:$0xff]  ;;  %vm5627_vm4 = vcmask 1046528  }
  0x91   :  { %v786_v58 = vunpack.c.3.s8 %v7411_v43  ;;  %vm5547_vm5 = vcmask 138240   ;;  %vm5622_vm6 = vcmask 236544   ;;  %vm6459_vm7 = vcmask 48128  }
  0x92   :  { %4765 = vmatpush.bf16.msra.mxu0 %v1956_v48  ;;  %v1380_v7 = vmul.f32 %v7213_v53, %v798_v34  ;;  %v534_v34 = vunpack.c.1.s8 %v7379_v16  ;;  %vm6461_vm8 = vcmask 146432   ;;  %vm6463_vm9 = vcmask 244736  }
  0x9d   :  { %v4646_v17 = vpop.f32.mrf.mxu0  ;;  %v4659_v18 = vpop.f32.mrf.mxu1 }
  0x9e   :  { %v4647_v13 = vadd.f32 %v4646_v17, %v4512_v4  ;;  %v4660_v14 = vadd.f32 %v4659_v18, %v4513_v8  ;;  %v4594_v22 = vpop.f32.mrf.mxu2  ;;  %v4607_v23 = vpop.f32.mrf.mxu3  ;;  %v1134_v17 = vcvt.s32.f32 %v558_v29  ;;  %v216_v18 = vunpack.c.0.s8 %v7324_v55 }
  0x9f   :  { %v4595_v38 = vadd.f32 %v4594_v22, %v4508_v49  ;;  %v4608_v39 = vadd.f32 %v4607_v23, %v4509_v36  ;;  %v2004_v49 = vpack.c.bf16 %v1488_v44, %v1482_v30  ;;  %v7370_v36 = vmul.f32 %v7213_v53, %v1038_v35 }
  0xa0   :  { %v4667_v21 = vmax.f32 %v4647_v13, 0.0  ;;  %v4668_v41 = vmax.f32 %v4660_v14, 0.0  ;;  %v7384_v13 = vmul.f32 %v7213_v53, %v1128_v10  ;;  %v312_v14 = vunpack.c.0.s8 %v7336_v63 }
  0xa1   :  { %v4663_v54 = vmax.f32 %v4595_v38, 0.0  ;;  %v4664_v4 = vmax.f32 %v4608_v39, 0.0  ;;  %4778 = vmatpush.bf16.msra.mxu1 %v2004_v49  ;;  %v2070_v27 = vpack.c.bf16 %v7370_v36, %v7363_v45  ;;  %v7391_v29 = vmul.f32 %v7213_v53, %v1134_v17 }
  0xa2   :  { %v7365_v8 = vpack.c.bf16 %v4667_v21, %v4667_v21  ;;  %v7367_v9 = vpack.c.bf16 %v4668_v41, %v4668_v41  ;;  %v792_v22 = vcvt.s32.f32 %v216_v18  ;;  %v318_v23 = vunpack.c.1.s8 %v7336_v63  ;;  %v7403_v21 = vld [vmem:[#allocation2 + $0x398] sm:$0xff] }
  0xa3   :  { %v7374_v12 = vpack.c.bf16 %v4663_v54, %v4663_v54  ;;  %v7376_v15 = vpack.c.bf16 %v4664_v4, %v4664_v4  ;;  %v888_v35 = vcvt.s32.f32 %v312_v14  ;;  %v450_v38 = vunpack.c.3.s8 %v7372_v11 }
  0xa4   :  { %v540_v39 = vunpack.c.2.s8 %v7379_v16  ;;  %v2118_v63 = vpack.c.bf16 %v7391_v29, %v7384_v13  ;;  %v1374_v57 = vmul.f32 %v7213_v53, %v792_v22  ;;  %v894_v59 = vcvt.s32.f32 %v318_v23 }
  0xa5   :  { %v4648_v19 = vpop.f32.mrf.mxu0  ;;  %v4661_v20 = vpop.f32.mrf.mxu1  ;;  %4689 = vmatmul.bf16.vlgmr.msra.gmra.mxu2 %v7374_v12  ;;  %4702 = vmatmul.bf16.vlgmr.msra.gmra.mxu3 %v7376_v15  ;;  %v1470_v25 = vmul.f32 %v7213_v53, %v888_v35  ;;  %v546_v41 = vunpack.c.3.s8 %v7379_v16  ;;  %v684_v4 = vunpack.c.2.s8 %v7403_v21  ;;  %v690_v17 = vunpack.c.3.s8 %v7403_v21 }
  0xa6   :  { %4785 = vmatpush.bf16.msra.mxu2 %v2088_v37  ;;  %4798 = vmatpush.bf16.msra.mxu3 %v2136_v46  ;;  %v4596_v55 = vpop.f32.mrf.mxu2  ;;  %v4609_v33 = vpop.f32.mrf.mxu3  ;;  %v1020_v37 = vcvt.s32.f32 %v444_v32  ;;  %v1026_v46 = vcvt.s32.f32 %v450_v38  ;;  %v1476_v30 = vmul.f32 %v7213_v53, %v894_v59  ;;  %v1116_v54 = vcvt.s32.f32 %v540_v39  ;;  %v7461_v59 = vld [vmem:[#allocation2 + $0x188] sm:$0xff] }
  0xa7   :  { %v1950_v48 = vpack.c.bf16 %v1380_v7, %v1374_v57  ;;  %v1122_v10 = vcvt.s32.f32 %v546_v41  ;;  %v1260_v26 = vcvt.s32.f32 %v684_v4  ;;  %v780_v14 = vunpack.c.2.s8 %v7411_v43 }
  0xa8   :  { %v7415_v44 = vmul.f32 %v7213_v53, %v1020_v37  ;;  %v7425_v49 = vmul.f32 %v7213_v53, %v1026_v46  ;;  %v1998_v18 = vpack.c.bf16 %v1476_v30, %v1470_v25  ;;  %v7429_v13 = vmul.f32 %v7213_v53, %v1116_v54  ;;  %v7469_v46 = vld [vmem:[#allocation2 + $0x248] sm:$0xff] }
  0xa9   :  { %4766 = vmatpush.bf16.msra.mxu0 %v1950_v48  ;;  %v1704_v28 = vmul.f32 %v7213_v53, %v1122_v10  ;;  %v1266_v31 = vcvt.s32.f32 %v690_v17  ;;  %v432_v19 = vunpack.c.0.s8 %v7372_v11  ;;  %v438_v20 = vunpack.c.1.s8 %v7372_v11 }
  0xaa   :  { %4786 = vmatpush.bf16.msra.mxu2 %v2082_v50  ;;  %4799 = vmatpush.bf16.msra.mxu3 %v2130_v51  ;;  %v2064_v24 = vpack.c.bf16 %v7425_v49, %v7415_v44  ;;  %v1842_v50 = vmul.f32 %v7213_v53, %v1260_v26  ;;  %v1356_v51 = vcvt.s32.f32 %v780_v14  ;;  %v1362_v55 = vcvt.s32.f32 %v786_v58 }
  0xab   :  { %4779 = vmatpush.bf16.msra.mxu1 %v1998_v18  ;;  %v2112_v23 = vpack.c.bf16 %v1704_v28, %v7429_v13  ;;  %v1848_v32 = vmul.f32 %v7213_v53, %v1266_v31  ;;  %v528_v33 = vunpack.c.0.s8 %v7379_v16  ;;  %v678_v25 = vunpack.c.1.s8 %v7403_v21 }
  0xac   :  { %v1938_v52 = vmul.f32 %v7213_v53, %v1356_v51  ;;  %v1944_v60 = vmul.f32 %v7213_v53, %v1362_v55  ;;  %v774_v30 = vunpack.c.1.s8 %v7411_v43  ;;  %v420_v44 = vunpack.c.2.s8 %v7461_v59  ;;  %v204_v51 = vld [vmem:[#allocation2 + $0x428] sm:$0xff] }
  0xad   :  { %v2184_v56 = vpack.c.bf16 %v1848_v32, %v1842_v50  ;;  %v1104_v57 = vcvt.s32.f32 %v528_v33  ;;  %v1254_v41 = vcvt.s32.f32 %v678_v25  ;;  %v426_v54 = vunpack.c.3.s8 %v7461_v59 }
  0xae   :  { %4787 = vmatpush.bf16.msra.mxu2 %v2076_v5  ;;  %4800 = vmatpush.bf16.msra.mxu3 %v2124_v6  ;;  %v4620_v29 = vpop.f32.mrf.mxu2  ;;  %v4633_v22 = vpop.f32.mrf.mxu3  ;;  %v1008_v5 = vcvt.s32.f32 %v432_v19  ;;  %v1014_v6 = vcvt.s32.f32 %v438_v20  ;;  %v2232_v47 = vpack.c.bf16 %v1944_v60, %v1938_v52  ;;  %v516_v18 = vunpack.c.2.s8 %v7469_v46 }
  0xaf   :  { %v4621_v11 = vadd.f32 %v4620_v29, %v4510_v62  ;;  %v4634_v42 = vadd.f32 %v4633_v22, %v4511_v2  ;;  %v1110_v62 = vcvt.s32.f32 %v534_v34  ;;  %v672_v2 = vunpack.c.0.s8 %v7403_v21  ;;  %v7478_v21 = vld [vmem:[#allocation2 + $0x368] sm:$0xff] }
  0xb0   :  { %v1590_v39 = vmul.f32 %v7213_v53, %v1008_v5  ;;  %v1596_v40 = vmul.f32 %v7213_v53, %v1014_v6  ;;  %v1686_v7 = vmul.f32 %v7213_v53, %v1104_v57  ;;  %v1350_v13 = vcvt.s32.f32 %v774_v30 }
  0xb1   :  { %v4665_v35 = vmax.f32 %v4621_v11, 0.0  ;;  %v4666_v38 = vmax.f32 %v4634_v42, 0.0  ;;  %v1692_v36 = vmul.f32 %v7213_v53, %v1110_v62  ;;  %v996_v26 = vcvt.s32.f32 %v420_v44 }
  0xb2   :  { %4788 = vmatpush.bf16.msra.mxu2 %v2070_v27  ;;  %4801 = vmatpush.bf16.msra.mxu3 %v2118_v63  ;;  %v2058_v45 = vpack.c.bf16 %v1596_v40, %v1590_v39  ;;  %v1248_v27 = vcvt.s32.f32 %v672_v2  ;;  %v768_v63 = vunpack.c.0.s8 %v7411_v43  ;;  %v1836_v43 = vmul.f32 %v7213_v53, %v1254_v41  ;;  %v7504_v41 = vld [vmem:[#allocation2 + $0xa0] sm:$0xff] }
  0xb3   :  { %v7463_v37 = vpack.c.bf16 %v4665_v35, %v4665_v35  ;;  %v7465_v16 = vpack.c.bf16 %v4666_v38, %v4666_v38  ;;  %v2106_v49 = vpack.c.bf16 %v1692_v36, %v1686_v7  ;;  %v1002_v14 = vcvt.s32.f32 %v426_v54 }
  0xb4   :  { %v1830_v10 = vmul.f32 %v7213_v53, %v1248_v27  ;;  %v1344_v17 = vcvt.s32.f32 %v768_v63  ;;  %v522_v31 = vunpack.c.3.s8 %v7469_v46  ;;  %v1092_v58 = vcvt.s32.f32 %v516_v18 }
  0xb5   :  { %4715 = vmatmul.bf16.vlgmr.msrb.gmra.mxu0 %v7463_v37  ;;  %4728 = vmatmul.bf16.vlgmr.msrb.gmra.mxu1 %v7465_v16  ;;  %v660_v50 = vunpack.c.2.s8 %v7478_v21  ;;  %v1932_v20 = vmul.f32 %v7213_v53, %v1350_v13  ;;  %v1584_v29 = vmul.f32 %v7213_v53, %v1002_v14  ;;  %v666_v32 = vunpack.c.3.s8 %v7478_v21  ;;  %v7512_v14 = vld [vmem:[#allocation2 + $0x338] sm:$0xff] }
  0xb6   :  { %4741 = vmatmul.bf16.vlgmr.msrb.gmra.mxu2 %v7365_v8  ;;  %4754 = vmatmul.bf16.vlgmr.msrb.gmra.mxu3 %v7367_v9  ;;  %v4622_v4 = vpop.f32.mrf.mxu2  ;;  %v4635_v48 = vpop.f32.mrf.mxu3  ;;  %v1926_v28 = vmul.f32 %v7213_v53, %v1344_v17  ;;  %v2178_v19 = vpack.c.bf16 %v1836_v43, %v1830_v10  ;;  %v1098_v22 = vcvt.s32.f32 %v522_v31  ;;  %v756_v42 = vunpack.c.2.s8 %v204_v51  ;;  %v115_v17 = vld [vmem:[#allocation2 + $0x160] sm:$0xff] }
  0xb7   :  { %4789 = vmatpush.bf16.msra.mxu2 %v2064_v24  ;;  %4802 = vmatpush.bf16.msra.mxu3 %v2112_v23  ;;  %v1578_v24 = vmul.f32 %v7213_v53, %v996_v26  ;;  %v1674_v23 = vmul.f32 %v7213_v53, %v1092_v58  ;;  %v1236_v55 = vcvt.s32.f32 %v660_v50  ;;  %v762_v52 = vunpack.c.3.s8 %v204_v51 }
  0xb8   :  { %4811 = vmatpush.bf16.msrb.mxu0 %v2184_v56  ;;  %4824 = vmatpush.bf16.msrb.mxu1 %v2232_v47  ;;  %v2226_v33 = vpack.c.bf16 %v1932_v20, %v1926_v28  ;;  %v1680_v5 = vmul.f32 %v7213_v53, %v1098_v22  ;;  %v1242_v56 = vcvt.s32.f32 %v666_v32  ;;  %v408_v6 = vunpack.c.0.s8 %v7461_v59  ;;  %v198_v32 = vld [vmem:[#allocation2 + $0x3f8] sm:$0xff] }
  0xb9   :  { %v2052_v11 = vpack.c.bf16 %v1584_v29, %v1578_v24  ;;  %v1818_v60 = vmul.f32 %v7213_v53, %v1236_v55  ;;  %v1332_v34 = vcvt.s32.f32 %v756_v42  ;;  %v1338_v35 = vcvt.s32.f32 %v762_v52 }
  0xba   :  { %v414_v38 = vunpack.c.1.s8 %v7461_v59  ;;  %v504_v39 = vunpack.c.0.s8 %v7469_v46  ;;  %v2100_v57 = vpack.c.bf16 %v1680_v5, %v1674_v23  ;;  %v1824_v47 = vmul.f32 %v7213_v53, %v1242_v56 }
  0xbb   :  { %4790 = vmatpush.bf16.msra.mxu2 %v2058_v45  ;;  %4803 = vmatpush.bf16.msra.mxu3 %v2106_v49  ;;  %v984_v40 = vcvt.s32.f32 %v408_v6  ;;  %v510_v62 = vunpack.c.1.s8 %v7469_v46  ;;  %v1914_v2 = vmul.f32 %v7213_v53, %v1332_v34  ;;  %v1920_v7 = vmul.f32 %v7213_v53, %v1338_v35 }
  0xbc   :  { %4812 = vmatpush.bf16.msrb.mxu0 %v2178_v19  ;;  %4825 = vmatpush.bf16.msrb.mxu1 %v2226_v33  ;;  %v990_v25 = vcvt.s32.f32 %v414_v38  ;;  %v1080_v45 = vcvt.s32.f32 %v504_v39  ;;  %v2172_v36 = vpack.c.bf16 %v1824_v47, %v1818_v60  ;;  %v648_v63 = vunpack.c.0.s8 %v7478_v21 }
  0xbd   :  { %v1566_v27 = vmul.f32 %v7213_v53, %v984_v40  ;;  %v1086_v59 = vcvt.s32.f32 %v510_v62  ;;  %v2220_v30 = vpack.c.bf16 %v1920_v7, %v1914_v2  ;;  %v654_v54 = vunpack.c.1.s8 %v7478_v21 }
  0xbe   :  { %v1572_v44 = vmul.f32 %v7213_v53, %v990_v25  ;;  %v1662_v46 = vmul.f32 %v7213_v53, %v1080_v45  ;;  %v1224_v48 = vcvt.s32.f32 %v648_v63  ;;  %v744_v49 = vunpack.c.0.s8 %v204_v51 }
  0xbf   :  { %4791 = vmatpush.bf16.msra.mxu2 %v2052_v11  ;;  %4804 = vmatpush.bf16.msra.mxu3 %v2100_v57  ;;  %v1668_v4 = vmul.f32 %v7213_v53, %v1086_v59  ;;  %v750_v10 = vunpack.c.1.s8 %v204_v51  ;;  %v1230_v43 = vcvt.s32.f32 %v654_v54  ;;  %v301_v13 = vunpack.c.2.s8 %v7504_v41 }
  0xc0   :  { %4813 = vmatpush.bf16.msrb.mxu0 %v2172_v36  ;;  %4826 = vmatpush.bf16.msrb.mxu1 %v2220_v30  ;;  %v2046_v18 = vpack.c.bf16 %v1572_v44, %v1566_v27  ;;  %v307_v26 = vunpack.c.3.s8 %v7504_v41  ;;  %v1806_v31 = vmul.f32 %v7213_v53, %v1224_v48  ;;  %v1320_v21 = vcvt.s32.f32 %v744_v49 }
  0xc1   :  { %v2094_v28 = vpack.c.bf16 %v1668_v4, %v1662_v46  ;;  %v1326_v58 = vcvt.s32.f32 %v750_v10  ;;  %v1812_v50 = vmul.f32 %v7213_v53, %v1230_v43  ;;  %v877_v19 = vcvt.s32.f32 %v301_v13 }
  0xc2   :  { %v883_v51 = vcvt.s32.f32 %v307_v26  ;;  %v397_v20 = vunpack.c.2.s8 %v115_v17  ;;  %v1902_v24 = vmul.f32 %v7213_v53, %v1320_v21  ;;  %v403_v22 = vunpack.c.3.s8 %v115_v17  ;;  %v109_v21 = vld [vmem:[#allocation2 + $0x130] sm:$0xff] }
  0xc3   :  { %4792 = vmatpush.bf16.msra.mxu2 %v2046_v18  ;;  %4805 = vmatpush.bf16.msra.mxu3 %v2094_v28  ;;  %v1908_v29 = vmul.f32 %v7213_v53, %v1326_v58  ;;  %v636_v23 = vunpack.c.2.s8 %v7512_v14  ;;  %v2166_v55 = vpack.c.bf16 %v1812_v50, %v1806_v31  ;;  %v1459_v33 = vmul.f32 %v7333_v61, %v877_v19 }
  0xc4   :  { %v1465_v11 = vmul.f32 %v7333_v61, %v883_v51  ;;  %v973_v42 = vcvt.s32.f32 %v397_v20  ;;  %v979_v5 = vcvt.s32.f32 %v403_v22  ;;  %v642_v56 = vunpack.c.3.s8 %v7512_v14  ;;  %v7540_v20 = vld [vmem:[#allocation2 + $0x308] sm:$0xff] }
  0xc5   :  { %4767 = vmatmul.bf16.vlgmr.msra.gmra.mxu0 %v7374_v12  ;;  %4780 = vmatmul.bf16.vlgmr.msra.gmra.mxu1 %v7376_v15  ;;  %v2214_v52 = vpack.c.bf16 %v1908_v29, %v1902_v24  ;;  %v1212_v60 = vcvt.s32.f32 %v636_v23  ;;  %v732_v35 = vunpack.c.2.s8 %v198_v32  ;;  %v738_v38 = vunpack.c.3.s8 %v198_v32 }
  0xc6   :  { %4793 = vmatmul.bf16.vlgmr.msra.gmra.mxu2 %v7463_v37  ;;  %4814 = vmatpush.bf16.msrb.mxu0 %v2166_v55  ;;  %v1993_v6 = vpack.c.bf16 %v1465_v11, %v1459_v33  ;;  %v1555_v34 = vmul.f32 %v7333_v61, %v973_v42  ;;  %v1561_v39 = vmul.f32 %v7333_v61, %v979_v5  ;;  %v1218_v57 = vcvt.s32.f32 %v642_v56  ;;  %v192_v56 = vld [vmem:[#allocation2 + $0x3c8] sm:$0xff] }
  0xc7   :  { %4806 = vmatmul.bf16.vlgmr.msra.gmra.mxu3 %v7465_v16  ;;  %4827 = vmatpush.bf16.msrb.mxu1 %v2214_v52  ;;  %v1794_v47 = vmul.f32 %v7213_v53, %v1212_v60  ;;  %v289_v40 = vunpack.c.0.s8 %v7504_v41  ;;  %v1308_v62 = vcvt.s32.f32 %v732_v35  ;;  %v1314_v2 = vcvt.s32.f32 %v738_v38 }
  0xc8   :  { %4837 = vmatpush.bf16.msrb.mxu2 %v1993_v6  ;;  %v295_v7 = vunpack.c.1.s8 %v7504_v41  ;;  %v385_v25 = vunpack.c.0.s8 %v115_v17  ;;  %v2041_v45 = vpack.c.bf16 %v1561_v39, %v1555_v34  ;;  %v1800_v36 = vmul.f32 %v7213_v53, %v1218_v57  ;;  %v85_v41 = vld [vmem:[#allocation2 + $0x70] sm:$0xff] }
  0xc9   :  { %v865_v27 = vcvt.s32.f32 %v289_v40  ;;  %v391_v59 = vunpack.c.1.s8 %v115_v17  ;;  %v1890_v63 = vmul.f32 %v7213_v53, %v1308_v62  ;;  %v1896_v30 = vmul.f32 %v7213_v53, %v1314_v2 }
  0xca   :  { %v871_v44 = vcvt.s32.f32 %v295_v7  ;;  %v961_v46 = vcvt.s32.f32 %v385_v25  ;;  %4850 = vmatpush.bf16.msrb.mxu3 %v2041_v45  ;;  %v2160_v54 = vpack.c.bf16 %v1800_v36, %v1794_v47  ;;  %v624_v49 = vunpack.c.0.s8 %v7512_v14 }
  0xcb   :  { %v1447_v4 = vmul.f32 %v7333_v61, %v865_v27  ;;  %v967_v48 = vcvt.s32.f32 %v391_v59  ;;  %v2208_v10 = vpack.c.bf16 %v1896_v30, %v1890_v63  ;;  %v630_v17 = vunpack.c.1.s8 %v7512_v14 }
  0xcc   :  { %v1453_v18 = vmul.f32 %v7333_v61, %v871_v44  ;;  %v1543_v43 = vmul.f32 %v7333_v61, %v961_v46  ;;  %4815 = vmatpush.bf16.msrb.mxu0 %v2160_v54  ;;  %v1200_v26 = vcvt.s32.f32 %v624_v49  ;;  %v720_v28 = vunpack.c.0.s8 %v198_v32 }
  0xcd   :  { %v1549_v13 = vmul.f32 %v7333_v61, %v967_v48  ;;  %v726_v31 = vunpack.c.1.s8 %v198_v32  ;;  %4828 = vmatpush.bf16.msrb.mxu1 %v2208_v10  ;;  %v1206_v50 = vcvt.s32.f32 %v630_v17  ;;  %v277_v19 = vunpack.c.2.s8 %v85_v41 }
  0xce   :  { %v1987_v58 = vpack.c.bf16 %v1453_v18, %v1447_v4  ;;  %v283_v51 = vunpack.c.3.s8 %v85_v41  ;;  %v1782_v29 = vmul.f32 %v7213_v53, %v1200_v26  ;;  %v1296_v22 = vcvt.s32.f32 %v720_v28 }
  0xcf   :  { %v2035_v24 = vpack.c.bf16 %v1549_v13, %v1543_v43  ;;  %v1302_v23 = vcvt.s32.f32 %v726_v31  ;;  %v1788_v14 = vmul.f32 %v7213_v53, %v1206_v50  ;;  %v853_v55 = vcvt.s32.f32 %v277_v19 }
  0xd0   :  { %4838 = vmatpush.bf16.msrb.mxu2 %v1987_v58  ;;  %v859_v33 = vcvt.s32.f32 %v283_v51  ;;  %v373_v11 = vunpack.c.2.s8 %v109_v21  ;;  %v1878_v32 = vmul.f32 %v7213_v53, %v1296_v22  ;;  %v379_v52 = vunpack.c.3.s8 %v109_v21  ;;  %v103_v22 = vld [vmem:[#allocation2 + $0x100] sm:$0xff] }
  0xd1   :  { %4851 = vmatpush.bf16.msrb.mxu3 %v2035_v24  ;;  %v1884_v42 = vmul.f32 %v7213_v53, %v1302_v23  ;;  %v612_v5 = vunpack.c.2.s8 %v7540_v20  ;;  %v2154_v60 = vpack.c.bf16 %v1788_v14, %v1782_v29  ;;  %v1435_v6 = vmul.f32 %v7333_v61, %v853_v55 }
  0xd2   :  { %v1441_v34 = vmul.f32 %v7333_v61, %v859_v33  ;;  %v949_v35 = vcvt.s32.f32 %v373_v11  ;;  %v955_v39 = vcvt.s32.f32 %v379_v52  ;;  %v618_v57 = vunpack.c.3.s8 %v7540_v20  ;;  %v7566_v11 = vld [vmem:[#allocation2 + $0x220] sm:$0xff] }
  0xd3   :  { %v2202_v38 = vpack.c.bf16 %v1884_v42, %v1878_v32  ;;  %v1188_v47 = vcvt.s32.f32 %v612_v5  ;;  %4816 = vmatpush.bf16.msrb.mxu0 %v2154_v60  ;;  %v708_v2 = vunpack.c.2.s8 %v192_v56  ;;  %v714_v7 = vunpack.c.3.s8 %v192_v56 }
  0xd4   :  { %v1981_v40 = vpack.c.bf16 %v1441_v34, %v1435_v6  ;;  %v1531_v62 = vmul.f32 %v7333_v61, %v949_v35  ;;  %v1537_v25 = vmul.f32 %v7333_v61, %v955_v39  ;;  %v1194_v45 = vcvt.s32.f32 %v618_v57  ;;  %v163_v57 = vld [vmem:[#allocation2 + $0x2e0] sm:$0xff] }
  0xd5   :  { %4829 = vmatpush.bf16.msrb.mxu1 %v2202_v38  ;;  %v1770_v36 = vmul.f32 %v7213_v53, %v1188_v47  ;;  %v265_v27 = vunpack.c.0.s8 %v85_v41  ;;  %v1284_v59 = vcvt.s32.f32 %v708_v2  ;;  %v1290_v63 = vcvt.s32.f32 %v714_v7 }
  0xd6   :  { %4839 = vmatpush.bf16.msrb.mxu2 %v1981_v40  ;;  %v271_v30 = vunpack.c.1.s8 %v85_v41  ;;  %v361_v44 = vunpack.c.0.s8 %v109_v21  ;;  %v2029_v46 = vpack.c.bf16 %v1537_v25, %v1531_v62  ;;  %v1776_v54 = vmul.f32 %v7213_v53, %v1194_v45  ;;  %v7558_v41 = vld [vmem:[#allocation2 + $0x40] sm:$0xff] }
  0xd7   :  { %v841_v4 = vcvt.s32.f32 %v265_v27  ;;  %v367_v48 = vunpack.c.1.s8 %v109_v21  ;;  %v1866_v49 = vmul.f32 %v7213_v53, %v1284_v59  ;;  %v1872_v10 = vmul.f32 %v7213_v53, %v1290_v63 }
  0xd8   :  { %v847_v18 = vcvt.s32.f32 %v271_v30  ;;  %v937_v43 = vcvt.s32.f32 %v361_v44  ;;  %4852 = vmatpush.bf16.msrb.mxu3 %v2029_v46  ;;  %v2148_v17 = vpack.c.bf16 %v1776_v54, %v1770_v36  ;;  %v600_v28 = vunpack.c.0.s8 %v7540_v20 }
  0xd9   :  { %v1423_v13 = vmul.f32 %v7333_v61, %v841_v4  ;;  %v943_v26 = vcvt.s32.f32 %v367_v48  ;;  %v2196_v31 = vpack.c.bf16 %v1872_v10, %v1866_v49  ;;  %v606_v50 = vunpack.c.1.s8 %v7540_v20 }
  0xda   :  { %v1429_v58 = vmul.f32 %v7333_v61, %v847_v18  ;;  %v1519_v21 = vmul.f32 %v7333_v61, %v937_v43  ;;  %4817 = vmatpush.bf16.msrb.mxu0 %v2148_v17  ;;  %v1176_v51 = vcvt.s32.f32 %v600_v28  ;;  %v696_v24 = vunpack.c.0.s8 %v192_v56 }
  0xdb   :  { %v1525_v19 = vmul.f32 %v7333_v61, %v943_v26  ;;  %v702_v29 = vunpack.c.1.s8 %v192_v56  ;;  %4830 = vmatpush.bf16.msrb.mxu1 %v2196_v31  ;;  %v1182_v14 = vcvt.s32.f32 %v606_v50  ;;  %v253_v55 = vunpack.c.2.s8 %v7558_v41 }
  0xdc   :  { %v1975_v23 = vpack.c.bf16 %v1429_v58, %v1423_v13  ;;  %v259_v33 = vunpack.c.3.s8 %v7558_v41  ;;  %v1758_v42 = vmul.f32 %v7213_v53, %v1176_v51  ;;  %v1272_v20 = vcvt.s32.f32 %v696_v24  ;;  %v73_v51 = vld [vmem:[#allocation2 + $0x10] sm:$0xff] }
  0xdd   :  { %v2023_v32 = vpack.c.bf16 %v1525_v19, %v1519_v21  ;;  %v1278_v52 = vcvt.s32.f32 %v702_v29  ;;  %v1764_v5 = vmul.f32 %v7213_v53, %v1182_v14  ;;  %v829_v60 = vcvt.s32.f32 %v253_v55 }
  0xde   :  { %4840 = vmatpush.bf16.msrb.mxu2 %v1975_v23  ;;  %v835_v56 = vcvt.s32.f32 %v259_v33  ;;  %v349_v6 = vunpack.c.2.s8 %v103_v22  ;;  %v1854_v34 = vmul.f32 %v7213_v53, %v1272_v20  ;;  %v355_v38 = vunpack.c.3.s8 %v103_v22 }
  0xdf   :  { %4853 = vmatpush.bf16.msrb.mxu3 %v2023_v32  ;;  %v1860_v35 = vmul.f32 %v7213_v53, %v1278_v52  ;;  %v493_v39 = vunpack.c.2.s8 %v7566_v11  ;;  %v2142_v47 = vpack.c.bf16 %v1764_v5, %v1758_v42  ;;  %v1411_v40 = vmul.f32 %v7333_v61, %v829_v60  ;;  %v97_v42 = vld [vmem:[#allocation2 + $0xd0] sm:$0xff] }
  0xe0   :  { %v1417_v62 = vmul.f32 %v7333_v61, %v835_v56  ;;  %v925_v2 = vcvt.s32.f32 %v349_v6  ;;  %v931_v25 = vcvt.s32.f32 %v355_v38  ;;  %v499_v45 = vunpack.c.3.s8 %v7566_v11  ;;  %v7592_v56 = vld [vmem:[#allocation2 + $0x1f0] sm:$0xff] }
  0xe1   :  { %v2190_v7 = vpack.c.bf16 %v1860_v35, %v1854_v34  ;;  %v1069_v36 = vcvt.s32.f32 %v493_v39  ;;  %4818 = vmatpush.bf16.msrb.mxu0 %v2142_v47  ;;  %v589_v53 = vunpack.c.2.s8 %v163_v57  ;;  %v595_v63 = vunpack.c.3.s8 %v163_v57 }
  0xe2   :  { %v1969_v27 = vpack.c.bf16 %v1417_v62, %v1411_v40  ;;  %v1507_v59 = vmul.f32 %v7333_v61, %v925_v2  ;;  %v1513_v30 = vmul.f32 %v7333_v61, %v931_v25  ;;  %v1075_v44 = vcvt.s32.f32 %v499_v45  ;;  %v157_v25 = vld [vmem:[#allocation2 + $0x2b0] sm:$0xff] }
  0xe3   :  { %4831 = vmatpush.bf16.msrb.mxu1 %v2190_v7  ;;  %v1651_v46 = vmul.f32 %v7333_v61, %v1069_v36  ;;  %v241_v54 = vunpack.c.0.s8 %v7558_v41  ;;  %v1165_v4 = vcvt.s32.f32 %v589_v53  ;;  %v1171_v48 = vcvt.s32.f32 %v595_v63 }
  0xe4   :  { %4841 = vmatpush.bf16.msrb.mxu2 %v1969_v27  ;;  %v247_v49 = vunpack.c.1.s8 %v7558_v41  ;;  %v337_v10 = vunpack.c.0.s8 %v103_v22  ;;  %v2017_v18 = vpack.c.bf16 %v1513_v30, %v1507_v59  ;;  %v1657_v43 = vmul.f32 %v7333_v61, %v1075_v44  ;;  %4819 = vmatmul.bf16.vlgmr.msrb.gmra.mxu0 %v7365_v8 }
  0xe5   :  { %v817_v17 = vcvt.s32.f32 %v241_v54  ;;  %v343_v13 = vunpack.c.1.s8 %v103_v22  ;;  %v1747_v26 = vmul.f32 %v7333_v61, %v1165_v4  ;;  %v1753_v28 = vmul.f32 %v7333_v61, %v1171_v48 }
  0xe6   :  { %4832 = vmatmul.bf16.vlgmr.msrb.gmra.mxu1 %v7367_v9  ;;  %v823_v31 = vcvt.s32.f32 %v247_v49  ;;  %v913_v58 = vcvt.s32.f32 %v337_v10  ;;  %4854 = vmatpush.bf16.msrb.mxu3 %v2017_v18  ;;  %v2089_v21 = vpack.c.bf16 %v1657_v43, %v1651_v46  ;;  %v481_v19 = vunpack.c.0.s8 %v7566_v11 }
  0xe7   :  { %v1399_v41 = vmul.f32 %v7333_v61, %v817_v17  ;;  %v919_v50 = vcvt.s32.f32 %v343_v13  ;;  %v2137_v24 = vpack.c.bf16 %v1753_v28, %v1747_v26  ;;  %v487_v23 = vunpack.c.1.s8 %v7566_v11 }
  0xe8   :  { %v1405_v29 = vmul.f32 %v7333_v61, %v823_v31  ;;  %v1495_v22 = vmul.f32 %v7333_v61, %v913_v58  ;;  %4863 = vmatpush.bf16.msra.mxu0 %v2089_v21  ;;  %v1057_v55 = vcvt.s32.f32 %v481_v19  ;;  %v577_v33 = vunpack.c.0.s8 %v163_v57 }
  0xe9   :  { %v1501_v14 = vmul.f32 %v7333_v61, %v919_v50  ;;  %v583_v32 = vunpack.c.1.s8 %v163_v57  ;;  %4876 = vmatpush.bf16.msra.mxu1 %v2137_v24  ;;  %v1063_v52 = vcvt.s32.f32 %v487_v23  ;;  %v229_v5 = vunpack.c.2.s8 %v73_v51 }
  0xea   :  { %v1963_v20 = vpack.c.bf16 %v1405_v29, %v1399_v41  ;;  %v235_v60 = vunpack.c.3.s8 %v73_v51  ;;  %v1639_v34 = vmul.f32 %v7333_v61, %v1057_v55  ;;  %v1153_v35 = vcvt.s32.f32 %v577_v33 }
  0xeb   :  { %v2011_v6 = vpack.c.bf16 %v1501_v14, %v1495_v22  ;;  %v1159_v38 = vcvt.s32.f32 %v583_v32  ;;  %v1645_v11 = vmul.f32 %v7333_v61, %v1063_v52  ;;  %v805_v39 = vcvt.s32.f32 %v229_v5 }
  0xec   :  { %4842 = vmatpush.bf16.msrb.mxu2 %v1963_v20  ;;  %v811_v47 = vcvt.s32.f32 %v235_v60  ;;  %v325_v40 = vunpack.c.2.s8 %v97_v42  ;;  %v1735_v57 = vmul.f32 %v7333_v61, %v1153_v35  ;;  %v331_v2 = vunpack.c.3.s8 %v97_v42 }
  0xed   :  { %4855 = vmatpush.bf16.msrb.mxu3 %v2011_v6  ;;  %v1741_v62 = vmul.f32 %v7333_v61, %v1159_v38  ;;  %v469_v7 = vunpack.c.2.s8 %v7592_v56  ;;  %v2083_v45 = vpack.c.bf16 %v1645_v11, %v1639_v34  ;;  %v1387_v36 = vmul.f32 %v7333_v61, %v805_v39  ;;  %v211_v34 = vld [vmem:[#allocation2 + $0x460] sm:$0xff] }
  0xee   :  { %v1393_v27 = vmul.f32 %v7333_v61, %v811_v47  ;;  %v901_v59 = vcvt.s32.f32 %v325_v40  ;;  %v907_v63 = vcvt.s32.f32 %v331_v2  ;;  %v475_v30 = vunpack.c.3.s8 %v7592_v56  ;;  %v7618_v47 = vld [vmem:[#allocation2 + $0x1c0] sm:$0xff] }
  0xef   :  { %v2131_v53 = vpack.c.bf16 %v1741_v62, %v1735_v57  ;;  %v1045_v44 = vcvt.s32.f32 %v469_v7  ;;  %4864 = vmatpush.bf16.msra.mxu0 %v2083_v45  ;;  %v565_v4 = vunpack.c.2.s8 %v157_v25  ;;  %v571_v48 = vunpack.c.3.s8 %v157_v25 }
  0xf0   :  { %v1957_v46 = vpack.c.bf16 %v1393_v27, %v1387_v36  ;;  %v1483_v54 = vmul.f32 %v7333_v61, %v901_v59  ;;  %v1489_v49 = vmul.f32 %v7333_v61, %v907_v63  ;;  %v1051_v10 = vcvt.s32.f32 %v475_v30  ;;  %v151_v63 = vld [vmem:[#allocation2 + $0x280] sm:$0xff] }
  0xf1   :  { %4877 = vmatpush.bf16.msra.mxu1 %v2131_v53  ;;  %v1627_v18 = vmul.f32 %v7333_v61, %v1045_v44  ;;  %v217_v43 = vunpack.c.0.s8 %v73_v51  ;;  %v1141_v17 = vcvt.s32.f32 %v565_v4  ;;  %v1147_v13 = vcvt.s32.f32 %v571_v48 }
  0xf2   :  { %4843 = vmatpush.bf16.msrb.mxu2 %v1957_v46  ;;  %v223_v26 = vunpack.c.1.s8 %v73_v51  ;;  %v313_v28 = vunpack.c.0.s8 %v97_v42  ;;  %v2005_v31 = vpack.c.bf16 %v1489_v49, %v1483_v54  ;;  %v1633_v58 = vmul.f32 %v7333_v61, %v1051_v10  ;;  %v7610_v51 = vld [vmem:[#allocation2 + $0x3a0] sm:$0xff] }
  0xf3   :  { %v793_v21 = vcvt.s32.f32 %v217_v43  ;;  %v319_v41 = vunpack.c.1.s8 %v97_v42  ;;  %v1723_v50 = vmul.f32 %v7333_v61, %v1141_v17  ;;  %v1729_v19 = vmul.f32 %v7333_v61, %v1147_v13 }
  0xf4   :  { %v799_v24 = vcvt.s32.f32 %v223_v26  ;;  %v889_v29 = vcvt.s32.f32 %v313_v28  ;;  %4856 = vmatpush.bf16.msrb.mxu3 %v2005_v31  ;;  %v2077_v22 = vpack.c.bf16 %v1633_v58, %v1627_v18  ;;  %v457_v55 = vunpack.c.0.s8 %v7592_v56 }
  0xf5   :  { %v1375_v23 = vmul.f32 %v7333_v61, %v793_v21  ;;  %v895_v14 = vcvt.s32.f32 %v319_v41  ;;  %v2125_v33 = vpack.c.bf16 %v1729_v19, %v1723_v50  ;;  %v463_v20 = vunpack.c.1.s8 %v7592_v56 }
  0xf6   :  { %v1381_v32 = vmul.f32 %v7333_v61, %v799_v24  ;;  %v1471_v42 = vmul.f32 %v7333_v61, %v889_v29  ;;  %4865 = vmatpush.bf16.msra.mxu0 %v2077_v22  ;;  %v1033_v5 = vcvt.s32.f32 %v457_v55  ;;  %v553_v60 = vunpack.c.0.s8 %v157_v25 }
  0xf7   :  { %v1477_v52 = vmul.f32 %v7333_v61, %v895_v14  ;;  %v559_v6 = vunpack.c.1.s8 %v157_v25  ;;  %4878 = vmatpush.bf16.msra.mxu1 %v2125_v33  ;;  %v1039_v38 = vcvt.s32.f32 %v463_v20  ;;  %v685_v11 = vunpack.c.2.s8 %v7610_v51 }
  0xf8   :  { %v1951_v35 = vpack.c.bf16 %v1381_v32, %v1375_v23  ;;  %v691_v39 = vunpack.c.3.s8 %v7610_v51  ;;  %v1615_v57 = vmul.f32 %v7333_v61, %v1033_v5  ;;  %v1129_v56 = vcvt.s32.f32 %v553_v60 }
  0xf9   :  { %v1999_v40 = vpack.c.bf16 %v1477_v52, %v1471_v42  ;;  %v1135_v62 = vcvt.s32.f32 %v559_v6  ;;  %v1621_v2 = vmul.f32 %v7333_v61, %v1039_v38  ;;  %v1261_v7 = vcvt.s32.f32 %v685_v11 }
  0xfa   :  { %4844 = vmatpush.bf16.msrb.mxu2 %v1951_v35  ;;  %v1267_v25 = vcvt.s32.f32 %v691_v39  ;;  %v781_v45 = vunpack.c.2.s8 %v211_v34  ;;  %v1711_v36 = vmul.f32 %v7333_v61, %v1129_v56  ;;  %v787_v59 = vunpack.c.3.s8 %v211_v34 }
  0xfb   :  { %4857 = vmatpush.bf16.msrb.mxu3 %v1999_v40  ;;  %v1717_v27 = vmul.f32 %v7333_v61, %v1135_v62  ;;  %v445_v53 = vunpack.c.2.s8 %v7618_v47  ;;  %v2071_v30 = vpack.c.bf16 %v1621_v2, %v1615_v57  ;;  %v1843_v44 = vmul.f32 %v7333_v61, %v1261_v7  ;;  %v205_v57 = vld [vmem:[#allocation2 + $0x430] sm:$0xff] }
  0xfc   :  { %v1849_v46 = vmul.f32 %v7333_v61, %v1267_v25  ;;  %v1357_v54 = vcvt.s32.f32 %v781_v45  ;;  %v1363_v48 = vcvt.s32.f32 %v787_v59  ;;  %v451_v49 = vunpack.c.3.s8 %v7618_v47  ;;  %v7644_v25 = vld [vmem:[#allocation2 + $0x190] sm:$0xff] }
  0xfd   :  { %v2119_v4 = vpack.c.bf16 %v1717_v27, %v1711_v36  ;;  %4845 = vmatmul.bf16.vlgmr.msrb.gmra.mxu2 %v7374_v12  ;;  %v1021_v10 = vcvt.s32.f32 %v445_v53  ;;  %4866 = vmatpush.bf16.msra.mxu0 %v2071_v30  ;;  %v541_v17 = vunpack.c.2.s8 %v151_v63  ;;  %v547_v13 = vunpack.c.3.s8 %v151_v63 }
  0xfe   :  { %v2185_v18 = vpack.c.bf16 %v1849_v46, %v1843_v44  ;;  %v1939_v43 = vmul.f32 %v7333_v61, %v1357_v54  ;;  %4858 = vmatmul.bf16.vlgmr.msrb.gmra.mxu3 %v7376_v15  ;;  %v1945_v26 = vmul.f32 %v7333_v61, %v1363_v48  ;;  %v1027_v28 = vcvt.s32.f32 %v451_v49  ;;  %v145_v48 = vld [vmem:[#allocation2 + $0x250] sm:$0xff] }
  0xff   :  { %4879 = vmatpush.bf16.msra.mxu1 %v2119_v4  ;;  %v1603_v31 = vmul.f32 %v7333_v61, %v1021_v10  ;;  %v673_v58 = vunpack.c.0.s8 %v7610_v51  ;;  %v1117_v21 = vcvt.s32.f32 %v541_v17  ;;  %v1123_v41 = vcvt.s32.f32 %v547_v13 }
 0x100   :  { %4889 = vmatpush.bf16.msra.mxu2 %v2185_v18  ;;  %v679_v50 = vunpack.c.1.s8 %v7610_v51  ;;  %v769_v19 = vunpack.c.0.s8 %v211_v34  ;;  %v2233_v24 = vpack.c.bf16 %v1945_v26, %v1939_v43  ;;  %v1609_v29 = vmul.f32 %v7333_v61, %v1027_v28  ;;  %v181_v51 = vld [vmem:[#allocation2 + $0x370] sm:$0xff] }
 0x101   :  { %v1249_v22 = vcvt.s32.f32 %v673_v58  ;;  %v775_v23 = vunpack.c.1.s8 %v211_v34  ;;  %v1699_v14 = vmul.f32 %v7333_v61, %v1117_v21  ;;  %v1705_v55 = vmul.f32 %v7333_v61, %v1123_v41 }
 0x102   :  { %v1255_v33 = vcvt.s32.f32 %v679_v50  ;;  %v1345_v32 = vcvt.s32.f32 %v769_v19  ;;  %4902 = vmatpush.bf16.msra.mxu3 %v2233_v24  ;;  %v2065_v42 = vpack.c.bf16 %v1609_v29, %v1603_v31  ;;  %v433_v5 = vunpack.c.0.s8 %v7618_v47 }
 0x103   :  { %v1831_v20 = vmul.f32 %v7333_v61, %v1249_v22  ;;  %v1351_v52 = vcvt.s32.f32 %v775_v23  ;;  %v2113_v60 = vpack.c.bf16 %v1705_v55, %v1699_v14  ;;  %v439_v34 = vunpack.c.1.s8 %v7618_v47 }
 0x104   :  { %v1837_v6 = vmul.f32 %v7333_v61, %v1255_v33  ;;  %v1927_v35 = vmul.f32 %v7333_v61, %v1345_v32  ;;  %4867 = vmatpush.bf16.msra.mxu0 %v2065_v42  ;;  %v1009_v11 = vcvt.s32.f32 %v433_v5  ;;  %v529_v39 = vunpack.c.0.s8 %v151_v63 }
 0x105   :  { %v1933_v38 = vmul.f32 %v7333_v61, %v1351_v52  ;;  %v535_v40 = vunpack.c.1.s8 %v151_v63  ;;  %4880 = vmatpush.bf16.msra.mxu1 %v2113_v60  ;;  %v1015_v62 = vcvt.s32.f32 %v439_v34  ;;  %v661_v2 = vunpack.c.2.s8 %v181_v51 }
 0x106   :  { %v2179_v56 = vpack.c.bf16 %v1837_v6, %v1831_v20  ;;  %v667_v7 = vunpack.c.3.s8 %v181_v51  ;;  %v1591_v36 = vmul.f32 %v7333_v61, %v1009_v11  ;;  %v1105_v27 = vcvt.s32.f32 %v529_v39 }
 0x107   :  { %v2227_v45 = vpack.c.bf16 %v1933_v38, %v1927_v35  ;;  %v1111_v59 = vcvt.s32.f32 %v535_v40  ;;  %v1597_v47 = vmul.f32 %v7333_v61, %v1015_v62  ;;  %v1237_v53 = vcvt.s32.f32 %v661_v2 }
 0x108   :  { %4890 = vmatpush.bf16.msra.mxu2 %v2179_v56  ;;  %v1243_v30 = vcvt.s32.f32 %v667_v7  ;;  %v757_v44 = vunpack.c.2.s8 %v205_v57  ;;  %v1687_v63 = vmul.f32 %v7333_v61, %v1105_v27  ;;  %v763_v54 = vunpack.c.3.s8 %v205_v57 }
 0x109   :  { %4903 = vmatpush.bf16.msra.mxu3 %v2227_v45  ;;  %v1693_v46 = vmul.f32 %v7333_v61, %v1111_v59  ;;  %v421_v4 = vunpack.c.2.s8 %v7644_v25  ;;  %v2059_v49 = vpack.c.bf16 %v1597_v47, %v1591_v36  ;;  %v1819_v10 = vmul.f32 %v7333_v61, %v1237_v53  ;;  %v199_v36 = vld [vmem:[#allocation2 + $0x400] sm:$0xff] }
 0x10a   :  { %v1825_v18 = vmul.f32 %v7333_v61, %v1243_v30  ;;  %v1333_v43 = vcvt.s32.f32 %v757_v44  ;;  %v1339_v13 = vcvt.s32.f32 %v763_v54  ;;  %v427_v26 = vunpack.c.3.s8 %v7644_v25  ;;  %v7670_v30 = vld [vmem:[#allocation2 + $0xa8] sm:$0xff] }
 0x10b   :  { %v2107_v17 = vpack.c.bf16 %v1693_v46, %v1687_v63  ;;  %v997_v28 = vcvt.s32.f32 %v421_v4  ;;  %4868 = vmatpush.bf16.msra.mxu0 %v2059_v49  ;;  %v517_v21 = vunpack.c.2.s8 %v145_v48  ;;  %v523_v41 = vunpack.c.3.s8 %v145_v48 }
 0x10c   :  { %v2173_v31 = vpack.c.bf16 %v1825_v18, %v1819_v10  ;;  %v1915_v58 = vmul.f32 %v7333_v61, %v1333_v43  ;;  %v1921_v50 = vmul.f32 %v7333_v61, %v1339_v13  ;;  %v1003_v19 = vcvt.s32.f32 %v427_v26  ;;  %v116_v13 = vld [vmem:[#allocation2 + $0x168] sm:$0xff] }
 0x10d   :  { %4881 = vmatpush.bf16.msra.mxu1 %v2107_v17  ;;  %v1579_v24 = vmul.f32 %v7333_v61, %v997_v28  ;;  %v649_v29 = vunpack.c.0.s8 %v181_v51  ;;  %v1093_v22 = vcvt.s32.f32 %v517_v21  ;;  %v1099_v23 = vcvt.s32.f32 %v523_v41 }
 0x10e   :  { %4891 = vmatpush.bf16.msra.mxu2 %v2173_v31  ;;  %v655_v14 = vunpack.c.1.s8 %v181_v51  ;;  %v745_v55 = vunpack.c.0.s8 %v205_v57  ;;  %v2221_v33 = vpack.c.bf16 %v1921_v50, %v1915_v58  ;;  %v1585_v32 = vmul.f32 %v7333_v61, %v1003_v19  ;;  %v7662_v51 = vld [vmem:[#allocation2 + $0x340] sm:$0xff] }
 0x10f   :  { %v1225_v42 = vcvt.s32.f32 %v649_v29  ;;  %v751_v20 = vunpack.c.1.s8 %v205_v57  ;;  %v1675_v52 = vmul.f32 %v7333_v61, %v1093_v22  ;;  %v1681_v5 = vmul.f32 %v7333_v61, %v1099_v23 }
 0x110   :  { %v1231_v60 = vcvt.s32.f32 %v655_v14  ;;  %v1321_v6 = vcvt.s32.f32 %v745_v55  ;;  %4904 = vmatpush.bf16.msra.mxu3 %v2221_v33  ;;  %v2053_v35 = vpack.c.bf16 %v1585_v32, %v1579_v24  ;;  %v409_v11 = vunpack.c.0.s8 %v7644_v25 }
 0x111   :  { %v1807_v34 = vmul.f32 %v7333_v61, %v1225_v42  ;;  %v1327_v38 = vcvt.s32.f32 %v751_v20  ;;  %v2101_v39 = vpack.c.bf16 %v1681_v5, %v1675_v52  ;;  %v415_v56 = vunpack.c.1.s8 %v7644_v25 }
 0x112   :  { %v1813_v40 = vmul.f32 %v7333_v61, %v1231_v60  ;;  %v1903_v57 = vmul.f32 %v7333_v61, %v1321_v6  ;;  %4869 = vmatpush.bf16.msra.mxu0 %v2053_v35  ;;  %v985_v2 = vcvt.s32.f32 %v409_v11  ;;  %v505_v7 = vunpack.c.0.s8 %v145_v48 }
 0x113   :  { %v1909_v62 = vmul.f32 %v7333_v61, %v1327_v38  ;;  %v511_v45 = vunpack.c.1.s8 %v145_v48  ;;  %4882 = vmatpush.bf16.msra.mxu1 %v2101_v39  ;;  %v991_v59 = vcvt.s32.f32 %v415_v56  ;;  %v637_v47 = vunpack.c.2.s8 %v7662_v51 }
 0x114   :  { %v2167_v27 = vpack.c.bf16 %v1813_v40, %v1807_v34  ;;  %v643_v53 = vunpack.c.3.s8 %v7662_v51  ;;  %v1567_v63 = vmul.f32 %v7333_v61, %v985_v2  ;;  %v1081_v25 = vcvt.s32.f32 %v505_v7  ;;  %v169_v2 = vld [vmem:[#allocation2 + $0x310] sm:$0xff] }
 0x115   :  { %v2215_v44 = vpack.c.bf16 %v1909_v62, %v1903_v57  ;;  %v1087_v46 = vcvt.s32.f32 %v511_v45  ;;  %v1573_v54 = vmul.f32 %v7333_v61, %v991_v59  ;;  %v1213_v4 = vcvt.s32.f32 %v637_v47 }
 0x116   :  { %4892 = vmatpush.bf16.msra.mxu2 %v2167_v27  ;;  %v1219_v48 = vcvt.s32.f32 %v643_v53  ;;  %v733_v49 = vunpack.c.2.s8 %v199_v36  ;;  %v1663_v10 = vmul.f32 %v7333_v61, %v1081_v25  ;;  %v739_v43 = vunpack.c.3.s8 %v199_v36 }
 0x117   :  { %4905 = vmatpush.bf16.msra.mxu3 %v2215_v44  ;;  %v1669_v18 = vmul.f32 %v7333_v61, %v1087_v46  ;;  %v302_v17 = vunpack.c.2.s8 %v7670_v30  ;;  %v2047_v26 = vpack.c.bf16 %v1573_v54, %v1567_v63  ;;  %v1795_v28 = vmul.f32 %v7333_v61, %v1213_v4  ;;  %v193_v63 = vld [vmem:[#allocation2 + $0x3d0] sm:$0xff] }
 0x118   :  { %v1801_v31 = vmul.f32 %v7333_v61, %v1219_v48  ;;  %v1309_v58 = vcvt.s32.f32 %v733_v49  ;;  %v1315_v41 = vcvt.s32.f32 %v739_v43  ;;  %v308_v50 = vunpack.c.3.s8 %v7670_v30  ;;  %v7696_v48 = vld [vmem:[#allocation2 + $0x78] sm:$0xff] }
 0x119   :  { %v2095_v21 = vpack.c.bf16 %v1669_v18, %v1663_v10  ;;  %v878_v19 = vcvt.s32.f32 %v302_v17  ;;  %4870 = vmatpush.bf16.msra.mxu0 %v2047_v26  ;;  %v398_v22 = vunpack.c.2.s8 %v116_v13  ;;  %v404_v23 = vunpack.c.3.s8 %v116_v13 }
 0x11a   :  { %v2161_v24 = vpack.c.bf16 %v1801_v31, %v1795_v28  ;;  %v1891_v29 = vmul.f32 %v7333_v61, %v1309_v58  ;;  %v1897_v14 = vmul.f32 %v7333_v61, %v1315_v41  ;;  %v884_v55 = vcvt.s32.f32 %v308_v50  ;;  %v110_v41 = vld [vmem:[#allocation2 + $0x138] sm:$0xff] }
 0x11b   :  { %4883 = vmatpush.bf16.msra.mxu1 %v2095_v21  ;;  %v1460_v33 = vmul.f32 %v7339_v1, %v878_v19  ;;  %v625_v32 = vunpack.c.0.s8 %v7662_v51  ;;  %v974_v42 = vcvt.s32.f32 %v398_v22  ;;  %v980_v20 = vcvt.s32.f32 %v404_v23 }
 0x11c   :  { %4893 = vmatpush.bf16.msra.mxu2 %v2161_v24  ;;  %v631_v52 = vunpack.c.1.s8 %v7662_v51  ;;  %v721_v5 = vunpack.c.0.s8 %v199_v36  ;;  %v2209_v60 = vpack.c.bf16 %v1897_v14, %v1891_v29  ;;  %v1466_v6 = vmul.f32 %v7339_v1, %v884_v55  ;;  %4871 = vmatmul.bf16.vlgmr.msra.gmra.mxu0 %v7463_v37 }
 0x11d   :  { %v1201_v35 = vcvt.s32.f32 %v625_v32  ;;  %v727_v34 = vunpack.c.1.s8 %v199_v36  ;;  %v1556_v38 = vmul.f32 %v7339_v1, %v974_v42  ;;  %v1562_v11 = vmul.f32 %v7339_v1, %v980_v20 }
 0x11e   :  { %4884 = vmatmul.bf16.vlgmr.msra.gmra.mxu1 %v7465_v16  ;;  %v1207_v39 = vcvt.s32.f32 %v631_v52  ;;  %v1297_v40 = vcvt.s32.f32 %v721_v5  ;;  %4906 = vmatpush.bf16.msra.mxu3 %v2209_v60  ;;  %v1994_v57 = vpack.c.bf16 %v1466_v6, %v1460_v33  ;;  %v290_v62 = vunpack.c.0.s8 %v7670_v30 }
 0x11f   :  { %v1783_v51 = vmul.f32 %v7333_v61, %v1201_v35  ;;  %v1303_v56 = vcvt.s32.f32 %v727_v34  ;;  %v2042_v7 = vpack.c.bf16 %v1562_v11, %v1556_v38  ;;  %v296_v27 = vunpack.c.1.s8 %v7670_v30 }
 0x120   :  { %v1789_v45 = vmul.f32 %v7333_v61, %v1207_v39  ;;  %v1879_v36 = vmul.f32 %v7333_v61, %v1297_v40  ;;  %4915 = vmatpush.bf16.msrb.mxu0 %v1994_v57  ;;  %v866_v47 = vcvt.s32.f32 %v290_v62  ;;  %v386_v53 = vunpack.c.0.s8 %v116_v13 }
 0x121   :  { %v1885_v59 = vmul.f32 %v7333_v61, %v1303_v56  ;;  %v392_v44 = vunpack.c.1.s8 %v116_v13  ;;  %4928 = vmatpush.bf16.msrb.mxu1 %v2042_v7  ;;  %v872_v46 = vcvt.s32.f32 %v296_v27  ;;  %v613_v54 = vunpack.c.2.s8 %v169_v2 }
 0x122   :  { %v2155_v25 = vpack.c.bf16 %v1789_v45, %v1783_v51  ;;  %v619_v4 = vunpack.c.3.s8 %v169_v2  ;;  %v1448_v10 = vmul.f32 %v7339_v1, %v866_v47  ;;  %v962_v18 = vcvt.s32.f32 %v386_v53 }
 0x123   :  { %v2203_v49 = vpack.c.bf16 %v1885_v59, %v1879_v36  ;;  %v968_v43 = vcvt.s32.f32 %v392_v44  ;;  %v1454_v30 = vmul.f32 %v7339_v1, %v872_v46  ;;  %v1189_v17 = vcvt.s32.f32 %v613_v54 }
 0x124   :  { %4894 = vmatpush.bf16.msra.mxu2 %v2155_v25  ;;  %v1195_v26 = vcvt.s32.f32 %v619_v4  ;;  %v709_v28 = vunpack.c.2.s8 %v193_v63  ;;  %v1544_v13 = vmul.f32 %v7339_v1, %v962_v18  ;;  %v715_v58 = vunpack.c.3.s8 %v193_v63 }
 0x125   :  { %4907 = vmatpush.bf16.msra.mxu3 %v2203_v49  ;;  %v1550_v31 = vmul.f32 %v7339_v1, %v968_v43  ;;  %v278_v21 = vunpack.c.2.s8 %v7696_v48  ;;  %v1988_v50 = vpack.c.bf16 %v1454_v30, %v1448_v10  ;;  %v1771_v19 = vmul.f32 %v7333_v61, %v1189_v17  ;;  %v164_v10 = vld [vmem:[#allocation2 + $0x2e8] sm:$0xff] }
 0x126   :  { %v1777_v24 = vmul.f32 %v7333_v61, %v1195_v26  ;;  %v1285_v29 = vcvt.s32.f32 %v709_v28  ;;  %v1291_v23 = vcvt.s32.f32 %v715_v58  ;;  %v284_v14 = vunpack.c.3.s8 %v7696_v48  ;;  %v7722_v26 = vld [vmem:[#allocation2 + $0x48] sm:$0xff] }
 0x127   :  { %v2036_v22 = vpack.c.bf16 %v1550_v31, %v1544_v13  ;;  %v854_v55 = vcvt.s32.f32 %v278_v21  ;;  %4916 = vmatpush.bf16.msrb.mxu0 %v1988_v50  ;;  %v374_v42 = vunpack.c.2.s8 %v110_v41  ;;  %v380_v20 = vunpack.c.3.s8 %v110_v41 }
 0x128   :  { %v2149_v33 = vpack.c.bf16 %v1777_v24, %v1771_v19  ;;  %v1867_v32 = vmul.f32 %v7333_v61, %v1285_v29  ;;  %v1873_v52 = vmul.f32 %v7333_v61, %v1291_v23  ;;  %v860_v5 = vcvt.s32.f32 %v284_v14 }
 0x129   :  { %4929 = vmatpush.bf16.msrb.mxu1 %v2036_v22  ;;  %v1436_v60 = vmul.f32 %v7339_v1, %v854_v55  ;;  %v601_v6 = vunpack.c.0.s8 %v169_v2  ;;  %v950_v35 = vcvt.s32.f32 %v374_v42  ;;  %v956_v34 = vcvt.s32.f32 %v380_v20  ;;  %v104_v22 = vld [vmem:[#allocation2 + $0x108] sm:$0xff] }
 0x12a   :  { %4895 = vmatpush.bf16.msra.mxu2 %v2149_v33  ;;  %v607_v38 = vunpack.c.1.s8 %v169_v2  ;;  %v697_v11 = vunpack.c.0.s8 %v193_v63  ;;  %v2197_v39 = vpack.c.bf16 %v1873_v52, %v1867_v32  ;;  %v1442_v40 = vmul.f32 %v7339_v1, %v860_v5  ;;  %v7714_v2 = vld [vmem:[#allocation2 + $0x228] sm:$0xff] }
 0x12b   :  { %v1177_v57 = vcvt.s32.f32 %v601_v6  ;;  %v703_v51 = vunpack.c.1.s8 %v193_v63  ;;  %v1532_v56 = vmul.f32 %v7339_v1, %v950_v35  ;;  %v1538_v62 = vmul.f32 %v7339_v1, %v956_v34 }
 0x12c   :  { %v1183_v7 = vcvt.s32.f32 %v607_v38  ;;  %v1273_v45 = vcvt.s32.f32 %v697_v11  ;;  %4908 = vmatpush.bf16.msra.mxu3 %v2197_v39  ;;  %v1982_v36 = vpack.c.bf16 %v1442_v40, %v1436_v60  ;;  %v266_v47 = vunpack.c.0.s8 %v7696_v48 }
 0x12d   :  { %v1759_v27 = vmul.f32 %v7333_v61, %v1177_v57  ;;  %v1279_v59 = vcvt.s32.f32 %v703_v51  ;;  %v2030_v53 = vpack.c.bf16 %v1538_v62, %v1532_v56  ;;  %v272_v25 = vunpack.c.1.s8 %v7696_v48 }
 0x12e   :  { %v1765_v44 = vmul.f32 %v7333_v61, %v1183_v7  ;;  %v1855_v63 = vmul.f32 %v7333_v61, %v1273_v45  ;;  %4917 = vmatpush.bf16.msrb.mxu0 %v1982_v36  ;;  %v842_v54 = vcvt.s32.f32 %v266_v47  ;;  %v362_v4 = vunpack.c.0.s8 %v110_v41 }
 0x12f   :  { %v1861_v46 = vmul.f32 %v7333_v61, %v1279_v59  ;;  %v368_v49 = vunpack.c.1.s8 %v110_v41  ;;  %4930 = vmatpush.bf16.msrb.mxu1 %v2030_v53  ;;  %v848_v43 = vcvt.s32.f32 %v272_v25  ;;  %v494_v30 = vunpack.c.2.s8 %v7714_v2 }
 0x130   :  { %v2143_v18 = vpack.c.bf16 %v1765_v44, %v1759_v27  ;;  %v500_v17 = vunpack.c.3.s8 %v7714_v2  ;;  %v1424_v13 = vmul.f32 %v7339_v1, %v842_v54  ;;  %v938_v48 = vcvt.s32.f32 %v362_v4 }
 0x131   :  { %v2191_v28 = vpack.c.bf16 %v1861_v46, %v1855_v63  ;;  %v944_v31 = vcvt.s32.f32 %v368_v49  ;;  %v1430_v61 = vmul.f32 %v7339_v1, %v848_v43  ;;  %v1070_v58 = vcvt.s32.f32 %v494_v30 }
 0x132   :  { %4896 = vmatpush.bf16.msra.mxu2 %v2143_v18  ;;  %v1076_v21 = vcvt.s32.f32 %v500_v17  ;;  %v590_v41 = vunpack.c.2.s8 %v164_v10  ;;  %v1520_v50 = vmul.f32 %v7339_v1, %v938_v48  ;;  %v596_v24 = vunpack.c.3.s8 %v164_v10 }
 0x133   :  { %4909 = vmatpush.bf16.msra.mxu3 %v2191_v28  ;;  %v1526_v19 = vmul.f32 %v7339_v1, %v944_v31  ;;  %v254_v29 = vunpack.c.2.s8 %v7722_v26  ;;  %v1976_v23 = vpack.c.bf16 %v1430_v61, %v1424_v13  ;;  %v1652_v14 = vmul.f32 %v7339_v1, %v1070_v58  ;;  %v158_v28 = vld [vmem:[#allocation2 + $0x2b8] sm:$0xff] }
 0x134   :  { %v1658_v55 = vmul.f32 %v7339_v1, %v1076_v21  ;;  %v1166_v33 = vcvt.s32.f32 %v590_v41  ;;  %v1172_v42 = vcvt.s32.f32 %v596_v24  ;;  %v260_v20 = vunpack.c.3.s8 %v7722_v26  ;;  %v7748_v58 = vld [vmem:[#allocation2 + $0x18] sm:$0xff] }
 0x135   :  { %v2024_v32 = vpack.c.bf16 %v1526_v19, %v1520_v50  ;;  %4897 = vmatmul.bf16.vlgmr.msra.gmra.mxu2 %v7365_v8  ;;  %v830_v52 = vcvt.s32.f32 %v254_v29  ;;  %4918 = vmatpush.bf16.msrb.mxu0 %v1976_v23  ;;  %v350_v6 = vunpack.c.2.s8 %v104_v22  ;;  %v356_v35 = vunpack.c.3.s8 %v104_v22 }
 0x136   :  { %v2090_v5 = vpack.c.bf16 %v1658_v55, %v1652_v14  ;;  %v1748_v60 = vmul.f32 %v7339_v1, %v1166_v33  ;;  %4910 = vmatmul.bf16.vlgmr.msra.gmra.mxu3 %v7367_v9  ;;  %v1754_v34 = vmul.f32 %v7339_v1, %v1172_v42  ;;  %v836_v38 = vcvt.s32.f32 %v260_v20 }
 0x137   :  { %4931 = vmatpush.bf16.msrb.mxu1 %v2024_v32  ;;  %v1412_v11 = vmul.f32 %v7339_v1, %v830_v52  ;;  %v482_v39 = vunpack.c.0.s8 %v7714_v2  ;;  %v926_v40 = vcvt.s32.f32 %v350_v6  ;;  %v932_v57 = vcvt.s32.f32 %v356_v35  ;;  %v98_v32 = vld [vmem:[#allocation2 + $0xd8] sm:$0xff] }
 0x138   :  { %4941 = vmatpush.bf16.msrb.mxu2 %v2090_v5  ;;  %v488_v51 = vunpack.c.1.s8 %v7714_v2  ;;  %v578_v56 = vunpack.c.0.s8 %v164_v10  ;;  %v2138_v62 = vpack.c.bf16 %v1754_v34, %v1748_v60  ;;  %v1418_v7 = vmul.f32 %v7339_v1, %v836_v38  ;;  %v134_v2 = vld [vmem:[#allocation2 + $0x1f8] sm:$0xff] }
 0x139   :  { %v1058_v45 = vcvt.s32.f32 %v482_v39  ;;  %v584_v36 = vunpack.c.1.s8 %v164_v10  ;;  %v1508_v27 = vmul.f32 %v7339_v1, %v926_v40  ;;  %v1514_v59 = vmul.f32 %v7339_v1, %v932_v57 }
 0x13a   :  { %v1064_v47 = vcvt.s32.f32 %v488_v51  ;;  %v1154_v53 = vcvt.s32.f32 %v578_v56  ;;  %4954 = vmatpush.bf16.msrb.mxu3 %v2138_v62  ;;  %v1970_v44 = vpack.c.bf16 %v1418_v7, %v1412_v11  ;;  %v242_v46 = vunpack.c.0.s8 %v7722_v26 }
 0x13b   :  { %v1640_v63 = vmul.f32 %v7339_v1, %v1058_v45  ;;  %v1160_v25 = vcvt.s32.f32 %v584_v36  ;;  %v2018_v54 = vpack.c.bf16 %v1514_v59, %v1508_v27  ;;  %v248_v10 = vunpack.c.1.s8 %v7722_v26 }
 0x13c   :  { %v1646_v4 = vmul.f32 %v7339_v1, %v1064_v47  ;;  %v1736_v49 = vmul.f32 %v7339_v1, %v1154_v53  ;;  %4919 = vmatpush.bf16.msrb.mxu0 %v1970_v44  ;;  %v818_v43 = vcvt.s32.f32 %v242_v46  ;;  %v338_v30 = vunpack.c.0.s8 %v104_v22 }
 0x13d   :  { %v1742_v18 = vmul.f32 %v7339_v1, %v1160_v25  ;;  %v344_v17 = vunpack.c.1.s8 %v104_v22  ;;  %4932 = vmatpush.bf16.msrb.mxu1 %v2018_v54  ;;  %v824_v48 = vcvt.s32.f32 %v248_v10  ;;  %v470_v31 = vunpack.c.2.s8 %v134_v2 }
 0x13e   :  { %v2084_v13 = vpack.c.bf16 %v1646_v4, %v1640_v63  ;;  %v476_v61 = vunpack.c.3.s8 %v134_v2  ;;  %v1400_v41 = vmul.f32 %v7339_v1, %v818_v43  ;;  %v914_v50 = vcvt.s32.f32 %v338_v30 }
 0x13f   :  { %v2132_v21 = vpack.c.bf16 %v1742_v18, %v1736_v49  ;;  %v920_v19 = vcvt.s32.f32 %v344_v17  ;;  %v1406_v26 = vmul.f32 %v7339_v1, %v824_v48  ;;  %v1046_v24 = vcvt.s32.f32 %v470_v31 }
 0x140   :  { %4942 = vmatpush.bf16.msrb.mxu2 %v2084_v13  ;;  %v1052_v29 = vcvt.s32.f32 %v476_v61  ;;  %v566_v23 = vunpack.c.2.s8 %v158_v28  ;;  %v1496_v22 = vmul.f32 %v7339_v1, %v914_v50  ;;  %v572_v55 = vunpack.c.3.s8 %v158_v28 }
 0x141   :  { %4955 = vmatpush.bf16.msrb.mxu3 %v2132_v21  ;;  %v1502_v14 = vmul.f32 %v7339_v1, %v920_v19  ;;  %v230_v33 = vunpack.c.2.s8 %v7748_v58  ;;  %v1964_v42 = vpack.c.bf16 %v1406_v26, %v1400_v41  ;;  %v1628_v20 = vmul.f32 %v7339_v1, %v1046_v24  ;;  %v152_v21 = vld [vmem:[#allocation2 + $0x288] sm:$0xff] }
 0x142   :  { %v1634_v52 = vmul.f32 %v7339_v1, %v1052_v29  ;;  %v1142_v5 = vcvt.s32.f32 %v566_v23  ;;  %v1148_v6 = vcvt.s32.f32 %v572_v55  ;;  %v236_v35 = vunpack.c.3.s8 %v7748_v58  ;;  %v7774_v24 = vld [vmem:[#allocation2 + $0x3a8] sm:$0xff] }
 0x143   :  { %v2012_v60 = vpack.c.bf16 %v1502_v14, %v1496_v22  ;;  %v806_v34 = vcvt.s32.f32 %v230_v33  ;;  %4920 = vmatpush.bf16.msrb.mxu0 %v1964_v42  ;;  %v326_v39 = vunpack.c.2.s8 %v98_v32  ;;  %v332_v40 = vunpack.c.3.s8 %v98_v32 }
 0x144   :  { %v2078_v38 = vpack.c.bf16 %v1634_v52, %v1628_v20  ;;  %v1724_v11 = vmul.f32 %v7339_v1, %v1142_v5  ;;  %v1730_v57 = vmul.f32 %v7339_v1, %v1148_v6  ;;  %v812_v51 = vcvt.s32.f32 %v236_v35 }
 0x145   :  { %4933 = vmatpush.bf16.msrb.mxu1 %v2012_v60  ;;  %v1388_v56 = vmul.f32 %v7339_v1, %v806_v34  ;;  %v458_v62 = vunpack.c.0.s8 %v134_v2  ;;  %v902_v7 = vcvt.s32.f32 %v326_v39  ;;  %v908_v45 = vcvt.s32.f32 %v332_v40  ;;  %v212_v60 = vld [vmem:[#allocation2 + $0x468] sm:$0xff] }
 0x146   :  { %4943 = vmatpush.bf16.msrb.mxu2 %v2078_v38  ;;  %v464_v36 = vunpack.c.1.s8 %v134_v2  ;;  %v554_v27 = vunpack.c.0.s8 %v158_v28  ;;  %v2126_v59 = vpack.c.bf16 %v1730_v57, %v1724_v11  ;;  %v1394_v47 = vmul.f32 %v7339_v1, %v812_v51  ;;  %v7766_v2 = vld [vmem:[#allocation2 + $0x1c8] sm:$0xff] }
 0x147   :  { %v1034_v53 = vcvt.s32.f32 %v458_v62  ;;  %v560_v44 = vunpack.c.1.s8 %v158_v28  ;;  %v1484_v63 = vmul.f32 %v7339_v1, %v902_v7  ;;  %v1490_v25 = vmul.f32 %v7339_v1, %v908_v45 }
 0x148   :  { %v1040_v46 = vcvt.s32.f32 %v464_v36  ;;  %v1130_v54 = vcvt.s32.f32 %v554_v27  ;;  %4956 = vmatpush.bf16.msrb.mxu3 %v2126_v59  ;;  %v1958_v4 = vpack.c.bf16 %v1394_v47, %v1388_v56  ;;  %v218_v18 = vunpack.c.0.s8 %v7748_v58 }
 0x149   :  { %v1616_v49 = vmul.f32 %v7339_v1, %v1034_v53  ;;  %v1136_v10 = vcvt.s32.f32 %v560_v44  ;;  %v2006_v43 = vpack.c.bf16 %v1490_v25, %v1484_v63  ;;  %v224_v28 = vunpack.c.1.s8 %v7748_v58 }
 0x14a   :  { %v1622_v30 = vmul.f32 %v7339_v1, %v1040_v46  ;;  %v1712_v17 = vmul.f32 %v7339_v1, %v1130_v54  ;;  %4921 = vmatpush.bf16.msrb.mxu0 %v1958_v4  ;;  %v794_v48 = vcvt.s32.f32 %v218_v18  ;;  %v314_v31 = vunpack.c.0.s8 %v98_v32 }
 0x14b   :  { %v1718_v13 = vmul.f32 %v7339_v1, %v1136_v10  ;;  %v320_v61 = vunpack.c.1.s8 %v98_v32  ;;  %4934 = vmatpush.bf16.msrb.mxu1 %v2006_v43  ;;  %v800_v50 = vcvt.s32.f32 %v224_v28  ;;  %v446_v19 = vunpack.c.2.s8 %v7766_v2 }
 0x14c   :  { %v2072_v41 = vpack.c.bf16 %v1622_v30, %v1616_v49  ;;  %v452_v26 = vunpack.c.3.s8 %v7766_v2  ;;  %v1376_v23 = vmul.f32 %v7339_v1, %v794_v48  ;;  %v890_v58 = vcvt.s32.f32 %v314_v31 }
 0x14d   :  { %v2120_v29 = vpack.c.bf16 %v1718_v13, %v1712_v17  ;;  %v896_v22 = vcvt.s32.f32 %v320_v61  ;;  %v1382_v14 = vmul.f32 %v7339_v1, %v800_v50  ;;  %v1022_v55 = vcvt.s32.f32 %v446_v19  ;;  %v122_v13 = vld [vmem:[#allocation2 + $0x198] sm:$0xff] }
 0x14e   :  { %4944 = vmatpush.bf16.msrb.mxu2 %v2072_v41  ;;  %v1028_v33 = vcvt.s32.f32 %v452_v26  ;;  %v542_v32 = vunpack.c.2.s8 %v152_v21  ;;  %v1472_v42 = vmul.f32 %v7339_v1, %v890_v58  ;;  %v548_v52 = vunpack.c.3.s8 %v152_v21 }
 0x14f   :  { %4957 = vmatpush.bf16.msrb.mxu3 %v2120_v29  ;;  %v1478_v20 = vmul.f32 %v7339_v1, %v896_v22  ;;  %v686_v5 = vunpack.c.2.s8 %v7774_v24  ;;  %v1952_v6 = vpack.c.bf16 %v1382_v14, %v1376_v23  ;;  %v1604_v35 = vmul.f32 %v7339_v1, %v1022_v55  ;;  %v146_v29 = vld [vmem:[#allocation2 + $0x258] sm:$0xff] }
 0x150   :  { %v1610_v34 = vmul.f32 %v7339_v1, %v1028_v33  ;;  %v1118_v38 = vcvt.s32.f32 %v542_v32  ;;  %v1124_v39 = vcvt.s32.f32 %v548_v52  ;;  %v692_v40 = vunpack.c.3.s8 %v7774_v24  ;;  %v7800_v55 = vld [vmem:[#allocation2 + $0x378] sm:$0xff] }
 0x151   :  { %v2000_v11 = vpack.c.bf16 %v1478_v20, %v1472_v42  ;;  %v1262_v57 = vcvt.s32.f32 %v686_v5  ;;  %4922 = vmatpush.bf16.msrb.mxu0 %v1952_v6  ;;  %v782_v62 = vunpack.c.2.s8 %v212_v60  ;;  %v788_v7 = vunpack.c.3.s8 %v212_v60 }
 0x152   :  { %v2066_v51 = vpack.c.bf16 %v1610_v34, %v1604_v35  ;;  %v1700_v56 = vmul.f32 %v7339_v1, %v1118_v38  ;;  %v1706_v45 = vmul.f32 %v7339_v1, %v1124_v39  ;;  %v1268_v36 = vcvt.s32.f32 %v692_v40 }
 0x153   :  { %4935 = vmatpush.bf16.msrb.mxu1 %v2000_v11  ;;  %v1844_v27 = vmul.f32 %v7339_v1, %v1262_v57  ;;  %v434_v59 = vunpack.c.0.s8 %v7766_v2  ;;  %v1358_v47 = vcvt.s32.f32 %v782_v62  ;;  %v1364_v53 = vcvt.s32.f32 %v788_v7  ;;  %v206_v11 = vld [vmem:[#allocation2 + $0x438] sm:$0xff] }
 0x154   :  { %4945 = vmatpush.bf16.msrb.mxu2 %v2066_v51  ;;  %v440_v44 = vunpack.c.1.s8 %v7766_v2  ;;  %v530_v63 = vunpack.c.0.s8 %v152_v21  ;;  %v2114_v25 = vpack.c.bf16 %v1706_v45, %v1700_v56  ;;  %v1850_v46 = vmul.f32 %v7339_v1, %v1268_v36  ;;  %4923 = vmatmul.bf16.vlgmr.msrb.gmra.mxu0 %v7374_v12 }
 0x155   :  { %v1010_v54 = vcvt.s32.f32 %v434_v59  ;;  %v536_v4 = vunpack.c.1.s8 %v152_v21  ;;  %v1940_v49 = vmul.f32 %v7339_v1, %v1358_v47  ;;  %v1946_v10 = vmul.f32 %v7339_v1, %v1364_v53 }
 0x156   :  { %4936 = vmatmul.bf16.vlgmr.msrb.gmra.mxu1 %v7376_v15  ;;  %v1016_v18 = vcvt.s32.f32 %v440_v44  ;;  %v1106_v43 = vcvt.s32.f32 %v530_v63  ;;  %4958 = vmatpush.bf16.msrb.mxu3 %v2114_v25  ;;  %v2186_v30 = vpack.c.bf16 %v1850_v46, %v1844_v27  ;;  %v674_v28 = vunpack.c.0.s8 %v7774_v24 }
 0x157   :  { %v1592_v2 = vmul.f32 %v7339_v1, %v1010_v54  ;;  %v1112_v17 = vcvt.s32.f32 %v536_v4  ;;  %v2234_v48 = vpack.c.bf16 %v1946_v10, %v1940_v49  ;;  %v680_v21 = vunpack.c.1.s8 %v7774_v24 }
 0x158   :  { %v1598_v31 = vmul.f32 %v7339_v1, %v1016_v18  ;;  %v1688_v61 = vmul.f32 %v7339_v1, %v1106_v43  ;;  %4967 = vmatpush.bf16.msra.mxu0 %v2186_v30  ;;  %v1250_v50 = vcvt.s32.f32 %v674_v28  ;;  %v770_v19 = vunpack.c.0.s8 %v212_v60 }
 0x159   :  { %v1694_v41 = vmul.f32 %v7339_v1, %v1112_v17  ;;  %v776_v26 = vunpack.c.1.s8 %v212_v60  ;;  %4980 = vmatpush.bf16.msra.mxu1 %v2234_v48  ;;  %v1256_v58 = vcvt.s32.f32 %v680_v21  ;;  %v422_v22 = vunpack.c.2.s8 %v122_v13 }
 0x15a   :  { %v2060_v23 = vpack.c.bf16 %v1598_v31, %v1592_v2  ;;  %v428_v14 = vunpack.c.3.s8 %v122_v13  ;;  %v1832_v32 = vmul.f32 %v7339_v1, %v1250_v50  ;;  %v1346_v42 = vcvt.s32.f32 %v770_v19 }
 0x15b   :  { %v2108_v33 = vpack.c.bf16 %v1694_v41, %v1688_v61  ;;  %v1352_v20 = vcvt.s32.f32 %v776_v26  ;;  %v1838_v24 = vmul.f32 %v7339_v1, %v1256_v58  ;;  %v998_v52 = vcvt.s32.f32 %v422_v22 }
 0x15c   :  { %4946 = vmatpush.bf16.msrb.mxu2 %v2060_v23  ;;  %v1004_v5 = vcvt.s32.f32 %v428_v14  ;;  %v518_v6 = vunpack.c.2.s8 %v146_v29  ;;  %v1928_v60 = vmul.f32 %v7339_v1, %v1346_v42  ;;  %v524_v34 = vunpack.c.3.s8 %v146_v29  ;;  %v7826_v42 = vpop.f32.mrf.mxu3 }
 0x15d   :  { %4959 = vmatpush.bf16.msrb.mxu3 %v2108_v33  ;;  %v1934_v35 = vmul.f32 %v7339_v1, %v1352_v20  ;;  %v662_v38 = vunpack.c.2.s8 %v7800_v55  ;;  %v2180_v39 = vpack.c.bf16 %v1838_v24, %v1832_v32  ;;  %v1580_v40 = vmul.f32 %v7339_v1, %v998_v52  ;;  %v117_v33 = vld [vmem:[#allocation2 + $0x170] sm:$0xff]  ;;  %v7824_v32 = vpop.f32.mrf.mxu2 }
 0x15e   :  { %v1586_v57 = vmul.f32 %v7339_v1, %v1004_v5  ;;  %v1094_v51 = vcvt.s32.f32 %v518_v6  ;;  %v1100_v62 = vcvt.s32.f32 %v524_v34  ;;  %v668_v7 = vunpack.c.3.s8 %v7800_v55  ;;  %v7830_v6 = vld [vmem:[#allocation2 + $0x348] sm:$0xff] }
 0x15f   :  { %v2228_v56 = vpack.c.bf16 %v1934_v35, %v1928_v60  ;;  %v1238_v45 = vcvt.s32.f32 %v662_v38  ;;  %4968 = vmatpush.bf16.msra.mxu0 %v2180_v39  ;;  %v758_v59 = vunpack.c.2.s8 %v206_v11  ;;  %v764_v47 = vunpack.c.3.s8 %v206_v11 }
 0x160   :  { %v2054_v36 = vpack.c.bf16 %v1586_v57, %v1580_v40  ;;  %v1676_v27 = vmul.f32 %v7339_v1, %v1094_v51  ;;  %v1682_v53 = vmul.f32 %v7339_v1, %v1100_v62  ;;  %v1244_v44 = vcvt.s32.f32 %v668_v7  ;;  %v200_v7 = vld [vmem:[#allocation2 + $0x408] sm:$0xff] }
 0x161   :  { %4981 = vmatpush.bf16.msra.mxu1 %v2228_v56  ;;  %v1820_v63 = vmul.f32 %v7339_v1, %v1238_v45  ;;  %v410_v25 = vunpack.c.0.s8 %v122_v13  ;;  %v1334_v46 = vcvt.s32.f32 %v758_v59  ;;  %v1340_v54 = vcvt.s32.f32 %v764_v47 }
 0x162   :  { %4947 = vmatpush.bf16.msrb.mxu2 %v2054_v36  ;;  %v416_v4 = vunpack.c.1.s8 %v122_v13  ;;  %v506_v49 = vunpack.c.0.s8 %v146_v29  ;;  %v2102_v10 = vpack.c.bf16 %v1682_v53, %v1676_v27  ;;  %v1826_v18 = vmul.f32 %v7339_v1, %v1244_v44  ;;  %v7818_v13 = vld [vmem:[#allocation2 + $0xb0] sm:$0xff] }
 0x163   :  { %v986_v43 = vcvt.s32.f32 %v410_v25  ;;  %v512_v30 = vunpack.c.1.s8 %v146_v29  ;;  %v1916_v2 = vmul.f32 %v7339_v1, %v1334_v46  ;;  %v1922_v17 = vmul.f32 %v7339_v1, %v1340_v54 }
 0x164   :  { %v992_v28 = vcvt.s32.f32 %v416_v4  ;;  %v1082_v48 = vcvt.s32.f32 %v506_v49  ;;  %4960 = vmatpush.bf16.msrb.mxu3 %v2102_v10  ;;  %v2174_v31 = vpack.c.bf16 %v1826_v18, %v1820_v63  ;;  %v650_v41 = vunpack.c.0.s8 %v7800_v55 }
 0x165   :  { %v1568_v61 = vmul.f32 %v7339_v1, %v986_v43  ;;  %v1088_v21 = vcvt.s32.f32 %v512_v30  ;;  %v2222_v50 = vpack.c.bf16 %v1922_v17, %v1916_v2  ;;  %v656_v29 = vunpack.c.1.s8 %v7800_v55  ;;  %v4692_v30 = vpop.f32.mrf.mxu2  ;;  %v4705_v2 = vpop.f32.mrf.mxu3 }
 0x166   :  { %v1574_v19 = vmul.f32 %v7339_v1, %v992_v28  ;;  %v1664_v26 = vmul.f32 %v7339_v1, %v1082_v48  ;;  %4969 = vmatpush.bf16.msra.mxu0 %v2174_v31  ;;  %v1226_v58 = vcvt.s32.f32 %v650_v41  ;;  %v746_v22 = vunpack.c.0.s8 %v206_v11 }
 0x167   :  { %v1670_v23 = vmul.f32 %v7339_v1, %v1088_v21  ;;  %v752_v14 = vunpack.c.1.s8 %v206_v11  ;;  %4982 = vmatpush.bf16.msra.mxu1 %v2222_v50  ;;  %v1232_v24 = vcvt.s32.f32 %v656_v29  ;;  %v303_v52 = vunpack.c.2.s8 %v7818_v13 }
 0x168   :  { %v2048_v20 = vpack.c.bf16 %v1574_v19, %v1568_v61  ;;  %v309_v5 = vunpack.c.3.s8 %v7818_v13  ;;  %v1808_v60 = vmul.f32 %v7339_v1, %v1226_v58  ;;  %v1322_v35 = vcvt.s32.f32 %v746_v22 }
 0x169   :  { %v2096_v55 = vpack.c.bf16 %v1670_v23, %v1664_v26  ;;  %v1328_v34 = vcvt.s32.f32 %v752_v14  ;;  %v1814_v38 = vmul.f32 %v7339_v1, %v1232_v24  ;;  %v879_v11 = vcvt.s32.f32 %v303_v52 }
 0x16a   :  { %4948 = vmatpush.bf16.msrb.mxu2 %v2048_v20  ;;  %v885_v39 = vcvt.s32.f32 %v309_v5  ;;  %v399_v40 = vunpack.c.2.s8 %v117_v33  ;;  %v1904_v57 = vmul.f32 %v7339_v1, %v1322_v35  ;;  %v405_v56 = vunpack.c.3.s8 %v117_v33 }
 0x16b   :  { %4961 = vmatpush.bf16.msrb.mxu3 %v2096_v55  ;;  %v1910_v51 = vmul.f32 %v7339_v1, %v1328_v34  ;;  %v638_v62 = vunpack.c.2.s8 %v7830_v6  ;;  %v2168_v45 = vpack.c.bf16 %v1814_v38, %v1808_v60  ;;  %v1461_v36 = vmul.f32 %v7342_v3, %v879_v11  ;;  %v111_v38 = vld [vmem:[#allocation2 + $0x140] sm:$0xff] }
 0x16c   :  { %v1467_v27 = vmul.f32 %v7342_v3, %v885_v39  ;;  %v975_v59 = vcvt.s32.f32 %v399_v40  ;;  %v981_v53 = vcvt.s32.f32 %v405_v56  ;;  %v644_v44 = vunpack.c.3.s8 %v7830_v6 }
 0x16d   :  { %v2216_v47 = vpack.c.bf16 %v1910_v51, %v1904_v57  ;;  %4949 = vmatmul.bf16.vlgmr.msrb.gmra.mxu2 %v7463_v37  ;;  %v1214_v63 = vcvt.s32.f32 %v638_v62  ;;  %4970 = vmatpush.bf16.msra.mxu0 %v2168_v45  ;;  %v734_v54 = vunpack.c.2.s8 %v200_v7  ;;  %v740_v4 = vunpack.c.3.s8 %v200_v7  ;;  %v7856_v51 = vld [vmem:[#allocation2 + $0x318] sm:$0xff] }
 0x16e   :  { %v1995_v25 = vpack.c.bf16 %v1467_v27, %v1461_v36  ;;  %v1557_v46 = vmul.f32 %v7342_v3, %v975_v59  ;;  %4962 = vmatmul.bf16.vlgmr.msrb.gmra.mxu3 %v7465_v16  ;;  %v1563_v49 = vmul.f32 %v7342_v3, %v981_v53  ;;  %v1220_v10 = vcvt.s32.f32 %v644_v44 }
 0x16f   :  { %4983 = vmatpush.bf16.msra.mxu1 %v2216_v47  ;;  %v1796_v18 = vmul.f32 %v7339_v1, %v1214_v63  ;;  %v291_v43 = vunpack.c.0.s8 %v7818_v13  ;;  %v1310_v17 = vcvt.s32.f32 %v734_v54  ;;  %v1316_v28 = vcvt.s32.f32 %v740_v4 }
 0x170   :  { %4993 = vmatpush.bf16.msra.mxu2 %v1995_v25  ;;  %v297_v48 = vunpack.c.1.s8 %v7818_v13  ;;  %v387_v31 = vunpack.c.0.s8 %v117_v33  ;;  %v2043_v61 = vpack.c.bf16 %v1563_v49, %v1557_v46  ;;  %v1802_v21 = vmul.f32 %v7339_v1, %v1220_v10  ;;  %v87_v13 = vld [vmem:[#allocation2 + $0x80] sm:$0xff]  ;;  %v7863_v25 = vld [vmem:[#allocation2 + $0x3d8] sm:$0xff] }
 0x171   :  { %v867_v41 = vcvt.s32.f32 %v291_v43  ;;  %v393_v50 = vunpack.c.1.s8 %v117_v33  ;;  %v1892_v19 = vmul.f32 %v7339_v1, %v1310_v17  ;;  %v1898_v26 = vmul.f32 %v7339_v1, %v1316_v28 }
 0x172   :  { %v873_v29 = vcvt.s32.f32 %v297_v48  ;;  %v963_v23 = vcvt.s32.f32 %v387_v31  ;;  %5006 = vmatpush.bf16.msra.mxu3 %v2043_v61  ;;  %v2162_v58 = vpack.c.bf16 %v1802_v21, %v1796_v18  ;;  %v626_v20 = vunpack.c.0.s8 %v7830_v6 }
 0x173   :  { %v1449_v22 = vmul.f32 %v7342_v3, %v867_v41  ;;  %v969_v14 = vcvt.s32.f32 %v393_v50  ;;  %v2210_v24 = vpack.c.bf16 %v1898_v26, %v1892_v19  ;;  %v632_v33 = vunpack.c.1.s8 %v7830_v6 }
 0x174   :  { %v1455_v52 = vmul.f32 %v7342_v3, %v873_v29  ;;  %v1545_v5 = vmul.f32 %v7342_v3, %v963_v23  ;;  %4971 = vmatpush.bf16.msra.mxu0 %v2162_v58  ;;  %v1202_v60 = vcvt.s32.f32 %v626_v20  ;;  %v722_v35 = vunpack.c.0.s8 %v200_v7 }
 0x175   :  { %v1551_v55 = vmul.f32 %v7342_v3, %v969_v14  ;;  %v728_v34 = vunpack.c.1.s8 %v200_v7  ;;  %4984 = vmatpush.bf16.msra.mxu1 %v2210_v24  ;;  %v1208_v39 = vcvt.s32.f32 %v632_v33  ;;  %v279_v40 = vunpack.c.2.s8 %v87_v13 }
 0x176   :  { %v1989_v11 = vpack.c.bf16 %v1455_v52, %v1449_v22  ;;  %v285_v57 = vunpack.c.3.s8 %v87_v13  ;;  %v1784_v62 = vmul.f32 %v7339_v1, %v1202_v60  ;;  %v1298_v45 = vcvt.s32.f32 %v722_v35 }
 0x177   :  { %v2037_v56 = vpack.c.bf16 %v1551_v55, %v1545_v5  ;;  %v1304_v36 = vcvt.s32.f32 %v728_v34  ;;  %v1790_v6 = vmul.f32 %v7339_v1, %v1208_v39  ;;  %v855_v27 = vcvt.s32.f32 %v279_v40  ;;  %v7880_v34 = vld [vmem:[#allocation2 + $0x50] sm:$0xff] }
 0x178   :  { %4994 = vmatpush.bf16.msra.mxu2 %v1989_v11  ;;  %v861_v59 = vcvt.s32.f32 %v285_v57  ;;  %v375_v47 = vunpack.c.2.s8 %v111_v38  ;;  %v1880_v7 = vmul.f32 %v7339_v1, %v1298_v45  ;;  %v381_v44 = vunpack.c.3.s8 %v111_v38  ;;  %v7882_v11 = vpop.f32.mrf.mxu0 }
 0x179   :  { %5007 = vmatpush.bf16.msra.mxu3 %v2037_v56  ;;  %v1886_v53 = vmul.f32 %v7339_v1, %v1304_v36  ;;  %v614_v63 = vunpack.c.2.s8 %v7856_v51  ;;  %v2156_v46 = vpack.c.bf16 %v1790_v6, %v1784_v62  ;;  %v1437_v54 = vmul.f32 %v7342_v3, %v855_v27 }
 0x17a   :  { %v1443_v4 = vmul.f32 %v7342_v3, %v861_v59  ;;  %v951_v49 = vcvt.s32.f32 %v375_v47  ;;  %v957_v18 = vcvt.s32.f32 %v381_v44  ;;  %v620_v43 = vunpack.c.3.s8 %v7856_v51 }
 0x17b   :  { %v2204_v10 = vpack.c.bf16 %v1886_v53, %v1880_v7  ;;  %v1190_v30 = vcvt.s32.f32 %v614_v63  ;;  %4972 = vmatpush.bf16.msra.mxu0 %v2156_v46  ;;  %v710_v28 = vunpack.c.2.s8 %v7863_v25  ;;  %v716_v48 = vunpack.c.3.s8 %v7863_v25  ;;  %v105_v53 = vld [vmem:[#allocation2 + $0x110] sm:$0xff] }
 0x17c   :  { %v1983_v2 = vpack.c.bf16 %v1443_v4, %v1437_v54  ;;  %v1533_v17 = vmul.f32 %v7342_v3, %v951_v49  ;;  %v1539_v31 = vmul.f32 %v7342_v3, %v957_v18  ;;  %v1196_v61 = vcvt.s32.f32 %v620_v43  ;;  %v7898_v4 = vld [vmem:[#allocation2 + $0x230] sm:$0xff] }
 0x17d   :  { %4985 = vmatpush.bf16.msra.mxu1 %v2204_v10  ;;  %v1772_v21 = vmul.f32 %v7339_v1, %v1190_v30  ;;  %v267_v41 = vunpack.c.0.s8 %v87_v13  ;;  %v1286_v50 = vcvt.s32.f32 %v710_v28  ;;  %v1292_v19 = vcvt.s32.f32 %v716_v48 }
 0x17e   :  { %4995 = vmatpush.bf16.msra.mxu2 %v1983_v2  ;;  %v273_v26 = vunpack.c.1.s8 %v87_v13  ;;  %v363_v29 = vunpack.c.0.s8 %v111_v38  ;;  %v2031_v23 = vpack.c.bf16 %v1539_v31, %v1533_v17  ;;  %v1778_v58 = vmul.f32 %v7339_v1, %v1196_v61  ;;  %v6842_v13 = vld [vmem:[%s10189_s7] sm:$0x7f] }
 0x17f   :  { %v843_v22 = vcvt.s32.f32 %v267_v41  ;;  %v369_v14 = vunpack.c.1.s8 %v111_v38  ;;  %v1868_v20 = vmul.f32 %v7339_v1, %v1286_v50  ;;  %v1874_v24 = vmul.f32 %v7339_v1, %v1292_v19  ;;  %v7884_v38 = vpop.f32.mrf.mxu1 }
 0x180   :  { %v849_v52 = vcvt.s32.f32 %v273_v26  ;;  %v939_v5 = vcvt.s32.f32 %v363_v29  ;;  %5008 = vmatpush.bf16.msra.mxu3 %v2031_v23  ;;  %v2150_v33 = vpack.c.bf16 %v1778_v58, %v1772_v21  ;;  %v4675_v35 = vperm.slane %v6842_v13, 1  ;;  %v4718_v50 = vpop.f32.mrf.mxu0 }
 0x181   :  { %v1425_v55 = vmul.f32 %v7342_v3, %v843_v22  ;;  %v945_v60 = vcvt.s32.f32 %v369_v14  ;;  %v2198_v39 = vpack.c.bf16 %v1874_v24, %v1868_v20  ;;  %v602_v56 = vunpack.c.0.s8 %v7856_v51 }
 0x182   :  { %v1431_v40 = vmul.f32 %v7342_v3, %v849_v52  ;;  %v1521_v57 = vmul.f32 %v7342_v3, %v939_v5  ;;  %4973 = vmatpush.bf16.msra.mxu0 %v2150_v33  ;;  %v4691_v45 = vadd.f32 %v7824_v32, %v4675_v35  ;;  %v608_v36 = vunpack.c.1.s8 %v7856_v51 }
 0x183   :  { %v1527_v62 = vmul.f32 %v7342_v3, %v945_v60  ;;  %v698_v6 = vunpack.c.0.s8 %v7863_v25  ;;  %4986 = vmatpush.bf16.msra.mxu1 %v2198_v39  ;;  %v1178_v59 = vcvt.s32.f32 %v602_v56  ;;  %v704_v47 = vunpack.c.1.s8 %v7863_v25  ;;  %v7919_v60 = vpop.f32.mrf.mxu3 }
 0x184   :  { %v1977_v27 = vpack.c.bf16 %v1431_v40, %v1425_v55  ;;  %v255_v7 = vunpack.c.2.s8 %v7880_v34  ;;  %v7896_v63 = vadd.f32 %v7826_v42, %v4691_v45  ;;  %v1184_v46 = vcvt.s32.f32 %v608_v36  ;;  %v7904_v42 = vld [vmem:[#allocation2 + $0x2f0] sm:$0xff]  ;;  %v7917_v55 = vpop.f32.mrf.mxu2 }
 0x185   :  { %v2025_v44 = vpack.c.bf16 %v1527_v62, %v1521_v57  ;;  %v1274_v54 = vcvt.s32.f32 %v698_v6  ;;  %v1760_v32 = vmul.f32 %v7339_v1, %v1178_v59  ;;  %v1280_v51 = vcvt.s32.f32 %v704_v47 }
 0x186   :  { %4996 = vmatpush.bf16.msra.mxu2 %v1977_v27  ;;  %v261_v49 = vunpack.c.3.s8 %v7880_v34  ;;  %v831_v10 = vcvt.s32.f32 %v255_v7  ;;  %v1766_v25 = vmul.f32 %v7339_v1, %v1184_v46  ;;  %v351_v43 = vunpack.c.2.s8 %v105_v53  ;;  %v7930_v46 = vld [vmem:[#allocation2 + $0x20] sm:$0xff] }
 0x187   :  { %5009 = vmatpush.bf16.msra.mxu3 %v2025_v44  ;;  %v1856_v18 = vmul.f32 %v7339_v1, %v1274_v54  ;;  %v357_v30 = vunpack.c.3.s8 %v105_v53  ;;  %v1862_v2 = vmul.f32 %v7339_v1, %v1280_v51  ;;  %v495_v48 = vunpack.c.2.s8 %v7898_v4  ;;  %v4731_v19 = vpop.f32.mrf.mxu1 }
 0x188   :  { %v837_v17 = vcvt.s32.f32 %v261_v49  ;;  %v1413_v28 = vmul.f32 %v7342_v3, %v831_v10  ;;  %v2144_v31 = vpack.c.bf16 %v1766_v25, %v1760_v32  ;;  %v927_v61 = vcvt.s32.f32 %v351_v43  ;;  %v7937_v43 = vld [vmem:[#allocation2 + $0xe0] sm:$0xff] }
 0x189   :  { %v933_v21 = vcvt.s32.f32 %v357_v30  ;;  %v501_v41 = vunpack.c.3.s8 %v7898_v4  ;;  %v2192_v26 = vpack.c.bf16 %v1862_v2, %v1856_v18  ;;  %v1071_v23 = vcvt.s32.f32 %v495_v48 }
 0x18a   :  { %v1419_v29 = vmul.f32 %v7342_v3, %v837_v17  ;;  %v591_v58 = vunpack.c.2.s8 %v7904_v42  ;;  %4974 = vmatpush.bf16.msra.mxu0 %v2144_v31  ;;  %v1509_v1 = vmul.f32 %v7342_v3, %v927_v61  ;;  %v597_v20 = vunpack.c.3.s8 %v7904_v42 }
 0x18b   :  { %v1515_v22 = vmul.f32 %v7342_v3, %v933_v21  ;;  %v1077_v14 = vcvt.s32.f32 %v501_v41  ;;  %4987 = vmatpush.bf16.msra.mxu1 %v2192_v26  ;;  %v1653_v52 = vmul.f32 %v7342_v3, %v1071_v23  ;;  %v243_v33 = vunpack.c.0.s8 %v7880_v34  ;;  %v4757_v50 = vpop.f32.mrf.mxu3  ;;  %v7948_v23 = vld [vmem:[#allocation2 + $0x2c0] sm:$0xff] }
 0x18c   :  { %v1971_v24 = vpack.c.bf16 %v1419_v29, %v1413_v28  ;;  %v1167_v5 = vcvt.s32.f32 %v591_v58  ;;  %v1173_v39 = vcvt.s32.f32 %v597_v20  ;;  %v249_v40 = vunpack.c.1.s8 %v7880_v34  ;;  %v7941_v28 = vld [vmem:[#allocation2 + $0x200] sm:$0xff]  ;;  %v4744_v41 = vpop.f32.mrf.mxu2 }
 0x18d   :  { %v2019_v13 = vpack.c.bf16 %v1515_v22, %v1509_v1  ;;  %v1659_v35 = vmul.f32 %v7342_v3, %v1077_v14  ;;  %4975 = vmatmul.bf16.vlgmr.msra.gmra.mxu0 %v7365_v8  ;;  %v819_v56 = vcvt.s32.f32 %v243_v33  ;;  %v339_v62 = vunpack.c.0.s8 %v105_v53 }
 0x18e   :  { %4997 = vmatpush.bf16.msra.mxu2 %v1971_v24  ;;  %v1749_v57 = vmul.f32 %v7342_v3, %v1167_v5  ;;  %v345_v45 = vunpack.c.1.s8 %v105_v53  ;;  %v1755_v6 = vmul.f32 %v7342_v3, %v1173_v39  ;;  %4988 = vmatmul.bf16.vlgmr.msra.gmra.mxu1 %v7367_v9  ;;  %v825_v27 = vcvt.s32.f32 %v249_v40 }
 0x18f   :  { %5010 = vmatpush.bf16.msra.mxu3 %v2019_v13  ;;  %v2091_v36 = vpack.c.bf16 %v1659_v35, %v1653_v52  ;;  %v483_v59 = vunpack.c.0.s8 %v7898_v4  ;;  %v1401_v47 = vmul.f32 %v7342_v3, %v819_v56  ;;  %v915_v34 = vcvt.s32.f32 %v339_v62 }
 0x190   :  { %v921_v7 = vcvt.s32.f32 %v345_v45  ;;  %v489_v44 = vunpack.c.1.s8 %v7898_v4  ;;  %v2139_v54 = vpack.c.bf16 %v1755_v6, %v1749_v57  ;;  %v1407_v53 = vmul.f32 %v7342_v3, %v825_v27 }
 0x191   :  { %5019 = vmatpush.bf16.msrb.mxu0 %v2091_v36  ;;  %v1059_v32 = vcvt.s32.f32 %v483_v59  ;;  %v579_v51 = vunpack.c.0.s8 %v7904_v42  ;;  %v1497_v49 = vmul.f32 %v7342_v3, %v915_v34  ;;  %v585_v18 = vunpack.c.1.s8 %v7904_v42 }
 0x192   :  { %v1503_v10 = vmul.f32 %v7342_v3, %v921_v7  ;;  %v1065_v25 = vcvt.s32.f32 %v489_v44  ;;  %5032 = vmatpush.bf16.msrb.mxu1 %v2139_v54  ;;  %v1965_v4 = vpack.c.bf16 %v1407_v53, %v1401_v47  ;;  %v231_v17 = vunpack.c.2.s8 %v7930_v46 }
 0x193   :  { %v1641_v30 = vmul.f32 %v7342_v3, %v1059_v32  ;;  %v1155_v2 = vcvt.s32.f32 %v579_v51  ;;  %v1161_v61 = vcvt.s32.f32 %v585_v18  ;;  %v237_v21 = vunpack.c.3.s8 %v7930_v46 }
 0x194   :  { %v2013_v48 = vpack.c.bf16 %v1503_v10, %v1497_v49  ;;  %v1647_v31 = vmul.f32 %v7342_v3, %v1065_v25  ;;  %4998 = vmatpush.bf16.msra.mxu2 %v1965_v4  ;;  %v807_v19 = vcvt.s32.f32 %v231_v17  ;;  %v327_v26 = vunpack.c.2.s8 %v7937_v43 }
 0x195   :  { %v1737_v42 = vmul.f32 %v7342_v3, %v1155_v2  ;;  %v333_v29 = vunpack.c.3.s8 %v7937_v43  ;;  %v1743_v1 = vmul.f32 %v7342_v3, %v1161_v61  ;;  %v813_v22 = vcvt.s32.f32 %v237_v21 }
 0x196   :  { %5011 = vmatpush.bf16.msra.mxu3 %v2013_v48  ;;  %v2085_v58 = vpack.c.bf16 %v1647_v31, %v1641_v30  ;;  %v471_v14 = vunpack.c.2.s8 %v7941_v28  ;;  %v1389_v20 = vmul.f32 %v7342_v3, %v807_v19  ;;  %v903_v24 = vcvt.s32.f32 %v327_v26  ;;  %v7972_v30 = vld [vmem:[#allocation2 + $0x3b0] sm:$0xff]  ;;  %v7976_v48 = vpop.f32.mrf.mxu0  ;;  %v7978_v31 = vpop.f32.mrf.mxu1 }
 0x197   :  { %v909_v52 = vcvt.s32.f32 %v333_v29  ;;  %v477_v5 = vunpack.c.3.s8 %v7941_v28  ;;  %v2133_v33 = vpack.c.bf16 %v1743_v1, %v1737_v42  ;;  %v1395_v13 = vmul.f32 %v7342_v3, %v813_v22  ;;  %v7985_v26 = vld [vmem:[#allocation2 + $0x470] sm:$0xff] }
 0x198   :  { %5020 = vmatpush.bf16.msrb.mxu0 %v2085_v58  ;;  %v1047_v35 = vcvt.s32.f32 %v471_v14  ;;  %v567_v39 = vunpack.c.2.s8 %v7948_v23  ;;  %v1485_v40 = vmul.f32 %v7342_v3, %v903_v24  ;;  %v573_v62 = vunpack.c.3.s8 %v7948_v23  ;;  %v7990_v14 = vld [vmem:[#allocation2 + $0x1d0] sm:$0xff] }
 0x199   :  { %v1491_v57 = vmul.f32 %v7342_v3, %v909_v52  ;;  %v1053_v56 = vcvt.s32.f32 %v477_v5  ;;  %5033 = vmatpush.bf16.msrb.mxu1 %v2133_v33  ;;  %v1959_v45 = vpack.c.bf16 %v1395_v13, %v1389_v20  ;;  %v4717_v27 = vadd.f32 %v7882_v11, %v7896_v63 }
 0x19a   :  { %v1629_v36 = vmul.f32 %v7342_v3, %v1047_v35  ;;  %v1143_v6 = vcvt.s32.f32 %v567_v39  ;;  %v1149_v34 = vcvt.s32.f32 %v573_v62  ;;  %v219_v7 = vunpack.c.0.s8 %v7930_v46  ;;  %v7995_v39 = vld [vmem:[#allocation2 + $0x290] sm:$0xff] }
 0x19b   :  { %v2007_v59 = vpack.c.bf16 %v1491_v57, %v1485_v40  ;;  %v1635_v47 = vmul.f32 %v7342_v3, %v1053_v56  ;;  %4999 = vmatpush.bf16.msra.mxu2 %v1959_v45  ;;  %v4730_v54 = vadd.f32 %v7884_v38, %v4717_v27  ;;  %v225_v53 = vunpack.c.1.s8 %v7930_v46 }
 0x19c   :  { %v1725_v44 = vmul.f32 %v7342_v3, %v1143_v6  ;;  %v315_v32 = vunpack.c.0.s8 %v7937_v43  ;;  %v1731_v49 = vmul.f32 %v7342_v3, %v1149_v34  ;;  %v795_v11 = vcvt.s32.f32 %v219_v7 }
 0x19d   :  { %5012 = vmatpush.bf16.msra.mxu3 %v2007_v59  ;;  %v2079_v51 = vpack.c.bf16 %v1635_v47, %v1629_v36  ;;  %v321_v63 = vunpack.c.1.s8 %v7937_v43  ;;  %v801_v10 = vcvt.s32.f32 %v225_v53  ;;  %v459_v18 = vunpack.c.0.s8 %v7941_v28 }
 0x19e   :  { %v891_v25 = vcvt.s32.f32 %v315_v32  ;;  %v465_v4 = vunpack.c.1.s8 %v7941_v28  ;;  %v2127_v38 = vpack.c.bf16 %v1731_v49, %v1725_v44  ;;  %v1377_v46 = vmul.f32 %v7342_v3, %v795_v11  ;;  %v4770_v44 = vpop.f32.mrf.mxu0 }
 0x19f   :  { %5021 = vmatpush.bf16.msrb.mxu0 %v2079_v51  ;;  %v897_v2 = vcvt.s32.f32 %v321_v63  ;;  %v555_v17 = vunpack.c.0.s8 %v7948_v23  ;;  %v1383_v43 = vmul.f32 %v7342_v3, %v801_v10  ;;  %v1035_v21 = vcvt.s32.f32 %v459_v18 }
 0x1a0   :  { %v1473_v61 = vmul.f32 %v7342_v3, %v891_v25  ;;  %v1041_v41 = vcvt.s32.f32 %v465_v4  ;;  %5034 = vmatpush.bf16.msrb.mxu1 %v2127_v38  ;;  %v561_v50 = vunpack.c.1.s8 %v7948_v23  ;;  %v687_v19 = vunpack.c.2.s8 %v7972_v30  ;;  %v6843_v4 = vld [vmem:[%s10189_s7 + $0x28] sm:$0x7f] }
 0x1a1   :  { %v1479_v28 = vmul.f32 %v7342_v3, %v897_v2  ;;  %v1131_v42 = vcvt.s32.f32 %v555_v17  ;;  %v1953_v29 = vpack.c.bf16 %v1383_v43, %v1377_v46  ;;  %v1617_v58 = vmul.f32 %v7342_v3, %v1035_v21 }
 0x1a2   :  { %v1623_v1 = vmul.f32 %v7342_v3, %v1041_v41  ;;  %v693_v22 = vunpack.c.3.s8 %v7972_v30  ;;  %v1137_v24 = vcvt.s32.f32 %v561_v50  ;;  %v1263_v5 = vcvt.s32.f32 %v687_v19  ;;  %v8027_v19 = vpop.f32.mrf.mxu2 }
 0x1a3   :  { %v2001_v20 = vpack.c.bf16 %v1479_v28, %v1473_v61  ;;  %v1713_v52 = vmul.f32 %v7342_v3, %v1131_v42  ;;  %5000 = vmatpush.bf16.msra.mxu2 %v1953_v29  ;;  %v783_v13 = vunpack.c.2.s8 %v7985_v26  ;;  %v789_v35 = vunpack.c.3.s8 %v7985_v26  ;;  %v8029_v29 = vpop.f32.mrf.mxu3 }
 0x1a4   :  { %v2073_v23 = vpack.c.bf16 %v1623_v1, %v1617_v58  ;;  %v1269_v33 = vcvt.s32.f32 %v693_v22  ;;  %v1719_v40 = vmul.f32 %v7342_v3, %v1137_v24  ;;  %v1845_v57 = vmul.f32 %v7342_v3, %v1263_v5 }
 0x1a5   :  { %5013 = vmatpush.bf16.msra.mxu3 %v2001_v20  ;;  %v4743_v56 = vadd.f32 %v7917_v55, %v4730_v54  ;;  %v447_v62 = vunpack.c.2.s8 %v7990_v14  ;;  %v1359_v36 = vcvt.s32.f32 %v783_v13  ;;  %v1365_v6 = vcvt.s32.f32 %v789_v35  ;;  %v4783_v55 = vpop.f32.mrf.mxu1 }
 0x1a6   :  { %5022 = vmatpush.bf16.msrb.mxu0 %v2073_v23  ;;  %v1851_v45 = vmul.f32 %v7342_v3, %v1269_v33  ;;  %v453_v27 = vunpack.c.3.s8 %v7990_v14  ;;  %v2121_v59 = vpack.c.bf16 %v1719_v40, %v1713_v52  ;;  %5001 = vmatmul.bf16.vlgmr.msra.gmra.mxu2 %v7374_v12  ;;  %v543_v7 = vunpack.c.2.s8 %v7995_v39 }
 0x1a7   :  { %v8004_v47 = vadd.f32 %v7919_v60, %v4743_v56  ;;  %v1023_v34 = vcvt.s32.f32 %v447_v62  ;;  %v1941_v53 = vmul.f32 %v7342_v3, %v1359_v36  ;;  %v1947_v32 = vmul.f32 %v7342_v3, %v1365_v6  ;;  %v8045_v36 = vld [vmem:[#allocation2 + $0x1a0] sm:$0xff] }
 0x1a8   :  { %v2187_v54 = vpack.c.bf16 %v1851_v45, %v1845_v57  ;;  %5014 = vmatmul.bf16.vlgmr.msra.gmra.mxu3 %v7376_v15  ;;  %v1029_v51 = vcvt.s32.f32 %v453_v27  ;;  %5035 = vmatpush.bf16.msrb.mxu1 %v2121_v59  ;;  %v549_v60 = vunpack.c.3.s8 %v7995_v39  ;;  %v1119_v11 = vcvt.s32.f32 %v543_v7 }
 0x1a9   :  { %v1605_v49 = vmul.f32 %v7342_v3, %v1023_v34  ;;  %v2235_v63 = vpack.c.bf16 %v1947_v32, %v1941_v53  ;;  %v675_v25 = vunpack.c.0.s8 %v7972_v30  ;;  %v681_v18 = vunpack.c.1.s8 %v7972_v30 }
 0x1aa   :  { %5045 = vmatpush.bf16.msrb.mxu2 %v2187_v54  ;;  %v1611_v10 = vmul.f32 %v7342_v3, %v1029_v51  ;;  %v8019_v38 = vperm.slane %v6843_v4, 5  ;;  %v1125_v46 = vcvt.s32.f32 %v549_v60  ;;  %v1701_v2 = vmul.f32 %v7342_v3, %v1119_v11 }
 0x1ab   :  { %v771_v17 = vunpack.c.0.s8 %v7985_v26  ;;  %5058 = vmatpush.bf16.msrb.mxu3 %v2235_v63  ;;  %v1251_v61 = vcvt.s32.f32 %v675_v25  ;;  %v1257_v21 = vcvt.s32.f32 %v681_v18  ;;  %v777_v41 = vunpack.c.1.s8 %v7985_v26  ;;  %v8034_v26 = vld [vmem:[#allocation2 + $0x380] sm:$0xff]  ;;  %v4796_v25 = vpop.f32.mrf.mxu2  ;;  %v4809_v18 = vpop.f32.mrf.mxu3 }
 0x1ac   :  { %v2067_v43 = vpack.c.bf16 %v1611_v10, %v1605_v49  ;;  %v1707_v28 = vmul.f32 %v7342_v3, %v1125_v46  ;;  %v435_v50 = vunpack.c.0.s8 %v7990_v14  ;;  %v441_v42 = vunpack.c.1.s8 %v7990_v14  ;;  %v8037_v14 = vld [vmem:[#allocation2 + $0x440] sm:$0xff]  ;;  %v94_v25 = vld [vmem:[#allocation2 + $0xb8] sm:$0xff] }
 0x1ad   :  { %v1347_v30 = vcvt.s32.f32 %v771_v17  ;;  %v1833_v58 = vmul.f32 %v7342_v3, %v1251_v61  ;;  %v1839_v1 = vmul.f32 %v7342_v3, %v1257_v21  ;;  %v1353_v22 = vcvt.s32.f32 %v777_v41 }
 0x1ae   :  { %5023 = vmatpush.bf16.msrb.mxu0 %v2067_v43  ;;  %v531_v20 = vunpack.c.0.s8 %v7995_v39  ;;  %v2115_v24 = vpack.c.bf16 %v1707_v28, %v1701_v2  ;;  %v1011_v5 = vcvt.s32.f32 %v435_v50  ;;  %v1017_v23 = vcvt.s32.f32 %v441_v42  ;;  %v6844_v50 = vld [vmem:[%s10189_s7 + $0x8] sm:$0x7f] }
 0x1af   :  { %v1929_v52 = vmul.f32 %v7342_v3, %v1347_v30  ;;  %v2181_v33 = vpack.c.bf16 %v1839_v1, %v1833_v58  ;;  %v1935_v13 = vmul.f32 %v7342_v3, %v1353_v22  ;;  %v537_v35 = vunpack.c.1.s8 %v7995_v39  ;;  %v8049_v39 = vld [vmem:[#allocation2 + $0x260] sm:$0xff] }
 0x1b0   :  { %v1107_v40 = vcvt.s32.f32 %v531_v20  ;;  %5036 = vmatpush.bf16.msrb.mxu1 %v2115_v24  ;;  %v1593_v57 = vmul.f32 %v7342_v3, %v1011_v5  ;;  %v1599_v56 = vmul.f32 %v7342_v3, %v1017_v23  ;;  %v663_v62 = vunpack.c.2.s8 %v8034_v26 }
 0x1b1   :  { %v669_v45 = vunpack.c.3.s8 %v8034_v26  ;;  %5046 = vmatpush.bf16.msrb.mxu2 %v2181_v33  ;;  %v2229_v6 = vpack.c.bf16 %v1935_v13, %v1929_v52  ;;  %v1113_v27 = vcvt.s32.f32 %v537_v35  ;;  %v759_v34 = vunpack.c.2.s8 %v8037_v14 }
 0x1b2   :  { %v1689_v59 = vmul.f32 %v7342_v3, %v1107_v40  ;;  %v2061_v7 = vpack.c.bf16 %v1599_v56, %v1593_v57  ;;  %v1239_v44 = vcvt.s32.f32 %v663_v62  ;;  %v765_v54 = vunpack.c.3.s8 %v8037_v14  ;;  %v8074_v56 = vpop.f32.mrf.mxu0  ;;  %v8076_v62 = vpop.f32.mrf.mxu1 }
 0x1b3   :  { %v1245_v55 = vcvt.s32.f32 %v669_v45  ;;  %5059 = vmatpush.bf16.msrb.mxu3 %v2229_v6  ;;  %v1695_v53 = vmul.f32 %v7342_v3, %v1113_v27  ;;  %v1335_v32 = vcvt.s32.f32 %v759_v34  ;;  %v423_v51 = vunpack.c.2.s8 %v8045_v36  ;;  %v8081_v27 = vld [vmem:[#allocation2 + $0x350] sm:$0xff] }
 0x1b4   :  { %v429_v49 = vunpack.c.3.s8 %v8045_v36  ;;  %5024 = vmatpush.bf16.msrb.mxu0 %v2061_v7  ;;  %v1821_v60 = vmul.f32 %v7342_v3, %v1239_v44  ;;  %v1341_v63 = vcvt.s32.f32 %v765_v54  ;;  %v519_v10 = vunpack.c.2.s8 %v8049_v39 }
 0x1b5   :  { %v1827_v11 = vmul.f32 %v7342_v3, %v1245_v55  ;;  %v2109_v4 = vpack.c.bf16 %v1695_v53, %v1689_v59  ;;  %v1917_v46 = vmul.f32 %v7342_v3, %v1335_v32  ;;  %v999_v2 = vcvt.s32.f32 %v423_v51 }
 0x1b6   :  { %v1005_v17 = vcvt.s32.f32 %v429_v49  ;;  %v1923_v61 = vmul.f32 %v7342_v3, %v1341_v63  ;;  %v525_v21 = vunpack.c.3.s8 %v8049_v39  ;;  %v1095_v41 = vcvt.s32.f32 %v519_v10 }
 0x1b7   :  { %v2175_v43 = vpack.c.bf16 %v1827_v11, %v1821_v60  ;;  %5037 = vmatpush.bf16.msrb.mxu1 %v2109_v4  ;;  %v1581_v28 = vmul.f32 %v7342_v3, %v999_v2  ;;  %v4676_v42 = vperm.slane %v6844_v50, 1  ;;  %v651_v58 = vunpack.c.0.s8 %v8034_v26  ;;  %v8096_v2 = vld [vmem:[#allocation2 + $0x178] sm:$0xff] }
 0x1b8   :  { %v1587_v30 = vmul.f32 %v7342_v3, %v1005_v17  ;;  %v2223_v1 = vpack.c.bf16 %v1923_v61, %v1917_v46  ;;  %v1101_v22 = vcvt.s32.f32 %v525_v21  ;;  %v1677_v20 = vmul.f32 %v7342_v3, %v1095_v41 }
 0x1b9   :  { %5047 = vmatpush.bf16.msrb.mxu2 %v2175_v43  ;;  %v657_v24 = vunpack.c.1.s8 %v8034_v26  ;;  %v4769_v5 = vadd.f32 %v7976_v48, %v4676_v42  ;;  %v1227_v23 = vcvt.s32.f32 %v651_v58  ;;  %v747_v33 = vunpack.c.0.s8 %v8037_v14 }
 0x1ba   :  { %v2055_v52 = vpack.c.bf16 %v1587_v30, %v1581_v28  ;;  %5060 = vmatpush.bf16.msrb.mxu3 %v2223_v1  ;;  %v1683_v13 = vmul.f32 %v7342_v3, %v1101_v22  ;;  %v753_v40 = vunpack.c.1.s8 %v8037_v14  ;;  %v411_v57 = vunpack.c.0.s8 %v8045_v36  ;;  %v4822_v42 = vpop.f32.mrf.mxu0  ;;  %v4835_v58 = vpop.f32.mrf.mxu1 }
 0x1bb   :  { %v1233_v35 = vcvt.s32.f32 %v657_v24  ;;  %v4782_v26 = vadd.f32 %v7978_v31, %v4769_v5  ;;  %v1809_v48 = vmul.f32 %v7342_v3, %v1227_v23  ;;  %v1323_v45 = vcvt.s32.f32 %v747_v33  ;;  %v8087_v31 = vld [vmem:[#allocation2 + $0x410] sm:$0xff] }
 0x1bc   :  { %5025 = vmatpush.bf16.msrb.mxu0 %v2055_v52  ;;  %v417_v6 = vunpack.c.1.s8 %v8045_v36  ;;  %v2103_v59 = vpack.c.bf16 %v1683_v13, %v1677_v20  ;;  %v1329_v14 = vcvt.s32.f32 %v753_v40  ;;  %v987_v7 = vcvt.s32.f32 %v411_v57 }
 0x1bd   :  { %v1815_v34 = vmul.f32 %v7342_v3, %v1233_v35  ;;  %v1905_v44 = vmul.f32 %v7342_v3, %v1323_v45  ;;  %v507_v54 = vunpack.c.0.s8 %v8049_v39  ;;  %v513_v53 = vunpack.c.1.s8 %v8049_v39 }
 0x1be   :  { %v993_v55 = vcvt.s32.f32 %v417_v6  ;;  %5038 = vmatpush.bf16.msrb.mxu1 %v2103_v59  ;;  %v1911_v36 = vmul.f32 %v7342_v3, %v1329_v14  ;;  %v1569_v51 = vmul.f32 %v7342_v3, %v987_v7  ;;  %v639_v49 = vunpack.c.2.s8 %v8081_v27 }
 0x1bf   :  { %v2169_v32 = vpack.c.bf16 %v1815_v34, %v1809_v48  ;;  %v1083_v11 = vcvt.s32.f32 %v507_v54  ;;  %v1089_v63 = vcvt.s32.f32 %v513_v53  ;;  %v645_v10 = vunpack.c.3.s8 %v8081_v27 }
 0x1c0   :  { %v1575_v60 = vmul.f32 %v7342_v3, %v993_v55  ;;  %v2217_v18 = vpack.c.bf16 %v1911_v36, %v1905_v44  ;;  %v1215_v39 = vcvt.s32.f32 %v639_v49  ;;  %v735_v4 = vunpack.c.2.s8 %v8087_v31  ;;  %v8120_v49 = vld [vmem:[#allocation2 + $0x320] sm:$0xff] }
 0x1c1   :  { %5048 = vmatpush.bf16.msrb.mxu2 %v2169_v32  ;;  %v741_v46 = vunpack.c.3.s8 %v8087_v31  ;;  %v1665_v43 = vmul.f32 %v7342_v3, %v1083_v11  ;;  %v1671_v61 = vmul.f32 %v7342_v3, %v1089_v63  ;;  %v1221_v21 = vcvt.s32.f32 %v645_v10 }
 0x1c2   :  { %v2049_v17 = vpack.c.bf16 %v1575_v60, %v1569_v51  ;;  %5061 = vmatpush.bf16.msrb.mxu3 %v2217_v18  ;;  %v1797_v41 = vmul.f32 %v7342_v3, %v1215_v39  ;;  %v1311_v28 = vcvt.s32.f32 %v735_v4  ;;  %v304_v50 = vunpack.c.2.s8 %v94_v25 }
 0x1c3   :  { %v1317_v30 = vcvt.s32.f32 %v741_v46  ;;  %v2097_v1 = vpack.c.bf16 %v1671_v61, %v1665_v43  ;;  %v1803_v22 = vmul.f32 %v7342_v3, %v1221_v21  ;;  %v310_v20 = vunpack.c.3.s8 %v94_v25 }
 0x1c4   :  { %5026 = vmatpush.bf16.msrb.mxu0 %v2049_v17  ;;  %v400_v24 = vunpack.c.2.s8 %v8096_v2  ;;  %v1893_v52 = vmul.f32 %v7342_v3, %v1311_v28  ;;  %v880_v23 = vcvt.s32.f32 %v304_v50  ;;  %v406_v33 = vunpack.c.3.s8 %v8096_v2  ;;  %v195_v17 = vld [vmem:[#allocation2 + $0x3e0] sm:$0xff]  ;;  %v8131_v28 = vld [vmem:[#allocation2 + $0x88] sm:$0xff] }
 0x1c5   :  { %v1899_v5 = vmul.f32 %v7342_v3, %v1317_v30  ;;  %5039 = vmatpush.bf16.msrb.mxu1 %v2097_v1  ;;  %v2163_v13 = vpack.c.bf16 %v1803_v22, %v1797_v41  ;;  %v886_v35 = vcvt.s32.f32 %v310_v20  ;;  %v4795_v57 = vadd.f32 %v8027_v19, %v4782_v26  ;;  %v8134_v1 = vld [vmem:[#allocation2 + $0x148] sm:$0xff] }
 0x1c6   :  { %v976_v40 = vcvt.s32.f32 %v400_v24  ;;  %v1462_v45 = vmul.f32 %v8019_v38, %v880_v23  ;;  %v982_v6 = vcvt.s32.f32 %v406_v33  ;;  %v627_v59 = vunpack.c.0.s8 %v8081_v27 }
 0x1c7   :  { %v2211_v48 = vpack.c.bf16 %v1899_v5, %v1893_v52  ;;  %5027 = vmatmul.bf16.vlgmr.msrb.gmra.mxu0 %v7463_v37  ;;  %5049 = vmatpush.bf16.msrb.mxu2 %v2163_v13  ;;  %v1468_v34 = vmul.f32 %v8019_v38, %v886_v35  ;;  %v8113_v7 = vadd.f32 %v8029_v29, %v4795_v57  ;;  %v633_v44 = vunpack.c.1.s8 %v8081_v27 }
 0x1c8   :  { %v1558_v14 = vmul.f32 %v8019_v38, %v976_v40  ;;  %v1564_v19 = vmul.f32 %v8019_v38, %v982_v6  ;;  %5040 = vmatmul.bf16.vlgmr.msrb.gmra.mxu1 %v7465_v16  ;;  %v1203_v26 = vcvt.s32.f32 %v627_v59  ;;  %v723_v55 = vunpack.c.0.s8 %v8087_v31 }
 0x1c9   :  { %5062 = vmatpush.bf16.msrb.mxu3 %v2211_v48  ;;  %v729_v54 = vunpack.c.1.s8 %v8087_v31  ;;  %v1996_v53 = vpack.c.bf16 %v1468_v34, %v1462_v45  ;;  %v1209_v32 = vcvt.s32.f32 %v633_v44  ;;  %v292_v36 = vunpack.c.0.s8 %v94_v25 }
 0x1ca   :  { %v298_v51 = vunpack.c.1.s8 %v94_v25  ;;  %v2044_v29 = vpack.c.bf16 %v1564_v19, %v1558_v14  ;;  %v1785_v60 = vmul.f32 %v7342_v3, %v1203_v26  ;;  %v1299_v27 = vcvt.s32.f32 %v723_v55 }
 0x1cb   :  { %v1305_v11 = vcvt.s32.f32 %v729_v54  ;;  %5071 = vmatpush.bf16.msra.mxu0 %v1996_v53  ;;  %v1791_v63 = vmul.f32 %v7342_v3, %v1209_v32  ;;  %v868_v10 = vcvt.s32.f32 %v292_v36  ;;  %v388_v39 = vunpack.c.0.s8 %v8096_v2 }
 0x1cc   :  { %v874_v18 = vcvt.s32.f32 %v298_v51  ;;  %5084 = vmatpush.bf16.msra.mxu1 %v2044_v29  ;;  %v1881_v31 = vmul.f32 %v7342_v3, %v1299_v27  ;;  %v394_v25 = vunpack.c.1.s8 %v8096_v2  ;;  %v615_v46 = vunpack.c.2.s8 %v8120_v49 }
 0x1cd   :  { %v1887_v4 = vmul.f32 %v7342_v3, %v1305_v11  ;;  %v2157_v43 = vpack.c.bf16 %v1791_v63, %v1785_v60  ;;  %v1450_v61 = vmul.f32 %v8019_v38, %v868_v10  ;;  %v964_v41 = vcvt.s32.f32 %v388_v39 }
 0x1ce   :  { %v1456_v21 = vmul.f32 %v8019_v38, %v874_v18  ;;  %v970_v50 = vcvt.s32.f32 %v394_v25  ;;  %v621_v42 = vunpack.c.3.s8 %v8120_v49  ;;  %v1191_v58 = vcvt.s32.f32 %v615_v46 }
 0x1cf   :  { %v2205_v30 = vpack.c.bf16 %v1887_v4, %v1881_v31  ;;  %5050 = vmatpush.bf16.msrb.mxu2 %v2157_v43  ;;  %v1546_v22 = vmul.f32 %v8019_v38, %v964_v41  ;;  %v711_v20 = vunpack.c.2.s8 %v195_v17  ;;  %v717_v24 = vunpack.c.3.s8 %v195_v17  ;;  %v8163_v41 = vld [vmem:[#allocation2 + $0x2f8] sm:$0xff] }
 0x1d0   :  { %v1990_v2 = vpack.c.bf16 %v1456_v21, %v1450_v61  ;;  %v1552_v52 = vmul.f32 %v8019_v38, %v970_v50  ;;  %v1197_v5 = vcvt.s32.f32 %v621_v42  ;;  %v1773_v23 = vmul.f32 %v7342_v3, %v1191_v58  ;;  %v142_v61 = vld [vmem:[#allocation2 + $0x238] sm:$0xff] }
 0x1d1   :  { %5063 = vmatpush.bf16.msrb.mxu3 %v2205_v30  ;;  %v280_v33 = vunpack.c.2.s8 %v8131_v28  ;;  %v1287_v13 = vcvt.s32.f32 %v711_v20  ;;  %v1293_v35 = vcvt.s32.f32 %v717_v24  ;;  %v286_v40 = vunpack.c.3.s8 %v8131_v28  ;;  %v8168_v24 = vld [vmem:[#allocation2 + $0x58] sm:$0xff] }
 0x1d2   :  { %5072 = vmatpush.bf16.msra.mxu0 %v1990_v2  ;;  %v376_v57 = vunpack.c.2.s8 %v8134_v1  ;;  %v2038_v48 = vpack.c.bf16 %v1552_v52, %v1546_v22  ;;  %v1779_v45 = vmul.f32 %v7342_v3, %v1197_v5  ;;  %v382_v59 = vunpack.c.3.s8 %v8134_v1 }
 0x1d3   :  { %v856_v6 = vcvt.s32.f32 %v280_v33  ;;  %v1869_v34 = vmul.f32 %v7342_v3, %v1287_v13  ;;  %v1875_v14 = vmul.f32 %v7342_v3, %v1293_v35  ;;  %v862_v44 = vcvt.s32.f32 %v286_v40 }
 0x1d4   :  { %v952_v19 = vcvt.s32.f32 %v376_v57  ;;  %5085 = vmatpush.bf16.msra.mxu1 %v2038_v48  ;;  %v2151_v26 = vpack.c.bf16 %v1779_v45, %v1773_v23  ;;  %v958_v54 = vcvt.s32.f32 %v382_v59  ;;  %v4821_v53 = vadd.f32 %v8074_v56, %v8113_v7 }
 0x1d5   :  { %v1438_v55 = vmul.f32 %v8019_v38, %v856_v6  ;;  %v2199_v32 = vpack.c.bf16 %v1875_v14, %v1869_v34  ;;  %v1444_v36 = vmul.f32 %v8019_v38, %v862_v44  ;;  %v603_v29 = vunpack.c.0.s8 %v8120_v49 }
 0x1d6   :  { %v1534_v51 = vmul.f32 %v8019_v38, %v952_v19  ;;  %5051 = vmatpush.bf16.msrb.mxu2 %v2151_v26  ;;  %v1540_v60 = vmul.f32 %v8019_v38, %v958_v54  ;;  %v8154_v27 = vadd.f32 %v8076_v62, %v4821_v53  ;;  %v609_v11 = vunpack.c.1.s8 %v8120_v49 }
 0x1d7   :  { %v699_v63 = vunpack.c.0.s8 %v195_v17  ;;  %5064 = vmatpush.bf16.msrb.mxu3 %v2199_v32  ;;  %v1984_v10 = vpack.c.bf16 %v1444_v36, %v1438_v55  ;;  %v1179_v18 = vcvt.s32.f32 %v603_v29  ;;  %v705_v56 = vunpack.c.1.s8 %v195_v17 }
 0x1d8   :  { %v268_v7 = vunpack.c.0.s8 %v8131_v28  ;;  %v2032_v39 = vpack.c.bf16 %v1540_v60, %v1534_v51  ;;  %v1185_v31 = vcvt.s32.f32 %v609_v11  ;;  %v274_v43 = vunpack.c.1.s8 %v8131_v28 }
 0x1d9   :  { %v1275_v4 = vcvt.s32.f32 %v699_v63  ;;  %5073 = vmatpush.bf16.msra.mxu0 %v1984_v10  ;;  %v1761_v25 = vmul.f32 %v7342_v3, %v1179_v18  ;;  %v1281_v46 = vcvt.s32.f32 %v705_v56  ;;  %v364_v17 = vunpack.c.0.s8 %v8134_v1 }
 0x1da   :  { %v844_v62 = vcvt.s32.f32 %v268_v7  ;;  %5086 = vmatpush.bf16.msra.mxu1 %v2032_v39  ;;  %v1767_v49 = vmul.f32 %v7342_v3, %v1185_v31  ;;  %v850_v50 = vcvt.s32.f32 %v274_v43  ;;  %v370_v58 = vunpack.c.1.s8 %v8134_v1  ;;  %v8174_v1 = vld [vmem:[#allocation2 + $0x118] sm:$0xff] }
 0x1db   :  { %v1857_v21 = vmul.f32 %v7342_v3, %v1275_v4  ;;  %v1863_v30 = vmul.f32 %v7342_v3, %v1281_v46  ;;  %v940_v28 = vcvt.s32.f32 %v364_v17  ;;  %v496_v22 = vunpack.c.2.s8 %v142_v61 }
 0x1dc   :  { %v1426_v42 = vmul.f32 %v8019_v38, %v844_v62  ;;  %v2145_v2 = vpack.c.bf16 %v1767_v49, %v1761_v25  ;;  %v502_v20 = vunpack.c.3.s8 %v142_v61  ;;  %v1432_v5 = vmul.f32 %v8019_v38, %v850_v50  ;;  %v8194_v49 = vpop.f32.mrf.mxu2 }
 0x1dd   :  { %v2193_v52 = vpack.c.bf16 %v1863_v30, %v1857_v21  ;;  %v946_v23 = vcvt.s32.f32 %v370_v58  ;;  %v592_v33 = vunpack.c.2.s8 %v8163_v41  ;;  %v1522_v3 = vmul.f32 %v8019_v38, %v940_v28  ;;  %v8196_v21 = vpop.f32.mrf.mxu3  ;;  %v136_v58 = vld [vmem:[#allocation2 + $0x208] sm:$0xff] }
 0x1de   :  { %5052 = vmatpush.bf16.msrb.mxu2 %v2145_v2  ;;  %v1072_v13 = vcvt.s32.f32 %v496_v22  ;;  %v1078_v35 = vcvt.s32.f32 %v502_v20  ;;  %v598_v40 = vunpack.c.3.s8 %v8163_v41  ;;  %v1978_v57 = vpack.c.bf16 %v1432_v5, %v1426_v42  ;;  %v8203_v20 = vld [vmem:[#allocation2 + $0x2c8] sm:$0xff] }
 0x1df   :  { %5065 = vmatpush.bf16.msrb.mxu3 %v2193_v52  ;;  %v1528_v48 = vmul.f32 %v8019_v38, %v946_v23  ;;  %v1168_v45 = vcvt.s32.f32 %v592_v33  ;;  %v256_v6 = vunpack.c.2.s8 %v8168_v24  ;;  %v262_v44 = vunpack.c.3.s8 %v8168_v24 }
 0x1e0   :  { %v1654_v59 = vmul.f32 %v8019_v38, %v1072_v13  ;;  %v1660_v34 = vmul.f32 %v8019_v38, %v1078_v35  ;;  %v1174_v14 = vcvt.s32.f32 %v598_v40  ;;  %5074 = vmatpush.bf16.msra.mxu0 %v1978_v57  ;;  %v352_v54 = vunpack.c.2.s8 %v8174_v1  ;;  %v8208_v40 = vld [vmem:[#allocation2 + $0x28] sm:$0xff] }
 0x1e1   :  { %v2026_v19 = vpack.c.bf16 %v1528_v48, %v1522_v3  ;;  %v1750_v26 = vmul.f32 %v8019_v38, %v1168_v45  ;;  %5053 = vmatmul.bf16.vlgmr.msrb.gmra.mxu2 %v7365_v8  ;;  %v832_v55 = vcvt.s32.f32 %v256_v6  ;;  %v838_v36 = vcvt.s32.f32 %v262_v44  ;;  %v8214_v44 = vld [vmem:[#allocation2 + $0xe8] sm:$0xff] }
 0x1e2   :  { %v2092_v53 = vpack.c.bf16 %v1660_v34, %v1654_v59  ;;  %v1756_v32 = vmul.f32 %v8019_v38, %v1174_v14  ;;  %5066 = vmatmul.bf16.vlgmr.msrb.gmra.mxu3 %v7367_v9  ;;  %v358_v51 = vunpack.c.3.s8 %v8174_v1  ;;  %v928_v60 = vcvt.s32.f32 %v352_v54 }
 0x1e3   :  { %5087 = vmatpush.bf16.msra.mxu1 %v2026_v19  ;;  %v1414_v29 = vmul.f32 %v8019_v38, %v832_v55  ;;  %v484_v11 = vunpack.c.0.s8 %v142_v61  ;;  %v490_v63 = vunpack.c.1.s8 %v142_v61  ;;  %v1420_v18 = vmul.f32 %v8019_v38, %v838_v36 }
 0x1e4   :  { %5097 = vmatpush.bf16.msra.mxu2 %v2092_v53  ;;  %v2140_v10 = vpack.c.bf16 %v1756_v32, %v1750_v26  ;;  %v934_v56 = vcvt.s32.f32 %v358_v51  ;;  %v580_v7 = vunpack.c.0.s8 %v8163_v41  ;;  %v1510_v39 = vmul.f32 %v8019_v38, %v928_v60 }
 0x1e5   :  { %v1060_v31 = vcvt.s32.f32 %v484_v11  ;;  %v1066_v4 = vcvt.s32.f32 %v490_v63  ;;  %v586_v25 = vunpack.c.1.s8 %v8163_v41  ;;  %v1972_v46 = vpack.c.bf16 %v1420_v18, %v1414_v29  ;;  %v4848_v29 = vpop.f32.mrf.mxu2  ;;  %v4861_v60 = vpop.f32.mrf.mxu3 }
 0x1e6   :  { %5110 = vmatpush.bf16.msra.mxu3 %v2140_v10  ;;  %v1516_v43 = vmul.f32 %v8019_v38, %v934_v56  ;;  %v1156_v62 = vcvt.s32.f32 %v580_v7  ;;  %v244_v61 = vunpack.c.0.s8 %v8168_v24  ;;  %v250_v42 = vunpack.c.1.s8 %v8168_v24 }
 0x1e7   :  { %v1642_v17 = vmul.f32 %v8019_v38, %v1060_v31  ;;  %v1648_v30 = vmul.f32 %v8019_v38, %v1066_v4  ;;  %v1162_v50 = vcvt.s32.f32 %v586_v25  ;;  %5075 = vmatpush.bf16.msra.mxu0 %v1972_v46  ;;  %v340_v22 = vunpack.c.0.s8 %v8174_v1 }
 0x1e8   :  { %v2020_v41 = vpack.c.bf16 %v1516_v43, %v1510_v39  ;;  %v1738_v2 = vmul.f32 %v8019_v38, %v1156_v62  ;;  %v820_v28 = vcvt.s32.f32 %v244_v61  ;;  %v826_v23 = vcvt.s32.f32 %v250_v42 }
 0x1e9   :  { %v2086_v52 = vpack.c.bf16 %v1648_v30, %v1642_v17  ;;  %v1744_v5 = vmul.f32 %v8019_v38, %v1162_v50  ;;  %v346_v33 = vunpack.c.1.s8 %v8174_v1  ;;  %v916_v24 = vcvt.s32.f32 %v340_v22 }
 0x1ea   :  { %5088 = vmatpush.bf16.msra.mxu1 %v2020_v41  ;;  %v1402_v3 = vmul.f32 %v8019_v38, %v820_v28  ;;  %v472_v13 = vunpack.c.2.s8 %v136_v58  ;;  %v478_v35 = vunpack.c.3.s8 %v136_v58  ;;  %v1408_v48 = vmul.f32 %v8019_v38, %v826_v23  ;;  %v8234_v23 = vpop.f32.mrf.mxu1 }
 0x1eb   :  { %5098 = vmatpush.bf16.msra.mxu2 %v2086_v52  ;;  %v2134_v57 = vpack.c.bf16 %v1744_v5, %v1738_v2  ;;  %v922_v45 = vcvt.s32.f32 %v346_v33  ;;  %v568_v6 = vunpack.c.2.s8 %v8203_v20  ;;  %v1498_v59 = vmul.f32 %v8019_v38, %v916_v24  ;;  %v8232_v5 = vpop.f32.mrf.mxu0 }
 0x1ec   :  { %v1048_v34 = vcvt.s32.f32 %v472_v13  ;;  %v1054_v14 = vcvt.s32.f32 %v478_v35  ;;  %v574_v1 = vunpack.c.3.s8 %v8203_v20  ;;  %v1966_v19 = vpack.c.bf16 %v1408_v48, %v1402_v3  ;;  %v8239_v35 = vld [vmem:[#allocation2 + $0x1d8] sm:$0xff] }
 0x1ed   :  { %5111 = vmatpush.bf16.msra.mxu3 %v2134_v57  ;;  %v1504_v26 = vmul.f32 %v8019_v38, %v922_v45  ;;  %v1144_v55 = vcvt.s32.f32 %v568_v6  ;;  %v232_v54 = vunpack.c.2.s8 %v8208_v40  ;;  %v238_v51 = vunpack.c.3.s8 %v8208_v40  ;;  %v8243_v6 = vld [vmem:[#allocation2 + $0x298] sm:$0xff] }
 0x1ee   :  { %v1630_v53 = vmul.f32 %v8019_v38, %v1048_v34  ;;  %v1636_v32 = vmul.f32 %v8019_v38, %v1054_v14  ;;  %v1150_v36 = vcvt.s32.f32 %v574_v1  ;;  %5076 = vmatpush.bf16.msra.mxu0 %v1966_v19  ;;  %v328_v18 = vunpack.c.2.s8 %v8214_v44 }
 0x1ef   :  { %v2014_v11 = vpack.c.bf16 %v1504_v26, %v1498_v59  ;;  %v1726_v63 = vmul.f32 %v8019_v38, %v1144_v55  ;;  %v808_v10 = vcvt.s32.f32 %v232_v54  ;;  %v814_v39 = vcvt.s32.f32 %v238_v51  ;;  %v8250_v54 = vld [vmem:[#allocation2 + $0x3b8] sm:$0xff] }
 0x1f0   :  { %v2080_v56 = vpack.c.bf16 %v1636_v32, %v1630_v53  ;;  %v1732_v7 = vmul.f32 %v8019_v38, %v1150_v36  ;;  %v334_v31 = vunpack.c.3.s8 %v8214_v44  ;;  %v904_v25 = vcvt.s32.f32 %v328_v18 }
 0x1f1   :  { %5089 = vmatpush.bf16.msra.mxu1 %v2014_v11  ;;  %v1390_v4 = vmul.f32 %v8019_v38, %v808_v10  ;;  %v460_v46 = vunpack.c.0.s8 %v136_v58  ;;  %v466_v43 = vunpack.c.1.s8 %v136_v58  ;;  %v1396_v61 = vmul.f32 %v8019_v38, %v814_v39 }
 0x1f2   :  { %5099 = vmatpush.bf16.msra.mxu2 %v2080_v56  ;;  %v2128_v62 = vpack.c.bf16 %v1732_v7, %v1726_v63  ;;  %v910_v17 = vcvt.s32.f32 %v334_v31  ;;  %v556_v30 = vunpack.c.0.s8 %v8203_v20  ;;  %v1486_v50 = vmul.f32 %v8019_v38, %v904_v25  ;;  %v8256_v63 = vld [vmem:[#allocation2 + $0x478] sm:$0xff] }
 0x1f3   :  { %v1036_v42 = vcvt.s32.f32 %v460_v46  ;;  %v1042_v41 = vcvt.s32.f32 %v466_v43  ;;  %v562_v2 = vunpack.c.1.s8 %v8203_v20  ;;  %v1960_v28 = vpack.c.bf16 %v1396_v61, %v1390_v4  ;;  %v4874_v46 = vpop.f32.mrf.mxu0  ;;  %v4887_v43 = vpop.f32.mrf.mxu1 }
 0x1f4   :  { %5112 = vmatpush.bf16.msra.mxu3 %v2128_v62  ;;  %v1492_v22 = vmul.f32 %v8019_v38, %v910_v17  ;;  %v1132_v52 = vcvt.s32.f32 %v556_v30  ;;  %v220_v58 = vunpack.c.0.s8 %v8208_v40  ;;  %v226_v13 = vunpack.c.1.s8 %v8208_v40 }
 0x1f5   :  { %v1618_v33 = vmul.f32 %v8019_v38, %v1036_v42  ;;  %v1624_v3 = vmul.f32 %v8019_v38, %v1042_v41  ;;  %v1138_v24 = vcvt.s32.f32 %v562_v2  ;;  %5077 = vmatpush.bf16.msra.mxu0 %v1960_v28  ;;  %v316_v45 = vunpack.c.0.s8 %v8214_v44 }
 0x1f6   :  { %v2008_v20 = vpack.c.bf16 %v1492_v22, %v1486_v50  ;;  %v1714_v57 = vmul.f32 %v8019_v38, %v1132_v52  ;;  %v796_v48 = vcvt.s32.f32 %v220_v58  ;;  %v802_v14 = vcvt.s32.f32 %v226_v13  ;;  %v6845_v52 = vld [vmem:[%s10189_s7 + $0x10] sm:$0x7f] }
 0x1f7   :  { %v2074_v59 = vpack.c.bf16 %v1624_v3, %v1618_v33  ;;  %v1720_v34 = vmul.f32 %v8019_v38, %v1138_v24  ;;  %v322_v1 = vunpack.c.1.s8 %v8214_v44  ;;  %v892_v19 = vcvt.s32.f32 %v316_v45 }
 0x1f8   :  { %5090 = vmatpush.bf16.msra.mxu1 %v2008_v20  ;;  %v1378_v40 = vmul.f32 %v8019_v38, %v796_v48  ;;  %v448_v26 = vunpack.c.2.s8 %v8239_v35  ;;  %v454_v55 = vunpack.c.3.s8 %v8239_v35  ;;  %v1384_v32 = vmul.f32 %v8019_v38, %v802_v14 }
 0x1f9   :  { %5100 = vmatpush.bf16.msra.mxu2 %v2074_v59  ;;  %v2122_v53 = vpack.c.bf16 %v1720_v34, %v1714_v57  ;;  %v898_v36 = vcvt.s32.f32 %v322_v1  ;;  %v544_v51 = vunpack.c.2.s8 %v8243_v6  ;;  %v1474_v29 = vmul.f32 %v8019_v38, %v892_v19 }
 0x1fa   :  { %v1024_v44 = vcvt.s32.f32 %v448_v26  ;;  %v1030_v60 = vcvt.s32.f32 %v454_v55  ;;  %v550_v11 = vunpack.c.3.s8 %v8243_v6  ;;  %v1954_v10 = vpack.c.bf16 %v1384_v32, %v1378_v40 }
 0x1fb   :  { %5113 = vmatpush.bf16.msra.mxu3 %v2122_v53  ;;  %v1480_v18 = vmul.f32 %v8019_v38, %v898_v36  ;;  %v1120_v56 = vcvt.s32.f32 %v544_v51  ;;  %v688_v7 = vunpack.c.2.s8 %v8250_v54  ;;  %v694_v25 = vunpack.c.3.s8 %v8250_v54 }
 0x1fc   :  { %v1606_v39 = vmul.f32 %v8019_v38, %v1024_v44  ;;  %v1612_v31 = vmul.f32 %v8019_v38, %v1030_v60  ;;  %v1126_v4 = vcvt.s32.f32 %v550_v11  ;;  %5078 = vmatpush.bf16.msra.mxu0 %v1954_v10  ;;  %v784_v30 = vunpack.c.2.s8 %v8256_v63 }
 0x1fd   :  { %v2002_v62 = vpack.c.bf16 %v1480_v18, %v1474_v29  ;;  %v1702_v61 = vmul.f32 %v8019_v38, %v1120_v56  ;;  %v1264_v17 = vcvt.s32.f32 %v688_v7  ;;  %v1270_v41 = vcvt.s32.f32 %v694_v25  ;;  %v8291_v29 = vld [vmem:[#allocation2 + $0x268] sm:$0xff] }
 0x1fe   :  { %v2068_v50 = vpack.c.bf16 %v1612_v31, %v1606_v39  ;;  %v1708_v42 = vmul.f32 %v8019_v38, %v1126_v4  ;;  %v790_v2 = vunpack.c.3.s8 %v8256_v63  ;;  %v1360_v22 = vcvt.s32.f32 %v784_v30  ;;  %v8297_v39 = vld [vmem:[#allocation2 + $0x388] sm:$0xff] }
 0x1ff   :  { %5091 = vmatpush.bf16.msra.mxu1 %v2002_v62  ;;  %v1846_v28 = vmul.f32 %v8019_v38, %v1264_v17  ;;  %v4677_v58 = vperm.slane %v6845_v52, 1  ;;  %v436_v33 = vunpack.c.0.s8 %v8239_v35  ;;  %v1852_v24 = vmul.f32 %v8019_v38, %v1270_v41  ;;  %5079 = vmatmul.bf16.vlgmr.msra.gmra.mxu0 %v7374_v12  ;;  %v8304_v17 = vld [vmem:[#allocation2 + $0x448] sm:$0xff] }
 0x200   :  { %5101 = vmatpush.bf16.msra.mxu2 %v2068_v50  ;;  %v2116_v3 = vpack.c.bf16 %v1708_v42, %v1702_v61  ;;  %v1366_v13 = vcvt.s32.f32 %v790_v2  ;;  %v442_v20 = vunpack.c.1.s8 %v8239_v35  ;;  %v1942_v57 = vmul.f32 %v8019_v38, %v1360_v22 }
 0x201   :  { %v4847_v48 = vadd.f32 %v8194_v49, %v4677_v58  ;;  %v1012_v45 = vcvt.s32.f32 %v436_v33  ;;  %v532_v59 = vunpack.c.0.s8 %v8243_v6  ;;  %v2188_v34 = vpack.c.bf16 %v1852_v24, %v1846_v28  ;;  %v8284_v49 = vld [vmem:[#allocation2 + $0x1a8] sm:$0xff] }
 0x202   :  { %5114 = vmatpush.bf16.msra.mxu3 %v2116_v3  ;;  %v1948_v14 = vmul.f32 %v8019_v38, %v1366_v13  ;;  %5092 = vmatmul.bf16.vlgmr.msra.gmra.mxu1 %v7376_v15  ;;  %v1018_v1 = vcvt.s32.f32 %v442_v20  ;;  %v538_v40 = vunpack.c.1.s8 %v8243_v6  ;;  %v676_v26 = vunpack.c.0.s8 %v8250_v54  ;;  %v8313_v13 = vpop.f32.mrf.mxu2  ;;  %v8315_v20 = vpop.f32.mrf.mxu3 }
 0x203   :  { %v4860_v12 = vadd.f32 %v8196_v21, %v4847_v48  ;;  %v1594_v35 = vmul.f32 %v8019_v38, %v1012_v45  ;;  %v1108_v19 = vcvt.s32.f32 %v532_v59  ;;  %5123 = vmatpush.bf16.msrb.mxu0 %v2188_v34  ;;  %v682_v36 = vunpack.c.1.s8 %v8250_v54 }
 0x204   :  { %v2236_v55 = vpack.c.bf16 %v1948_v14, %v1942_v57  ;;  %v1600_v53 = vmul.f32 %v8019_v38, %v1018_v1  ;;  %v1114_v32 = vcvt.s32.f32 %v538_v40  ;;  %v1252_v51 = vcvt.s32.f32 %v676_v26 }
 0x205   :  { %v1690_v15 = vmul.f32 %v8019_v38, %v1108_v19  ;;  %v772_v6 = vunpack.c.0.s8 %v8256_v63  ;;  %v778_v21 = vunpack.c.1.s8 %v8256_v63  ;;  %v1258_v11 = vcvt.s32.f32 %v682_v36 }
 0x206   :  { %5136 = vmatpush.bf16.msrb.mxu1 %v2236_v55  ;;  %v2062_v44 = vpack.c.bf16 %v1600_v53, %v1594_v35  ;;  %v1696_v60 = vmul.f32 %v8019_v38, %v1114_v32  ;;  %v424_v10 = vunpack.c.2.s8 %v8284_v49  ;;  %v1834_v18 = vmul.f32 %v8019_v38, %v1252_v51 }
 0x207   :  { %v1348_v56 = vcvt.s32.f32 %v772_v6  ;;  %v1354_v54 = vcvt.s32.f32 %v778_v21  ;;  %v430_v7 = vunpack.c.3.s8 %v8284_v49  ;;  %v1840_v63 = vmul.f32 %v8019_v38, %v1258_v11  ;;  %v178_v21 = vld [vmem:[#allocation2 + $0x358] sm:$0xff] }
 0x208   :  { %5102 = vmatpush.bf16.msra.mxu2 %v2062_v44  ;;  %v2110_v31 = vpack.c.bf16 %v1696_v60, %v1690_v15  ;;  %v1000_v4 = vcvt.s32.f32 %v424_v10  ;;  %v520_v25 = vunpack.c.2.s8 %v8291_v29  ;;  %v526_v61 = vunpack.c.3.s8 %v8291_v29 }
 0x209   :  { %v1930_v46 = vmul.f32 %v8019_v38, %v1348_v56  ;;  %v1936_v43 = vmul.f32 %v8019_v38, %v1354_v54  ;;  %v1006_v62 = vcvt.s32.f32 %v430_v7  ;;  %v2182_v30 = vpack.c.bf16 %v1840_v63, %v1834_v18  ;;  %v8335_v54 = vpop.f32.mrf.mxu0  ;;  %v8337_v7 = vpop.f32.mrf.mxu1 }
 0x20a   :  { %5115 = vmatpush.bf16.msra.mxu3 %v2110_v31  ;;  %v1582_v50 = vmul.f32 %v8019_v38, %v1000_v4  ;;  %v1096_v42 = vcvt.s32.f32 %v520_v25  ;;  %v664_v41 = vunpack.c.2.s8 %v8297_v39  ;;  %v1102_v22 = vcvt.s32.f32 %v526_v61  ;;  %v202_v25 = vld [vmem:[#allocation2 + $0x418] sm:$0xff] }
 0x20b   :  { %v2230_v2 = vpack.c.bf16 %v1936_v43, %v1930_v46  ;;  %v1588_v28 = vmul.f32 %v8019_v38, %v1006_v62  ;;  %v670_v52 = vunpack.c.3.s8 %v8297_v39  ;;  %5124 = vmatpush.bf16.msrb.mxu0 %v2182_v30  ;;  %v760_v3 = vunpack.c.2.s8 %v8304_v17  ;;  %v4900_v46 = vpop.f32.mrf.mxu2  ;;  %v4913_v43 = vpop.f32.mrf.mxu3 }
 0x20c   :  { %v1678_v58 = vmul.f32 %v8019_v38, %v1096_v42  ;;  %v1240_v33 = vcvt.s32.f32 %v664_v41  ;;  %v766_v24 = vunpack.c.3.s8 %v8304_v17  ;;  %v1684_v48 = vmul.f32 %v8019_v38, %v1102_v22 }
 0x20d   :  { %5137 = vmatpush.bf16.msrb.mxu1 %v2230_v2  ;;  %v2056_v57 = vpack.c.bf16 %v1588_v28, %v1582_v50  ;;  %v1246_v45 = vcvt.s32.f32 %v670_v52  ;;  %v4873_v59 = vadd.f32 %v8232_v5, %v4860_v12  ;;  %v1336_v14 = vcvt.s32.f32 %v760_v3 }
 0x20e   :  { %v1822_v34 = vmul.f32 %v8019_v38, %v1240_v33  ;;  %v1342_v1 = vcvt.s32.f32 %v766_v24  ;;  %v412_v40 = vunpack.c.0.s8 %v8284_v49  ;;  %v2104_v35 = vpack.c.bf16 %v1684_v48, %v1678_v58 }
 0x20f   :  { %5103 = vmatpush.bf16.msra.mxu2 %v2056_v57  ;;  %v1828_v19 = vmul.f32 %v8019_v38, %v1246_v45  ;;  %v8323_v26 = vadd.f32 %v8234_v23, %v4873_v59  ;;  %v418_v55 = vunpack.c.1.s8 %v8284_v49  ;;  %v1918_v53 = vmul.f32 %v8019_v38, %v1336_v14 }
 0x210   :  { %v1924_v32 = vmul.f32 %v8019_v38, %v1342_v1  ;;  %v988_v5 = vcvt.s32.f32 %v412_v40  ;;  %v508_v12 = vunpack.c.0.s8 %v8291_v29  ;;  %5116 = vmatpush.bf16.msra.mxu3 %v2104_v35  ;;  %v514_v51 = vunpack.c.1.s8 %v8291_v29  ;;  %v172_v40 = vld [vmem:[#allocation2 + $0x328] sm:$0xff] }
 0x211   :  { %v2176_v36 = vpack.c.bf16 %v1828_v19, %v1822_v34  ;;  %v994_v15 = vcvt.s32.f32 %v418_v55  ;;  %v652_v6 = vunpack.c.0.s8 %v8297_v39  ;;  %v658_v49 = vunpack.c.1.s8 %v8297_v39  ;;  %v8344_v39 = vld [vmem:[%s10188_s6 + $0x38] sm:$0xff]  ;;  %v8361_v34 = vld [vmem:[%s10188_s6 + $0x30] sm:$0xff] }
 0x212   :  { %v2224_v44 = vpack.c.bf16 %v1924_v32, %v1918_v53  ;;  %v1570_v23 = vmul.f32 %v8019_v38, %v988_v5  ;;  %v1084_v60 = vcvt.s32.f32 %v508_v12  ;;  %v1090_v10 = vcvt.s32.f32 %v514_v51  ;;  %v8368_v55 = vld [vmem:[%s10188_s6 + $0x70] sm:$0xff]  ;;  %v196_v51 = vld [vmem:[#allocation2 + $0x3e8] sm:$0xff] }
 0x213   :  { %5125 = vmatpush.bf16.msrb.mxu0 %v2176_v36  ;;  %v1576_v11 = vmul.f32 %v8019_v38, %v994_v15  ;;  %v1228_v18 = vcvt.s32.f32 %v652_v6  ;;  %v748_v56 = vunpack.c.0.s8 %v8304_v17  ;;  %v1234_v31 = vcvt.s32.f32 %v658_v49  ;;  %v4926_v6 = vpop.f32.mrf.mxu0 }
 0x214   :  { %5138 = vmatpush.bf16.msrb.mxu1 %v2224_v44  ;;  %v1666_v29 = vmul.f32 %v8019_v38, %v1084_v60  ;;  %v754_v63 = vunpack.c.1.s8 %v8304_v17  ;;  %v640_v4 = vunpack.c.2.s8 %v178_v21  ;;  %v1672_v61 = vmul.f32 %v8019_v38, %v1090_v10  ;;  %v8352_v17 = vld [vmem:[%s10188_s6 + $0x78] sm:$0xff]  ;;  %v8437_v6 = vld [vmem:[%s10188_s6 + $0x50] sm:$0xff] }
 0x215   :  { %v2050_v62 = vpack.c.bf16 %v1576_v11, %v1570_v23  ;;  %v1810_v30 = vmul.f32 %v8019_v38, %v1228_v18  ;;  %v1324_v50 = vcvt.s32.f32 %v748_v56  ;;  %v1816_v42 = vmul.f32 %v8019_v38, %v1234_v31  ;;  %v8380_v18 = vld [vmem:[%s10188_s6 + $0x28] sm:$0xff]  ;;  %6254 = vrot.lane.b32.xlu2 %v8352_v17, %s6948_s15 }
 0x216   :  { %v1330_v41 = vcvt.s32.f32 %v754_v63  ;;  %v646_v2 = vunpack.c.3.s8 %v178_v21  ;;  %v1216_v28 = vcvt.s32.f32 %v640_v4  ;;  %v2098_v22 = vpack.c.bf16 %v1672_v61, %v1666_v29  ;;  %v8388_v31 = vld [vmem:[%s10188_s6 + $0x68] sm:$0xff] }
 0x217   :  { %5104 = vmatpush.bf16.msra.mxu2 %v2050_v62  ;;  %v1906_v52 = vmul.f32 %v8019_v38, %v1324_v50  ;;  %v736_v58 = vunpack.c.2.s8 %v202_v25  ;;  %v742_v33 = vunpack.c.3.s8 %v202_v25  ;;  %v2170_v3 = vpack.c.bf16 %v1816_v42, %v1810_v30 }
 0x218   :  { %v1912_v24 = vmul.f32 %v8019_v38, %v1330_v41  ;;  %v1222_v57 = vcvt.s32.f32 %v646_v2  ;;  %v1798_v48 = vmul.f32 %v8019_v38, %v1216_v28  ;;  %5117 = vmatpush.bf16.msra.mxu3 %v2098_v22  ;;  %v628_v14 = vunpack.c.0.s8 %v178_v21  ;;  %v8396_v28 = vld [vmem:[%s10188_s6 + $0x20] sm:$0xff] }
 0x219   :  { %v1312_v45 = vcvt.s32.f32 %v736_v58  ;;  %v1318_v59 = vcvt.s32.f32 %v742_v33  ;;  %v634_v1 = vunpack.c.1.s8 %v178_v21  ;;  %5126 = vmatpush.bf16.msrb.mxu0 %v2170_v3  ;;  %v724_v53 = vunpack.c.0.s8 %v202_v25  ;;  %v4939_v21 = vpop.f32.mrf.mxu1  ;;  %v8403_v33 = vld [vmem:[%s10188_s6 + $0x60] sm:$0xff] }
 0x21a   :  { %v2218_v35 = vpack.c.bf16 %v1912_v24, %v1906_v52  ;;  %v1804_v19 = vmul.f32 %v8019_v38, %v1222_v57  ;;  %v730_v32 = vunpack.c.1.s8 %v202_v25  ;;  %5105 = vmatmul.bf16.vlgmr.msra.gmra.mxu2 %v7463_v37  ;;  %v1204_v36 = vcvt.s32.f32 %v628_v14  ;;  %v8442_v21 = vld [vmem:[%s10188_s6 + $0xf8] sm:$0xff] }
 0x21b   :  { %5450 = vmatpush.bf16.msrb.mxu2 %v8344_v39  ;;  %v1894_v5 = vmul.f32 %v8019_v38, %v1312_v45  ;;  %v1900_v12 = vmul.f32 %v8019_v38, %v1318_v59  ;;  %v1210_v15 = vcvt.s32.f32 %v634_v1  ;;  %5118 = vmatmul.bf16.vlgmr.msra.gmra.mxu3 %v7465_v16  ;;  %v1300_v23 = vcvt.s32.f32 %v724_v53 }
 0x21c   :  { %5463 = vmatpush.bf16.msrb.mxu3 %v8352_v17  ;;  %5139 = vmatpush.bf16.msrb.mxu1 %v2218_v35  ;;  %v2164_v44 = vpack.c.bf16 %v1804_v19, %v1798_v48  ;;  %v1306_v60 = vcvt.s32.f32 %v730_v32  ;;  %v616_v49 = vunpack.c.2.s8 %v172_v40  ;;  %v1786_v37 = vmul.f32 %v8019_v38, %v1204_v36  ;;  %v8413_v19 = vld [vmem:[%s10188_s6 + $0x18] sm:$0xff]  ;;  %v4950_v36 = vpop.f32.mrf.mxu2 }
 0x21d   :  { %v2212_v11 = vpack.c.bf16 %v1900_v12, %v1894_v5  ;;  %v1792_v10 = vmul.f32 %v8019_v38, %v1210_v15  ;;  %v622_v56 = vunpack.c.3.s8 %v172_v40  ;;  %v1882_v16 = vmul.f32 %v8019_v38, %v1300_v23  ;;  %v8420_v5 = vld [vmem:[%s10188_s6 + $0x58] sm:$0xff]  ;;  %v4963_v15 = vpop.f32.mrf.mxu3  ;;  %6236 = vrot.lane.b32.xlu2 %v8361_v34, %s6948_s15 }
 0x21e   :  { %5127 = vmatpush.bf16.msrb.mxu0 %v2164_v44  ;;  %v1888_v29 = vmul.f32 %v8019_v38, %v1306_v60  ;;  %v1192_v63 = vcvt.s32.f32 %v616_v49  ;;  %v712_v4 = vunpack.c.2.s8 %v196_v51  ;;  %v718_v43 = vunpack.c.3.s8 %v196_v51  ;;  %v8425_v12 = vld [vmem:[%s10188_s6 + $0xb8] sm:$0xff]  ;;  %v4976_v44 = vpop.f32.mrf.mxu0  ;;  %v8450_v60 = vld [vmem:[%s10188_s6 + $0xb0] sm:$0xff]  ;;  %v8457_v49 = vld [vmem:[%s10188_s6 + $0x8] sm:$0xff] }
 0x21f   :  { %5451 = vmatpush.bf16.msrb.mxu2 %v8361_v34  ;;  %v2158_v25 = vpack.c.bf16 %v1792_v10, %v1786_v37  ;;  %v1198_v46 = vcvt.s32.f32 %v622_v56  ;;  %v604_v62 = vunpack.c.0.s8 %v172_v40  ;;  %v610_v42 = vunpack.c.1.s8 %v172_v40  ;;  %v8475_v10 = vld [vmem:[%s10188_s6 + $0xf0] sm:$0xff]  ;;  %v8482_v56 = vld [vmem:[%s10188_s6 + $0xa8] sm:$0xff]  ;;  %v8595_v17 = vld [vmem:[%s10188_s6 + $0x118] sm:$0xff] }
 0x220   :  { %5464 = vmatpush.bf16.msrb.mxu3 %v8368_v55  ;;  %5140 = vmatpush.bf16.msrb.mxu1 %v2212_v11  ;;  %v2206_v61 = vpack.c.bf16 %v1888_v29, %v1882_v16  ;;  %v1774_v30 = vmul.f32 %v8019_v38, %v1192_v63  ;;  %v1288_v50 = vcvt.s32.f32 %v712_v4  ;;  %v1294_v2 = vcvt.s32.f32 %v718_v43  ;;  %v8462_v11 = vld [vmem:[%s10189_s7 + $0x18] sm:$0x7f]  ;;  %v8489_v4 = vld [vmem:[%s10188_s6] sm:$0xff] }
 0x221   :  { %v1780_v41 = vmul.f32 %v8019_v38, %v1198_v46  ;;  %v1180_v22 = vcvt.s32.f32 %v604_v62  ;;  %v700_v52 = vunpack.c.0.s8 %v196_v51  ;;  %v1186_v3 = vcvt.s32.f32 %v610_v42  ;;  %v8444_v23 = vpop.f32.mrf.mxu1  ;;  %v8623_v34 = vld [vmem:[%s10188_s6 + $0x100] sm:$0xff] }
 0x222   :  { %5128 = vmatpush.bf16.msrb.mxu0 %v2158_v25  ;;  %v1870_v58 = vmul.f32 %v8019_v38, %v1288_v50  ;;  %v706_v24 = vunpack.c.1.s8 %v196_v51  ;;  %v1876_v48 = vmul.f32 %v8019_v38, %v1294_v2  ;;  %v4678_v37 = vperm.slane %v8462_v11, 1  ;;  %v8496_v25 = vld [vmem:[%s10188_s6 + $0x40] sm:$0xff] }
 0x223   :  { %5452 = vmatpush.bf16.msrb.mxu2 %v8380_v18  ;;  %v2152_v57 = vpack.c.bf16 %v1780_v41, %v1774_v30  ;;  %v1762_v45 = vmul.f32 %v8019_v38, %v1180_v22  ;;  %v1276_v59 = vcvt.s32.f32 %v700_v52  ;;  %v1768_v14 = vmul.f32 %v8019_v38, %v1186_v3  ;;  %v8529_v41 = vld [vmem:[%s10188_s6 + $0x98] sm:$0xff]  ;;  %v8535_v52 = vld [vmem:[%s10188_s6 + $0x130] sm:$0xff] }
 0x224   :  { %5465 = vmatpush.bf16.msrb.mxu3 %v8388_v31  ;;  %5141 = vmatpush.bf16.msrb.mxu1 %v2206_v61  ;;  %v1282_v1 = vcvt.s32.f32 %v706_v24  ;;  %v2200_v40 = vpack.c.bf16 %v1876_v48, %v1870_v58  ;;  %v4952_v16 = vpop.f32.mrf.mxu2  ;;  %v4925_v63 = vadd.f32 %v8335_v54, %v4678_v37  ;;  %v8502_v54 = vld [vmem:[%s10188_s6 + $0xe8] sm:$0xff]  ;;  %v5150_v62 = vmax.f32 %v8154_v27, 0.0  ;;  %v8514_v61 = vld [vmem:[%s10188_s6 + $0x138] sm:$0xff]  ;;  %v8523_v27 = vld [vmem:[%s10188_s6 + $0xe0] sm:$0xff] }
 0x225   :  { %v1858_v35 = vmul.f32 %v8019_v38, %v1276_v59  ;;  %v2146_v53 = vpack.c.bf16 %v1768_v14, %v1762_v45  ;;  %v4965_v29 = vpop.f32.mrf.mxu3  ;;  %v8541_v58 = vld [vmem:[%s10188_s6 + $0xd8] sm:$0xff]  ;;  %v8547_v3 = vld [vmem:[%s10188_s6 + $0x90] sm:$0xff]  ;;  %v4899_v48 = vadd.f32 %v8313_v13, %v8323_v26  ;;  %v8567_v14 = vld [vmem:[%s10188_s6 + $0x88] sm:$0xff]  ;;  %6234 = vrot.lane.b32.xlu2 %v8380_v18, %s6948_s15 }
 0x226   :  { %5129 = vmatpush.bf16.msrb.mxu0 %v2152_v57  ;;  %v1864_v32 = vmul.f32 %v8019_v38, %v1282_v1  ;;  %v8431_v38 = vld [vmem:[%s10188_s6 + $0x10] sm:$0xff]  ;;  %v4978_v46 = vpop.f32.mrf.mxu0  ;;  %v4938_v30 = vadd.f32 %v8337_v7, %v4925_v63  ;;  %v5156_v42 = vpack.c.bf16 %v5150_v62, %v5150_v62  ;;  %v8553_v57 = vld [vmem:[%s10188_s6 + $0x128] sm:$0xff]  ;;  %v8573_v13 = vld [vmem:[%s10188_s6 + $0x120] sm:$0xff] }
 0x227   :  { %5453 = vmatpush.bf16.msrb.mxu2 %v8396_v28  ;;  %v8561_v59 = vld [vmem:[%s10188_s6 + $0xd0] sm:$0xff]  ;;  %v4912_v26 = vadd.f32 %v8315_v20, %v4899_v48  ;;  %v8617_v63 = vld [vmem:[%s10188_s6 + $0x108] sm:$0xff]  ;;  %v8631_v46 = vld [vmem:[%s10189_s7 + $0x20] sm:$0x7f] }
 0x228   :  { %5466 = vmatpush.bf16.msrb.mxu3 %v8403_v33  ;;  %5142 = vmatpush.bf16.msrb.mxu1 %v2200_v40  ;;  %v2194_v51 = vpack.c.bf16 %v1864_v32, %v1858_v35  ;;  %v4951_v7 = vadd.f32 %v4950_v36, %v4938_v30  ;;  %v8589_v32 = vld [vmem:[%s10188_s6 + $0x80] sm:$0xff] }
 0x229   :  { %v4991_v43 = vpop.f32.mrf.mxu1  ;;  %v5151_v36 = vmax.f32 %v4912_v26, 0.0 }
 0x22a   :  { %5130 = vmatpush.bf16.msrb.mxu0 %v2146_v53  ;;  %v4964_v24 = vadd.f32 %v4963_v15, %v4951_v7  ;;  %v8583_v53 = vld [vmem:[%s10188_s6 + $0xc8] sm:$0xff]  ;;  %v4679_v43 = vperm.slane %v8631_v46, 1 }
 0x22b   :  { %5454 = vmatpush.bf16.msrb.mxu2 %v8413_v19  ;;  %v5157_v37 = vpack.c.bf16 %v5151_v36, %v5151_v36  ;;  %v8679_v36 = vld [vmem:[%s10188_s6 + $0x150] sm:$0xff] }
 0x22c   :  { %5467 = vmatpush.bf16.msrb.mxu3 %v8420_v5  ;;  %5143 = vmatpush.bf16.msrb.mxu1 %v2194_v51  ;;  %v5002_v2 = vpop.f32.mrf.mxu2  ;;  %v4977_v45 = vadd.f32 %v4976_v44, %v4964_v24  ;;  %v8601_v44 = vld [vmem:[%s10188_s6 + $0xc0] sm:$0xff] }
 0x22d   :  { %5131 = vmatmul.bf16.vlgmr.msrb.gmra.mxu0 %v7365_v8  ;;  %v8469_v8 = vld [vmem:[%s10188_s6 + $0x48] sm:$0xff]  ;;  %v5015_v22 = vpop.f32.mrf.mxu3  ;;  %6268 = vrot.lane.b32.xlu2 %v8450_v60, %s6948_s15  ;;  %v5003_v62 = vadd.f32 %v5002_v2, %v4679_v43 }
 0x22e   :  { %5476 = vmatpush.bf16.msra.mxu0 %v8425_v12  ;;  %v4990_v35 = vadd.f32 %v8444_v23, %v4977_v45  ;;  %v8608_v23 = vld [vmem:[%s10188_s6 + $0x110] sm:$0xff] }
 0x22f   :  { %5455 = vmatpush.bf16.msrb.mxu2 %v8431_v38  ;;  %5144 = vmatmul.bf16.vlgmr.msrb.gmra.mxu1 %v7367_v9  ;;  %v5149_v9 = vmax.f32 %v8004_v47, 0.0  ;;  %v8509_v47 = vld [vmem:[%s10188_s6 + $0xa0] sm:$0xff]  ;;  %v5016_v30 = vadd.f32 %v5015_v22, %v5003_v62 }
 0x230   :  { %5468 = vmatpush.bf16.msrb.mxu3 %v8437_v6  ;;  %5489 = vmatpush.bf16.msra.mxu1 %v8442_v21  ;;  %v5152_v15 = vmax.f32 %v4990_v35, 0.0  ;;  %v8665_v35 = vld [vmem:[%s10188_s6 + $0x160] sm:$0xff] }
 0x231   :  { %v5155_v50 = vpack.c.bf16 %v5149_v9, %v5149_v9 }
 0x232   :  { %5477 = vmatpush.bf16.msra.mxu0 %v8450_v60  ;;  %v5158_v16 = vpack.c.bf16 %v5152_v15, %v5152_v15  ;;  %v8647_v60 = vld [vmem:[%s10188_s6 + $0x170] sm:$0xff]  ;;  %v6800_v15 = vld [vmem:[%s10188_s6 + $0x140] sm:$0xff] }
 0x233   :  { %5456 = vmatpush.bf16.msrb.mxu2 %v8457_v49 }
 0x234   :  { %5469 = vmatpush.bf16.msrb.mxu3 %v8469_v8  ;;  %5490 = vmatpush.bf16.msra.mxu1 %v8475_v10  ;;  %v5004_v1 = vpop.f32.mrf.mxu2 }
 0x235   :  { %v5017_v40 = vpop.f32.mrf.mxu3  ;;  %6248 = vrot.lane.b32.xlu2 %v8403_v33, %s6948_s15  ;;  %v8655_v33 = vld [vmem:[%s10188_s6 + $0x168] sm:$0xff] }
 0x236   :  { %5478 = vmatpush.bf16.msra.mxu0 %v8482_v56 }
 0x237   :  { %5457 = vmatpush.bf16.msrb.mxu2 %v8489_v4 }
 0x238   :  { %5470 = vmatpush.bf16.msrb.mxu3 %v8496_v25  ;;  %5491 = vmatpush.bf16.msra.mxu1 %v8502_v54 }
 0x23a   :  { %5479 = vmatpush.bf16.msra.mxu0 %v8509_v47  ;;  %5458 = vmatmul.bf16.vlgmr.msrb.gmra.mxu2 %v5155_v50 }
 0x23b   :  { %5502 = vmatpush.bf16.msra.mxu2 %v8514_v61  ;;  %5471 = vmatmul.bf16.vlgmr.msrb.gmra.mxu3 %v5156_v42  ;;  %v8639_v42 = vld [vmem:[%s10188_s6 + $0x178] sm:$0xff] }
 0x23c   :  { %5492 = vmatpush.bf16.msra.mxu1 %v8523_v27  ;;  %5515 = vmatpush.bf16.msra.mxu3 %v8639_v42 }
 0x23d   :  { %6282 = vrot.lane.b32.xlu2 %v8502_v54, %s6948_s15 }
 0x23e   :  { %5480 = vmatpush.bf16.msra.mxu0 %v8529_v41 }
 0x23f   :  { %5503 = vmatpush.bf16.msra.mxu2 %v8535_v52 }
 0x240   :  { %5493 = vmatpush.bf16.msra.mxu1 %v8541_v58  ;;  %5516 = vmatpush.bf16.msra.mxu3 %v8647_v60 }
 0x242   :  { %5481 = vmatpush.bf16.msra.mxu0 %v8547_v3 }
 0x243   :  { %5504 = vmatpush.bf16.msra.mxu2 %v8553_v57 }
 0x244   :  { %5494 = vmatpush.bf16.msra.mxu1 %v8561_v59  ;;  %v5028_v20 = vpop.f32.mrf.mxu0  ;;  %5517 = vmatpush.bf16.msra.mxu3 %v8655_v33 }
 0x245   :  { %v5041_v51 = vpop.f32.mrf.mxu1  ;;  %v5029_v50 = vadd.f32 %v5028_v20, %v5016_v30  ;;  %6264 = vrot.lane.b32.xlu2 %v8509_v47, %s6948_s15  ;;  %v8673_v20 = vld [vmem:[%s10188_s6 + $0x158] sm:$0xff] }
 0x246   :  { %5482 = vmatpush.bf16.msra.mxu0 %v8567_v14 }
 0x247   :  { %5505 = vmatpush.bf16.msra.mxu2 %v8573_v13  ;;  %v5042_v18 = vadd.f32 %v5041_v51, %v5029_v50 }
 0x248   :  { %5495 = vmatpush.bf16.msra.mxu1 %v8583_v53  ;;  %5518 = vmatpush.bf16.msra.mxu3 %v8665_v35 }
 0x24a   :  { %5483 = vmatpush.bf16.msra.mxu0 %v8589_v32 }
 0x24b   :  { %5506 = vmatpush.bf16.msra.mxu2 %v8595_v17 }
 0x24c   :  { %5496 = vmatpush.bf16.msra.mxu1 %v8601_v44  ;;  %v5030_v29 = vpop.f32.mrf.mxu0  ;;  %5519 = vmatpush.bf16.msra.mxu3 %v8673_v20 }
 0x24d   :  { %5484 = vmatmul.bf16.vlgmr.msra.gmra.mxu0 %v5157_v37  ;;  %v5043_v9 = vpop.f32.mrf.mxu1  ;;  %6280 = vrot.lane.b32.xlu2 %v8523_v27, %s6948_s15 }
 0x24f   :  { %5507 = vmatpush.bf16.msra.mxu2 %v8608_v23  ;;  %5497 = vmatmul.bf16.vlgmr.msra.gmra.mxu1 %v5158_v16 }
 0x250   :  { %5520 = vmatpush.bf16.msra.mxu3 %v8679_v36 }
 0x253   :  { %5508 = vmatpush.bf16.msra.mxu2 %v8617_v63 }
 0x255   :  { %6262 = vrot.lane.b32.xlu2 %v8529_v41, %s6948_s15  ;;  %v8687_v41 = vld [vmem:[%s10188_s6 + $0x148] sm:$0xff] }
 0x256   :  { %5521 = vmatpush.bf16.msra.mxu3 %v8687_v41 }
 0x257   :  { %5509 = vmatpush.bf16.msra.mxu2 %v8623_v34 }
 0x25a   :  { %5522 = vmatpush.bf16.msra.mxu3 %v6800_v15 }
 0x25d   :  { %6278 = vrot.lane.b32.xlu2 %v8541_v58, %s6948_s15  ;;  %v6848_v58 = vld [vmem:[%s10189_s7 + $0x28] sm:$0x7f] }
 0x25e   :  { %v4680_v51 = vperm.slane %v6848_v58, 1 }
 0x264   :  { %v5054_v7 = vpop.f32.mrf.mxu2 }
 0x265   :  { %v5055_v24 = vadd.f32 %v5054_v7, %v5042_v18  ;;  %v5067_v48 = vpop.f32.mrf.mxu3  ;;  %6260 = vrot.lane.b32.xlu2 %v8547_v3, %s6948_s15 }
 0x267   :  { %v5068_v45 = vadd.f32 %v5067_v48, %v5055_v24  ;;  %v64_v48 = vld [vmem:[%s10183_s1] sm:$0xff]  ;;  %s6950_s1 = smov 6  }
 0x268   :  { %5533 = vrot.lane.b32.xlu0 %v64_v48, %s6949_s24  ;;  %v6819_v48 = vld [vmem:[%s10186_s4 + $0x24] sm:$0xf0] }
 0x269   :  { %v5153_v2 = vmax.f32 %v5068_v45, 0.0 }
 0x26b   :  { %v5159_v22 = vpack.c.bf16 %v5153_v2, %v5153_v2 }
 0x26c   :  { %v5056_v1 = vpop.f32.mrf.mxu2 }
 0x26d   :  { %v5069_v40 = vpop.f32.mrf.mxu3  ;;  %5510 = vmatmul.bf16.vlgmr.msra.gmra.mxu2 %v5159_v22  ;;  %6276 = vrot.lane.b32.xlu2 %v8561_v59, %s6948_s15 }
 0x275   :  { %6258 = vrot.lane.b32.xlu2 %v8567_v14, %s6948_s15 }
 0x27c   :  { %v5080_v54 = vpop.f32.mrf.mxu0 }
 0x27d   :  { %v5081_v16 = vadd.f32 %v5080_v54, %v4680_v51  ;;  %6294 = vrot.lane.b32.xlu2 %v8595_v17, %s6948_s15  ;;  %v8712_v17 = vld [vmem:[%s10189_s7] sm:$0x7f] }
 0x27e   :  { %v5161_v22 = vperm.slane %v8712_v17, 4 }
 0x27f   :  { %v5093_v26 = vpop.f32.mrf.mxu1 }
 0x280   :  { %v5094_v9 = vadd.f32 %v5093_v26, %v5081_v16 }
 0x284   :  { %v5082_v47 = vpop.f32.mrf.mxu0 }
 0x285   :  { %6272 = vrot.lane.b32.xlu2 %v8601_v44, %s6948_s15 }
 0x287   :  { %v5095_v27 = vpop.f32.mrf.mxu1 }
 0x28d   :  { %6290 = vrot.lane.b32.xlu2 %v8617_v63, %s6948_s15 }
 0x295   :  { %6304 = vrot.lane.b32.xlu2 %v6800_v15, %s6948_s15 }
 0x29d   :  { %v5106_v37 = vpop.f32.mrf.mxu2 }
 0x29e   :  { %v5119_v29 = vpop.f32.mrf.mxu3  ;;  %v5107_v43 = vadd.f32 %v5106_v37, %v5094_v9 }
 0x2a0   :  { %v5120_v3 = vadd.f32 %v5119_v29, %v5107_v43 }
 0x2a5   :  { %v5108_v62 = vpop.f32.mrf.mxu2 }
 0x2a6   :  { %v5121_v30 = vpop.f32.mrf.mxu3 }
 0x2aa   :  { %v5132_v59 = vpop.f32.mrf.mxu0 }
 0x2ab   :  { %v5133_v50 = vadd.f32 %v5132_v59, %v5120_v3 }
 0x2ac   :  { %v5145_v18 = vpop.f32.mrf.mxu1 }
 0x2ad   :  { %v5146_v7 = vadd.f32 %v5145_v18, %v5133_v50 }
 0x2af   :  { %v5154_v24 = vmax.f32 %v5146_v7, 0.0 }
 0x2b1   :  { %v5160_v14 = vpack.c.bf16 %v5154_v24, %v5154_v24 }
 0x2b2   :  { %v5134_v45 = vpop.f32.mrf.mxu0 }
 0x2b3   :  { %5523 = vmatmul.bf16.vlgmr.msra.gmra.mxu3 %v5160_v14 }
 0x2b4   :  { %v5147_v2 = vpop.f32.mrf.mxu1 }
 0x2b5   :  { %v6816_v2 = vld [vmem:[%s10186_s4 + $0x14] sm:$0xf] }
 0x2bd   :  { %v5459_v1 = vpop.f32.mrf.mxu2 }
 0x2be   :  { %v5460_v40 = vadd.f32 %v5459_v1, %v5161_v22  ;;  %v5472_v54 = vpop.f32.mrf.mxu3 }
 0x2c0   :  { %v5473_v26 = vadd.f32 %v5472_v54, %v5460_v40  ;;  %v6740_v40 = vld [vmem:[%s10186_s4 + $0x38] sm:$0xf]  ;;  %v6824_v54 = vld [vmem:[%s10186_s4 + $0x4c] sm:$0x70] }
 0x2c5   :  { %v5461_v44 = vpop.f32.mrf.mxu2 }
 0x2c6   :  { %v5474_v47 = vpop.f32.mrf.mxu3  ;;  %v6741_v44 = vor.u32 %v6824_v54, %v6740_v40 }
 0x2c7   :  { %v6742_v47 = vld [vmem:[%s10186_s4 + $0x50] sm:$0x70] }
 0x2ca   :  { %v5485_v27 = vpop.f32.mrf.mxu0 }
 0x2cb   :  { %v5486_v58 = vadd.f32 %v5485_v27, %v5473_v26  ;;  %v6821_v26 = vld [vmem:[%s10186_s4 + $0x3c] sm:$0xf] }
 0x2cc   :  { %v5498_v51 = vpop.f32.mrf.mxu1  ;;  %v6745_v27 = vor.u32 %v6821_v26, %v6742_v47 }
 0x2cd   :  { %v5499_v37 = vadd.f32 %v5498_v51, %v5486_v58  ;;  %v6716_v51 = vld [vmem:[%s10186_s4 + $0x8] sm:$0xf] }
 0x2d2   :  { %v5487_v16 = vpop.f32.mrf.mxu0 }
 0x2d3   :  { %v6815_v16 = vld [vmem:[%s10186_s4 + $0xc] sm:$0xf] }
 0x2d4   :  { %v5500_v29 = vpop.f32.mrf.mxu1 }
 0x2da   :  { %v5534_v15 = vpop.permute.xlu0 %5533 }
 0x2f0   :  { %v5511_v9 = vpop.f32.mrf.mxu2 }
 0x2f1   :  { %v5512_v43 = vadd.f32 %v5511_v9, %v5499_v37  ;;  %v6818_v37 = vld [vmem:[%s10186_s4 + $0x1c] sm:$0xf0]  ;;  %v6718_v9 = vld [vmem:[%s10186_s4 + $0x20] sm:$0xf0] }
 0x2f2   :  { %v6717_v29 = vor.u32 %v6818_v37, %v6716_v51  ;;  %v8885_v51 = vperm.slane %v8462_v11, 6  ;;  %v8888_v37 = vperm.slane %v8631_v46, 6 }
 0x2f8   :  { %v5513_v62 = vpop.f32.mrf.mxu2 }
 0x336   :  { %v5524_v30 = vpop.f32.mrf.mxu3 }
 0x337   :  { %v8718_v3 = vadd.f32 %v5524_v30, %v5512_v43  ;;  %v6721_v43 = vor.u32 %v6815_v16, %v6718_v9 }
 0x339   :  { %v5528_v63 = vmax.f32 %v8718_v3, -4.0 }
 0x33b   :  { %v5529_v59 = vmin.f32 %v5528_v63, 15.0 }
 0x33d   :  { %v5530_v50 = vmul.f32 1.442695, %v5529_v59 }
 0x33e   :  { %v5526_v18 = vpop.f32.mrf.mxu3 }
 0x33f   :  { %6837 = vpow2.f32 %v5530_v50 }
 0x345   :  { %v6838_v7 = vpop.eup %6837 }
 0x346   :  { %v5536_v24 = vmul.f32 %v6838_v7, %v5534_v15  ;;  %6456 = vrot.lane.b32.xlu2 %v6838_v7, %s6950_s1  ;;  %v8865_v15 = vperm.slane %v8712_v17, 6 }
 0x348   :  { %5538 = vrot.lane.b32.xlu0 %v5536_v24, %s6951_s27 }
 0x350   :  { %6252 = vrot.lane.b32.xlu0 %v8368_v55, %s6948_s15 }
 0x358   :  { %6286 = vrot.lane.b32.xlu0 %v8442_v21, %s6948_s15  ;;  %v6825_v21 = vld [vmem:[%s10186_s4 + $0x54] sm:$0x70] }
 0x360   :  { %6232 = vrot.lane.b32.xlu0 %v8396_v28, %s6948_s15 }
 0x368   :  { %6266 = vrot.lane.b32.xlu0 %v8482_v56, %s6948_s15  ;;  %v6822_v56 = vld [vmem:[%s10186_s4 + $0x44] sm:$0xf] }
 0x370   :  { %6302 = vrot.lane.b32.xlu0 %v8514_v61, %s6948_s15  ;;  %v6750_v61 = vld [vmem:[%s10186_s4 + $0x58] sm:$0x70] }
 0x378   :  { %6318 = vrot.lane.b32.xlu0 %v8639_v42, %s6948_s15  ;;  %v6708_v42 = vld [vmem:[%s10186_s4] sm:$0xf] }
 0x380   :  { %6300 = vrot.lane.b32.xlu0 %v8535_v52, %s6948_s15 }
 0x388   :  { %6316 = vrot.lane.b32.xlu0 %v8647_v60, %s6948_s15  ;;  %v6817_v60 = vld [vmem:[%s10186_s4 + $0x14] sm:$0xf0] }
 0x390   :  { %6298 = vrot.lane.b32.xlu0 %v8553_v57, %s6948_s15  ;;  %v6753_v57 = vor.u32 %v6822_v56, %v6750_v61  ;;  %v2249_v61 = vld [vmem:[#allocation5 + $0x60] sm:$0xff] }
 0x398   :  { %6314 = vrot.lane.b32.xlu0 %v8655_v33, %s6948_s15  ;;  %v6814_v33 = vld [vmem:[%s10186_s4 + $0x4] sm:$0xf] }
 0x3a0   :  { %6296 = vrot.lane.b32.xlu0 %v8573_v13, %s6948_s15 }
 0x3a8   :  { %6312 = vrot.lane.b32.xlu0 %v8665_v35, %s6948_s15  ;;  %v6709_v35 = vor.u32 %v6817_v60, %v6708_v42 }
 0x3b0   :  { %6256 = vrot.lane.b32.xlu0 %v8589_v32, %s6948_s15 }
 0x3b8   :  { %6292 = vrot.lane.b32.xlu0 %v8608_v23, %s6948_s15 }
 0x3ba   :  { %v5539_v55 = vpop.permute.xlu0 %5538 }
 0x3bb   :  { %v5541_v28 = vadd.f32 %v5539_v55, %v8718_v3 }
 0x3bd   :  { %5544 = vrot.lane.b32.xlu1 %v5541_v28, %s6952_s28 }
 0x3c0   :  { %6306 = vrot.lane.b32.xlu0 %v8687_v41, %s6948_s15  ;;  %v6710_v41 = vld [vmem:[%s10186_s4 + $0x18] sm:$0xf0] }
 0x3c1   :  { %v6713_v14 = vor.u32 %v6814_v33, %v6710_v41 }
 0x3c5   :  { %6238 = vrot.lane.b32.xlu1 %v8344_v39, %s6948_s15  ;;  %v5628_v39 = vsel %vm5626_vm3, 4294967295, %v6947_v0  ;;  %v6734_v0 = vld [vmem:[%s10186_s4 + $0x48] sm:$0x70] }
 0x3c8   :  { %6369 = vrot.lane.b32.xlu0 %v5161_v22, %s6948_s15  ;;  %v6726_v22 = vld [vmem:[%s10186_s4 + $0x28] sm:$0xf0] }
 0x3c9   :  { %v6729_v1 = vor.u32 %v6816_v2, %v6726_v22 }
 0x3cd   :  { %6270 = vrot.lane.b32.xlu1 %v8425_v12, %s6948_s15  ;;  %v6820_v12 = vld [vmem:[%s10186_s4 + $0x34] sm:$0xf] }
 0x3d5   :  { %6250 = vrot.lane.b32.xlu1 %v8388_v31, %s6948_s15  ;;  %v5629_v31 = vsel %vm5627_vm4, %v5628_v39, 0 }
 0x3d6   :  { %v5646_v23 = vand.u32 %v6753_v57, %v5629_v31  ;;  %v5637_v58 = vand.u32 %v6741_v44, %v5629_v31  ;;  %v2429_v44 = vunpack.c.0.s8 %v2249_v61 }
 0x3d8   :  { %5719 = vmatpush.bf16.msrb.mxu3 %v5646_v23 }
 0x3dc   :  { %5720 = vmatpush.bf16.msrb.mxu3 %v6729_v1 }
 0x3dd   :  { %6284 = vrot.lane.b32.xlu1 %v8475_v10, %s6948_s15 }
 0x3e5   :  { %6230 = vrot.lane.b32.xlu1 %v8413_v19, %s6948_s15  ;;  %v6732_v19 = vld [vmem:[%s10186_s4 + $0x30] sm:$0xf] }
 0x3ed   :  { %6246 = vrot.lane.b32.xlu1 %v8420_v5, %s6948_s15  ;;  %v6823_v5 = vld [vmem:[%s10186_s4 + $0x44] sm:$0x70] }
 0x3f5   :  { %6228 = vrot.lane.b32.xlu1 %v8431_v38, %s6948_s15  ;;  %v6733_v38 = vor.u32 %v6823_v5, %v6732_v19 }
 0x3f7   :  { %v5631_v52 = vand.u32 %v6733_v38, %v5629_v31 }
 0x3f9   :  { %5654 = vmatpush.bf16.msrb.mxu0 %v5631_v52  ;;  %v2273_v52 = vld [vmem:[#allocation5 + $0x120] sm:$0xff] }
 0x3fa   :  { %v2537_v23 = vunpack.c.2.s8 %v2273_v52 }
 0x3fd   :  { %6244 = vrot.lane.b32.xlu1 %v8437_v6, %s6948_s15  ;;  %v6748_v6 = vld [vmem:[%s10186_s4 + $0x40] sm:$0xf]  ;;  %5655 = vmatpush.bf16.msrb.mxu0 %v6709_v35  ;;  %v2543_v35 = vunpack.c.3.s8 %v2273_v52 }
 0x3fe   :  { %v6749_v10 = vor.u32 %v6825_v21, %v6748_v6 }
 0x3ff   :  { %v3119_v1 = vcvt.s32.f32 %v2543_v35 }
 0x400   :  { %v5643_v32 = vand.u32 %v6749_v10, %v5629_v31 }
 0x401   :  { %5680 = vmatpush.bf16.msra.mxu0 %v5637_v58  ;;  %v3701_v47 = vmul.f32 %v8865_v15, %v3119_v1  ;;  %v2525_v58 = vunpack.c.0.s8 %v2273_v52 }
 0x402   :  { %5706 = vmatpush.bf16.msrb.mxu2 %v5643_v32  ;;  %v2447_v32 = vunpack.c.3.s8 %v2249_v61 }
 0x405   :  { %6226 = vrot.lane.b32.xlu1 %v8457_v49, %s6948_s15  ;;  %v6737_v49 = vor.u32 %v6820_v12, %v6734_v0  ;;  %5681 = vmatpush.bf16.msra.mxu0 %v6717_v29  ;;  %v3005_v29 = vcvt.s32.f32 %v2429_v44 }
 0x407   :  { %v5634_v13 = vand.u32 %v6737_v49, %v5629_v31 }
 0x409   :  { %5667 = vmatpush.bf16.msrb.mxu1 %v5634_v13  ;;  %v2441_v13 = vunpack.c.2.s8 %v2249_v61 }
 0x40b   :  { %v3017_v41 = vcvt.s32.f32 %v2441_v13 }
 0x40d   :  { %6242 = vrot.lane.b32.xlu1 %v8469_v8, %s6948_s15  ;;  %v6724_v8 = vld [vmem:[%s10186_s4 + $0x10] sm:$0xf]  ;;  %5668 = vmatpush.bf16.msrb.mxu1 %v6713_v14  ;;  %v3599_v40 = vmul.f32 %v8865_v15, %v3017_v41 }
 0x40e   :  { %v6725_v45 = vor.u32 %v6819_v48, %v6724_v8  ;;  %v3023_v8 = vcvt.s32.f32 %v2447_v32  ;;  %v3113_v48 = vcvt.s32.f32 %v2537_v23  ;;  %v6851_v14 = vld [vmem:[%s10189_s7 + $0x10] sm:$0x7f] }
 0x410   :  { %5707 = vmatpush.bf16.msrb.mxu2 %v6725_v45  ;;  %v8878_v45 = vperm.slane %v6851_v14, 6  ;;  %v3605_v54 = vmul.f32 %v8865_v15, %v3023_v8  ;;  %v3695_v26 = vmul.f32 %v8865_v15, %v3113_v48 }
 0x412   :  { %v4145_v16 = vpack.c.bf16 %v3605_v54, %v3599_v40  ;;  %v4193_v9 = vpack.c.bf16 %v3701_v47, %v3695_v26  ;;  %v2237_v26 = vld [vmem:[#allocation5] sm:$0xff] }
 0x415   :  { %6224 = vrot.lane.b32.xlu1 %v8489_v4, %s6948_s15  ;;  %v5640_v4 = vand.u32 %v6745_v27, %v5629_v31  ;;  %v2435_v27 = vunpack.c.1.s8 %v2249_v61 }
 0x417   :  { %5693 = vmatpush.bf16.msra.mxu1 %v5640_v4  ;;  %v2531_v4 = vunpack.c.1.s8 %v2273_v52 }
 0x41b   :  { %5694 = vmatpush.bf16.msra.mxu1 %v6721_v43  ;;  %v3011_v43 = vcvt.s32.f32 %v2435_v27 }
 0x41d   :  { %6240 = vrot.lane.b32.xlu1 %v8496_v25, %s6948_s15  ;;  %v6850_v25 = vld [vmem:[%s10182_s0] sm:$0xf]  ;;  %v3593_v11 = vmul.f32 %v8865_v15, %v3011_v43 }
 0x41e   :  { %v5542_v62 = vunpack.c.l.bf16 %v6850_v25  ;;  %v3101_v25 = vcvt.s32.f32 %v2525_v58 }
 0x420   :  { %v3683_v46 = vmul.f32 %v8865_v15, %v3101_v25 }
 0x425   :  { %6274 = vrot.lane.b32.xlu1 %v8583_v53, %s6948_s15  ;;  %v2255_v53 = vld [vmem:[#allocation5 + $0x90] sm:$0xff] }
 0x426   :  { %v2465_v50 = vunpack.c.2.s8 %v2255_v53  ;;  %v2471_v18 = vunpack.c.3.s8 %v2255_v53  ;;  %v2459_v12 = vunpack.c.1.s8 %v2255_v53 }
 0x428   :  { %v3041_v55 = vcvt.s32.f32 %v2465_v50  ;;  %v3047_v28 = vcvt.s32.f32 %v2471_v18  ;;  %v3035_v49 = vcvt.s32.f32 %v2459_v12 }
 0x42a   :  { %v3629_v31 = vmul.f32 %v8865_v15, %v3047_v28  ;;  %v3617_v42 = vmul.f32 %v8865_v15, %v3035_v49 }
 0x42d   :  { %6310 = vrot.lane.b32.xlu1 %v8673_v20, %s6948_s15  ;;  %v2279_v20 = vld [vmem:[#allocation5 + $0x150] sm:$0xff] }
 0x42e   :  { %v2561_v7 = vunpack.c.2.s8 %v2279_v20  ;;  %v2567_v24 = vunpack.c.3.s8 %v2279_v20  ;;  %v2549_v38 = vunpack.c.0.s8 %v2279_v20  ;;  %v2555_v0 = vunpack.c.1.s8 %v2279_v20 }
 0x42f   :  { %v5545_v30 = vpop.permute.xlu1 %5544 }
 0x430   :  { %v5548_v63 = vsel %vm5547_vm5, %v5542_v62, %v5545_v30  ;;  %v3143_v39 = vcvt.s32.f32 %v2567_v24  ;;  %v3125_v10 = vcvt.s32.f32 %v2549_v38  ;;  %v3131_v56 = vcvt.s32.f32 %v2555_v0  ;;  %v2243_v30 = vld [vmem:[#allocation5 + $0x30] sm:$0xff] }
 0x431   :  { %v5549_v59 = vpack.c.bf16 %v5548_v63, %v5548_v63  ;;  %v3107_v62 = vcvt.s32.f32 %v2531_v4  ;;  %v2267_v63 = vld [vmem:[#allocation5 + $0xf0] sm:$0xff]  ;;  %v2417_v20 = vunpack.c.2.s8 %v2243_v30  ;;  %v2423_v50 = vunpack.c.3.s8 %v2243_v30  ;;  %v2261_v4 = vld [vmem:[#allocation5 + $0xc0] sm:$0xff] }
 0x432   :  { %v3725_v5 = vmul.f32 %v8865_v15, %v3143_v39  ;;  %v3707_v60 = vmul.f32 %v8865_v15, %v3125_v10  ;;  %v3713_v33 = vmul.f32 %v8865_v15, %v3131_v56  ;;  %v2513_v18 = vunpack.c.2.s8 %v2267_v63 }
 0x433   :  { %6754 = vmatmul.msk.bf16.vlgmr.msrb.gmra.mxu0 %vm5622_vm6, %v5549_v59  ;;  %6755 = vmatmul.msk.bf16.vlgmr.msrb.gmra.mxu1 %vm5622_vm6, %v5549_v59  ;;  %v2519_v24 = vunpack.c.3.s8 %v2267_v63  ;;  %v2999_v28 = vcvt.s32.f32 %v2423_v50  ;;  %v2405_v52 = vunpack.c.0.s8 %v2243_v30  ;;  %v2501_v35 = vunpack.c.0.s8 %v2267_v63 }
 0x434   :  { %6758 = vmatmul.msk.bf16.vlgmr.msrb.gmra.mxu2 %vm5622_vm6, %v5549_v59  ;;  %6759 = vmatmul.msk.bf16.vlgmr.msrb.gmra.mxu3 %vm5622_vm6, %v5549_v59  ;;  %v4199_v22 = vpack.c.bf16 %v3713_v33, %v3707_v60  ;;  %v2507_v41 = vunpack.c.1.s8 %v2267_v63  ;;  %v2393_v63 = vunpack.c.2.s8 %v2237_v26  ;;  %v2399_v50 = vunpack.c.3.s8 %v2237_v26 }
 0x435   :  { %6308 = vrot.lane.b32.xlu1 %v8679_v36, %s6948_s15  ;;  %v3137_v36 = vcvt.s32.f32 %v2561_v7  ;;  %v3689_v7 = vmul.f32 %v8865_v15, %v3107_v62  ;;  %v3581_v38 = vmul.f32 %v8865_v15, %v2999_v28  ;;  %v2981_v60 = vcvt.s32.f32 %v2405_v52 }
 0x436   :  { %v3077_v40 = vcvt.s32.f32 %v2501_v35  ;;  %v3083_v54 = vcvt.s32.f32 %v2507_v41  ;;  %v2975_v28 = vcvt.s32.f32 %v2399_v50  ;;  %v2381_v52 = vunpack.c.0.s8 %v2237_v26 }
 0x437   :  { %v3719_v19 = vmul.f32 %v8865_v15, %v3137_v36  ;;  %v3089_v36 = vcvt.s32.f32 %v2513_v18  ;;  %v2489_v18 = vunpack.c.2.s8 %v2261_v4  ;;  %v2477_v35 = vunpack.c.0.s8 %v2261_v4 }
 0x438   :  { %v2483_v41 = vunpack.c.1.s8 %v2261_v4 }
 0x439   :  { %v4205_v21 = vpack.c.bf16 %v3725_v5, %v3719_v19  ;;  %v4187_v19 = vpack.c.bf16 %v3689_v7, %v3683_v46  ;;  %v3671_v0 = vmul.f32 %v8865_v15, %v3089_v36  ;;  %v2969_v7 = vcvt.s32.f32 %v2393_v63 }
 0x43a   :  { %v3065_v36 = vcvt.s32.f32 %v2489_v18 }
 0x43b   :  { %5757 = vmatpush.bf16.msrb.mxu1 %v4205_v21 }
 0x43d   :  { %6288 = vrot.lane.b32.xlu1 %v8623_v34, %s6948_s15  ;;  %v3623_v34 = vmul.f32 %v8865_v15, %v3041_v55  ;;  %v2993_v55 = vcvt.s32.f32 %v2417_v20  ;;  %s6473_s15 = sshll.u32 %s10190_s8, 4  ;;  %s6474_s15 = int_to_ptr.hbm [resolvable:$true] %s6473_s15 }
 0x43f   :  { %v4157_v17 = vpack.c.bf16 %v3629_v31, %v3623_v34  ;;  %5758 = vmatpush.bf16.msrb.mxu1 %v4199_v22  ;;  %v2327_v34 = vld [vmem:[#allocation5 + $0x2d0] sm:$0xff]  ;;  %v3575_v12 = vmul.f32 %v8865_v15, %v2993_v55  ;;  %v3563_v22 = vmul.f32 %v8865_v15, %v2981_v60  ;;  %v2957_v60 = vcvt.s32.f32 %v2381_v52 }
 0x440   :  { %v2753_v49 = vunpack.c.2.s8 %v2327_v34  ;;  %v2759_v10 = vunpack.c.3.s8 %v2327_v34  ;;  %v2741_v58 = vunpack.c.0.s8 %v2327_v34  ;;  %v2747_v43 = vunpack.c.1.s8 %v2327_v34  ;;  %v2321_v34 = vld [vmem:[#allocation5 + $0x2a0] sm:$0xff] }
 0x441   :  { %5744 = vmatpush.bf16.msrb.mxu0 %v4157_v17  ;;  %v4133_v56 = vpack.c.bf16 %v3581_v38, %v3575_v12  ;;  %v3557_v38 = vmul.f32 %v8865_v15, %v2975_v28 }
 0x442   :  { %v3329_v23 = vcvt.s32.f32 %v2753_v49  ;;  %v2729_v49 = vunpack.c.2.s8 %v2321_v34 }
 0x443   :  { %6756 = vmatmul.msk.bf16.vlgmr.msra.gmra.mxu0 %vm5622_vm6, %v5549_v59  ;;  %6757 = vmatmul.msk.bf16.vlgmr.msra.gmra.mxu1 %vm5622_vm6, %v5549_v59  ;;  %v8890_v59 = vld [vmem:[#allocation5 + $0x210] sm:$0xff] }
 0x444   :  { %5759 = vmatpush.bf16.msrb.mxu1 %v4193_v9  ;;  %v2657_v39 = vunpack.c.2.s8 %v8890_v59  ;;  %v2663_v5 = vunpack.c.3.s8 %v8890_v59  ;;  %v3911_v48 = vmul.f32 %v8865_v15, %v3329_v23  ;;  %v2651_v47 = vunpack.c.1.s8 %v8890_v59 }
 0x445   :  { %6452 = vrot.lane.b32.xlu1 %v8718_v3, %s6950_s1  ;;  %v2453_v3 = vunpack.c.0.s8 %v2255_v53  ;;  %v3587_v53 = vmul.f32 %v8865_v15, %v3005_v29  ;;  %v3659_v29 = vmul.f32 %v8865_v15, %v3077_v40  ;;  %v3665_v9 = vmul.f32 %v8865_v15, %v3083_v54 }
 0x446   :  { %v3233_v17 = vcvt.s32.f32 %v2657_v39  ;;  %v3239_v21 = vcvt.s32.f32 %v2663_v5  ;;  %v3227_v25 = vcvt.s32.f32 %v2651_v47  ;;  %v3305_v23 = vcvt.s32.f32 %v2729_v49 }
 0x447   :  { %v3029_v6 = vcvt.s32.f32 %v2453_v3  ;;  %v4139_v31 = vpack.c.bf16 %v3593_v11, %v3587_v53  ;;  %v3095_v3 = vcvt.s32.f32 %v2519_v24  ;;  %v8913_v53 = vld [vmem:[#allocation5 + $0x1e0] sm:$0xff]  ;;  %v4175_v20 = vpack.c.bf16 %v3665_v9, %v3659_v29 }
 0x448   :  { %5760 = vmatpush.bf16.msrb.mxu1 %v4187_v19  ;;  %v3815_v61 = vmul.f32 %v8865_v15, %v3233_v17  ;;  %v3821_v32 = vmul.f32 %v8865_v15, %v3239_v21  ;;  %v3809_v11 = vmul.f32 %v8865_v15, %v3227_v25  ;;  %v2495_v24 = vunpack.c.3.s8 %v2261_v4  ;;  %v2375_v4 = vld [vmem:[#allocation5 + $0x450] sm:$0xff] }
 0x449   :  { %v3611_v57 = vmul.f32 %v8865_v15, %v3029_v6  ;;  %v3677_v6 = vmul.f32 %v8865_v15, %v3095_v3  ;;  %v2633_v39 = vunpack.c.2.s8 %v8913_v53  ;;  %v3551_v19 = vmul.f32 %v8865_v15, %v2969_v7 }
 0x44a   :  { %v4253_v8 = vpack.c.bf16 %v3821_v32, %v3815_v61  ;;  %v3071_v3 = vcvt.s32.f32 %v2495_v24  ;;  %v2639_v5 = vunpack.c.3.s8 %v8913_v53  ;;  %v3053_v40 = vcvt.s32.f32 %v2477_v35 }
 0x44b   :  { %v4151_v2 = vpack.c.bf16 %v3617_v42, %v3611_v57  ;;  %v2411_v57 = vunpack.c.1.s8 %v2243_v30  ;;  %v4181_v13 = vpack.c.bf16 %v3677_v6, %v3671_v0  ;;  %v3335_v42 = vcvt.s32.f32 %v2759_v10 }
 0x44c   :  { %5770 = vmatpush.bf16.msra.mxu2 %v4253_v8  ;;  %v3317_v30 = vcvt.s32.f32 %v2741_v58  ;;  %v3647_v0 = vmul.f32 %v8865_v15, %v3065_v36  ;;  %v3209_v17 = vcvt.s32.f32 %v2633_v39  ;;  %v3653_v6 = vmul.f32 %v8865_v15, %v3071_v3 }
 0x44d   :  { %5745 = vmatpush.bf16.msrb.mxu0 %v4151_v2  ;;  %v2987_v33 = vcvt.s32.f32 %v2411_v57  ;;  %5761 = vmatpush.bf16.msrb.mxu1 %v4181_v13  ;;  %v3917_v14 = vmul.f32 %v8865_v15, %v3335_v42  ;;  %v2645_v2 = vunpack.c.0.s8 %v8890_v59  ;;  %v3323_v59 = vcvt.s32.f32 %v2747_v43 }
 0x44e   :  { %v3899_v46 = vmul.f32 %v8865_v15, %v3317_v30  ;;  %v3215_v21 = vcvt.s32.f32 %v2639_v5  ;;  %v2735_v10 = vunpack.c.3.s8 %v2321_v34  ;;  %v3791_v61 = vmul.f32 %v8865_v15, %v3209_v17 }
 0x44f   :  { %v3569_v1 = vmul.f32 %v8865_v15, %v2987_v33  ;;  %v4301_v44 = vpack.c.bf16 %v3917_v14, %v3911_v48  ;;  %v3221_v27 = vcvt.s32.f32 %v2645_v2  ;;  %v3905_v55 = vmul.f32 %v8865_v15, %v3323_v59 }
 0x450   :  { %v2387_v57 = vunpack.c.1.s8 %v2237_v26  ;;  %v4169_v13 = vpack.c.bf16 %v3653_v6, %v3647_v0  ;;  %v3797_v32 = vmul.f32 %v8865_v15, %v3215_v21  ;;  %v3311_v42 = vcvt.s32.f32 %v2735_v10  ;;  %v2351_v26 = vld [vmem:[#allocation5 + $0x390] sm:$0xff] }
 0x451   :  { %5746 = vmatpush.bf16.msrb.mxu0 %v4145_v16  ;;  %v4127_v16 = vpack.c.bf16 %v3569_v1, %v3563_v22  ;;  %5783 = vmatpush.bf16.msra.mxu3 %v4301_v44  ;;  %v3803_v62 = vmul.f32 %v8865_v15, %v3221_v27  ;;  %v4295_v12 = vpack.c.bf16 %v3905_v55, %v3899_v46  ;;  %v2621_v2 = vunpack.c.0.s8 %v8913_v53 }
 0x452   :  { %5762 = vmatpush.bf16.msrb.mxu1 %v4175_v20  ;;  %v2963_v33 = vcvt.s32.f32 %v2387_v57  ;;  %v4241_v8 = vpack.c.bf16 %v3797_v32, %v3791_v61  ;;  %v3887_v48 = vmul.f32 %v8865_v15, %v3305_v23  ;;  %v3893_v14 = vmul.f32 %v8865_v15, %v3311_v42  ;;  %v8935_v20 = vld [vmem:[#allocation5 + $0x1b0] sm:$0xff] }
 0x453   :  { %v3539_v22 = vmul.f32 %v8865_v15, %v2957_v60  ;;  %v3059_v54 = vcvt.s32.f32 %v2483_v41  ;;  %v2627_v47 = vunpack.c.1.s8 %v8913_v53  ;;  %v3197_v27 = vcvt.s32.f32 %v2621_v2 }
 0x454   :  { %v3545_v1 = vmul.f32 %v8865_v15, %v2963_v33  ;;  %v4289_v44 = vpack.c.bf16 %v3893_v14, %v3887_v48  ;;  %v2717_v58 = vunpack.c.0.s8 %v2321_v34  ;;  %v3635_v29 = vmul.f32 %v8865_v15, %v3053_v40 }
 0x455   :  { %5747 = vmatpush.bf16.msrb.mxu0 %v4139_v31  ;;  %v4247_v31 = vpack.c.bf16 %v3809_v11, %v3803_v62  ;;  %5784 = vmatpush.bf16.msra.mxu3 %v4295_v12  ;;  %v3641_v9 = vmul.f32 %v8865_v15, %v3059_v54  ;;  %v2723_v43 = vunpack.c.1.s8 %v2321_v34  ;;  %v3203_v25 = vcvt.s32.f32 %v2627_v47  ;;  %v2315_v34 = vld [vmem:[#allocation5 + $0x270] sm:$0xff] }
 0x456   :  { %5763 = vmatpush.bf16.msrb.mxu1 %v4169_v13  ;;  %v3779_v62 = vmul.f32 %v8865_v15, %v3197_v27  ;;  %v3293_v30 = vcvt.s32.f32 %v2717_v58  ;;  %v2849_v63 = vunpack.c.2.s8 %v2351_v26  ;;  %v2855_v50 = vunpack.c.3.s8 %v2351_v26 }
 0x457   :  { %5771 = vmatpush.bf16.msra.mxu2 %v4247_v31  ;;  %v4163_v59 = vpack.c.bf16 %v3641_v9, %v3635_v29  ;;  %v3299_v53 = vcvt.s32.f32 %v2723_v43  ;;  %v2945_v18 = vunpack.c.2.s8 %v2375_v4  ;;  %v3785_v11 = vmul.f32 %v8865_v15, %v3203_v25 }
 0x458   :  { %v3875_v46 = vmul.f32 %v8865_v15, %v3293_v30  ;;  %v3425_v7 = vcvt.s32.f32 %v2849_v63  ;;  %v2951_v24 = vunpack.c.3.s8 %v2375_v4  ;;  %v3431_v28 = vcvt.s32.f32 %v2855_v50 }
 0x459   :  { %5748 = vmatpush.bf16.msrb.mxu0 %v4133_v56  ;;  %v4121_v56 = vpack.c.bf16 %v3557_v38, %v3551_v19  ;;  %5785 = vmatpush.bf16.msra.mxu3 %v4289_v44  ;;  %v3881_v55 = vmul.f32 %v8865_v15, %v3299_v53  ;;  %v3521_v36 = vcvt.s32.f32 %v2945_v18  ;;  %v2609_v39 = vunpack.c.2.s8 %v8935_v20 }
 0x45a   :  { %5764 = vmatpush.bf16.msrb.mxu1 %v4163_v59  ;;  %v4235_v31 = vpack.c.bf16 %v3785_v11, %v3779_v62  ;;  %v4007_v19 = vmul.f32 %v8865_v15, %v3425_v7  ;;  %v3527_v3 = vcvt.s32.f32 %v2951_v24  ;;  %v2615_v5 = vunpack.c.3.s8 %v8935_v20  ;;  %v8957_v59 = vld [vmem:[#allocation5 + $0x180] sm:$0xff] }
 0x45b   :  { %5772 = vmatpush.bf16.msra.mxu2 %v4241_v8  ;;  %v4283_v12 = vpack.c.bf16 %v3881_v55, %v3875_v46  ;;  %v4013_v38 = vmul.f32 %v8865_v15, %v3431_v28  ;;  %v4103_v0 = vmul.f32 %v8865_v15, %v3521_v36  ;;  %v3185_v17 = vcvt.s32.f32 %v2609_v39 }
 0x45c   :  { %v4109_v6 = vmul.f32 %v8865_v15, %v3527_v3  ;;  %v3191_v21 = vcvt.s32.f32 %v2615_v5  ;;  %v2705_v49 = vunpack.c.2.s8 %v2315_v34  ;;  %v2711_v10 = vunpack.c.3.s8 %v2315_v34 }
 0x45d   :  { %5749 = vmatpush.bf16.msrb.mxu0 %v4127_v16  ;;  %v4115_v16 = vpack.c.bf16 %v3545_v1, %v3539_v22  ;;  %5786 = vmatpush.bf16.msra.mxu3 %v4283_v12  ;;  %v3767_v61 = vmul.f32 %v8865_v15, %v3185_v17  ;;  %v2837_v52 = vunpack.c.0.s8 %v2351_v26  ;;  %v2843_v57 = vunpack.c.1.s8 %v2351_v26  ;;  %v2345_v26 = vld [vmem:[#allocation5 + $0x360] sm:$0xff] }
 0x45e   :  { %v4397_v13 = vpack.c.bf16 %v4109_v6, %v4103_v0  ;;  %v3773_v32 = vmul.f32 %v8865_v15, %v3191_v21  ;;  %v3281_v23 = vcvt.s32.f32 %v2705_v49  ;;  %v3287_v42 = vcvt.s32.f32 %v2711_v10 }
 0x45f   :  { %5773 = vmatpush.bf16.msra.mxu2 %v4235_v31  ;;  %v3413_v60 = vcvt.s32.f32 %v2837_v52  ;;  %v3419_v33 = vcvt.s32.f32 %v2843_v57  ;;  %v2933_v35 = vunpack.c.0.s8 %v2375_v4  ;;  %v2939_v41 = vunpack.c.1.s8 %v2375_v4  ;;  %v2369_v4 = vld [vmem:[#allocation5 + $0x420] sm:$0xff] }
 0x460   :  { %5809 = vmatpush.bf16.msra.mxu1 %v4397_v13  ;;  %v4229_v8 = vpack.c.bf16 %v3773_v32, %v3767_v61  ;;  %v3863_v48 = vmul.f32 %v8865_v15, %v3281_v23  ;;  %v3869_v14 = vmul.f32 %v8865_v15, %v3287_v42  ;;  %v2597_v2 = vunpack.c.0.s8 %v8935_v20 }
 0x461   :  { %5750 = vmatpush.bf16.msrb.mxu0 %v4121_v56  ;;  %v4349_v56 = vpack.c.bf16 %v4013_v38, %v4007_v19  ;;  %v3995_v22 = vmul.f32 %v8865_v15, %v3413_v60  ;;  %v4001_v1 = vmul.f32 %v8865_v15, %v3419_v33  ;;  %v3509_v40 = vcvt.s32.f32 %v2933_v35 }
 0x462   :  { %v3515_v54 = vcvt.s32.f32 %v2939_v41  ;;  %v4277_v44 = vpack.c.bf16 %v3869_v14, %v3863_v48  ;;  %v2603_v47 = vunpack.c.1.s8 %v8935_v20  ;;  %v3173_v27 = vcvt.s32.f32 %v2597_v2 }
 0x463   :  { %5774 = vmatpush.bf16.msra.mxu2 %v4229_v8  ;;  %v2693_v58 = vunpack.c.0.s8 %v2315_v34  ;;  %v4091_v29 = vmul.f32 %v8865_v15, %v3509_v40  ;;  %v2699_v43 = vunpack.c.1.s8 %v2315_v34  ;;  %v2825_v63 = vunpack.c.2.s8 %v2345_v26  ;;  %v2309_v34 = vld [vmem:[#allocation5 + $0x240] sm:$0xff] }
 0x464   :  { %v4097_v9 = vmul.f32 %v8865_v15, %v3515_v54  ;;  %5787 = vmatpush.bf16.msra.mxu3 %v4277_v44  ;;  %v3179_v25 = vcvt.s32.f32 %v2603_v47  ;;  %v3755_v62 = vmul.f32 %v8865_v15, %v3173_v27  ;;  %v2831_v50 = vunpack.c.3.s8 %v2345_v26 }
 0x465   :  { %5751 = vmatpush.bf16.msrb.mxu0 %v4115_v16  ;;  %v4343_v16 = vpack.c.bf16 %v4001_v1, %v3995_v22  ;;  %v3269_v30 = vcvt.s32.f32 %v2693_v58  ;;  %v3275_v20 = vcvt.s32.f32 %v2699_v43  ;;  %v2921_v18 = vunpack.c.2.s8 %v2369_v4 }
 0x466   :  { %v4391_v53 = vpack.c.bf16 %v4097_v9, %v4091_v29  ;;  %v3761_v11 = vmul.f32 %v8865_v15, %v3179_v25  ;;  %v3401_v7 = vcvt.s32.f32 %v2825_v63  ;;  %v2927_v24 = vunpack.c.3.s8 %v2369_v4 }
 0x467   :  { %v3851_v46 = vmul.f32 %v8865_v15, %v3269_v30  ;;  %v3857_v55 = vmul.f32 %v8865_v15, %v3275_v20  ;;  %v3407_v28 = vcvt.s32.f32 %v2831_v50  ;;  %v3497_v36 = vcvt.s32.f32 %v2921_v18 }
 0x468   :  { %5810 = vmatpush.bf16.msra.mxu1 %v4391_v53  ;;  %v2585_v39 = vunpack.c.2.s8 %v8957_v59  ;;  %v4223_v31 = vpack.c.bf16 %v3761_v11, %v3755_v62  ;;  %v3983_v19 = vmul.f32 %v8865_v15, %v3401_v7  ;;  %v3503_v3 = vcvt.s32.f32 %v2927_v24  ;;  %v8981_v53 = vld [vmem:[#allocation5 + $0x98] sm:$0xff] }
 0x469   :  { %5796 = vmatpush.bf16.msra.mxu0 %v4349_v56  ;;  %v2591_v5 = vunpack.c.3.s8 %v8957_v59  ;;  %v4271_v12 = vpack.c.bf16 %v3857_v55, %v3851_v46  ;;  %v3989_v38 = vmul.f32 %v8865_v15, %v3407_v28  ;;  %v4079_v0 = vmul.f32 %v8865_v15, %v3497_v36 }
 0x46a   :  { %v3161_v17 = vcvt.s32.f32 %v2585_v39  ;;  %5775 = vmatpush.bf16.msra.mxu2 %v4223_v31  ;;  %v4085_v6 = vmul.f32 %v8865_v15, %v3503_v3  ;;  %v2681_v49 = vunpack.c.2.s8 %v2309_v34  ;;  %v2687_v10 = vunpack.c.3.s8 %v2309_v34 }
 0x46b   :  { %v3167_v21 = vcvt.s32.f32 %v2591_v5  ;;  %5788 = vmatpush.bf16.msra.mxu3 %v4271_v12  ;;  %v4337_v56 = vpack.c.bf16 %v3989_v38, %v3983_v19  ;;  %v2813_v52 = vunpack.c.0.s8 %v2345_v26  ;;  %v2819_v57 = vunpack.c.1.s8 %v2345_v26  ;;  %v2339_v26 = vld [vmem:[#allocation5 + $0x330] sm:$0xff] }
 0x46c   :  { %v3743_v61 = vmul.f32 %v8865_v15, %v3161_v17  ;;  %v4385_v13 = vpack.c.bf16 %v4085_v6, %v4079_v0  ;;  %v3257_v23 = vcvt.s32.f32 %v2681_v49  ;;  %v3263_v42 = vcvt.s32.f32 %v2687_v10  ;;  %v8997_v49 = vld [vmem:[%s10189_s7 + $0x8] sm:$0x7f] }
 0x46d   :  { %5797 = vmatpush.bf16.msra.mxu0 %v4343_v16  ;;  %v3749_v32 = vmul.f32 %v8865_v15, %v3167_v21  ;;  %v3389_v60 = vcvt.s32.f32 %v2813_v52  ;;  %v3395_v33 = vcvt.s32.f32 %v2819_v57  ;;  %v2909_v35 = vunpack.c.0.s8 %v2369_v4 }
 0x46e   :  { %v2915_v41 = vunpack.c.1.s8 %v2369_v4  ;;  %5811 = vmatpush.bf16.msra.mxu1 %v4385_v13  ;;  %v3839_v48 = vmul.f32 %v8865_v15, %v3257_v23  ;;  %v3845_v14 = vmul.f32 %v8865_v15, %v3263_v42  ;;  %v2573_v2 = vunpack.c.0.s8 %v8957_v59  ;;  %v8976_v4 = vld [vmem:[#allocation5 + $0x3f0] sm:$0xff] }
 0x46f   :  { %v4217_v8 = vpack.c.bf16 %v3749_v32, %v3743_v61  ;;  %v3971_v22 = vmul.f32 %v8865_v15, %v3389_v60  ;;  %v3977_v1 = vmul.f32 %v8865_v15, %v3395_v33  ;;  %v3485_v40 = vcvt.s32.f32 %v2909_v35 }
 0x470   :  { %v3491_v54 = vcvt.s32.f32 %v2915_v41  ;;  %v4265_v44 = vpack.c.bf16 %v3845_v14, %v3839_v48  ;;  %v2579_v47 = vunpack.c.1.s8 %v8957_v59  ;;  %v3149_v27 = vcvt.s32.f32 %v2573_v2 }
 0x471   :  { %5798 = vmatpush.bf16.msra.mxu0 %v4337_v56  ;;  %5776 = vmatpush.bf16.msra.mxu2 %v4217_v8  ;;  %v2669_v58 = vunpack.c.0.s8 %v2309_v34  ;;  %v4331_v16 = vpack.c.bf16 %v3977_v1, %v3971_v22  ;;  %v4067_v29 = vmul.f32 %v8865_v15, %v3485_v40  ;;  %v2675_v43 = vunpack.c.1.s8 %v2309_v34  ;;  %v2280_v34 = vld [vmem:[#allocation5 + $0x158] sm:$0xff] }
 0x472   :  { %v4073_v9 = vmul.f32 %v8865_v15, %v3491_v54  ;;  %5789 = vmatpush.bf16.msra.mxu3 %v4265_v44  ;;  %v3155_v25 = vcvt.s32.f32 %v2579_v47  ;;  %v3731_v62 = vmul.f32 %v8865_v15, %v3149_v27  ;;  %v2801_v63 = vunpack.c.2.s8 %v2339_v26 }
 0x473   :  { %v3245_v30 = vcvt.s32.f32 %v2669_v58  ;;  %v3251_v20 = vcvt.s32.f32 %v2675_v43  ;;  %v2807_v50 = vunpack.c.3.s8 %v2339_v26  ;;  %v2897_v18 = vunpack.c.2.s8 %v8976_v4 }
 0x474   :  { %v4379_v59 = vpack.c.bf16 %v4073_v9, %v4067_v29  ;;  %v3737_v11 = vmul.f32 %v8865_v15, %v3155_v25  ;;  %v3377_v7 = vcvt.s32.f32 %v2801_v63  ;;  %v2903_v24 = vunpack.c.3.s8 %v8976_v4 }
 0x475   :  { %5799 = vmatpush.bf16.msra.mxu0 %v4331_v16  ;;  %v3827_v46 = vmul.f32 %v8865_v15, %v3245_v30  ;;  %v3833_v55 = vmul.f32 %v8865_v15, %v3251_v20  ;;  %v3383_v28 = vcvt.s32.f32 %v2807_v50  ;;  %v3473_v36 = vcvt.s32.f32 %v2897_v18  ;;  %v9012_v16 = vld [vmem:[#allocation5 + $0x300] sm:$0xff] }
 0x476   :  { %5812 = vmatpush.bf16.msra.mxu1 %v4379_v59  ;;  %v2466_v39 = vunpack.c.2.s8 %v8981_v53  ;;  %v4211_v31 = vpack.c.bf16 %v3737_v11, %v3731_v62  ;;  %v3959_v19 = vmul.f32 %v8865_v15, %v3377_v7  ;;  %v3479_v3 = vcvt.s32.f32 %v2903_v24  ;;  %v9017_v59 = vld [vmem:[#allocation5 + $0x3c0] sm:$0xff] }
 0x477   :  { %v2472_v5 = vunpack.c.3.s8 %v8981_v53  ;;  %v4259_v12 = vpack.c.bf16 %v3833_v55, %v3827_v46  ;;  %v3965_v38 = vmul.f32 %v8865_v15, %v3383_v28  ;;  %v4055_v0 = vmul.f32 %v8865_v15, %v3473_v36  ;;  %v6853_v20 = vld [vmem:[%s10189_s7] sm:$0x7f]  ;;  %v9024_v46 = vld [vmem:[#allocation5 + $0x68] sm:$0xff] }
 0x478   :  { %v3042_v17 = vcvt.s32.f32 %v2466_v39  ;;  %5777 = vmatpush.bf16.msra.mxu2 %v4211_v31  ;;  %v4061_v6 = vmul.f32 %v8865_v15, %v3479_v3  ;;  %v9000_v10 = vperm.slane %v8997_v49, 6  ;;  %v2562_v56 = vunpack.c.2.s8 %v2280_v34 }
 0x479   :  { %v3048_v21 = vcvt.s32.f32 %v2472_v5  ;;  %5790 = vmatpush.bf16.msra.mxu3 %v4259_v12  ;;  %v4325_v61 = vpack.c.bf16 %v3965_v38, %v3959_v19  ;;  %v2568_v52 = vunpack.c.3.s8 %v2280_v34  ;;  %v2789_v57 = vunpack.c.0.s8 %v2339_v26 }
 0x47a   :  { %v2795_v13 = vunpack.c.1.s8 %v2339_v26  ;;  %v4373_v32 = vpack.c.bf16 %v4061_v6, %v4055_v0  ;;  %v3624_v23 = vmul.f32 %v9000_v10, %v3042_v17  ;;  %v3138_v60 = vcvt.s32.f32 %v2562_v56  ;;  %v9034_v17 = vld [vmem:[#allocation5 + $0x128] sm:$0xff] }
 0x47b   :  { %v3630_v42 = vmul.f32 %v9000_v10, %v3048_v21  ;;  %5800 = vmatpush.bf16.msra.mxu0 %v4325_v61  ;;  %v3144_v33 = vcvt.s32.f32 %v2568_v52  ;;  %v3365_v35 = vcvt.s32.f32 %v2789_v57  ;;  %v2885_v8 = vunpack.c.0.s8 %v8976_v4 }
 0x47c   :  { %v3371_v41 = vcvt.s32.f32 %v2795_v13  ;;  %5813 = vmatpush.bf16.msra.mxu1 %v4373_v32  ;;  %v3720_v14 = vmul.f32 %v9000_v10, %v3138_v60  ;;  %v2891_v2 = vunpack.c.1.s8 %v8976_v4  ;;  %v2454_v22 = vunpack.c.0.s8 %v8981_v53 }
 0x47d   :  { %v4158_v48 = vpack.c.bf16 %v3630_v42, %v3624_v23  ;;  %v3726_v1 = vmul.f32 %v9000_v10, %v3144_v33  ;;  %v3947_v40 = vmul.f32 %v8865_v15, %v3365_v35  ;;  %v3461_v26 = vcvt.s32.f32 %v2885_v8 }
 0x47e   :  { %v3953_v54 = vmul.f32 %v8865_v15, %v3371_v41  ;;  %v3467_v44 = vcvt.s32.f32 %v2891_v2  ;;  %v2460_v47 = vunpack.c.1.s8 %v8981_v53  ;;  %v3030_v27 = vcvt.s32.f32 %v2454_v22 }
 0x47f   :  { %5822 = vmatpush.bf16.msrb.mxu2 %v4158_v48  ;;  %v2550_v58 = vunpack.c.0.s8 %v2280_v34  ;;  %v4206_v29 = vpack.c.bf16 %v3726_v1, %v3720_v14  ;;  %v4043_v4 = vmul.f32 %v8865_v15, %v3461_v26  ;;  %v2556_v43 = vunpack.c.1.s8 %v2280_v34 }
 0x480   :  { %v4319_v9 = vpack.c.bf16 %v3953_v54, %v3947_v40  ;;  %v4049_v25 = vmul.f32 %v8865_v15, %v3467_v44  ;;  %v3036_v62 = vcvt.s32.f32 %v2460_v47  ;;  %v3612_v30 = vmul.f32 %v9000_v10, %v3030_v27  ;;  %v6854_v54 = vld [vmem:[%s10189_s7 + $0x20] sm:$0x7f]  ;;  %v6855_v44 = vld [vmem:[%s10189_s7 + $0x28] sm:$0x7f] }
 0x481   :  { %v3126_v63 = vcvt.s32.f32 %v2550_v58  ;;  %5835 = vmatpush.bf16.msrb.mxu3 %v4206_v29  ;;  %v3132_v53 = vcvt.s32.f32 %v2556_v43  ;;  %v5562_v50 = vperm.slane %v6853_v20, 2  ;;  %v5563_v18 = vperm.slane %v8997_v49, 2 }
 0x482   :  { %5801 = vmatpush.bf16.msra.mxu0 %v4319_v9  ;;  %v2777_v11 = vunpack.c.2.s8 %v9012_v16  ;;  %v4367_v7 = vpack.c.bf16 %v4049_v25, %v4043_v4  ;;  %v3618_v24 = vmul.f32 %v9000_v10, %v3036_v62  ;;  %v2783_v28 = vunpack.c.3.s8 %v9012_v16 }
 0x483   :  { %v3708_v55 = vmul.f32 %v9000_v10, %v3126_v63  ;;  %v3714_v36 = vmul.f32 %v9000_v10, %v3132_v53  ;;  %v2873_v34 = vunpack.c.2.s8 %v9017_v59  ;;  %v2879_v31 = vunpack.c.3.s8 %v9017_v59 }
 0x484   :  { %v3353_v39 = vcvt.s32.f32 %v2777_v11  ;;  %5814 = vmatpush.bf16.msra.mxu1 %v4367_v7  ;;  %v4152_v19 = vpack.c.bf16 %v3618_v24, %v3612_v30  ;;  %v3359_v12 = vcvt.s32.f32 %v2783_v28  ;;  %v2442_v38 = vunpack.c.2.s8 %v9024_v46 }
 0x485   :  { %v2448_v0 = vunpack.c.3.s8 %v9024_v46  ;;  %v4200_v6 = vpack.c.bf16 %v3714_v36, %v3708_v55  ;;  %v3449_v52 = vcvt.s32.f32 %v2873_v34  ;;  %v3455_v57 = vcvt.s32.f32 %v2879_v31 }
 0x486   :  { %v3935_v56 = vmul.f32 %v8865_v15, %v3353_v39  ;;  %5823 = vmatpush.bf16.msrb.mxu2 %v4152_v19  ;;  %v3941_v61 = vmul.f32 %v8865_v15, %v3359_v12  ;;  %v3018_v13 = vcvt.s32.f32 %v2442_v38  ;;  %v2538_v60 = vunpack.c.2.s8 %v9034_v17  ;;  %v9065_v19 = vld [vmem:[#allocation5 + $0x218] sm:$0xff] }
 0x487   :  { %5836 = vmatpush.bf16.msrb.mxu3 %v4200_v6  ;;  %v3024_v42 = vcvt.s32.f32 %v2448_v0  ;;  %v4031_v35 = vmul.f32 %v8865_v15, %v3449_v52  ;;  %v4037_v41 = vmul.f32 %v8865_v15, %v3455_v57  ;;  %v2544_v22 = vunpack.c.3.s8 %v9034_v17  ;;  %v9073_v38 = vld [vmem:[#allocation5 + $0x2d8] sm:$0xff] }
 0x488   :  { %v4313_v33 = vpack.c.bf16 %v3941_v61, %v3935_v56  ;;  %v3600_v8 = vmul.f32 %v9000_v10, %v3018_v13  ;;  %v3114_v40 = vcvt.s32.f32 %v2538_v60  ;;  %v5566_v26 = vperm.slane %v6854_v54, 2  ;;  %v9080_v13 = vld [vmem:[#allocation5 + $0x38] sm:$0xff] }
 0x489   :  { %v3606_v2 = vmul.f32 %v9000_v10, %v3024_v42  ;;  %v4361_v1 = vpack.c.bf16 %v4037_v41, %v4031_v35  ;;  %v5567_v47 = vperm.slane %v6855_v44, 2  ;;  %v3120_v58 = vcvt.s32.f32 %v2544_v22  ;;  %v2268_v54 = vld [vmem:[#allocation5 + $0xf8] sm:$0xff] }
 0x48a   :  { %5802 = vmatpush.bf16.msra.mxu0 %v4313_v33  ;;  %v2765_v4 = vunpack.c.0.s8 %v9012_v16  ;;  %v2771_v43 = vunpack.c.1.s8 %v9012_v16  ;;  %v3696_v25 = vmul.f32 %v9000_v10, %v3114_v40  ;;  %v2861_v63 = vunpack.c.0.s8 %v9017_v59 }
 0x48b   :  { %v4146_v27 = vpack.c.bf16 %v3606_v2, %v3600_v8  ;;  %5815 = vmatpush.bf16.msra.mxu1 %v4361_v1  ;;  %v3702_v20 = vmul.f32 %v9000_v10, %v3120_v58  ;;  %v2867_v11 = vunpack.c.1.s8 %v9017_v59  ;;  %v2430_v28 = vunpack.c.0.s8 %v9024_v46 }
 0x48c   :  { %v3437_v55 = vcvt.s32.f32 %v2861_v63  ;;  %v2436_v12 = vunpack.c.1.s8 %v9024_v46  ;;  %v2532_v61 = vunpack.c.1.s8 %v9034_v17  ;;  %v2658_v52 = vunpack.c.2.s8 %v9065_v19 }
 0x48d   :  { %5824 = vmatpush.bf16.msrb.mxu2 %v4146_v27  ;;  %v4194_v36 = vpack.c.bf16 %v3702_v20, %v3696_v25  ;;  %v3443_v31 = vcvt.s32.f32 %v2867_v11  ;;  %v2664_v57 = vunpack.c.3.s8 %v9065_v19  ;;  %v2754_v42 = vunpack.c.2.s8 %v9073_v38 }
 0x48e   :  { %v4019_v59 = vmul.f32 %v8865_v15, %v3437_v55  ;;  %v3012_v56 = vcvt.s32.f32 %v2436_v12  ;;  %v3108_v35 = vcvt.s32.f32 %v2532_v61  ;;  %v3234_v41 = vcvt.s32.f32 %v2658_v52 }
 0x48f   :  { %5837 = vmatpush.bf16.msrb.mxu3 %v4194_v36  ;;  %v4025_v6 = vmul.f32 %v8865_v15, %v3443_v31  ;;  %v2760_v22 = vunpack.c.3.s8 %v9073_v38  ;;  %v3330_v1 = vcvt.s32.f32 %v2754_v42  ;;  %v2418_v40 = vunpack.c.2.s8 %v9080_v13 }
 0x490   :  { %v3594_v33 = vmul.f32 %v9000_v10, %v3012_v56  ;;  %v3816_v27 = vmul.f32 %v9000_v10, %v3234_v41  ;;  %v2520_v63 = vunpack.c.3.s8 %v2268_v54  ;;  %v9110_v56 = vld [vmem:[#allocation5 + $0x1e8] sm:$0xff]  ;;  %v2502_v42 = vunpack.c.0.s8 %v2268_v54 }
 0x491   :  { %v4355_v46 = vpack.c.bf16 %v4025_v6, %v4019_v59  ;;  %v2634_v41 = vunpack.c.2.s8 %v9110_v56 }
 0x493   :  { %5816 = vmatpush.bf16.msra.mxu1 %v4355_v46  ;;  %v2412_v46 = vunpack.c.1.s8 %v9080_v13 }
 0x4b0   :  { %v5657_v3 = vpop.f32.mrf.mxu0  ;;  %v5670_v5 = vpop.f32.mrf.mxu1 }
 0x4b1   :  { %v5658_v21 = vadd.f32 %v5657_v3, %v5562_v50  ;;  %v5671_v49 = vadd.f32 %v5670_v5, %v5563_v18  ;;  %v3341_v50 = vcvt.s32.f32 %v2765_v4  ;;  %v3347_v18 = vcvt.s32.f32 %v2771_v43 }
 0x4b2   :  { %v2424_v4 = vunpack.c.3.s8 %v9080_v13  ;;  %v2994_v43 = vcvt.s32.f32 %v2418_v40 }
 0x4b3   :  { %v5726_v32 = vmax.f32 %v5658_v21, 0.0  ;;  %v5727_v23 = vmax.f32 %v5671_v49, 0.0  ;;  %v3923_v39 = vmul.f32 %v8865_v15, %v3341_v50  ;;  %v3929_v34 = vmul.f32 %v8865_v15, %v3347_v18 }
 0x4b4   :  { %v3006_v21 = vcvt.s32.f32 %v2430_v28  ;;  %v2526_v49 = vunpack.c.0.s8 %v9034_v17  ;;  %v3240_v17 = vcvt.s32.f32 %v2664_v57  ;;  %v3000_v20 = vcvt.s32.f32 %v2424_v4 }
 0x4b5   :  { %v9042_v48 = vpack.c.bf16 %v5726_v32, %v5726_v32  ;;  %v9044_v14 = vpack.c.bf16 %v5727_v23, %v5727_v23  ;;  %v4307_v0 = vpack.c.bf16 %v3929_v34, %v3923_v39  ;;  %v3576_v50 = vmul.f32 %v9000_v10, %v2994_v43  ;;  %v2238_v43 = vld [vmem:[#allocation5 + $0x8] sm:$0xff] }
 0x4b6   :  { %v3588_v32 = vmul.f32 %v9000_v10, %v3006_v21  ;;  %v3102_v23 = vcvt.s32.f32 %v2526_v49  ;;  %v3822_v58 = vmul.f32 %v9000_v10, %v3240_v17  ;;  %v2646_v18 = vunpack.c.0.s8 %v9065_v19 }
 0x4b7   :  { %v5709_v29 = vpop.f32.mrf.mxu2  ;;  %v5722_v9 = vpop.f32.mrf.mxu3  ;;  %5752 = vmatmul.bf16.vlgmr.msrb.gmra.mxu0 %v9042_v48  ;;  %5765 = vmatmul.bf16.vlgmr.msrb.gmra.mxu1 %v9044_v14  ;;  %v3582_v28 = vmul.f32 %v9000_v10, %v3000_v20  ;;  %v2748_v39 = vunpack.c.1.s8 %v9073_v38  ;;  %v2406_v49 = vunpack.c.0.s8 %v9080_v13  ;;  %v2640_v17 = vunpack.c.3.s8 %v9110_v56 }
 0x4b8   :  { %v5710_v62 = vadd.f32 %v5709_v29, %v5566_v26  ;;  %v5723_v30 = vadd.f32 %v5722_v9, %v5567_v47  ;;  %v5659_v53 = vpop.f32.mrf.mxu0  ;;  %v5672_v16 = vpop.f32.mrf.mxu1  ;;  %5803 = vmatpush.bf16.msra.mxu0 %v4307_v0  ;;  %v3684_v2 = vmul.f32 %v9000_v10, %v3102_v23  ;;  %v4140_v44 = vpack.c.bf16 %v3594_v33, %v3588_v32 }
 0x4b9   :  { %v3690_v47 = vmul.f32 %v9000_v10, %v3108_v35  ;;  %v3336_v29 = vcvt.s32.f32 %v2760_v22  ;;  %v3912_v9 = vmul.f32 %v9000_v10, %v3330_v1  ;;  %v3096_v16 = vcvt.s32.f32 %v2520_v63 }
 0x4ba   :  { %v5730_v7 = vmax.f32 %v5710_v62, 0.0  ;;  %v5731_v24 = vmax.f32 %v5723_v30, 0.0  ;;  %5825 = vmatpush.bf16.msrb.mxu2 %v4140_v44  ;;  %v4254_v62 = vpack.c.bf16 %v3822_v58, %v3816_v27  ;;  %v2514_v30 = vunpack.c.2.s8 %v2268_v54 }
 0x4bb   :  { %v4188_v25 = vpack.c.bf16 %v3690_v47, %v3684_v2  ;;  %v3918_v53 = vmul.f32 %v9000_v10, %v3336_v29  ;;  %v3222_v36 = vcvt.s32.f32 %v2646_v18  ;;  %v3678_v31 = vmul.f32 %v9000_v10, %v3096_v16 }
 0x4bc   :  { %v9067_v3 = vpack.c.bf16 %v5730_v7, %v5730_v7  ;;  %v9069_v5 = vpack.c.bf16 %v5731_v24, %v5731_v24  ;;  %5848 = vmatpush.bf16.msrb.mxu0 %v4254_v62  ;;  %v3090_v11 = vcvt.s32.f32 %v2514_v30  ;;  %v2652_v7 = vunpack.c.1.s8 %v9065_v19 }
 0x4bd   :  { %5838 = vmatpush.bf16.msrb.mxu3 %v4188_v25  ;;  %v2742_v24 = vunpack.c.0.s8 %v9073_v38  ;;  %v4302_v55 = vpack.c.bf16 %v3918_v53, %v3912_v9  ;;  %v4134_v19 = vpack.c.bf16 %v3582_v28, %v3576_v50  ;;  %v3804_v6 = vmul.f32 %v9000_v10, %v3222_v36  ;;  %v6856_v9 = vld [vmem:[%s10189_s7 + $0x10] sm:$0x7f]  ;;  %v2262_v53 = vld [vmem:[#allocation5 + $0xc8] sm:$0xff] }
 0x4be   :  { %v3672_v34 = vmul.f32 %v9000_v10, %v3090_v11  ;;  %v3228_v59 = vcvt.s32.f32 %v2652_v7  ;;  %v3324_v21 = vcvt.s32.f32 %v2748_v39  ;;  %v2982_v23 = vcvt.s32.f32 %v2406_v49  ;;  %v6857_v11 = vld [vmem:[%s10189_s7 + $0x18] sm:$0x7f] }
 0x4bf   :  { %v5711_v15 = vpop.f32.mrf.mxu2  ;;  %v5724_v60 = vpop.f32.mrf.mxu3  ;;  %v3318_v12 = vcvt.s32.f32 %v2742_v24  ;;  %5861 = vmatpush.bf16.msrb.mxu1 %v4302_v55  ;;  %5826 = vmatpush.bf16.msrb.mxu2 %v4134_v19  ;;  %v2988_v35 = vcvt.s32.f32 %v2412_v46  ;;  %v3078_v1 = vcvt.s32.f32 %v2502_v42  ;;  %v3210_v44 = vcvt.s32.f32 %v2634_v41 }
 0x4c0   :  { %v9085_v8 = vpop.f32.mrf.mxu0  ;;  %v9090_v26 = vpop.f32.mrf.mxu1  ;;  %v4182_v61 = vpack.c.bf16 %v3678_v31, %v3672_v34  ;;  %v3810_v52 = vmul.f32 %v9000_v10, %v3228_v59  ;;  %v3906_v32 = vmul.f32 %v9000_v10, %v3324_v21  ;;  %v2508_v15 = vunpack.c.1.s8 %v2268_v54  ;;  %v9116_v60 = vld [vmem:[#allocation5 + $0x2a8] sm:$0xff] }
 0x4c1   :  { %v3900_v57 = vmul.f32 %v9000_v10, %v3318_v12  ;;  %v3564_v22 = vmul.f32 %v9000_v10, %v2982_v23  ;;  %v3570_v40 = vmul.f32 %v9000_v10, %v2988_v35  ;;  %v3216_v47 = vcvt.s32.f32 %v2640_v17 }
 0x4c2   :  { %5839 = vmatpush.bf16.msrb.mxu3 %v4182_v61  ;;  %v4248_v33 = vpack.c.bf16 %v3810_v52, %v3804_v6  ;;  %v3084_v13 = vcvt.s32.f32 %v2508_v15  ;;  %v2730_v54 = vunpack.c.2.s8 %v9116_v60  ;;  %v3660_v27 = vmul.f32 %v9000_v10, %v3078_v1 }
 0x4c3   :  { %v4296_v2 = vpack.c.bf16 %v3906_v32, %v3900_v57  ;;  %v2736_v29 = vunpack.c.3.s8 %v9116_v60  ;;  %v5564_v4 = vperm.slane %v6856_v9, 2  ;;  %v4128_v25 = vpack.c.bf16 %v3570_v40, %v3564_v22  ;;  %v2292_v22 = vld [vmem:[#allocation5 + $0x1b8] sm:$0xff] }
 0x4c4   :  { %5849 = vmatpush.bf16.msrb.mxu0 %v4248_v33  ;;  %v3666_v58 = vmul.f32 %v9000_v10, %v3084_v13  ;;  %v3792_v62 = vmul.f32 %v9000_v10, %v3210_v44  ;;  %v3798_v30 = vmul.f32 %v9000_v10, %v3216_v47  ;;  %v3306_v63 = vcvt.s32.f32 %v2730_v54 }
 0x4c5   :  { %5862 = vmatpush.bf16.msrb.mxu1 %v4296_v2  ;;  %v3312_v50 = vcvt.s32.f32 %v2736_v29  ;;  %v5684_v18 = vadd.f32 %v9085_v8, %v5564_v4  ;;  %v5565_v16 = vperm.slane %v6857_v11, 2  ;;  %5827 = vmatpush.bf16.msrb.mxu2 %v4128_v25  ;;  %v2394_v55 = vunpack.c.2.s8 %v2238_v43 }
 0x4c6   :  { %v4176_v20 = vpack.c.bf16 %v3666_v58, %v3660_v27  ;;  %v4242_v7 = vpack.c.bf16 %v3798_v30, %v3792_v62  ;;  %v3888_v24 = vmul.f32 %v9000_v10, %v3306_v63  ;;  %v2400_v28 = vunpack.c.3.s8 %v2238_v43 }
 0x4c7   :  { %5804 = vmatmul.bf16.vlgmr.msra.gmra.mxu0 %v9067_v3  ;;  %5817 = vmatmul.bf16.vlgmr.msra.gmra.mxu1 %v9069_v5  ;;  %v3894_v36 = vmul.f32 %v9000_v10, %v3312_v50  ;;  %v5728_v39 = vmax.f32 %v5684_v18, 0.0  ;;  %v5697_v34 = vadd.f32 %v9090_v26, %v5565_v16  ;;  %v2490_v31 = vunpack.c.2.s8 %v2262_v53  ;;  %v2376_v16 = vld [vmem:[#allocation5 + $0x458] sm:$0xff] }
 0x4c8   :  { %v5685_v0 = vpop.f32.mrf.mxu0  ;;  %v5698_v38 = vpop.f32.mrf.mxu1  ;;  %5840 = vmatpush.bf16.msrb.mxu3 %v4176_v20  ;;  %5850 = vmatpush.bf16.msrb.mxu0 %v4242_v7  ;;  %v2970_v8 = vcvt.s32.f32 %v2394_v55  ;;  %v2976_v59 = vcvt.s32.f32 %v2400_v28  ;;  %v2496_v12 = vunpack.c.3.s8 %v2262_v53  ;;  %v2628_v57 = vunpack.c.1.s8 %v9110_v56  ;;  %v2352_v20 = vld [vmem:[#allocation5 + $0x398] sm:$0xff] }
 0x4c9   :  { %v2622_v0 = vunpack.c.0.s8 %v9110_v56  ;;  %v4290_v19 = vpack.c.bf16 %v3894_v36, %v3888_v24  ;;  %v9139_v6 = vpack.c.bf16 %v5728_v39, %v5728_v39  ;;  %v5729_v21 = vmax.f32 %v5697_v34, 0.0 }
 0x4ca   :  { %v3066_v49 = vcvt.s32.f32 %v2490_v31  ;;  %v3552_v38 = vmul.f32 %v9000_v10, %v2970_v8  ;;  %v3558_v61 = vmul.f32 %v9000_v10, %v2976_v59  ;;  %v3072_v52 = vcvt.s32.f32 %v2496_v12 }
 0x4cb   :  { %5863 = vmatpush.bf16.msrb.mxu1 %v4290_v19  ;;  %v9144_v26 = vpack.c.bf16 %v5729_v21, %v5729_v21  ;;  %v3198_v32 = vcvt.s32.f32 %v2622_v0  ;;  %v2718_v23 = vunpack.c.0.s8 %v9116_v60  ;;  %5778 = vmatmul.bf16.vlgmr.msra.gmra.mxu2 %v9139_v6  ;;  %v3204_v33 = vcvt.s32.f32 %v2628_v57 }
 0x4cc   :  { %v3648_v46 = vmul.f32 %v9000_v10, %v3066_v49  ;;  %v4122_v42 = vpack.c.bf16 %v3558_v61, %v3552_v38  ;;  %v3654_v15 = vmul.f32 %v9000_v10, %v3072_v52  ;;  %v2724_v35 = vunpack.c.1.s8 %v9116_v60  ;;  %v9155_v60 = vld [vmem:[#allocation5 + $0x278] sm:$0xff] }
 0x4cd   :  { %v3780_v41 = vmul.f32 %v9000_v10, %v3198_v32  ;;  %v3294_v17 = vcvt.s32.f32 %v2718_v23  ;;  %v2382_v56 = vunpack.c.0.s8 %v2238_v43  ;;  %v2388_v2 = vunpack.c.1.s8 %v2238_v43  ;;  %5791 = vmatmul.bf16.vlgmr.msra.gmra.mxu3 %v9144_v26 }
 0x4ce   :  { %5828 = vmatpush.bf16.msrb.mxu2 %v4122_v42  ;;  %v4170_v1 = vpack.c.bf16 %v3654_v15, %v3648_v46  ;;  %v3786_v13 = vmul.f32 %v9000_v10, %v3204_v33  ;;  %v3300_v40 = vcvt.s32.f32 %v2724_v35  ;;  %v2478_v44 = vunpack.c.0.s8 %v2262_v53 }
 0x4cf   :  { %v3876_v47 = vmul.f32 %v9000_v10, %v3294_v17  ;;  %v2958_v54 = vcvt.s32.f32 %v2382_v56  ;;  %v2964_v27 = vcvt.s32.f32 %v2388_v2  ;;  %v2484_v58 = vunpack.c.1.s8 %v2262_v53 }
 0x4d0   :  { %5841 = vmatpush.bf16.msrb.mxu3 %v4170_v1  ;;  %v4236_v29 = vpack.c.bf16 %v3786_v13, %v3780_v41  ;;  %v3882_v9 = vmul.f32 %v9000_v10, %v3300_v40  ;;  %v3054_v4 = vcvt.s32.f32 %v2478_v44  ;;  %v2610_v43 = vunpack.c.2.s8 %v2292_v22 }
 0x4d1   :  { %v3540_v25 = vmul.f32 %v9000_v10, %v2958_v54  ;;  %v3546_v62 = vmul.f32 %v9000_v10, %v2964_v27  ;;  %v3060_v30 = vcvt.s32.f32 %v2484_v58  ;;  %v2616_v63 = vunpack.c.3.s8 %v2292_v22 }
 0x4d2   :  { %5851 = vmatpush.bf16.msrb.mxu0 %v4236_v29  ;;  %v4284_v50 = vpack.c.bf16 %v3882_v9, %v3876_v47  ;;  %v3636_v18 = vmul.f32 %v9000_v10, %v3054_v4  ;;  %v3186_v53 = vcvt.s32.f32 %v2610_v43  ;;  %v2706_v11 = vunpack.c.2.s8 %v9155_v60 }
 0x4d3   :  { %v4116_v7 = vpack.c.bf16 %v3546_v62, %v3540_v25  ;;  %v3642_v24 = vmul.f32 %v9000_v10, %v3060_v30  ;;  %v3192_v55 = vcvt.s32.f32 %v2616_v63  ;;  %v2712_v28 = vunpack.c.3.s8 %v9155_v60  ;;  %v9180_v62 = vld [vmem:[#allocation5 + $0x248] sm:$0xff] }
 0x4d4   :  { %5864 = vmatpush.bf16.msrb.mxu1 %v4284_v50  ;;  %v3768_v36 = vmul.f32 %v9000_v10, %v3186_v53  ;;  %v3282_v39 = vcvt.s32.f32 %v2706_v11  ;;  %v2850_v34 = vunpack.c.2.s8 %v2352_v20  ;;  %v2856_v31 = vunpack.c.3.s8 %v2352_v20 }
 0x4d5   :  { %5829 = vmatpush.bf16.msrb.mxu2 %v4116_v7  ;;  %v4164_v8 = vpack.c.bf16 %v3642_v24, %v3636_v18  ;;  %v3774_v59 = vmul.f32 %v9000_v10, %v3192_v55  ;;  %v3288_v12 = vcvt.s32.f32 %v2712_v28  ;;  %v2946_v0 = vunpack.c.2.s8 %v2376_v16  ;;  %v2346_v24 = vld [vmem:[#allocation5 + $0x368] sm:$0xff] }
 0x4d6   :  { %v3864_v19 = vmul.f32 %v9000_v10, %v3282_v39  ;;  %v3426_v21 = vcvt.s32.f32 %v2850_v34  ;;  %v3432_v49 = vcvt.s32.f32 %v2856_v31  ;;  %v2952_v38 = vunpack.c.3.s8 %v2376_v16  ;;  %v2370_v39 = vld [vmem:[#allocation5 + $0x428] sm:$0xff] }
 0x4d7   :  { %5842 = vmatpush.bf16.msrb.mxu3 %v4164_v8  ;;  %v4230_v61 = vpack.c.bf16 %v3774_v59, %v3768_v36  ;;  %v3870_v52 = vmul.f32 %v9000_v10, %v3288_v12  ;;  %v3522_v57 = vcvt.s32.f32 %v2946_v0  ;;  %v2598_v46 = vunpack.c.0.s8 %v2292_v22 }
 0x4d8   :  { %v4008_v32 = vmul.f32 %v9000_v10, %v3426_v21  ;;  %v4014_v23 = vmul.f32 %v9000_v10, %v3432_v49  ;;  %v3528_v42 = vcvt.s32.f32 %v2952_v38  ;;  %v2604_v15 = vunpack.c.1.s8 %v2292_v22  ;;  %v9175_v22 = vld [vmem:[#allocation5 + $0x188] sm:$0xff] }
 0x4d9   :  { %5852 = vmatpush.bf16.msrb.mxu0 %v4230_v61  ;;  %v4278_v33 = vpack.c.bf16 %v3870_v52, %v3864_v19  ;;  %v4104_v35 = vmul.f32 %v9000_v10, %v3522_v57  ;;  %v3174_v41 = vcvt.s32.f32 %v2598_v46  ;;  %v2694_v17 = vunpack.c.0.s8 %v9155_v60 }
 0x4da   :  { %v4350_v56 = vpack.c.bf16 %v4014_v23, %v4008_v32  ;;  %v4110_v2 = vmul.f32 %v9000_v10, %v3528_v42  ;;  %v3180_v1 = vcvt.s32.f32 %v2604_v15  ;;  %v2700_v13 = vunpack.c.1.s8 %v9155_v60 }
 0x4db   :  { %5865 = vmatpush.bf16.msrb.mxu1 %v4278_v33  ;;  %v3756_v40 = vmul.f32 %v9000_v10, %v3174_v41  ;;  %v3270_v44 = vcvt.s32.f32 %v2694_v17  ;;  %v2838_v47 = vunpack.c.0.s8 %v2352_v20  ;;  %v2844_v54 = vunpack.c.1.s8 %v2352_v20  ;;  %5830 = vmatmul.bf16.vlgmr.msrb.gmra.mxu2 %v9042_v48 }
 0x4dc   :  { %5874 = vmatpush.bf16.msra.mxu2 %v4350_v56  ;;  %v4398_v27 = vpack.c.bf16 %v4110_v2, %v4104_v35  ;;  %v3762_v58 = vmul.f32 %v9000_v10, %v3180_v1  ;;  %v3276_v29 = vcvt.s32.f32 %v2700_v13  ;;  %v2934_v9 = vunpack.c.0.s8 %v2376_v16 }
 0x4dd   :  { %v3852_v4 = vmul.f32 %v9000_v10, %v3270_v44  ;;  %v3414_v43 = vcvt.s32.f32 %v2838_v47  ;;  %v3420_v60 = vcvt.s32.f32 %v2844_v54  ;;  %v2940_v25 = vunpack.c.1.s8 %v2376_v16  ;;  %5843 = vmatmul.bf16.vlgmr.msrb.gmra.mxu3 %v9044_v14 }
 0x4de   :  { %5887 = vmatpush.bf16.msra.mxu3 %v4398_v27  ;;  %v4224_v30 = vpack.c.bf16 %v3762_v58, %v3756_v40  ;;  %v3858_v63 = vmul.f32 %v9000_v10, %v3276_v29  ;;  %v3510_v20 = vcvt.s32.f32 %v2934_v9  ;;  %v2586_v50 = vunpack.c.2.s8 %v9175_v22 }
 0x4df   :  { %v3996_v18 = vmul.f32 %v9000_v10, %v3414_v43  ;;  %v4002_v53 = vmul.f32 %v9000_v10, %v3420_v60  ;;  %v3516_v11 = vcvt.s32.f32 %v2940_v25  ;;  %v2592_v7 = vunpack.c.3.s8 %v9175_v22 }
 0x4e0   :  { %5853 = vmatpush.bf16.msrb.mxu0 %v4224_v30  ;;  %v4272_v16 = vpack.c.bf16 %v3858_v63, %v3852_v4  ;;  %v4092_v55 = vmul.f32 %v9000_v10, %v3510_v20  ;;  %v3162_v28 = vcvt.s32.f32 %v2586_v50  ;;  %v2682_v36 = vunpack.c.2.s8 %v9180_v62 }
 0x4e1   :  { %v4344_v34 = vpack.c.bf16 %v4002_v53, %v3996_v18  ;;  %v4098_v31 = vmul.f32 %v9000_v10, %v3516_v11  ;;  %v3168_v8 = vcvt.s32.f32 %v2592_v7  ;;  %v2688_v59 = vunpack.c.3.s8 %v9180_v62 }
 0x4e2   :  { %5866 = vmatpush.bf16.msrb.mxu1 %v4272_v16  ;;  %v3744_v12 = vmul.f32 %v9000_v10, %v3162_v28  ;;  %v3258_v0 = vcvt.s32.f32 %v2682_v36  ;;  %v2826_v19 = vunpack.c.2.s8 %v2346_v24  ;;  %v2832_v21 = vunpack.c.3.s8 %v2346_v24 }
 0x4e3   :  { %5875 = vmatpush.bf16.msra.mxu2 %v4344_v34  ;;  %v4392_v49 = vpack.c.bf16 %v4098_v31, %v4092_v55  ;;  %v3750_v38 = vmul.f32 %v9000_v10, %v3168_v8  ;;  %v3264_v61 = vcvt.s32.f32 %v2688_v59  ;;  %v2922_v52 = vunpack.c.2.s8 %v2370_v39  ;;  %v2340_v31 = vld [vmem:[#allocation5 + $0x338] sm:$0xff] }
 0x4e4   :  { %v3840_v57 = vmul.f32 %v9000_v10, %v3258_v0  ;;  %v3402_v46 = vcvt.s32.f32 %v2826_v19  ;;  %v3408_v32 = vcvt.s32.f32 %v2832_v21  ;;  %v2928_v23 = vunpack.c.3.s8 %v2370_v39  ;;  %v2364_v0 = vld [vmem:[#allocation5 + $0x3f8] sm:$0xff] }
 0x4e5   :  { %5888 = vmatpush.bf16.msra.mxu3 %v4392_v49  ;;  %v4218_v42 = vpack.c.bf16 %v3750_v38, %v3744_v12  ;;  %v3846_v15 = vmul.f32 %v9000_v10, %v3264_v61  ;;  %v3498_v33 = vcvt.s32.f32 %v2922_v52  ;;  %v2574_v35 = vunpack.c.0.s8 %v9175_v22 }
 0x4e6   :  { %v3984_v41 = vmul.f32 %v9000_v10, %v3402_v46  ;;  %v3990_v17 = vmul.f32 %v9000_v10, %v3408_v32  ;;  %v3504_v56 = vcvt.s32.f32 %v2928_v23  ;;  %v2580_v2 = vunpack.c.1.s8 %v9175_v22  ;;  %v9205_v22 = vld [vmem:[#allocation5 + $0xa0] sm:$0xff] }
 0x4e7   :  { %5854 = vmatpush.bf16.msrb.mxu0 %v4218_v42  ;;  %v4266_v1 = vpack.c.bf16 %v3846_v15, %v3840_v57  ;;  %v4080_v13 = vmul.f32 %v9000_v10, %v3498_v33  ;;  %v3150_v40 = vcvt.s32.f32 %v2574_v35  ;;  %v2670_v44 = vunpack.c.0.s8 %v9180_v62 }
 0x4e8   :  { %v4338_v47 = vpack.c.bf16 %v3990_v17, %v3984_v41  ;;  %v4086_v54 = vmul.f32 %v9000_v10, %v3504_v56  ;;  %v3156_v27 = vcvt.s32.f32 %v2580_v2  ;;  %v2676_v58 = vunpack.c.1.s8 %v9180_v62  ;;  %v9209_v62 = vld [vmem:[#allocation5 + $0x160] sm:$0xff] }
 0x4e9   :  { %5867 = vmatpush.bf16.msrb.mxu1 %v4266_v1  ;;  %v3732_v29 = vmul.f32 %v9000_v10, %v3150_v40  ;;  %v3246_v9 = vcvt.s32.f32 %v2670_v44  ;;  %v2814_v4 = vunpack.c.0.s8 %v2346_v24  ;;  %v2820_v43 = vunpack.c.1.s8 %v2346_v24 }
 0x4ea   :  { %5876 = vmatpush.bf16.msra.mxu2 %v4338_v47  ;;  %v4386_v60 = vpack.c.bf16 %v4086_v54, %v4080_v13  ;;  %v3738_v25 = vmul.f32 %v9000_v10, %v3156_v27  ;;  %v3252_v30 = vcvt.s32.f32 %v2676_v58  ;;  %v2910_v63 = vunpack.c.0.s8 %v2370_v39 }
 0x4eb   :  { %v3828_v20 = vmul.f32 %v9000_v10, %v3246_v9  ;;  %v3390_v50 = vcvt.s32.f32 %v2814_v4  ;;  %v3396_v18 = vcvt.s32.f32 %v2820_v43  ;;  %v2916_v53 = vunpack.c.1.s8 %v2370_v39 }
 0x4ec   :  { %5889 = vmatpush.bf16.msra.mxu3 %v4386_v60  ;;  %v4212_v11 = vpack.c.bf16 %v3738_v25, %v3732_v29  ;;  %v3834_v7 = vmul.f32 %v9000_v10, %v3252_v30  ;;  %v3486_v24 = vcvt.s32.f32 %v2910_v63  ;;  %v2467_v16 = vunpack.c.2.s8 %v9205_v22 }
 0x4ed   :  { %v3972_v55 = vmul.f32 %v9000_v10, %v3390_v50  ;;  %v3978_v28 = vmul.f32 %v9000_v10, %v3396_v18  ;;  %v3492_v36 = vcvt.s32.f32 %v2916_v53  ;;  %v2473_v34 = vunpack.c.3.s8 %v9205_v22 }
 0x4ee   :  { %5855 = vmatpush.bf16.msrb.mxu0 %v4212_v11  ;;  %v4260_v8 = vpack.c.bf16 %v3834_v7, %v3828_v20  ;;  %v4068_v39 = vmul.f32 %v9000_v10, %v3486_v24  ;;  %v3043_v59 = vcvt.s32.f32 %v2467_v16  ;;  %v2563_v12 = vunpack.c.2.s8 %v9209_v62 }
 0x4ef   :  { %v4332_v19 = vpack.c.bf16 %v3978_v28, %v3972_v55  ;;  %v4074_v21 = vmul.f32 %v9000_v10, %v3492_v36  ;;  %v3049_v49 = vcvt.s32.f32 %v2473_v34  ;;  %v2569_v38 = vunpack.c.3.s8 %v9209_v62  ;;  %v2275_v36 = vld [vmem:[#allocation5 + $0x130] sm:$0xff] }
 0x4f0   :  { %5868 = vmatpush.bf16.msrb.mxu1 %v4260_v8  ;;  %v3625_v61 = vmul.f32 %v8878_v45, %v3043_v59  ;;  %v3139_v52 = vcvt.s32.f32 %v2563_v12  ;;  %v2802_v57 = vunpack.c.2.s8 %v2340_v31  ;;  %v2808_v46 = vunpack.c.3.s8 %v2340_v31 }
 0x4f1   :  { %5877 = vmatpush.bf16.msra.mxu2 %v4332_v19  ;;  %v4380_v32 = vpack.c.bf16 %v4074_v21, %v4068_v39  ;;  %v3631_v23 = vmul.f32 %v8878_v45, %v3049_v49  ;;  %v3145_v42 = vcvt.s32.f32 %v2569_v38  ;;  %5856 = vmatmul.bf16.vlgmr.msrb.gmra.mxu0 %v9139_v6  ;;  %v2898_v15 = vunpack.c.2.s8 %v2364_v0  ;;  %v2334_v21 = vld [vmem:[#allocation5 + $0x308] sm:$0xff] }
 0x4f2   :  { %v3721_v33 = vmul.f32 %v8878_v45, %v3139_v52  ;;  %v3378_v35 = vcvt.s32.f32 %v2802_v57  ;;  %v3384_v41 = vcvt.s32.f32 %v2808_v46  ;;  %v2904_v17 = vunpack.c.3.s8 %v2364_v0  ;;  %v2358_v52 = vld [vmem:[#allocation5 + $0x3c8] sm:$0xff] }
 0x4f3   :  { %5890 = vmatpush.bf16.msra.mxu3 %v4380_v32  ;;  %v4159_v56 = vpack.c.bf16 %v3631_v23, %v3625_v61  ;;  %v3727_v2 = vmul.f32 %v8878_v45, %v3145_v42  ;;  %5869 = vmatmul.bf16.vlgmr.msrb.gmra.mxu1 %v9144_v26  ;;  %v3474_v1 = vcvt.s32.f32 %v2898_v15  ;;  %v2455_v13 = vunpack.c.0.s8 %v9205_v22 }
 0x4f4   :  { %v3960_v40 = vmul.f32 %v9000_v10, %v3378_v35  ;;  %v3966_v44 = vmul.f32 %v9000_v10, %v3384_v41  ;;  %v3480_v47 = vcvt.s32.f32 %v2904_v17  ;;  %v2461_v54 = vunpack.c.1.s8 %v9205_v22  ;;  %v2251_v22 = vld [vmem:[#allocation5 + $0x70] sm:$0xff] }
 0x4f5   :  { %5900 = vmatpush.bf16.msra.mxu0 %v4159_v56  ;;  %v4207_v27 = vpack.c.bf16 %v3727_v2, %v3721_v33  ;;  %v4056_v58 = vmul.f32 %v9000_v10, %v3474_v1  ;;  %v3031_v29 = vcvt.s32.f32 %v2455_v13  ;;  %v2551_v9 = vunpack.c.0.s8 %v9209_v62 }
 0x4f6   :  { %v4326_v4 = vpack.c.bf16 %v3966_v44, %v3960_v40  ;;  %v4062_v43 = vmul.f32 %v9000_v10, %v3480_v47  ;;  %v3037_v60 = vcvt.s32.f32 %v2461_v54  ;;  %v2557_v25 = vunpack.c.1.s8 %v9209_v62 }
 0x4f7   :  { %5913 = vmatpush.bf16.msra.mxu1 %v4207_v27  ;;  %v3613_v30 = vmul.f32 %v8878_v45, %v3031_v29  ;;  %v3127_v63 = vcvt.s32.f32 %v2551_v9  ;;  %v2790_v20 = vunpack.c.0.s8 %v2340_v31  ;;  %v2796_v50 = vunpack.c.1.s8 %v2340_v31 }
 0x4f8   :  { %5878 = vmatpush.bf16.msra.mxu2 %v4326_v4  ;;  %v4374_v18 = vpack.c.bf16 %v4062_v43, %v4056_v58  ;;  %v3619_v53 = vmul.f32 %v8878_v45, %v3037_v60  ;;  %v3133_v11 = vcvt.s32.f32 %v2557_v25  ;;  %v2886_v7 = vunpack.c.0.s8 %v2364_v0 }
 0x4f9   :  { %v3709_v24 = vmul.f32 %v8878_v45, %v3127_v63  ;;  %v3366_v16 = vcvt.s32.f32 %v2790_v20  ;;  %v3372_v55 = vcvt.s32.f32 %v2796_v50  ;;  %v2892_v28 = vunpack.c.1.s8 %v2364_v0 }
 0x4fa   :  { %5891 = vmatpush.bf16.msra.mxu3 %v4374_v18  ;;  %v4153_v62 = vpack.c.bf16 %v3619_v53, %v3613_v30  ;;  %v3715_v34 = vmul.f32 %v8878_v45, %v3133_v11  ;;  %v3462_v8 = vcvt.s32.f32 %v2886_v7  ;;  %v2443_v39 = vunpack.c.2.s8 %v2251_v22 }
 0x4fb   :  { %v3948_v31 = vmul.f32 %v9000_v10, %v3366_v16  ;;  %v3954_v59 = vmul.f32 %v9000_v10, %v3372_v55  ;;  %v3468_v12 = vcvt.s32.f32 %v2892_v28  ;;  %v2449_v19 = vunpack.c.3.s8 %v2251_v22  ;;  %v9251_v55 = vld [vmem:[#allocation5 + $0x40] sm:$0xff] }
 0x4fc   :  { %5901 = vmatpush.bf16.msra.mxu0 %v4153_v62  ;;  %v4201_v49 = vpack.c.bf16 %v3715_v34, %v3709_v24  ;;  %v4044_v38 = vmul.f32 %v9000_v10, %v3462_v8  ;;  %v3019_v61 = vcvt.s32.f32 %v2443_v39  ;;  %v2539_v0 = vunpack.c.2.s8 %v2275_v36 }
 0x4fd   :  { %v4320_v57 = vpack.c.bf16 %v3954_v59, %v3948_v31  ;;  %v4050_v46 = vmul.f32 %v9000_v10, %v3468_v12  ;;  %v3025_v32 = vcvt.s32.f32 %v2449_v19  ;;  %v2545_v23 = vunpack.c.3.s8 %v2275_v36 }
 0x4fe   :  { %5914 = vmatpush.bf16.msra.mxu1 %v4201_v49  ;;  %v3601_v42 = vmul.f32 %v8878_v45, %v3019_v61  ;;  %v3115_v15 = vcvt.s32.f32 %v2539_v0  ;;  %v2778_v33 = vunpack.c.2.s8 %v2334_v21  ;;  %v2784_v35 = vunpack.c.3.s8 %v2334_v21 }
 0x4ff   :  { %5879 = vmatpush.bf16.msra.mxu2 %v4320_v57  ;;  %v4368_v41 = vpack.c.bf16 %v4050_v46, %v4044_v38  ;;  %v3607_v17 = vmul.f32 %v8878_v45, %v3025_v32  ;;  %v3121_v56 = vcvt.s32.f32 %v2545_v23  ;;  %v2874_v2 = vunpack.c.2.s8 %v2358_v52  ;;  %v2305_v46 = vld [vmem:[#allocation5 + $0x220] sm:$0xff] }
 0x500   :  { %v3697_v1 = vmul.f32 %v8878_v45, %v3115_v15  ;;  %v3354_v13 = vcvt.s32.f32 %v2778_v33  ;;  %v3360_v40 = vcvt.s32.f32 %v2784_v35  ;;  %v2880_v44 = vunpack.c.3.s8 %v2358_v52  ;;  %v2329_v15 = vld [vmem:[#allocation5 + $0x2e0] sm:$0xff] }
 0x501   :  { %5892 = vmatpush.bf16.msra.mxu3 %v4368_v41  ;;  %v4147_v47 = vpack.c.bf16 %v3607_v17, %v3601_v42  ;;  %v3703_v54 = vmul.f32 %v8878_v45, %v3121_v56  ;;  %v3450_v27 = vcvt.s32.f32 %v2874_v2  ;;  %v2431_v58 = vunpack.c.0.s8 %v2251_v22 }
 0x502   :  { %v3936_v29 = vmul.f32 %v9000_v10, %v3354_v13  ;;  %v3942_v9 = vmul.f32 %v9000_v10, %v3360_v40  ;;  %v3456_v4 = vcvt.s32.f32 %v2880_v44  ;;  %v2437_v43 = vunpack.c.1.s8 %v2251_v22 }
 0x503   :  { %5902 = vmatpush.bf16.msra.mxu0 %v4147_v47  ;;  %v4195_v60 = vpack.c.bf16 %v3703_v54, %v3697_v1  ;;  %v4032_v25 = vmul.f32 %v9000_v10, %v3450_v27  ;;  %v3007_v30 = vcvt.s32.f32 %v2431_v58  ;;  %v2527_v63 = vunpack.c.0.s8 %v2275_v36 }
 0x504   :  { %v4314_v20 = vpack.c.bf16 %v3942_v9, %v3936_v29  ;;  %v4038_v50 = vmul.f32 %v9000_v10, %v3456_v4  ;;  %v3013_v18 = vcvt.s32.f32 %v2437_v43  ;;  %v2533_v53 = vunpack.c.1.s8 %v2275_v36  ;;  %v9255_v36 = vld [vmem:[#allocation5 + $0x100] sm:$0xff] }
 0x505   :  { %5915 = vmatpush.bf16.msra.mxu1 %v4195_v60  ;;  %v3589_v11 = vmul.f32 %v8878_v45, %v3007_v30  ;;  %v3103_v7 = vcvt.s32.f32 %v2527_v63  ;;  %v2766_v24 = vunpack.c.0.s8 %v2334_v21  ;;  %v2772_v16 = vunpack.c.1.s8 %v2334_v21 }
 0x506   :  { %5880 = vmatpush.bf16.msra.mxu2 %v4314_v20  ;;  %v4362_v22 = vpack.c.bf16 %v4038_v50, %v4032_v25  ;;  %v3595_v28 = vmul.f32 %v8878_v45, %v3013_v18  ;;  %v3109_v62 = vcvt.s32.f32 %v2533_v53  ;;  %v2862_v34 = vunpack.c.0.s8 %v2358_v52 }
 0x507   :  { %v3685_v8 = vmul.f32 %v8878_v45, %v3103_v7  ;;  %v3342_v39 = vcvt.s32.f32 %v2766_v24  ;;  %v3348_v31 = vcvt.s32.f32 %v2772_v16  ;;  %v2868_v59 = vunpack.c.1.s8 %v2358_v52 }
 0x508   :  { %5893 = vmatpush.bf16.msra.mxu3 %v4362_v22  ;;  %v4141_v12 = vpack.c.bf16 %v3595_v28, %v3589_v11  ;;  %v3691_v19 = vmul.f32 %v8878_v45, %v3109_v62  ;;  %v3438_v21 = vcvt.s32.f32 %v2862_v34  ;;  %v2419_v49 = vunpack.c.2.s8 %v9251_v55 }
 0x509   :  { %v3924_v38 = vmul.f32 %v9000_v10, %v3342_v39  ;;  %v3930_v61 = vmul.f32 %v9000_v10, %v3348_v31  ;;  %v3444_v0 = vcvt.s32.f32 %v2868_v59  ;;  %v2425_v57 = vunpack.c.3.s8 %v9251_v55 }
 0x50a   :  { %5903 = vmatpush.bf16.msra.mxu0 %v4141_v12  ;;  %v4189_v32 = vpack.c.bf16 %v3691_v19, %v3685_v8  ;;  %v4020_v52 = vmul.f32 %v9000_v10, %v3438_v21  ;;  %v2995_v23 = vcvt.s32.f32 %v2419_v49  ;;  %v2515_v42 = vunpack.c.2.s8 %v9255_v36  ;;  %v2239_v8 = vld [vmem:[#allocation5 + $0x10] sm:$0xff] }
 0x50b   :  { %v4308_v33 = vpack.c.bf16 %v3930_v61, %v3924_v38  ;;  %v4026_v35 = vmul.f32 %v9000_v10, %v3444_v0  ;;  %v3001_v41 = vcvt.s32.f32 %v2425_v57  ;;  %v2521_v17 = vunpack.c.3.s8 %v9255_v36  ;;  %v2263_v61 = vld [vmem:[#allocation5 + $0xd0] sm:$0xff] }
 0x50c   :  { %5916 = vmatpush.bf16.msra.mxu1 %v4189_v32  ;;  %v3577_v56 = vmul.f32 %v8878_v45, %v2995_v23  ;;  %v3091_v2 = vcvt.s32.f32 %v2515_v42  ;;  %v2659_v1 = vunpack.c.2.s8 %v2305_v46  ;;  %v2665_v13 = vunpack.c.3.s8 %v2305_v46 }
 0x50d   :  { %5881 = vmatpush.bf16.msra.mxu2 %v4308_v33  ;;  %v4356_v40 = vpack.c.bf16 %v4026_v35, %v4020_v52  ;;  %v3583_v44 = vmul.f32 %v8878_v45, %v3001_v41  ;;  %v3097_v47 = vcvt.s32.f32 %v2521_v17  ;;  %v2755_v54 = vunpack.c.2.s8 %v2329_v15  ;;  %v2299_v33 = vld [vmem:[#allocation5 + $0x1f0] sm:$0xff] }
 0x50e   :  { %v3673_v27 = vmul.f32 %v8878_v45, %v3091_v2  ;;  %v3235_v58 = vcvt.s32.f32 %v2659_v1  ;;  %v3241_v29 = vcvt.s32.f32 %v2665_v13  ;;  %v2761_v10 = vunpack.c.3.s8 %v2329_v15 }
 0x50f   :  { %5894 = vmatpush.bf16.msra.mxu3 %v4356_v40  ;;  %v4135_v9 = vpack.c.bf16 %v3583_v44, %v3577_v56  ;;  %v3679_v4 = vmul.f32 %v8878_v45, %v3097_v47  ;;  %v3331_v43 = vcvt.s32.f32 %v2755_v54  ;;  %v2407_v60 = vunpack.c.0.s8 %v9251_v55  ;;  %v2323_v56 = vld [vmem:[#allocation5 + $0x2b0] sm:$0xff] }
 0x510   :  { %v3817_v25 = vmul.f32 %v8878_v45, %v3235_v58  ;;  %v3823_v30 = vmul.f32 %v8878_v45, %v3241_v29  ;;  %v3337_v63 = vcvt.s32.f32 %v2761_v10  ;;  %5882 = vmatmul.bf16.vlgmr.msra.gmra.mxu2 %v9067_v3  ;;  %v2413_v20 = vunpack.c.1.s8 %v9251_v55 }
 0x511   :  { %5904 = vmatpush.bf16.msra.mxu0 %v4135_v9  ;;  %v4183_v50 = vpack.c.bf16 %v3679_v4, %v3673_v27  ;;  %v3913_v18 = vmul.f32 %v8878_v45, %v3331_v43  ;;  %v2983_v53 = vcvt.s32.f32 %v2407_v60  ;;  %v2503_v11 = vunpack.c.0.s8 %v9255_v36 }
 0x512   :  { %v4255_v7 = vpack.c.bf16 %v3823_v30, %v3817_v25  ;;  %v3919_v24 = vmul.f32 %v8878_v45, %v3337_v63  ;;  %5895 = vmatmul.bf16.vlgmr.msra.gmra.mxu3 %v9069_v5  ;;  %v2989_v16 = vcvt.s32.f32 %v2413_v20  ;;  %v2509_v22 = vunpack.c.1.s8 %v9255_v36 }
 0x513   :  { %5917 = vmatpush.bf16.msra.mxu1 %v4183_v50  ;;  %v3565_v28 = vmul.f32 %v8878_v45, %v2983_v53  ;;  %v3079_v62 = vcvt.s32.f32 %v2503_v11  ;;  %v2647_v55 = vunpack.c.0.s8 %v2305_v46  ;;  %v2653_v34 = vunpack.c.1.s8 %v2305_v46 }
 0x514   :  { %5926 = vmatpush.bf16.msrb.mxu2 %v4255_v7  ;;  %v4303_v39 = vpack.c.bf16 %v3919_v24, %v3913_v18  ;;  %v3571_v31 = vmul.f32 %v8878_v45, %v2989_v16  ;;  %v3085_v59 = vcvt.s32.f32 %v2509_v22  ;;  %v2743_v12 = vunpack.c.0.s8 %v2329_v15 }
 0x515   :  { %v3661_v19 = vmul.f32 %v8878_v45, %v3079_v62  ;;  %v3223_v21 = vcvt.s32.f32 %v2647_v55  ;;  %v3229_v49 = vcvt.s32.f32 %v2653_v34  ;;  %v2749_v38 = vunpack.c.1.s8 %v2329_v15 }
 0x516   :  { %5939 = vmatpush.bf16.msrb.mxu3 %v4303_v39  ;;  %v4129_v36 = vpack.c.bf16 %v3571_v31, %v3565_v28  ;;  %v3667_v0 = vmul.f32 %v8878_v45, %v3085_v59  ;;  %v3319_v57 = vcvt.s32.f32 %v2743_v12  ;;  %v2395_v32 = vunpack.c.2.s8 %v2239_v8 }
 0x517   :  { %v3805_v46 = vmul.f32 %v8878_v45, %v3223_v21  ;;  %v3811_v52 = vmul.f32 %v8878_v45, %v3229_v49  ;;  %v3325_v23 = vcvt.s32.f32 %v2749_v38  ;;  %v2401_v42 = vunpack.c.3.s8 %v2239_v8  ;;  %v9297_v21 = vld [vmem:[#allocation5 + $0x3a0] sm:$0xff] }
 0x518   :  { %5905 = vmatpush.bf16.msra.mxu0 %v4129_v36  ;;  %v4177_v35 = vpack.c.bf16 %v3667_v0, %v3661_v19  ;;  %v3901_v41 = vmul.f32 %v8878_v45, %v3319_v57  ;;  %v2971_v17 = vcvt.s32.f32 %v2395_v32  ;;  %v2491_v15 = vunpack.c.2.s8 %v2263_v61 }
 0x519   :  { %v4249_v2 = vpack.c.bf16 %v3811_v52, %v3805_v46  ;;  %v3907_v1 = vmul.f32 %v8878_v45, %v3325_v23  ;;  %v2977_v13 = vcvt.s32.f32 %v2401_v42  ;;  %v2497_v40 = vunpack.c.3.s8 %v2263_v61 }
 0x51a   :  { %5918 = vmatpush.bf16.msra.mxu1 %v4177_v35  ;;  %v3553_v44 = vmul.f32 %v8878_v45, %v2971_v17  ;;  %v3067_v47 = vcvt.s32.f32 %v2491_v15  ;;  %v2635_v54 = vunpack.c.2.s8 %v2299_v33  ;;  %v2641_v27 = vunpack.c.3.s8 %v2299_v33 }
 0x51b   :  { %5927 = vmatpush.bf16.msrb.mxu2 %v4249_v2  ;;  %v4297_v58 = vpack.c.bf16 %v3907_v1, %v3901_v41  ;;  %v3559_v29 = vmul.f32 %v8878_v45, %v2977_v13  ;;  %v3073_v10 = vcvt.s32.f32 %v2497_v40  ;;  %v2731_v9 = vunpack.c.2.s8 %v2323_v56  ;;  %v2293_v2 = vld [vmem:[#allocation5 + $0x1c0] sm:$0xff] }
 0x51c   :  { %v3649_v4 = vmul.f32 %v8878_v45, %v3067_v47  ;;  %v3211_v43 = vcvt.s32.f32 %v2635_v54  ;;  %v3217_v60 = vcvt.s32.f32 %v2641_v27  ;;  %v2737_v25 = vunpack.c.3.s8 %v2323_v56 }
 0x51d   :  { %5940 = vmatpush.bf16.msrb.mxu3 %v4297_v58  ;;  %v4123_v30 = vpack.c.bf16 %v3559_v29, %v3553_v44  ;;  %v3655_v63 = vmul.f32 %v8878_v45, %v3073_v10  ;;  %v3307_v20 = vcvt.s32.f32 %v2731_v9  ;;  %v2383_v50 = vunpack.c.0.s8 %v2239_v8  ;;  %v2317_v44 = vld [vmem:[#allocation5 + $0x280] sm:$0xff] }
 0x51e   :  { %v3793_v18 = vmul.f32 %v8878_v45, %v3211_v43  ;;  %v3799_v53 = vmul.f32 %v8878_v45, %v3217_v60  ;;  %v3313_v11 = vcvt.s32.f32 %v2737_v25  ;;  %v2389_v7 = vunpack.c.1.s8 %v2239_v8 }
 0x51f   :  { %5906 = vmatpush.bf16.msra.mxu0 %v4123_v30  ;;  %v4171_v24 = vpack.c.bf16 %v3655_v63, %v3649_v4  ;;  %v3889_v16 = vmul.f32 %v8878_v45, %v3307_v20  ;;  %v2959_v22 = vcvt.s32.f32 %v2383_v50  ;;  %v2479_v28 = vunpack.c.0.s8 %v2263_v61 }
 0x520   :  { %v4243_v62 = vpack.c.bf16 %v3799_v53, %v3793_v18  ;;  %v3895_v55 = vmul.f32 %v8878_v45, %v3313_v11  ;;  %v2965_v34 = vcvt.s32.f32 %v2389_v7  ;;  %v2485_v39 = vunpack.c.1.s8 %v2263_v61  ;;  %v9301_v61 = vld [vmem:[#allocation5 + $0x460] sm:$0xff] }
 0x521   :  { %5919 = vmatpush.bf16.msra.mxu1 %v4171_v24  ;;  %v3541_v31 = vmul.f32 %v8878_v45, %v2959_v22  ;;  %v3055_v59 = vcvt.s32.f32 %v2479_v28  ;;  %v2623_v12 = vunpack.c.0.s8 %v2299_v33  ;;  %v2629_v19 = vunpack.c.1.s8 %v2299_v33 }
 0x522   :  { %5928 = vmatpush.bf16.msrb.mxu2 %v4243_v62  ;;  %v4291_v8 = vpack.c.bf16 %v3895_v55, %v3889_v16  ;;  %v3547_v49 = vmul.f32 %v8878_v45, %v2965_v34  ;;  %v3061_v38 = vcvt.s32.f32 %v2485_v39  ;;  %v2719_v36 = vunpack.c.0.s8 %v2323_v56 }
 0x523   :  { %v3637_v0 = vmul.f32 %v8878_v45, %v3055_v59  ;;  %v3199_v57 = vcvt.s32.f32 %v2623_v12  ;;  %v3205_v32 = vcvt.s32.f32 %v2629_v19  ;;  %v2725_v46 = vunpack.c.1.s8 %v2323_v56 }
 0x524   :  { %5941 = vmatpush.bf16.msrb.mxu3 %v4291_v8  ;;  %v4117_v52 = vpack.c.bf16 %v3547_v49, %v3541_v31  ;;  %v3643_v23 = vmul.f32 %v8878_v45, %v3061_v38  ;;  %v3295_v42 = vcvt.s32.f32 %v2719_v36  ;;  %v2851_v33 = vunpack.c.2.s8 %v9297_v21 }
 0x525   :  { %v3781_v35 = vmul.f32 %v8878_v45, %v3199_v57  ;;  %v3787_v41 = vmul.f32 %v8878_v45, %v3205_v32  ;;  %v3301_v17 = vcvt.s32.f32 %v2725_v46  ;;  %v2857_v15 = vunpack.c.3.s8 %v9297_v21 }
 0x526   :  { %5907 = vmatpush.bf16.msra.mxu0 %v4117_v52  ;;  %v4165_v1 = vpack.c.bf16 %v3643_v23, %v3637_v0  ;;  %v3877_v56 = vmul.f32 %v8878_v45, %v3295_v42  ;;  %v3427_v13 = vcvt.s32.f32 %v2851_v33  ;;  %v2947_v40 = vunpack.c.2.s8 %v9301_v61 }
 0x527   :  { %v4237_v47 = vpack.c.bf16 %v3787_v41, %v3781_v35  ;;  %v3883_v54 = vmul.f32 %v8878_v45, %v3301_v17  ;;  %v3433_v27 = vcvt.s32.f32 %v2857_v15  ;;  %v2953_v58 = vunpack.c.3.s8 %v9301_v61  ;;  %v2371_v41 = vld [vmem:[#allocation5 + $0x430] sm:$0xff] }
 0x528   :  { %5920 = vmatpush.bf16.msra.mxu1 %v4165_v1  ;;  %v4009_v29 = vmul.f32 %v8878_v45, %v3427_v13  ;;  %v3523_v10 = vcvt.s32.f32 %v2947_v40  ;;  %v2611_v9 = vunpack.c.2.s8 %v2293_v2  ;;  %v2617_v4 = vunpack.c.3.s8 %v2293_v2 }
 0x529   :  { %5929 = vmatpush.bf16.msrb.mxu2 %v4237_v47  ;;  %v4285_v43 = vpack.c.bf16 %v3883_v54, %v3877_v56  ;;  %v4015_v60 = vmul.f32 %v8878_v45, %v3433_v27  ;;  %v3529_v25 = vcvt.s32.f32 %v2953_v58  ;;  %5908 = vmatmul.bf16.vlgmr.msra.gmra.mxu0 %v9042_v48  ;;  %v2707_v30 = vunpack.c.2.s8 %v2317_v44  ;;  %v2287_v47 = vld [vmem:[#allocation5 + $0x190] sm:$0xff] }
 0x52a   :  { %v4105_v63 = vmul.f32 %v8878_v45, %v3523_v10  ;;  %v3187_v20 = vcvt.s32.f32 %v2611_v9  ;;  %v3193_v50 = vcvt.s32.f32 %v2617_v4  ;;  %v2713_v18 = vunpack.c.3.s8 %v2317_v44 }
 0x52b   :  { %5942 = vmatpush.bf16.msrb.mxu3 %v4285_v43  ;;  %v4351_v53 = vpack.c.bf16 %v4015_v60, %v4009_v29  ;;  %v4111_v11 = vmul.f32 %v8878_v45, %v3529_v25  ;;  %5921 = vmatmul.bf16.vlgmr.msra.gmra.mxu1 %v9044_v14  ;;  %v3283_v7 = vcvt.s32.f32 %v2707_v30  ;;  %v2839_v24 = vunpack.c.0.s8 %v9297_v21  ;;  %v2311_v29 = vld [vmem:[#allocation5 + $0x250] sm:$0xff] }
 0x52c   :  { %v3769_v16 = vmul.f32 %v8878_v45, %v3187_v20  ;;  %v3775_v22 = vmul.f32 %v8878_v45, %v3193_v50  ;;  %v3289_v28 = vcvt.s32.f32 %v2713_v18  ;;  %v2845_v62 = vunpack.c.1.s8 %v9297_v21  ;;  %v2347_v21 = vld [vmem:[#allocation5 + $0x370] sm:$0xff] }
 0x52d   :  { %5952 = vmatpush.bf16.msrb.mxu0 %v4351_v53  ;;  %v4399_v55 = vpack.c.bf16 %v4111_v11, %v4105_v63  ;;  %v3865_v34 = vmul.f32 %v8878_v45, %v3283_v7  ;;  %v3415_v39 = vcvt.s32.f32 %v2839_v24  ;;  %v2935_v31 = vunpack.c.0.s8 %v9301_v61 }
 0x52e   :  { %v4231_v59 = vpack.c.bf16 %v3775_v22, %v3769_v16  ;;  %v3871_v12 = vmul.f32 %v8878_v45, %v3289_v28  ;;  %v3421_v19 = vcvt.s32.f32 %v2845_v62  ;;  %v2941_v8 = vunpack.c.1.s8 %v9301_v61 }
 0x52f   :  { %5965 = vmatpush.bf16.msrb.mxu1 %v4399_v55  ;;  %v3997_v49 = vmul.f32 %v8878_v45, %v3415_v39  ;;  %v3511_v38 = vcvt.s32.f32 %v2935_v31  ;;  %v2599_v36 = vunpack.c.0.s8 %v2293_v2  ;;  %v2605_v0 = vunpack.c.1.s8 %v2293_v2 }
 0x530   :  { %5930 = vmatpush.bf16.msrb.mxu2 %v4231_v59  ;;  %v4279_v57 = vpack.c.bf16 %v3871_v12, %v3865_v34  ;;  %v4003_v32 = vmul.f32 %v8878_v45, %v3421_v19  ;;  %v3517_v46 = vcvt.s32.f32 %v2941_v8  ;;  %v2695_v52 = vunpack.c.0.s8 %v2317_v44 }
 0x531   :  { %v4093_v23 = vmul.f32 %v8878_v45, %v3511_v38  ;;  %v3175_v42 = vcvt.s32.f32 %v2599_v36  ;;  %v3181_v33 = vcvt.s32.f32 %v2605_v0  ;;  %v2701_v35 = vunpack.c.1.s8 %v2317_v44 }
 0x532   :  { %5943 = vmatpush.bf16.msrb.mxu3 %v4279_v57  ;;  %v4345_v61 = vpack.c.bf16 %v4003_v32, %v3997_v49  ;;  %v4099_v17 = vmul.f32 %v8878_v45, %v3517_v46  ;;  %v3271_v15 = vcvt.s32.f32 %v2695_v52  ;;  %v2827_v1 = vunpack.c.2.s8 %v2347_v21 }
 0x533   :  { %v3757_v2 = vmul.f32 %v8878_v45, %v3175_v42  ;;  %v3763_v56 = vmul.f32 %v8878_v45, %v3181_v33  ;;  %v3277_v13 = vcvt.s32.f32 %v2701_v35  ;;  %v2833_v40 = vunpack.c.3.s8 %v2347_v21  ;;  %v9343_v42 = vld [vmem:[#allocation5 + $0x340] sm:$0xff] }
 0x534   :  { %5953 = vmatpush.bf16.msrb.mxu0 %v4345_v61  ;;  %v4393_v54 = vpack.c.bf16 %v4099_v17, %v4093_v23  ;;  %v3853_v27 = vmul.f32 %v8878_v45, %v3271_v15  ;;  %v3403_v58 = vcvt.s32.f32 %v2827_v1  ;;  %v2923_v44 = vunpack.c.2.s8 %v2371_v41 }
 0x535   :  { %v4225_v10 = vpack.c.bf16 %v3763_v56, %v3757_v2  ;;  %v3859_v9 = vmul.f32 %v8878_v45, %v3277_v13  ;;  %v3409_v4 = vcvt.s32.f32 %v2833_v40  ;;  %v2929_v43 = vunpack.c.3.s8 %v2371_v41 }
 0x536   :  { %5966 = vmatpush.bf16.msrb.mxu1 %v4393_v54  ;;  %v3985_v60 = vmul.f32 %v8878_v45, %v3403_v58  ;;  %v3499_v25 = vcvt.s32.f32 %v2923_v44  ;;  %v2587_v30 = vunpack.c.2.s8 %v2287_v47  ;;  %v2593_v63 = vunpack.c.3.s8 %v2287_v47 }
 0x537   :  { %5931 = vmatpush.bf16.msrb.mxu2 %v4225_v10  ;;  %v4273_v20 = vpack.c.bf16 %v3859_v9, %v3853_v27  ;;  %v3991_v50 = vmul.f32 %v8878_v45, %v3409_v4  ;;  %v3505_v18 = vcvt.s32.f32 %v2929_v43  ;;  %v2683_v53 = vunpack.c.2.s8 %v2311_v29  ;;  %v2258_v10 = vld [vmem:[#allocation5 + $0xa8] sm:$0xff] }
 0x538   :  { %v4081_v11 = vmul.f32 %v8878_v45, %v3499_v25  ;;  %v3163_v7 = vcvt.s32.f32 %v2587_v30  ;;  %v3169_v24 = vcvt.s32.f32 %v2593_v63  ;;  %v2689_v16 = vunpack.c.3.s8 %v2311_v29 }
 0x539   :  { %5944 = vmatpush.bf16.msrb.mxu3 %v4273_v20  ;;  %v4339_v22 = vpack.c.bf16 %v3991_v50, %v3985_v60  ;;  %v4087_v28 = vmul.f32 %v8878_v45, %v3505_v18  ;;  %v3259_v62 = vcvt.s32.f32 %v2683_v53  ;;  %v2815_v55 = vunpack.c.0.s8 %v2347_v21  ;;  %v2282_v60 = vld [vmem:[#allocation5 + $0x168] sm:$0xff] }
 0x53a   :  { %v3745_v34 = vmul.f32 %v8878_v45, %v3163_v7  ;;  %v3751_v39 = vmul.f32 %v8878_v45, %v3169_v24  ;;  %v3265_v31 = vcvt.s32.f32 %v2689_v16  ;;  %v2821_v59 = vunpack.c.1.s8 %v2347_v21 }
 0x53b   :  { %5954 = vmatpush.bf16.msrb.mxu0 %v4339_v22  ;;  %v4387_v12 = vpack.c.bf16 %v4087_v28, %v4081_v11  ;;  %v3841_v19 = vmul.f32 %v8878_v45, %v3259_v62  ;;  %v3391_v8 = vcvt.s32.f32 %v2815_v55  ;;  %v2911_v49 = vunpack.c.0.s8 %v2371_v41 }
 0x53c   :  { %v4219_v38 = vpack.c.bf16 %v3751_v39, %v3745_v34  ;;  %v3847_v36 = vmul.f32 %v8878_v45, %v3265_v31  ;;  %v3397_v0 = vcvt.s32.f32 %v2821_v59  ;;  %v2917_v57 = vunpack.c.1.s8 %v2371_v41  ;;  %v9347_v41 = vld [vmem:[#allocation5 + $0x400] sm:$0xff] }
 0x53d   :  { %5967 = vmatpush.bf16.msrb.mxu1 %v4387_v12  ;;  %v3973_v32 = vmul.f32 %v8878_v45, %v3391_v8  ;;  %v3487_v46 = vcvt.s32.f32 %v2911_v49  ;;  %v2575_v52 = vunpack.c.0.s8 %v2287_v47  ;;  %v2581_v23 = vunpack.c.1.s8 %v2287_v47 }
 0x53e   :  { %5932 = vmatpush.bf16.msrb.mxu2 %v4219_v38  ;;  %v4267_v21 = vpack.c.bf16 %v3847_v36, %v3841_v19  ;;  %v3979_v33 = vmul.f32 %v8878_v45, %v3397_v0  ;;  %v3493_v35 = vcvt.s32.f32 %v2917_v57  ;;  %v2671_v61 = vunpack.c.0.s8 %v2311_v29 }
 0x53f   :  { %v4069_v17 = vmul.f32 %v8878_v45, %v3487_v46  ;;  %v3151_v15 = vcvt.s32.f32 %v2575_v52  ;;  %v3157_v1 = vcvt.s32.f32 %v2581_v23  ;;  %v2677_v2 = vunpack.c.1.s8 %v2311_v29 }
 0x540   :  { %5945 = vmatpush.bf16.msrb.mxu3 %v4267_v21  ;;  %v4333_v56 = vpack.c.bf16 %v3979_v33, %v3973_v32  ;;  %v4075_v13 = vmul.f32 %v8878_v45, %v3493_v35  ;;  %v3247_v40 = vcvt.s32.f32 %v2671_v61  ;;  %v2803_v47 = vunpack.c.2.s8 %v9343_v42 }
 0x541   :  { %v3733_v54 = vmul.f32 %v8878_v45, %v3151_v15  ;;  %v3739_v27 = vmul.f32 %v8878_v45, %v3157_v1  ;;  %v3253_v58 = vcvt.s32.f32 %v2677_v2  ;;  %v2809_v44 = vunpack.c.3.s8 %v9343_v42 }
 0x542   :  { %5955 = vmatpush.bf16.msrb.mxu0 %v4333_v56  ;;  %v4381_v9 = vpack.c.bf16 %v4075_v13, %v4069_v17  ;;  %v3829_v29 = vmul.f32 %v8878_v45, %v3247_v40  ;;  %v3379_v4 = vcvt.s32.f32 %v2803_v47  ;;  %v2899_v43 = vunpack.c.2.s8 %v9347_v41  ;;  %v2335_v17 = vld [vmem:[#allocation5 + $0x310] sm:$0xff] }
 0x543   :  { %v4213_v25 = vpack.c.bf16 %v3739_v27, %v3733_v54  ;;  %v3835_v30 = vmul.f32 %v8878_v45, %v3253_v58  ;;  %v3385_v63 = vcvt.s32.f32 %v2809_v44  ;;  %v2905_v20 = vunpack.c.3.s8 %v9347_v41  ;;  %v2359_v27 = vld [vmem:[#allocation5 + $0x3d0] sm:$0xff] }
 0x544   :  { %5968 = vmatpush.bf16.msrb.mxu1 %v4381_v9  ;;  %v3961_v50 = vmul.f32 %v8878_v45, %v3379_v4  ;;  %v3475_v18 = vcvt.s32.f32 %v2899_v43  ;;  %v2468_v53 = vunpack.c.2.s8 %v2258_v10  ;;  %v2474_v11 = vunpack.c.3.s8 %v2258_v10 }
 0x545   :  { %5933 = vmatpush.bf16.msrb.mxu2 %v4213_v25  ;;  %v4261_v7 = vpack.c.bf16 %v3835_v30, %v3829_v29  ;;  %v3967_v24 = vmul.f32 %v8878_v45, %v3385_v63  ;;  %v3481_v16 = vcvt.s32.f32 %v2905_v20  ;;  %v2564_v22 = vunpack.c.2.s8 %v2282_v60  ;;  %v2252_v25 = vld [vmem:[#allocation5 + $0x78] sm:$0xff] }
 0x546   :  { %v4057_v28 = vmul.f32 %v8878_v45, %v3475_v18  ;;  %v3044_v62 = vcvt.s32.f32 %v2468_v53  ;;  %v3050_v55 = vcvt.s32.f32 %v2474_v11  ;;  %v2570_v34 = vunpack.c.3.s8 %v2282_v60 }
 0x547   :  { %5946 = vmatpush.bf16.msrb.mxu3 %v4261_v7  ;;  %v4327_v39 = vpack.c.bf16 %v3967_v24, %v3961_v50  ;;  %v4063_v31 = vmul.f32 %v8878_v45, %v3481_v16  ;;  %v3140_v59 = vcvt.s32.f32 %v2564_v22  ;;  %v2791_v12 = vunpack.c.0.s8 %v9343_v42  ;;  %v2276_v50 = vld [vmem:[#allocation5 + $0x138] sm:$0xff] }
 0x548   :  { %v3626_v19 = vmul.f32 %v8885_v51, %v3044_v62  ;;  %v3632_v8 = vmul.f32 %v8885_v51, %v3050_v55  ;;  %v3146_v49 = vcvt.s32.f32 %v2570_v34  ;;  %5934 = vmatmul.bf16.vlgmr.msrb.gmra.mxu2 %v9139_v6  ;;  %v2797_v38 = vunpack.c.1.s8 %v9343_v42 }
 0x549   :  { %5956 = vmatpush.bf16.msrb.mxu0 %v4327_v39  ;;  %v4375_v36 = vpack.c.bf16 %v4063_v31, %v4057_v28  ;;  %v3722_v0 = vmul.f32 %v8885_v51, %v3140_v59  ;;  %v3367_v57 = vcvt.s32.f32 %v2791_v12  ;;  %v2887_v32 = vunpack.c.0.s8 %v9347_v41 }
 0x54a   :  { %v4160_v46 = vpack.c.bf16 %v3632_v8, %v3626_v19  ;;  %v3728_v52 = vmul.f32 %v8885_v51, %v3146_v49  ;;  %5947 = vmatmul.bf16.vlgmr.msrb.gmra.mxu3 %v9144_v26  ;;  %v3373_v23 = vcvt.s32.f32 %v2797_v38  ;;  %v2893_v21 = vunpack.c.1.s8 %v9347_v41 }
 0x54b   :  { %5969 = vmatpush.bf16.msrb.mxu1 %v4375_v36  ;;  %v3949_v33 = vmul.f32 %v8878_v45, %v3367_v57  ;;  %v3463_v35 = vcvt.s32.f32 %v2887_v32  ;;  %v2456_v42 = vunpack.c.0.s8 %v2258_v10  ;;  %v2462_v61 = vunpack.c.1.s8 %v2258_v10 }
 0x54c   :  { %5978 = vmatpush.bf16.msra.mxu2 %v4160_v46  ;;  %v4208_v15 = vpack.c.bf16 %v3728_v52, %v3722_v0  ;;  %v3955_v1 = vmul.f32 %v8878_v45, %v3373_v23  ;;  %v3469_v2 = vcvt.s32.f32 %v2893_v21  ;;  %v2552_v56 = vunpack.c.0.s8 %v2282_v60 }
 0x54d   :  { %v4045_v13 = vmul.f32 %v8878_v45, %v3463_v35  ;;  %v3032_v40 = vcvt.s32.f32 %v2456_v42  ;;  %v3038_v47 = vcvt.s32.f32 %v2462_v61  ;;  %v2558_v54 = vunpack.c.1.s8 %v2282_v60 }
 0x54e   :  { %5991 = vmatpush.bf16.msra.mxu3 %v4208_v15  ;;  %v4321_v41 = vpack.c.bf16 %v3955_v1, %v3949_v33  ;;  %v4051_v58 = vmul.f32 %v8878_v45, %v3469_v2  ;;  %v3128_v44 = vcvt.s32.f32 %v2552_v56  ;;  %v2779_v9 = vunpack.c.2.s8 %v2335_v17 }
 0x54f   :  { %v3614_v10 = vmul.f32 %v8885_v51, %v3032_v40  ;;  %v3620_v29 = vmul.f32 %v8885_v51, %v3038_v47  ;;  %v3134_v4 = vcvt.s32.f32 %v2558_v54  ;;  %v2785_v43 = vunpack.c.3.s8 %v2335_v17  ;;  %v9389_v40 = vld [vmem:[#allocation5 + $0x228] sm:$0xff] }
 0x550   :  { %5957 = vmatpush.bf16.msrb.mxu0 %v4321_v41  ;;  %v4369_v30 = vpack.c.bf16 %v4051_v58, %v4045_v13  ;;  %v3710_v63 = vmul.f32 %v8885_v51, %v3128_v44  ;;  %v3355_v20 = vcvt.s32.f32 %v2779_v9  ;;  %v2875_v60 = vunpack.c.2.s8 %v2359_v27 }
 0x551   :  { %v4154_v18 = vpack.c.bf16 %v3620_v29, %v3614_v10  ;;  %v3716_v53 = vmul.f32 %v8885_v51, %v3134_v4  ;;  %v3361_v11 = vcvt.s32.f32 %v2785_v43  ;;  %v2881_v7 = vunpack.c.3.s8 %v2359_v27 }
 0x552   :  { %5970 = vmatpush.bf16.msrb.mxu1 %v4369_v30  ;;  %v3937_v24 = vmul.f32 %v8878_v45, %v3355_v20  ;;  %v3451_v16 = vcvt.s32.f32 %v2875_v60  ;;  %v2444_v22 = vunpack.c.2.s8 %v2252_v25  ;;  %v2450_v28 = vunpack.c.3.s8 %v2252_v25 }
 0x553   :  { %5979 = vmatpush.bf16.msra.mxu2 %v4154_v18  ;;  %v4202_v62 = vpack.c.bf16 %v3716_v53, %v3710_v63  ;;  %v3943_v55 = vmul.f32 %v8878_v45, %v3361_v11  ;;  %v3457_v34 = vcvt.s32.f32 %v2881_v7  ;;  %v2540_v39 = vunpack.c.2.s8 %v2276_v50  ;;  %v2246_v18 = vld [vmem:[#allocation5 + $0x48] sm:$0xff] }
 0x554   :  { %v4033_v31 = vmul.f32 %v8878_v45, %v3451_v16  ;;  %v3020_v59 = vcvt.s32.f32 %v2444_v22  ;;  %v3026_v12 = vcvt.s32.f32 %v2450_v28  ;;  %v2546_v19 = vunpack.c.3.s8 %v2276_v50 }
 0x555   :  { %5992 = vmatpush.bf16.msra.mxu3 %v4202_v62  ;;  %v4315_v8 = vpack.c.bf16 %v3943_v55, %v3937_v24  ;;  %v4039_v49 = vmul.f32 %v8878_v45, %v3457_v34  ;;  %v3116_v38 = vcvt.s32.f32 %v2540_v39  ;;  %v2767_v36 = vunpack.c.0.s8 %v2335_v17  ;;  %v2270_v24 = vld [vmem:[#allocation5 + $0x108] sm:$0xff] }
 0x556   :  { %v3602_v0 = vmul.f32 %v8885_v51, %v3020_v59  ;;  %v3608_v57 = vmul.f32 %v8885_v51, %v3026_v12  ;;  %v3122_v32 = vcvt.s32.f32 %v2546_v19  ;;  %v2773_v46 = vunpack.c.1.s8 %v2335_v17 }
 0x557   :  { %5958 = vmatpush.bf16.msrb.mxu0 %v4315_v8  ;;  %v4363_v52 = vpack.c.bf16 %v4039_v49, %v4033_v31  ;;  %v3698_v23 = vmul.f32 %v8885_v51, %v3116_v38  ;;  %v3343_v21 = vcvt.s32.f32 %v2767_v36  ;;  %v2863_v33 = vunpack.c.0.s8 %v2359_v27 }
 0x558   :  { %v4148_v35 = vpack.c.bf16 %v3608_v57, %v3602_v0  ;;  %v3704_v42 = vmul.f32 %v8885_v51, %v3122_v32  ;;  %v3349_v61 = vcvt.s32.f32 %v2773_v46  ;;  %v2869_v15 = vunpack.c.1.s8 %v2359_v27  ;;  %v9393_v27 = vld [vmem:[#allocation5 + $0x2e8] sm:$0xff] }
 0x559   :  { %5971 = vmatpush.bf16.msrb.mxu1 %v4363_v52  ;;  %v3925_v1 = vmul.f32 %v8878_v45, %v3343_v21  ;;  %v3439_v2 = vcvt.s32.f32 %v2863_v33  ;;  %v2432_v56 = vunpack.c.0.s8 %v2252_v25  ;;  %v2438_v13 = vunpack.c.1.s8 %v2252_v25 }
 0x55a   :  { %5980 = vmatpush.bf16.msra.mxu2 %v4148_v35  ;;  %v4196_v17 = vpack.c.bf16 %v3704_v42, %v3698_v23  ;;  %v3931_v47 = vmul.f32 %v8878_v45, %v3349_v61  ;;  %v3445_v54 = vcvt.s32.f32 %v2869_v15  ;;  %v2528_v41 = vunpack.c.0.s8 %v2276_v50 }
 0x55b   :  { %v4021_v58 = vmul.f32 %v8878_v45, %v3439_v2  ;;  %v3008_v44 = vcvt.s32.f32 %v2432_v56  ;;  %v3014_v9 = vcvt.s32.f32 %v2438_v13  ;;  %v2534_v10 = vunpack.c.1.s8 %v2276_v50 }
 0x55c   :  { %5993 = vmatpush.bf16.msra.mxu3 %v4196_v17  ;;  %v4309_v29 = vpack.c.bf16 %v3931_v47, %v3925_v1  ;;  %v4027_v4 = vmul.f32 %v8878_v45, %v3445_v54  ;;  %v3104_v43 = vcvt.s32.f32 %v2528_v41  ;;  %v2660_v25 = vunpack.c.2.s8 %v9389_v40 }
 0x55d   :  { %v3590_v30 = vmul.f32 %v8885_v51, %v3008_v44  ;;  %v3596_v63 = vmul.f32 %v8885_v51, %v3014_v9  ;;  %v3110_v20 = vcvt.s32.f32 %v2534_v10  ;;  %v2666_v60 = vunpack.c.3.s8 %v9389_v40 }
 0x55e   :  { %5959 = vmatpush.bf16.msrb.mxu0 %v4309_v29  ;;  %v4357_v53 = vpack.c.bf16 %v4027_v4, %v4021_v58  ;;  %v3686_v50 = vmul.f32 %v8885_v51, %v3104_v43  ;;  %v3236_v11 = vcvt.s32.f32 %v2660_v25  ;;  %v2756_v7 = vunpack.c.2.s8 %v9393_v27 }
 0x55f   :  { %v4142_v45 = vpack.c.bf16 %v3596_v63, %v3590_v30  ;;  %v3692_v16 = vmul.f32 %v8885_v51, %v3110_v20  ;;  %v3242_v22 = vcvt.s32.f32 %v2666_v60  ;;  %v2762_v28 = vunpack.c.3.s8 %v9393_v27  ;;  %v2324_v30 = vld [vmem:[#allocation5 + $0x2b8] sm:$0xff] }
 0x560   :  { %5972 = vmatpush.bf16.msrb.mxu1 %v4357_v53  ;;  %v3818_v62 = vmul.f32 %v8885_v51, %v3236_v11  ;;  %v3332_v55 = vcvt.s32.f32 %v2756_v7  ;;  %v2420_v34 = vunpack.c.2.s8 %v2246_v18  ;;  %v2426_v39 = vunpack.c.3.s8 %v2246_v18  ;;  %v2240_v7 = vld [vmem:[#allocation5 + $0x18] sm:$0xff] }
 0x561   :  { %5981 = vmatpush.bf16.msra.mxu2 %v4142_v45  ;;  %v4190_v31 = vpack.c.bf16 %v3692_v16, %v3686_v50  ;;  %v3824_v59 = vmul.f32 %v8885_v51, %v3242_v22  ;;  %v3338_v12 = vcvt.s32.f32 %v2762_v28  ;;  %5960 = vmatmul.bf16.vlgmr.msrb.gmra.mxu0 %v9067_v3  ;;  %v2516_v19 = vunpack.c.2.s8 %v2270_v24  ;;  %v2264_v28 = vld [vmem:[#allocation5 + $0xd8] sm:$0xff] }
 0x562   :  { %v3914_v8 = vmul.f32 %v8885_v51, %v3332_v55  ;;  %v2996_v49 = vcvt.s32.f32 %v2420_v34  ;;  %v3002_v38 = vcvt.s32.f32 %v2426_v39  ;;  %v2522_v36 = vunpack.c.3.s8 %v2270_v24 }
 0x563   :  { %5994 = vmatpush.bf16.msra.mxu3 %v4190_v31  ;;  %v4256_v0 = vpack.c.bf16 %v3824_v59, %v3818_v62  ;;  %v3920_v57 = vmul.f32 %v8885_v51, %v3338_v12  ;;  %5973 = vmatmul.bf16.vlgmr.msrb.gmra.mxu1 %v9069_v5  ;;  %v3092_v32 = vcvt.s32.f32 %v2516_v19  ;;  %v2648_v46 = vunpack.c.0.s8 %v9389_v40 }
 0x564   :  { %v3578_v52 = vmul.f32 %v8885_v51, %v2996_v49  ;;  %v3584_v23 = vmul.f32 %v8885_v51, %v3002_v38  ;;  %v3098_v21 = vcvt.s32.f32 %v2522_v36  ;;  %v2654_v33 = vunpack.c.1.s8 %v9389_v40  ;;  %v2300_v40 = vld [vmem:[#allocation5 + $0x1f8] sm:$0xff] }
 0x565   :  { %6004 = vmatpush.bf16.msra.mxu0 %v4256_v0  ;;  %v4304_v35 = vpack.c.bf16 %v3920_v57, %v3914_v8  ;;  %v3674_v42 = vmul.f32 %v8885_v51, %v3092_v32  ;;  %v3224_v61 = vcvt.s32.f32 %v2648_v46  ;;  %v2744_v15 = vunpack.c.0.s8 %v9393_v27 }
 0x566   :  { %v4136_v1 = vpack.c.bf16 %v3584_v23, %v3578_v52  ;;  %v3680_v2 = vmul.f32 %v8885_v51, %v3098_v21  ;;  %v3230_v56 = vcvt.s32.f32 %v2654_v33  ;;  %v2750_v13 = vunpack.c.1.s8 %v9393_v27 }
 0x567   :  { %6017 = vmatpush.bf16.msra.mxu1 %v4304_v35  ;;  %v3806_v17 = vmul.f32 %v8885_v51, %v3224_v61  ;;  %v3320_v47 = vcvt.s32.f32 %v2744_v15  ;;  %v2408_v54 = vunpack.c.0.s8 %v2246_v18  ;;  %v2414_v41 = vunpack.c.1.s8 %v2246_v18 }
 0x568   :  { %5982 = vmatpush.bf16.msra.mxu2 %v4136_v1  ;;  %v4184_v58 = vpack.c.bf16 %v3680_v2, %v3674_v42  ;;  %v3812_v44 = vmul.f32 %v8885_v51, %v3230_v56  ;;  %v3326_v9 = vcvt.s32.f32 %v2750_v13  ;;  %v2504_v10 = vunpack.c.0.s8 %v2270_v24 }
 0x569   :  { %v3902_v29 = vmul.f32 %v8885_v51, %v3320_v47  ;;  %v2984_v4 = vcvt.s32.f32 %v2408_v54  ;;  %v2990_v43 = vcvt.s32.f32 %v2414_v41  ;;  %v2510_v25 = vunpack.c.1.s8 %v2270_v24 }
 0x56a   :  { %5995 = vmatpush.bf16.msra.mxu3 %v4184_v58  ;;  %v4250_v27 = vpack.c.bf16 %v3812_v44, %v3806_v17  ;;  %v3908_v63 = vmul.f32 %v8885_v51, %v3326_v9  ;;  %v3080_v20 = vcvt.s32.f32 %v2504_v10  ;;  %v2636_v60 = vunpack.c.2.s8 %v2300_v40 }
 0x56b   :  { %v3566_v18 = vmul.f32 %v8885_v51, %v2984_v4  ;;  %v3572_v53 = vmul.f32 %v8885_v51, %v2990_v43  ;;  %v3086_v50 = vcvt.s32.f32 %v2510_v25  ;;  %v2642_v11 = vunpack.c.3.s8 %v2300_v40 }
 0x56c   :  { %6005 = vmatpush.bf16.msra.mxu0 %v4250_v27  ;;  %v4298_v45 = vpack.c.bf16 %v3908_v63, %v3902_v29  ;;  %v3662_v16 = vmul.f32 %v8885_v51, %v3080_v20  ;;  %v3212_v22 = vcvt.s32.f32 %v2636_v60  ;;  %v2732_v24 = vunpack.c.2.s8 %v2324_v30  ;;  %v9435_v29 = vld [vmem:[#allocation5 + $0x1c8] sm:$0xff] }
 0x56d   :  { %v4130_v62 = vpack.c.bf16 %v3572_v53, %v3566_v18  ;;  %v3668_v55 = vmul.f32 %v8885_v51, %v3086_v50  ;;  %v3218_v34 = vcvt.s32.f32 %v2642_v11  ;;  %v2738_v39 = vunpack.c.3.s8 %v2324_v30 }
 0x56e   :  { %6018 = vmatpush.bf16.msra.mxu1 %v4298_v45  ;;  %v3794_v31 = vmul.f32 %v8885_v51, %v3212_v22  ;;  %v3308_v59 = vcvt.s32.f32 %v2732_v24  ;;  %v2396_v12 = vunpack.c.2.s8 %v2240_v7  ;;  %v2402_v19 = vunpack.c.3.s8 %v2240_v7  ;;  %v2354_v24 = vld [vmem:[#allocation5 + $0x3a8] sm:$0xff] }
 0x56f   :  { %5983 = vmatpush.bf16.msra.mxu2 %v4130_v62  ;;  %v4178_v8 = vpack.c.bf16 %v3668_v55, %v3662_v16  ;;  %v3800_v49 = vmul.f32 %v8885_v51, %v3218_v34  ;;  %v3314_v38 = vcvt.s32.f32 %v2738_v39  ;;  %v2492_v36 = vunpack.c.2.s8 %v2264_v28  ;;  %v2378_v39 = vld [vmem:[#allocation5 + $0x468] sm:$0xff] }
 0x570   :  { %v3890_v0 = vmul.f32 %v8885_v51, %v3308_v59  ;;  %v2972_v57 = vcvt.s32.f32 %v2396_v12  ;;  %v2978_v32 = vcvt.s32.f32 %v2402_v19  ;;  %v2498_v46 = vunpack.c.3.s8 %v2264_v28 }
 0x571   :  { %5996 = vmatpush.bf16.msra.mxu3 %v4178_v8  ;;  %v4244_v52 = vpack.c.bf16 %v3800_v49, %v3794_v31  ;;  %v3896_v23 = vmul.f32 %v8885_v51, %v3314_v38  ;;  %v3068_v21 = vcvt.s32.f32 %v2492_v36  ;;  %v2624_v33 = vunpack.c.0.s8 %v2300_v40 }
 0x572   :  { %v3554_v35 = vmul.f32 %v8885_v51, %v2972_v57  ;;  %v3560_v42 = vmul.f32 %v8885_v51, %v2978_v32  ;;  %v3074_v61 = vcvt.s32.f32 %v2498_v46  ;;  %v2630_v15 = vunpack.c.1.s8 %v2300_v40 }
 0x573   :  { %6006 = vmatpush.bf16.msra.mxu0 %v4244_v52  ;;  %v4292_v1 = vpack.c.bf16 %v3896_v23, %v3890_v0  ;;  %v3650_v2 = vmul.f32 %v8885_v51, %v3068_v21  ;;  %v3200_v56 = vcvt.s32.f32 %v2624_v33  ;;  %v2720_v13 = vunpack.c.0.s8 %v2324_v30 }
 0x574   :  { %v4124_v17 = vpack.c.bf16 %v3560_v42, %v3554_v35  ;;  %v3656_v47 = vmul.f32 %v8885_v51, %v3074_v61  ;;  %v3206_v54 = vcvt.s32.f32 %v2630_v15  ;;  %v2726_v41 = vunpack.c.1.s8 %v2324_v30  ;;  %v9439_v30 = vld [vmem:[#allocation5 + $0x288] sm:$0xff] }
 0x575   :  { %6019 = vmatpush.bf16.msra.mxu1 %v4292_v1  ;;  %v3782_v58 = vmul.f32 %v8885_v51, %v3200_v56  ;;  %v3296_v44 = vcvt.s32.f32 %v2720_v13  ;;  %v2384_v9 = vunpack.c.0.s8 %v2240_v7  ;;  %v2390_v10 = vunpack.c.1.s8 %v2240_v7 }
 0x576   :  { %5984 = vmatpush.bf16.msra.mxu2 %v4124_v17  ;;  %v4172_v40 = vpack.c.bf16 %v3656_v47, %v3650_v2  ;;  %v3788_v4 = vmul.f32 %v8885_v51, %v3206_v54  ;;  %v3302_v43 = vcvt.s32.f32 %v2726_v41  ;;  %v2480_v25 = vunpack.c.0.s8 %v2264_v28 }
 0x577   :  { %v3878_v27 = vmul.f32 %v8885_v51, %v3296_v44  ;;  %v2960_v63 = vcvt.s32.f32 %v2384_v9  ;;  %v2966_v20 = vcvt.s32.f32 %v2390_v10  ;;  %v2486_v60 = vunpack.c.1.s8 %v2264_v28 }
 0x578   :  { %5997 = vmatpush.bf16.msra.mxu3 %v4172_v40  ;;  %v4238_v18 = vpack.c.bf16 %v3788_v4, %v3782_v58  ;;  %v3884_v53 = vmul.f32 %v8885_v51, %v3302_v43  ;;  %v3056_v50 = vcvt.s32.f32 %v2480_v25  ;;  %v2612_v11 = vunpack.c.2.s8 %v9435_v29  ;;  %v9465_v25 = vld [vmem:[#allocation5 + $0x198] sm:$0xff] }
 0x579   :  { %v3542_v7 = vmul.f32 %v8885_v51, %v2960_v63  ;;  %v3548_v45 = vmul.f32 %v8885_v51, %v2966_v20  ;;  %v3062_v16 = vcvt.s32.f32 %v2486_v60  ;;  %v2618_v22 = vunpack.c.3.s8 %v9435_v29 }
 0x57a   :  { %6007 = vmatpush.bf16.msra.mxu0 %v4238_v18  ;;  %v4286_v62 = vpack.c.bf16 %v3884_v53, %v3878_v27  ;;  %v3638_v28 = vmul.f32 %v8885_v51, %v3056_v50  ;;  %v3188_v55 = vcvt.s32.f32 %v2612_v11  ;;  %v2708_v34 = vunpack.c.2.s8 %v9439_v30 }
 0x57b   :  { %v4118_v31 = vpack.c.bf16 %v3548_v45, %v3542_v7  ;;  %v3644_v59 = vmul.f32 %v8885_v51, %v3062_v16  ;;  %v3194_v12 = vcvt.s32.f32 %v2618_v22  ;;  %v2714_v19 = vunpack.c.3.s8 %v9439_v30 }
 0x57c   :  { %6020 = vmatpush.bf16.msra.mxu1 %v4286_v62  ;;  %v3770_v8 = vmul.f32 %v8885_v51, %v3188_v55  ;;  %v3284_v49 = vcvt.s32.f32 %v2708_v34  ;;  %v2852_v38 = vunpack.c.2.s8 %v2354_v24  ;;  %v2858_v36 = vunpack.c.3.s8 %v2354_v24  ;;  %v2348_v34 = vld [vmem:[#allocation5 + $0x378] sm:$0xff] }
 0x57d   :  { %5985 = vmatpush.bf16.msra.mxu2 %v4118_v31  ;;  %v4166_v0 = vpack.c.bf16 %v3644_v59, %v3638_v28  ;;  %v3776_v57 = vmul.f32 %v8885_v51, %v3194_v12  ;;  %v3290_v32 = vcvt.s32.f32 %v2714_v19  ;;  %v2948_v46 = vunpack.c.2.s8 %v2378_v39  ;;  %v2372_v19 = vld [vmem:[#allocation5 + $0x438] sm:$0xff] }
 0x57e   :  { %v3866_v52 = vmul.f32 %v8885_v51, %v3284_v49  ;;  %v3428_v23 = vcvt.s32.f32 %v2852_v38  ;;  %v3434_v21 = vcvt.s32.f32 %v2858_v36  ;;  %v2954_v33 = vunpack.c.3.s8 %v2378_v39 }
 0x57f   :  { %5998 = vmatpush.bf16.msra.mxu3 %v4166_v0  ;;  %v4232_v35 = vpack.c.bf16 %v3776_v57, %v3770_v8  ;;  %v3872_v42 = vmul.f32 %v8885_v51, %v3290_v32  ;;  %v3524_v61 = vcvt.s32.f32 %v2948_v46  ;;  %v2600_v15 = vunpack.c.0.s8 %v9435_v29 }
 0x580   :  { %v4010_v1 = vmul.f32 %v8885_v51, %v3428_v23  ;;  %v4016_v2 = vmul.f32 %v8885_v51, %v3434_v21  ;;  %v3530_v56 = vcvt.s32.f32 %v2954_v33  ;;  %5986 = vmatmul.bf16.vlgmr.msra.gmra.mxu2 %v9042_v48  ;;  %v2606_v13 = vunpack.c.1.s8 %v9435_v29 }
 0x581   :  { %6008 = vmatpush.bf16.msra.mxu0 %v4232_v35  ;;  %v4280_v17 = vpack.c.bf16 %v3872_v42, %v3866_v52  ;;  %v4106_v47 = vmul.f32 %v8885_v51, %v3524_v61  ;;  %v3176_v54 = vcvt.s32.f32 %v2600_v15  ;;  %v2696_v41 = vunpack.c.0.s8 %v9439_v30 }
 0x582   :  { %v4352_v58 = vpack.c.bf16 %v4016_v2, %v4010_v1  ;;  %v4112_v44 = vmul.f32 %v8885_v51, %v3530_v56  ;;  %5999 = vmatmul.bf16.vlgmr.msra.gmra.mxu3 %v9044_v14  ;;  %v3182_v9 = vcvt.s32.f32 %v2606_v13  ;;  %v2702_v10 = vunpack.c.1.s8 %v9439_v30  ;;  %v9469_v30 = vld [vmem:[#allocation5 + $0x258] sm:$0xff] }
 0x583   :  { %6021 = vmatpush.bf16.msra.mxu1 %v4280_v17  ;;  %v3758_v40 = vmul.f32 %v8885_v51, %v3176_v54  ;;  %v3272_v4 = vcvt.s32.f32 %v2696_v41  ;;  %v2840_v29 = vunpack.c.0.s8 %v2354_v24  ;;  %v2846_v43 = vunpack.c.1.s8 %v2354_v24  ;;  %v9485_v17 = vpop.f32.mrf.mxu0 }
 0x584   :  { %6030 = vmatpush.bf16.msrb.mxu2 %v4352_v58  ;;  %v4400_v27 = vpack.c.bf16 %v4112_v44, %v4106_v47  ;;  %v3764_v63 = vmul.f32 %v8885_v51, %v3182_v9  ;;  %v3278_v20 = vcvt.s32.f32 %v2702_v10  ;;  %v2936_v60 = vunpack.c.0.s8 %v2378_v39  ;;  %v9487_v47 = vpop.f32.mrf.mxu1 }
 0x585   :  { %v3854_v18 = vmul.f32 %v8885_v51, %v3272_v4  ;;  %v3416_v53 = vcvt.s32.f32 %v2840_v29  ;;  %v3422_v50 = vcvt.s32.f32 %v2846_v43  ;;  %v2942_v11 = vunpack.c.1.s8 %v2378_v39 }
 0x586   :  { %6043 = vmatpush.bf16.msrb.mxu3 %v4400_v27  ;;  %v4226_v7 = vpack.c.bf16 %v3764_v63, %v3758_v40  ;;  %v3860_v45 = vmul.f32 %v8885_v51, %v3278_v20  ;;  %v3512_v16 = vcvt.s32.f32 %v2936_v60  ;;  %v2588_v22 = vunpack.c.2.s8 %v9465_v25 }
 0x587   :  { %v3998_v24 = vmul.f32 %v8885_v51, %v3416_v53  ;;  %v4004_v62 = vmul.f32 %v8885_v51, %v3422_v50  ;;  %v3518_v28 = vcvt.s32.f32 %v2942_v11  ;;  %v2594_v55 = vunpack.c.3.s8 %v9465_v25 }
 0x588   :  { %6009 = vmatpush.bf16.msra.mxu0 %v4226_v7  ;;  %v4274_v31 = vpack.c.bf16 %v3860_v45, %v3854_v18  ;;  %v4094_v39 = vmul.f32 %v8885_v51, %v3512_v16  ;;  %v3164_v59 = vcvt.s32.f32 %v2588_v22  ;;  %v2684_v12 = vunpack.c.2.s8 %v9469_v30 }
 0x589   :  { %v4346_v8 = vpack.c.bf16 %v4004_v62, %v3998_v24  ;;  %v4100_v49 = vmul.f32 %v8885_v51, %v3518_v28  ;;  %v3170_v38 = vcvt.s32.f32 %v2594_v55  ;;  %v2690_v36 = vunpack.c.3.s8 %v9469_v30 }
 0x58a   :  { %6022 = vmatpush.bf16.msra.mxu1 %v4274_v31  ;;  %v3746_v0 = vmul.f32 %v8885_v51, %v3164_v59  ;;  %v3260_v57 = vcvt.s32.f32 %v2684_v12  ;;  %v2828_v32 = vunpack.c.2.s8 %v2348_v34  ;;  %v2834_v46 = vunpack.c.3.s8 %v2348_v34 }
 0x58b   :  { %6031 = vmatpush.bf16.msrb.mxu2 %v4346_v8  ;;  %v4394_v52 = vpack.c.bf16 %v4100_v49, %v4094_v39  ;;  %v3752_v23 = vmul.f32 %v8885_v51, %v3170_v38  ;;  %v3266_v21 = vcvt.s32.f32 %v2690_v36  ;;  %v2924_v33 = vunpack.c.2.s8 %v2372_v19  ;;  %v2342_v49 = vld [vmem:[#allocation5 + $0x348] sm:$0xff]  ;;  %v5755_v38 = vpop.f32.mrf.mxu0 }
 0x58c   :  { %v3842_v35 = vmul.f32 %v8885_v51, %v3260_v57  ;;  %v3404_v42 = vcvt.s32.f32 %v2828_v32  ;;  %v3410_v61 = vcvt.s32.f32 %v2834_v46  ;;  %v2930_v15 = vunpack.c.3.s8 %v2372_v19  ;;  %v5768_v36 = vpop.f32.mrf.mxu1  ;;  %v2366_v46 = vld [vmem:[#allocation5 + $0x408] sm:$0xff] }
 0x58d   :  { %6044 = vmatpush.bf16.msrb.mxu3 %v4394_v52  ;;  %v4220_v1 = vpack.c.bf16 %v3752_v23, %v3746_v0  ;;  %v3848_v2 = vmul.f32 %v8885_v51, %v3266_v21  ;;  %v3500_v56 = vcvt.s32.f32 %v2924_v33  ;;  %v2576_v13 = vunpack.c.0.s8 %v9465_v25 }
 0x58e   :  { %v3986_v54 = vmul.f32 %v8885_v51, %v3404_v42  ;;  %v3992_v41 = vmul.f32 %v8885_v51, %v3410_v61  ;;  %v3506_v58 = vcvt.s32.f32 %v2930_v15  ;;  %v2582_v44 = vunpack.c.1.s8 %v9465_v25  ;;  %v9497_v25 = vld [vmem:[#allocation5 + $0xb0] sm:$0xff] }
 0x58f   :  { %6010 = vmatpush.bf16.msra.mxu0 %v4220_v1  ;;  %v4268_v9 = vpack.c.bf16 %v3848_v2, %v3842_v35  ;;  %v4082_v10 = vmul.f32 %v8885_v51, %v3500_v56  ;;  %v3152_v40 = vcvt.s32.f32 %v2576_v13  ;;  %v2672_v4 = vunpack.c.0.s8 %v9469_v30 }
 0x590   :  { %v4340_v29 = vpack.c.bf16 %v3992_v41, %v3986_v54  ;;  %v4088_v43 = vmul.f32 %v8885_v51, %v3506_v58  ;;  %v3158_v27 = vcvt.s32.f32 %v2582_v44  ;;  %v2678_v63 = vunpack.c.1.s8 %v9469_v30  ;;  %v9501_v30 = vld [vmem:[#allocation5 + $0x170] sm:$0xff] }
 0x591   :  { %6023 = vmatpush.bf16.msra.mxu1 %v4268_v9  ;;  %v3734_v20 = vmul.f32 %v8885_v51, %v3152_v40  ;;  %v3248_v60 = vcvt.s32.f32 %v2672_v4  ;;  %v2816_v18 = vunpack.c.0.s8 %v2348_v34  ;;  %v2822_v53 = vunpack.c.1.s8 %v2348_v34 }
 0x592   :  { %6032 = vmatpush.bf16.msrb.mxu2 %v4340_v29  ;;  %v4388_v50 = vpack.c.bf16 %v4088_v43, %v4082_v10  ;;  %v3740_v11 = vmul.f32 %v8885_v51, %v3158_v27  ;;  %v3254_v7 = vcvt.s32.f32 %v2678_v63  ;;  %v2912_v45 = vunpack.c.0.s8 %v2372_v19 }
 0x593   :  { %v3830_v16 = vmul.f32 %v8885_v51, %v3248_v60  ;;  %v3392_v22 = vcvt.s32.f32 %v2816_v18  ;;  %v3398_v24 = vcvt.s32.f32 %v2822_v53  ;;  %v2918_v62 = vunpack.c.1.s8 %v2372_v19 }
 0x594   :  { %6045 = vmatpush.bf16.msrb.mxu3 %v4388_v50  ;;  %v4214_v28 = vpack.c.bf16 %v3740_v11, %v3734_v20  ;;  %v3836_v55 = vmul.f32 %v8885_v51, %v3254_v7  ;;  %v3488_v34 = vcvt.s32.f32 %v2912_v45  ;;  %v2469_v31 = vunpack.c.2.s8 %v9497_v25 }
 0x595   :  { %v3974_v39 = vmul.f32 %v8885_v51, %v3392_v22  ;;  %v3980_v59 = vmul.f32 %v8885_v51, %v3398_v24  ;;  %v3494_v12 = vcvt.s32.f32 %v2918_v62  ;;  %v2475_v8 = vunpack.c.3.s8 %v9497_v25 }
 0x596   :  { %6011 = vmatpush.bf16.msra.mxu0 %v4214_v28  ;;  %v4262_v19 = vpack.c.bf16 %v3836_v55, %v3830_v16  ;;  %v4070_v0 = vmul.f32 %v8885_v51, %v3488_v34  ;;  %v3045_v57 = vcvt.s32.f32 %v2469_v31  ;;  %v2565_v32 = vunpack.c.2.s8 %v9501_v30 }
 0x597   :  { %v4334_v52 = vpack.c.bf16 %v3980_v59, %v3974_v39  ;;  %v4076_v23 = vmul.f32 %v8885_v51, %v3494_v12  ;;  %v3051_v21 = vcvt.s32.f32 %v2475_v8  ;;  %v2571_v33 = vunpack.c.3.s8 %v9501_v30 }
 0x598   :  { %6024 = vmatpush.bf16.msra.mxu1 %v4262_v19  ;;  %v3627_v35 = vmul.f32 %v8888_v37, %v3045_v57  ;;  %v3141_v42 = vcvt.s32.f32 %v2565_v32  ;;  %v2804_v61 = vunpack.c.2.s8 %v2342_v49  ;;  %v2810_v15 = vunpack.c.3.s8 %v2342_v49 }
 0x599   :  { %6033 = vmatpush.bf16.msrb.mxu2 %v4334_v52  ;;  %v4382_v1 = vpack.c.bf16 %v4076_v23, %v4070_v0  ;;  %v3633_v2 = vmul.f32 %v8888_v37, %v3051_v21  ;;  %v3147_v56 = vcvt.s32.f32 %v2571_v33  ;;  %6012 = vmatmul.bf16.vlgmr.msra.gmra.mxu0 %v9139_v6  ;;  %v2900_v13 = vunpack.c.2.s8 %v2366_v46  ;;  %v9538_v23 = vld [vmem:[#allocation5 + $0x318] sm:$0xff] }
 0x59a   :  { %v3723_v54 = vmul.f32 %v8888_v37, %v3141_v42  ;;  %v3380_v41 = vcvt.s32.f32 %v2804_v61  ;;  %v3386_v58 = vcvt.s32.f32 %v2810_v15  ;;  %v2906_v44 = vunpack.c.3.s8 %v2366_v46 }
 0x59b   :  { %6046 = vmatpush.bf16.msrb.mxu3 %v4382_v1  ;;  %v4161_v9 = vpack.c.bf16 %v3633_v2, %v3627_v35  ;;  %v3729_v10 = vmul.f32 %v8888_v37, %v3147_v56  ;;  %6025 = vmatmul.bf16.vlgmr.msra.gmra.mxu1 %v9144_v26  ;;  %v3476_v40 = vcvt.s32.f32 %v2900_v13  ;;  %v2457_v4 = vunpack.c.0.s8 %v9497_v25  ;;  %v9544_v2 = vld [vmem:[#allocation5 + $0x3d8] sm:$0xff] }
 0x59c   :  { %v3962_v29 = vmul.f32 %v8885_v51, %v3380_v41  ;;  %v3968_v43 = vmul.f32 %v8885_v51, %v3386_v58  ;;  %v3482_v27 = vcvt.s32.f32 %v2906_v44  ;;  %v2463_v63 = vunpack.c.1.s8 %v9497_v25  ;;  %v9527_v25 = vld [vmem:[#allocation5 + $0x80] sm:$0xff] }
 0x59d   :  { %6056 = vmatpush.bf16.msrb.mxu0 %v4161_v9  ;;  %v4209_v20 = vpack.c.bf16 %v3729_v10, %v3723_v54  ;;  %v4058_v60 = vmul.f32 %v8885_v51, %v3476_v40  ;;  %v3033_v18 = vcvt.s32.f32 %v2457_v4  ;;  %v2553_v53 = vunpack.c.0.s8 %v9501_v30  ;;  %v6858_v54 = vld [vmem:[%s10189_s7] sm:$0x7f] }
 0x59e   :  { %v4328_v50 = vpack.c.bf16 %v3968_v43, %v3962_v29  ;;  %v4064_v11 = vmul.f32 %v8885_v51, %v3482_v27  ;;  %v3039_v7 = vcvt.s32.f32 %v2463_v63  ;;  %v2559_v45 = vunpack.c.1.s8 %v9501_v30  ;;  %v9531_v30 = vld [vmem:[#allocation5 + $0x140] sm:$0xff] }
 0x59f   :  { %6069 = vmatpush.bf16.msrb.mxu1 %v4209_v20  ;;  %v3615_v16 = vmul.f32 %v8888_v37, %v3033_v18  ;;  %v3129_v22 = vcvt.s32.f32 %v2553_v53  ;;  %v2792_v24 = vunpack.c.0.s8 %v2342_v49  ;;  %v2798_v62 = vunpack.c.1.s8 %v2342_v49 }
 0x5a0   :  { %6034 = vmatpush.bf16.msrb.mxu2 %v4328_v50  ;;  %v4376_v28 = vpack.c.bf16 %v4064_v11, %v4058_v60  ;;  %v3621_v55 = vmul.f32 %v8888_v37, %v3039_v7  ;;  %v3135_v34 = vcvt.s32.f32 %v2559_v45  ;;  %v2888_v31 = vunpack.c.0.s8 %v2366_v46 }
 0x5a1   :  { %v3711_v39 = vmul.f32 %v8888_v37, %v3129_v22  ;;  %v3368_v59 = vcvt.s32.f32 %v2792_v24  ;;  %v3374_v12 = vcvt.s32.f32 %v2798_v62  ;;  %v2894_v8 = vunpack.c.1.s8 %v2366_v46 }
 0x5a2   :  { %6047 = vmatpush.bf16.msrb.mxu3 %v4376_v28  ;;  %v4155_v38 = vpack.c.bf16 %v3621_v55, %v3615_v16  ;;  %v3717_v36 = vmul.f32 %v8888_v37, %v3135_v34  ;;  %v3464_v49 = vcvt.s32.f32 %v2888_v31  ;;  %v2445_v19 = vunpack.c.2.s8 %v9527_v25 }
 0x5a3   :  { %v3950_v0 = vmul.f32 %v8885_v51, %v3368_v59  ;;  %v3956_v57 = vmul.f32 %v8885_v51, %v3374_v12  ;;  %v3470_v32 = vcvt.s32.f32 %v2894_v8  ;;  %v2451_v52 = vunpack.c.3.s8 %v9527_v25  ;;  %v9570_v59 = vpop.f32.mrf.mxu0  ;;  %v9572_v12 = vpop.f32.mrf.mxu1 }
 0x5a4   :  { %6057 = vmatpush.bf16.msrb.mxu0 %v4155_v38  ;;  %v4203_v46 = vpack.c.bf16 %v3717_v36, %v3711_v39  ;;  %v4046_v21 = vmul.f32 %v8885_v51, %v3464_v49  ;;  %v3021_v33 = vcvt.s32.f32 %v2445_v19  ;;  %v2541_v35 = vunpack.c.2.s8 %v9531_v30  ;;  %v9576_v49 = vld [vmem:[#allocation5 + $0x50] sm:$0xff] }
 0x5a5   :  { %v4322_v42 = vpack.c.bf16 %v3956_v57, %v3950_v0  ;;  %v4052_v61 = vmul.f32 %v8885_v51, %v3470_v32  ;;  %v3027_v15 = vcvt.s32.f32 %v2451_v52  ;;  %v2547_v1 = vunpack.c.3.s8 %v9531_v30 }
 0x5a6   :  { %6070 = vmatpush.bf16.msrb.mxu1 %v4203_v46  ;;  %v3603_v56 = vmul.f32 %v8888_v37, %v3021_v33  ;;  %v3117_v13 = vcvt.s32.f32 %v2541_v35  ;;  %v5738_v41 = vperm.slane %v6858_v54, 3  ;;  %v2780_v58 = vunpack.c.2.s8 %v9538_v23  ;;  %v2271_v33 = vld [vmem:[#allocation5 + $0x110] sm:$0xff] }
 0x5a7   :  { %6035 = vmatpush.bf16.msrb.mxu2 %v4322_v42  ;;  %v4370_v44 = vpack.c.bf16 %v4052_v61, %v4046_v21  ;;  %v3609_v9 = vmul.f32 %v8888_v37, %v3027_v15  ;;  %v3123_v10 = vcvt.s32.f32 %v2547_v1  ;;  %v2786_v40 = vunpack.c.3.s8 %v9538_v23  ;;  %v9585_v15 = vld [vmem:[#allocation5 + $0x230] sm:$0xff] }
 0x5a8   :  { %v3699_v4 = vmul.f32 %v8888_v37, %v3117_v13  ;;  %v5754_v29 = vadd.f32 %v9485_v17, %v5738_v41  ;;  %v3356_v43 = vcvt.s32.f32 %v2780_v58  ;;  %v2876_v27 = vunpack.c.2.s8 %v9544_v2 }
 0x5a9   :  { %6048 = vmatpush.bf16.msrb.mxu3 %v4370_v44  ;;  %v4149_v63 = vpack.c.bf16 %v3609_v9, %v3603_v56  ;;  %v3705_v20 = vmul.f32 %v8888_v37, %v3123_v10  ;;  %v3362_v60 = vcvt.s32.f32 %v2786_v40  ;;  %v2882_v18 = vunpack.c.3.s8 %v9544_v2  ;;  %v9590_v9 = vld [vmem:[#allocation5 + $0x2f0] sm:$0xff] }
 0x5aa   :  { %v9559_v53 = vadd.f32 %v9487_v47, %v5754_v29  ;;  %v3938_v50 = vmul.f32 %v8885_v51, %v3356_v43  ;;  %v3452_v11 = vcvt.s32.f32 %v2876_v27  ;;  %v2433_v7 = vunpack.c.0.s8 %v9527_v25 }
 0x5ab   :  { %6058 = vmatpush.bf16.msrb.mxu0 %v4149_v63  ;;  %v4197_v17 = vpack.c.bf16 %v3705_v20, %v3699_v4  ;;  %v3944_v45 = vmul.f32 %v8885_v51, %v3362_v60  ;;  %v3458_v16 = vcvt.s32.f32 %v2882_v18  ;;  %v2439_v22 = vunpack.c.1.s8 %v9527_v25  ;;  %v5807_v60 = vpop.f32.mrf.mxu0  ;;  %v5820_v18 = vpop.f32.mrf.mxu1 }
 0x5ac   :  { %v4034_v24 = vmul.f32 %v8885_v51, %v3452_v11  ;;  %v3009_v62 = vcvt.s32.f32 %v2433_v7  ;;  %v2529_v28 = vunpack.c.0.s8 %v9531_v30  ;;  %v2535_v47 = vunpack.c.1.s8 %v9531_v30 }
 0x5ad   :  { %6071 = vmatpush.bf16.msrb.mxu1 %v4197_v17  ;;  %v4316_v55 = vpack.c.bf16 %v3944_v45, %v3938_v50  ;;  %v4040_v34 = vmul.f32 %v8885_v51, %v3458_v16  ;;  %v3015_v31 = vcvt.s32.f32 %v2439_v22  ;;  %v2768_v39 = vunpack.c.0.s8 %v9538_v23 }
 0x5ae   :  { %v3591_v25 = vmul.f32 %v8888_v37, %v3009_v62  ;;  %v3105_v8 = vcvt.s32.f32 %v2529_v28  ;;  %v3111_v38 = vcvt.s32.f32 %v2535_v47  ;;  %v2774_v36 = vunpack.c.1.s8 %v9538_v23  ;;  %v9603_v62 = vpop.f32.mrf.mxu3 }
 0x5af   :  { %6036 = vmatpush.bf16.msrb.mxu2 %v4316_v55  ;;  %v4364_v30 = vpack.c.bf16 %v4040_v34, %v4034_v24  ;;  %v3597_v19 = vmul.f32 %v8888_v37, %v3015_v31  ;;  %v3344_v0 = vcvt.s32.f32 %v2768_v39  ;;  %v2864_v57 = vunpack.c.0.s8 %v9544_v2  ;;  %v9601_v24 = vpop.f32.mrf.mxu2 }
 0x5b0   :  { %v3687_v32 = vmul.f32 %v8888_v37, %v3105_v8  ;;  %v3693_v52 = vmul.f32 %v8888_v37, %v3111_v38  ;;  %v3350_v46 = vcvt.s32.f32 %v2774_v36  ;;  %v2870_v21 = vunpack.c.1.s8 %v9544_v2 }
 0x5b1   :  { %6049 = vmatpush.bf16.msrb.mxu3 %v4364_v30  ;;  %v4143_v35 = vpack.c.bf16 %v3597_v19, %v3591_v25  ;;  %v3926_v23 = vmul.f32 %v8885_v51, %v3344_v0  ;;  %v3440_v42 = vcvt.s32.f32 %v2864_v57  ;;  %v2421_v61 = vunpack.c.2.s8 %v9576_v49 }
 0x5b2   :  { %v4191_v1 = vpack.c.bf16 %v3693_v52, %v3687_v32  ;;  %v3932_v56 = vmul.f32 %v8885_v51, %v3350_v46  ;;  %v3446_v13 = vcvt.s32.f32 %v2870_v21  ;;  %v2427_v54 = vunpack.c.3.s8 %v9576_v49 }
 0x5b3   :  { %6059 = vmatpush.bf16.msrb.mxu0 %v4143_v35  ;;  %v4022_v41 = vmul.f32 %v8885_v51, %v3440_v42  ;;  %v2997_v2 = vcvt.s32.f32 %v2421_v61  ;;  %v2517_v58 = vunpack.c.2.s8 %v2271_v33  ;;  %v2523_v44 = vunpack.c.3.s8 %v2271_v33 }
 0x5b4   :  { %6072 = vmatpush.bf16.msrb.mxu1 %v4191_v1  ;;  %v4310_v10 = vpack.c.bf16 %v3932_v56, %v3926_v23  ;;  %v4028_v40 = vmul.f32 %v8885_v51, %v3446_v13  ;;  %v3003_v4 = vcvt.s32.f32 %v2427_v54  ;;  %v2661_v29 = vunpack.c.2.s8 %v9585_v15  ;;  %v9616_v23 = vld [vmem:[#allocation5 + $0x20] sm:$0xff] }
 0x5b5   :  { %v3579_v43 = vmul.f32 %v8888_v37, %v2997_v2  ;;  %v3093_v27 = vcvt.s32.f32 %v2517_v58  ;;  %v3099_v63 = vcvt.s32.f32 %v2523_v44  ;;  %v2667_v20 = vunpack.c.3.s8 %v9585_v15  ;;  %v2265_v2 = vld [vmem:[#allocation5 + $0xe0] sm:$0xff] }
 0x5b6   :  { %6037 = vmatpush.bf16.msrb.mxu2 %v4310_v10  ;;  %v4358_v50 = vpack.c.bf16 %v4028_v40, %v4022_v41  ;;  %v3585_v11 = vmul.f32 %v8888_v37, %v3003_v4  ;;  %v3237_v7 = vcvt.s32.f32 %v2661_v29  ;;  %v2757_v17 = vunpack.c.2.s8 %v9590_v9  ;;  %v9625_v40 = vld [vmem:[#allocation5 + $0x200] sm:$0xff] }
 0x5b7   :  { %v3675_v51 = vmul.f32 %v8888_v37, %v3093_v27  ;;  %v3681_v45 = vmul.f32 %v8888_v37, %v3099_v63  ;;  %v3243_v16 = vcvt.s32.f32 %v2667_v20  ;;  %v2763_v22 = vunpack.c.3.s8 %v9590_v9  ;;  %v5781_v4 = vpop.f32.mrf.mxu2  ;;  %v5794_v20 = vpop.f32.mrf.mxu3 }
 0x5b8   :  { %6050 = vmatpush.bf16.msrb.mxu3 %v4358_v50  ;;  %v4137_v28 = vpack.c.bf16 %v3585_v11, %v3579_v43  ;;  %v3819_v47 = vmul.f32 %v8888_v37, %v3237_v7  ;;  %v3333_v55 = vcvt.s32.f32 %v2757_v17  ;;  %v2409_v34 = vunpack.c.0.s8 %v9576_v49  ;;  %v2325_v11 = vld [vmem:[#allocation5 + $0x2c0] sm:$0xff] }
 0x5b9   :  { %v4185_v31 = vpack.c.bf16 %v3681_v45, %v3675_v51  ;;  %v3825_v39 = vmul.f32 %v8888_v37, %v3243_v16  ;;  %v3339_v25 = vcvt.s32.f32 %v2763_v22  ;;  %6038 = vmatmul.bf16.vlgmr.msrb.gmra.mxu2 %v9067_v3  ;;  %v2415_v8 = vunpack.c.1.s8 %v9576_v49 }
 0x5ba   :  { %6060 = vmatpush.bf16.msrb.mxu0 %v4137_v28  ;;  %v3915_v38 = vmul.f32 %v8888_v37, %v3333_v55  ;;  %v2985_v36 = vcvt.s32.f32 %v2409_v34  ;;  %v2505_v30 = vunpack.c.0.s8 %v2271_v33  ;;  %v2511_v19 = vunpack.c.1.s8 %v2271_v33 }
 0x5bb   :  { %6073 = vmatpush.bf16.msrb.mxu1 %v4185_v31  ;;  %v4257_v0 = vpack.c.bf16 %v3825_v39, %v3819_v47  ;;  %v3921_v57 = vmul.f32 %v8888_v37, %v3339_v25  ;;  %6051 = vmatmul.bf16.vlgmr.msrb.gmra.mxu3 %v9069_v5  ;;  %v2991_v32 = vcvt.s32.f32 %v2415_v8  ;;  %v2649_v52 = vunpack.c.0.s8 %v9585_v15 }
 0x5bc   :  { %v3567_v46 = vmul.f32 %v8888_v37, %v2985_v36  ;;  %v3081_v21 = vcvt.s32.f32 %v2505_v30  ;;  %v3087_v35 = vcvt.s32.f32 %v2511_v19  ;;  %v2655_v49 = vunpack.c.1.s8 %v9585_v15 }
 0x5bd   :  { %6082 = vmatpush.bf16.msra.mxu2 %v4257_v0  ;;  %v4305_v42 = vpack.c.bf16 %v3921_v57, %v3915_v38  ;;  %v3573_v33 = vmul.f32 %v8888_v37, %v2991_v32  ;;  %v3225_v61 = vcvt.s32.f32 %v2649_v52  ;;  %v2745_v1 = vunpack.c.0.s8 %v9590_v9 }
 0x5be   :  { %v3663_v56 = vmul.f32 %v8888_v37, %v3081_v21  ;;  %v3669_v13 = vmul.f32 %v8888_v37, %v3087_v35  ;;  %v3231_v54 = vcvt.s32.f32 %v2655_v49  ;;  %v2751_v41 = vunpack.c.1.s8 %v9590_v9 }
 0x5bf   :  { %6095 = vmatpush.bf16.msra.mxu3 %v4305_v42  ;;  %v4131_v58 = vpack.c.bf16 %v3573_v33, %v3567_v46  ;;  %v3807_v15 = vmul.f32 %v8888_v37, %v3225_v61  ;;  %v3321_v44 = vcvt.s32.f32 %v2745_v1  ;;  %v2397_v10 = vunpack.c.2.s8 %v9616_v23 }
 0x5c0   :  { %v4179_v29 = vpack.c.bf16 %v3669_v13, %v3663_v56  ;;  %v3813_v43 = vmul.f32 %v8888_v37, %v3231_v54  ;;  %v3327_v27 = vcvt.s32.f32 %v2751_v41  ;;  %v2403_v63 = vunpack.c.3.s8 %v9616_v23 }
 0x5c1   :  { %6061 = vmatpush.bf16.msrb.mxu0 %v4131_v58  ;;  %v3903_v9 = vmul.f32 %v8888_v37, %v3321_v44  ;;  %v2973_v60 = vcvt.s32.f32 %v2397_v10  ;;  %v2493_v18 = vunpack.c.2.s8 %v2265_v2  ;;  %v2499_v50 = vunpack.c.3.s8 %v2265_v2  ;;  %v9648_v44 = vpop.f32.mrf.mxu0  ;;  %v9650_v10 = vpop.f32.mrf.mxu1 }
 0x5c2   :  { %6074 = vmatpush.bf16.msrb.mxu1 %v4179_v29  ;;  %v4251_v7 = vpack.c.bf16 %v3813_v43, %v3807_v15  ;;  %v3909_v17 = vmul.f32 %v8888_v37, %v3327_v27  ;;  %v2979_v51 = vcvt.s32.f32 %v2403_v63  ;;  %v2637_v45 = vunpack.c.2.s8 %v9625_v40 }
 0x5c3   :  { %v3555_v16 = vmul.f32 %v8888_v37, %v2973_v60  ;;  %v3069_v22 = vcvt.s32.f32 %v2493_v18  ;;  %v3075_v28 = vcvt.s32.f32 %v2499_v50  ;;  %v2643_v47 = vunpack.c.3.s8 %v9625_v40  ;;  %v9655_v60 = vld [vmem:[#allocation5 + $0x470] sm:$0xff] }
 0x5c4   :  { %6083 = vmatpush.bf16.msra.mxu2 %v4251_v7  ;;  %v4299_v55 = vpack.c.bf16 %v3909_v17, %v3903_v9  ;;  %v3561_v34 = vmul.f32 %v8888_v37, %v2979_v51  ;;  %v3213_v31 = vcvt.s32.f32 %v2637_v45  ;;  %v2733_v39 = vunpack.c.2.s8 %v2325_v11 }
 0x5c5   :  { %v3651_v25 = vmul.f32 %v8888_v37, %v3069_v22  ;;  %v3657_v8 = vmul.f32 %v8888_v37, %v3075_v28  ;;  %v3219_v38 = vcvt.s32.f32 %v2643_v47  ;;  %v2739_v36 = vunpack.c.3.s8 %v2325_v11  ;;  %v9661_v22 = vld [vmem:[#allocation5 + $0x1d0] sm:$0xff] }
 0x5c6   :  { %6096 = vmatpush.bf16.msra.mxu3 %v4299_v55  ;;  %v4125_v30 = vpack.c.bf16 %v3561_v34, %v3555_v16  ;;  %v3795_v19 = vmul.f32 %v8888_v37, %v3213_v31  ;;  %v3309_v0 = vcvt.s32.f32 %v2733_v39  ;;  %v2385_v57 = vunpack.c.0.s8 %v9616_v23 }
 0x5c7   :  { %v4173_v32 = vpack.c.bf16 %v3657_v8, %v3651_v25  ;;  %v3801_v52 = vmul.f32 %v8888_v37, %v3219_v38  ;;  %v3315_v46 = vcvt.s32.f32 %v2739_v36  ;;  %v2391_v21 = vunpack.c.1.s8 %v9616_v23  ;;  %v9646_v23 = vld [vmem:[#allocation5 + $0x3b0] sm:$0xff] }
 0x5c8   :  { %6062 = vmatpush.bf16.msrb.mxu0 %v4125_v30  ;;  %v3891_v35 = vmul.f32 %v8888_v37, %v3309_v0  ;;  %v2961_v49 = vcvt.s32.f32 %v2385_v57  ;;  %v2481_v42 = vunpack.c.0.s8 %v2265_v2  ;;  %v2487_v33 = vunpack.c.1.s8 %v2265_v2  ;;  %v9669_v8 = vld [vmem:[#allocation5 + $0x290] sm:$0xff] }
 0x5c9   :  { %6075 = vmatpush.bf16.msrb.mxu1 %v4173_v32  ;;  %v4245_v61 = vpack.c.bf16 %v3801_v52, %v3795_v19  ;;  %v3897_v1 = vmul.f32 %v8888_v37, %v3315_v46  ;;  %v2967_v56 = vcvt.s32.f32 %v2391_v21  ;;  %v2625_v13 = vunpack.c.0.s8 %v9625_v40  ;;  %v5859_v46 = vpop.f32.mrf.mxu0 }
 0x5ca   :  { %v3543_v54 = vmul.f32 %v8888_v37, %v2961_v49  ;;  %v3057_v41 = vcvt.s32.f32 %v2481_v42  ;;  %v3063_v58 = vcvt.s32.f32 %v2487_v33  ;;  %v2631_v15 = vunpack.c.1.s8 %v9625_v40 }
 0x5cb   :  { %6084 = vmatpush.bf16.msra.mxu2 %v4245_v61  ;;  %v4293_v2 = vpack.c.bf16 %v3897_v1, %v3891_v35  ;;  %v3549_v4 = vmul.f32 %v8888_v37, %v2967_v56  ;;  %v3201_v29 = vcvt.s32.f32 %v2625_v13  ;;  %v2721_v43 = vunpack.c.0.s8 %v2325_v11 }
 0x5cc   :  { %v3639_v27 = vmul.f32 %v8888_v37, %v3057_v41  ;;  %v3645_v63 = vmul.f32 %v8888_v37, %v3063_v58  ;;  %v3207_v20 = vcvt.s32.f32 %v2631_v15  ;;  %v2727_v9 = vunpack.c.1.s8 %v2325_v11 }
 0x5cd   :  { %6097 = vmatpush.bf16.msra.mxu3 %v4293_v2  ;;  %v4119_v40 = vpack.c.bf16 %v3549_v4, %v3543_v54  ;;  %v3783_v18 = vmul.f32 %v8888_v37, %v3201_v29  ;;  %v3297_v50 = vcvt.s32.f32 %v2721_v43  ;;  %v2853_v7 = vunpack.c.2.s8 %v9646_v23 }
 0x5ce   :  { %v4167_v17 = vpack.c.bf16 %v3645_v63, %v3639_v27  ;;  %v3789_v51 = vmul.f32 %v8888_v37, %v3207_v20  ;;  %v3303_v45 = vcvt.s32.f32 %v2727_v9  ;;  %v2859_v16 = vunpack.c.3.s8 %v9646_v23  ;;  %v9694_v9 = vpop.f32.mrf.mxu2 }
 0x5cf   :  { %6063 = vmatpush.bf16.msrb.mxu0 %v4119_v40  ;;  %v3879_v11 = vmul.f32 %v8888_v37, %v3297_v50  ;;  %v3429_v28 = vcvt.s32.f32 %v2853_v7  ;;  %v2949_v47 = vunpack.c.2.s8 %v9655_v60  ;;  %v2955_v55 = vunpack.c.3.s8 %v9655_v60  ;;  %v9700_v7 = vld [vmem:[#allocation5 + $0x380] sm:$0xff] }
 0x5d0   :  { %6076 = vmatpush.bf16.msrb.mxu1 %v4167_v17  ;;  %v4239_v34 = vpack.c.bf16 %v3789_v51, %v3783_v18  ;;  %v3885_v31 = vmul.f32 %v8888_v37, %v3303_v45  ;;  %v3435_v39 = vcvt.s32.f32 %v2859_v16  ;;  %v5780_v25 = vadd.f32 %v9601_v24, %v9559_v53  ;;  %v5872_v53 = vpop.f32.mrf.mxu1 }
 0x5d1   :  { %v4011_v38 = vmul.f32 %v8888_v37, %v3429_v28  ;;  %v3525_v36 = vcvt.s32.f32 %v2949_v47  ;;  %v3531_v30 = vcvt.s32.f32 %v2955_v55  ;;  %v2613_v19 = vunpack.c.2.s8 %v9661_v22 }
 0x5d2   :  { %6085 = vmatpush.bf16.msra.mxu2 %v4239_v34  ;;  %v4287_v0 = vpack.c.bf16 %v3885_v31, %v3879_v11  ;;  %v4017_v57 = vmul.f32 %v8888_v37, %v3435_v39  ;;  %v5793_v32 = vadd.f32 %v9603_v62, %v5780_v25  ;;  %6064 = vmatmul.bf16.vlgmr.msrb.gmra.mxu0 %v9042_v48  ;;  %v2619_v52 = vunpack.c.3.s8 %v9661_v22  ;;  %v2373_v34 = vld [vmem:[#allocation5 + $0x440] sm:$0xff] }
 0x5d3   :  { %v4107_v24 = vmul.f32 %v8888_v37, %v3525_v36  ;;  %v4113_v21 = vmul.f32 %v8888_v37, %v3531_v30  ;;  %6077 = vmatmul.bf16.vlgmr.msrb.gmra.mxu1 %v9044_v14  ;;  %v3189_v35 = vcvt.s32.f32 %v2613_v19  ;;  %v2709_v49 = vunpack.c.2.s8 %v9669_v8  ;;  %v9714_v36 = vld [vmem:[#allocation5 + $0x1a0] sm:$0xff] }
 0x5d4   :  { %6098 = vmatpush.bf16.msra.mxu3 %v4287_v0  ;;  %v4353_v42 = vpack.c.bf16 %v4017_v57, %v4011_v38  ;;  %v5806_v33 = vadd.f32 %v9570_v59, %v5793_v32  ;;  %v3195_v62 = vcvt.s32.f32 %v2619_v52  ;;  %v2715_v61 = vunpack.c.3.s8 %v9669_v8 }
 0x5d5   :  { %v4401_v1 = vpack.c.bf16 %v4113_v21, %v4107_v24  ;;  %v3771_v56 = vmul.f32 %v8888_v37, %v3189_v35  ;;  %v3285_v13 = vcvt.s32.f32 %v2709_v49  ;;  %v2841_v54 = vunpack.c.0.s8 %v9646_v23  ;;  %v9721_v35 = vld [vmem:[#allocation5 + $0x260] sm:$0xff] }
 0x5d6   :  { %6108 = vmatpush.bf16.msra.mxu0 %v4353_v42  ;;  %v9686_v41 = vadd.f32 %v9572_v12, %v5806_v33  ;;  %v3777_v58 = vmul.f32 %v8888_v37, %v3195_v62  ;;  %v3291_v15 = vcvt.s32.f32 %v2715_v61  ;;  %v2847_v2 = vunpack.c.1.s8 %v9646_v23  ;;  %v9696_v12 = vpop.f32.mrf.mxu3  ;;  %v5833_v61 = vpop.f32.mrf.mxu2 }
 0x5d7   :  { %6121 = vmatpush.bf16.msra.mxu1 %v4401_v1  ;;  %v3867_v59 = vmul.f32 %v8888_v37, %v3285_v13  ;;  %v3417_v4 = vcvt.s32.f32 %v2841_v54  ;;  %v2937_v29 = vunpack.c.0.s8 %v9655_v60  ;;  %v2943_v43 = vunpack.c.1.s8 %v9655_v60  ;;  %v6859_v60 = vld [vmem:[%s10189_s7 + $0x28] sm:$0x7f] }
 0x5d8   :  { %v4233_v27 = vpack.c.bf16 %v3777_v58, %v3771_v56  ;;  %v3873_v63 = vmul.f32 %v8888_v37, %v3291_v15  ;;  %v3423_v20 = vcvt.s32.f32 %v2847_v2  ;;  %v2601_v50 = vunpack.c.0.s8 %v9661_v22  ;;  %v9727_v15 = vpop.permute.xlu2 %6254 }
 0x5d9   :  { %v3999_v40 = vmul.f32 %v8888_v37, %v3417_v4  ;;  %v3513_v18 = vcvt.s32.f32 %v2937_v29  ;;  %v3519_v23 = vcvt.s32.f32 %v2943_v43  ;;  %v9705_v17 = vperm.slane %v6859_v60, 6 }
 0x5da   :  { %6086 = vmatpush.bf16.msra.mxu2 %v4233_v27  ;;  %v4281_v51 = vpack.c.bf16 %v3873_v63, %v3867_v59  ;;  %v4005_v45 = vmul.f32 %v8888_v37, %v3423_v20  ;;  %v2607_v16 = vunpack.c.1.s8 %v9661_v22  ;;  %v3177_v47 = vcvt.s32.f32 %v2601_v50 }
 0x5db   :  { %v4095_v11 = vmul.f32 %v8888_v37, %v3513_v18  ;;  %v4101_v28 = vmul.f32 %v8888_v37, %v3519_v23  ;;  %v2697_v55 = vunpack.c.0.s8 %v9669_v8  ;;  %v2703_v25 = vunpack.c.1.s8 %v9669_v8 }
 0x5dc   :  { %6099 = vmatpush.bf16.msra.mxu3 %v4281_v51  ;;  %v4347_v31 = vpack.c.bf16 %v4005_v45, %v3999_v40  ;;  %v3183_v39 = vcvt.s32.f32 %v2607_v16  ;;  %v2829_v38 = vunpack.c.2.s8 %v9700_v7  ;;  %v3759_v22 = vmul.f32 %v8888_v37, %v3177_v47 }
 0x5dd   :  { %v4395_v30 = vpack.c.bf16 %v4101_v28, %v4095_v11  ;;  %v3273_v19 = vcvt.s32.f32 %v2697_v55  ;;  %v2835_v0 = vunpack.c.3.s8 %v9700_v7  ;;  %v3279_v32 = vcvt.s32.f32 %v2703_v25  ;;  %v9737_v11 = vpop.permute.xlu1 %6238 }
 0x5de   :  { %6109 = vmatpush.bf16.msra.mxu0 %v4347_v31  ;;  %v3765_v57 = vmul.f32 %v8888_v37, %v3183_v39  ;;  %v3405_v52 = vcvt.s32.f32 %v2829_v38  ;;  %v2925_v46 = vunpack.c.2.s8 %v2373_v34  ;;  %v2931_v24 = vunpack.c.3.s8 %v2373_v34  ;;  %v5846_v58 = vpop.f32.mrf.mxu3 }
 0x5df   :  { %6122 = vmatpush.bf16.msra.mxu1 %v4395_v30  ;;  %v3855_v53 = vmul.f32 %v8888_v37, %v3273_v19  ;;  %v3411_v8 = vcvt.s32.f32 %v2835_v0  ;;  %v2589_v21 = vunpack.c.2.s8 %v9714_v36  ;;  %v3861_v42 = vmul.f32 %v8888_v37, %v3279_v32  ;;  %v9742_v30 = vld [vmem:[#allocation5 + $0x350] sm:$0xff] }
 0x5e0   :  { %v4227_v49 = vpack.c.bf16 %v3765_v57, %v3759_v22  ;;  %v3987_v33 = vmul.f32 %v8888_v37, %v3405_v52  ;;  %v3501_v62 = vcvt.s32.f32 %v2925_v46  ;;  %v3507_v56 = vcvt.s32.f32 %v2931_v24 }
 0x5e1   :  { %v3993_v1 = vmul.f32 %v8888_v37, %v3411_v8  ;;  %v2595_v13 = vunpack.c.3.s8 %v9714_v36  ;;  %v3165_v54 = vcvt.s32.f32 %v2589_v21  ;;  %v4275_v2 = vpack.c.bf16 %v3861_v42, %v3855_v53  ;;  %v9750_v53 = vld [vmem:[#allocation5 + $0x410] sm:$0xff]  ;;  %v9754_v42 = vld [vmem:[#allocation5 + $0xb8] sm:$0xff] }
 0x5e2   :  { %6087 = vmatpush.bf16.msra.mxu2 %v4227_v49  ;;  %v4083_v59 = vmul.f32 %v8888_v37, %v3501_v62  ;;  %v2685_v4 = vunpack.c.2.s8 %v9721_v35  ;;  %v2691_v29 = vunpack.c.3.s8 %v9721_v35  ;;  %v4089_v27 = vmul.f32 %v8888_v37, %v3507_v56 }
 0x5e3   :  { %v4341_v43 = vpack.c.bf16 %v3993_v1, %v3987_v33  ;;  %v3171_v63 = vcvt.s32.f32 %v2595_v13  ;;  %v3747_v20 = vmul.f32 %v8888_v37, %v3165_v54  ;;  %6100 = vmatpush.bf16.msra.mxu3 %v4275_v2  ;;  %v2817_v23 = vunpack.c.0.s8 %v9700_v7  ;;  %v9758_v1 = vpop.permute.xlu2 %6236 }
 0x5e4   :  { %v3261_v40 = vcvt.s32.f32 %v2685_v4  ;;  %v3267_v18 = vcvt.s32.f32 %v2691_v29  ;;  %v2823_v50 = vunpack.c.1.s8 %v9700_v7  ;;  %v4389_v60 = vpack.c.bf16 %v4089_v27, %v4083_v59  ;;  %v9765_v29 = vld [vmem:[#allocation5 + $0x178] sm:$0xff] }
 0x5e5   :  { %6110 = vmatpush.bf16.msra.mxu0 %v4341_v43  ;;  %v3753_v51 = vmul.f32 %v8888_v37, %v3171_v63  ;;  %v2913_v45 = vunpack.c.0.s8 %v2373_v34  ;;  %v2919_v16 = vunpack.c.1.s8 %v2373_v34  ;;  %v3393_v55 = vcvt.s32.f32 %v2817_v23 }
 0x5e6   :  { %v3843_v28 = vmul.f32 %v8888_v37, %v3261_v40  ;;  %v3849_v47 = vmul.f32 %v8888_v37, %v3267_v18  ;;  %v3399_v31 = vcvt.s32.f32 %v2823_v50  ;;  %6123 = vmatpush.bf16.msra.mxu1 %v4389_v60  ;;  %v2577_v7 = vunpack.c.0.s8 %v9714_v36  ;;  %v9771_v60 = vpop.permute.xlu1 %6270 }
 0x5e7   :  { %v4221_v39 = vpack.c.bf16 %v3753_v51, %v3747_v20  ;;  %v3489_v25 = vcvt.s32.f32 %v2913_v45  ;;  %v3495_v38 = vcvt.s32.f32 %v2919_v16  ;;  %v3975_v19 = vmul.f32 %v8888_v37, %v3393_v55 }
 0x5e8   :  { %v4269_v22 = vpack.c.bf16 %v3849_v47, %v3843_v28  ;;  %v3981_v34 = vmul.f32 %v8888_v37, %v3399_v31  ;;  %v2583_v0 = vunpack.c.1.s8 %v9714_v36  ;;  %v3153_v52 = vcvt.s32.f32 %v2577_v7 }
 0x5e9   :  { %6088 = vmatpush.bf16.msra.mxu2 %v4221_v39  ;;  %v4071_v57 = vmul.f32 %v8888_v37, %v3489_v25  ;;  %v4077_v32 = vmul.f32 %v8888_v37, %v3495_v38  ;;  %v2673_v46 = vunpack.c.0.s8 %v9721_v35  ;;  %v2679_v21 = vunpack.c.1.s8 %v9721_v35  ;;  %v9778_v25 = vpop.permute.xlu0 %6252 }
 0x5ea   :  { %6101 = vmatpush.bf16.msra.mxu3 %v4269_v22  ;;  %v4335_v8 = vpack.c.bf16 %v3981_v34, %v3975_v19  ;;  %v3159_v24 = vcvt.s32.f32 %v2583_v0  ;;  %v2805_v49 = vunpack.c.2.s8 %v9742_v30  ;;  %v3735_v33 = vmul.f32 %v8888_v37, %v3153_v52  ;;  %v6860_v22 = vld [vmem:[%s10189_s7 + $0x8] sm:$0x7f] }
 0x5eb   :  { %v4383_v36 = vpack.c.bf16 %v4077_v32, %v4071_v57  ;;  %v3249_v62 = vcvt.s32.f32 %v2673_v46  ;;  %v2811_v61 = vunpack.c.3.s8 %v9742_v30  ;;  %v3255_v13 = vcvt.s32.f32 %v2679_v21 }
 0x5ec   :  { %6111 = vmatpush.bf16.msra.mxu0 %v4335_v8  ;;  %v3741_v56 = vmul.f32 %v8888_v37, %v3159_v24  ;;  %v3381_v54 = vcvt.s32.f32 %v2805_v49  ;;  %v2901_v58 = vunpack.c.2.s8 %v9750_v53  ;;  %v2907_v59 = vunpack.c.3.s8 %v9750_v53 }
 0x5ed   :  { %6124 = vmatpush.bf16.msra.mxu1 %v4383_v36  ;;  %v3831_v35 = vmul.f32 %v8888_v37, %v3249_v62  ;;  %v3387_v2 = vcvt.s32.f32 %v2811_v61  ;;  %v2470_v4 = vunpack.c.2.s8 %v9754_v42  ;;  %v3837_v27 = vmul.f32 %v8888_v37, %v3255_v13  ;;  %v9793_v61 = vpop.permute.xlu2 %6234 }
 0x5ee   :  { %v4215_v43 = vpack.c.bf16 %v3741_v56, %v3735_v33  ;;  %v3963_v63 = vmul.f32 %v8888_v37, %v3381_v54  ;;  %v3477_v20 = vcvt.s32.f32 %v2901_v58  ;;  %v3483_v18 = vcvt.s32.f32 %v2907_v59  ;;  %v9798_v58 = vld [vmem:[#allocation5 + $0x320] sm:$0xff] }
 0x5ef   :  { %v3969_v40 = vmul.f32 %v8888_v37, %v3387_v2  ;;  %v2476_v23 = vunpack.c.3.s8 %v9754_v42  ;;  %v3046_v50 = vcvt.s32.f32 %v2470_v4  ;;  %v4263_v51 = vpack.c.bf16 %v3837_v27, %v3831_v35  ;;  %v9808_v27 = vld [vmem:[#allocation5 + $0x3e0] sm:$0xff] }
 0x5f0   :  { %6089 = vmatpush.bf16.msra.mxu2 %v4215_v43  ;;  %v4059_v45 = vmul.f32 %v8888_v37, %v3477_v20  ;;  %v2566_v16 = vunpack.c.2.s8 %v9765_v29  ;;  %v2572_v28 = vunpack.c.3.s8 %v9765_v29  ;;  %v4065_v55 = vmul.f32 %v8888_v37, %v3483_v18 }
 0x5f1   :  { %v4329_v47 = vpack.c.bf16 %v3969_v40, %v3963_v63  ;;  %v3052_v31 = vcvt.s32.f32 %v2476_v23  ;;  %v3628_v39 = vmul.f32 %v9705_v17, %v3046_v50  ;;  %6102 = vmatpush.bf16.msra.mxu3 %v4263_v51  ;;  %v5739_v19 = vperm.slane %v6860_v22, 3  ;;  %v9812_v23 = vpop.f32.mrf.mxu2  ;;  %v9816_v50 = vpop.permute.xlu1 %6250 }
 0x5f2   :  { %v3142_v38 = vcvt.s32.f32 %v2566_v16  ;;  %v3148_v7 = vcvt.s32.f32 %v2572_v28  ;;  %v2793_v34 = vunpack.c.0.s8 %v9742_v30  ;;  %v4377_v0 = vpack.c.bf16 %v4065_v55, %v4059_v45  ;;  %v9820_v16 = vld [vmem:[#allocation5 + $0x88] sm:$0xff] }
 0x5f3   :  { %6112 = vmatpush.bf16.msra.mxu0 %v4329_v47  ;;  %v3634_v57 = vmul.f32 %v9705_v17, %v3052_v31  ;;  %6090 = vmatmul.bf16.vlgmr.msra.gmra.mxu2 %v9139_v6  ;;  %v2799_v32 = vunpack.c.1.s8 %v9742_v30  ;;  %v2889_v52 = vunpack.c.0.s8 %v9750_v53  ;;  %v5832_v24 = vadd.f32 %v9694_v9, %v5739_v19 }
 0x5f4   :  { %v3724_v46 = vmul.f32 %v9705_v17, %v3142_v38  ;;  %v3730_v8 = vmul.f32 %v9705_v17, %v3148_v7  ;;  %v3369_v21 = vcvt.s32.f32 %v2793_v34  ;;  %6125 = vmatpush.bf16.msra.mxu1 %v4377_v0  ;;  %6103 = vmatmul.bf16.vlgmr.msra.gmra.mxu3 %v9144_v26  ;;  %v2895_v33 = vunpack.c.1.s8 %v9750_v53  ;;  %v9829_v34 = vld [vmem:[#allocation5 + $0x148] sm:$0xff] }
 0x5f5   :  { %v4162_v49 = vpack.c.bf16 %v3634_v57, %v3628_v39  ;;  %v3375_v36 = vcvt.s32.f32 %v2799_v32  ;;  %v3465_v62 = vcvt.s32.f32 %v2889_v52  ;;  %v5845_v56 = vadd.f32 %v9696_v12, %v5832_v24  ;;  %v9824_v39 = vpop.permute.xlu0 %6286 }
 0x5f6   :  { %v4210_v30 = vpack.c.bf16 %v3730_v8, %v3724_v46  ;;  %v3951_v13 = vmul.f32 %v8888_v37, %v3369_v21  ;;  %v2458_v54 = vunpack.c.0.s8 %v9754_v42  ;;  %v3471_v35 = vcvt.s32.f32 %v2895_v33 }
 0x5f7   :  { %6134 = vmatpush.bf16.msrb.mxu2 %v4162_v49  ;;  %v3957_v9 = vmul.f32 %v8888_v37, %v3375_v36  ;;  %v4047_v2 = vmul.f32 %v8888_v37, %v3465_v62  ;;  %v2464_v53 = vunpack.c.1.s8 %v9754_v42  ;;  %v9804_v59 = vadd.f32 %v9648_v44, %v5845_v56  ;;  %v9814_v42 = vpop.f32.mrf.mxu3 }
 0x5f8   :  { %6147 = vmatpush.bf16.msrb.mxu3 %v4210_v30  ;;  %v3034_v4 = vcvt.s32.f32 %v2458_v54  ;;  %v2554_v12 = vunpack.c.0.s8 %v9765_v29  ;;  %v2560_v43 = vunpack.c.1.s8 %v9765_v29  ;;  %v4053_v20 = vmul.f32 %v8888_v37, %v3471_v35  ;;  %v9838_v30 = vpop.permute.xlu2 %6268 }
 0x5f9   :  { %v4323_v63 = vpack.c.bf16 %v3957_v9, %v3951_v13  ;;  %v3040_v40 = vcvt.s32.f32 %v2464_v53  ;;  %v2781_v18 = vunpack.c.2.s8 %v9798_v58  ;;  %v2787_v29 = vunpack.c.3.s8 %v9798_v58 }
 0x5fa   :  { %v3616_v44 = vmul.f32 %v9705_v17, %v3034_v4  ;;  %v3130_v51 = vcvt.s32.f32 %v2554_v12  ;;  %v3136_v45 = vcvt.s32.f32 %v2560_v43  ;;  %v4371_v28 = vpack.c.bf16 %v4053_v20, %v4047_v2  ;;  %v9844_v12 = vpop.f32.mrf.mxu0 }
 0x5fb   :  { %6113 = vmatpush.bf16.msra.mxu0 %v4323_v63  ;;  %v3622_v47 = vmul.f32 %v9705_v17, %v3040_v40  ;;  %v3357_v55 = vcvt.s32.f32 %v2781_v18  ;;  %v2877_v31 = vunpack.c.2.s8 %v9808_v27  ;;  %v3363_v22 = vcvt.s32.f32 %v2787_v29  ;;  %v9848_v18 = vpop.f32.mrf.mxu1 }
 0x5fc   :  { %v3712_v38 = vmul.f32 %v9705_v17, %v3130_v51  ;;  %v3718_v7 = vmul.f32 %v9705_v17, %v3136_v45  ;;  %v2883_v19 = vunpack.c.3.s8 %v9808_v27  ;;  %6126 = vmatpush.bf16.msra.mxu1 %v4371_v28  ;;  %v2446_v52 = vunpack.c.2.s8 %v9820_v16 }
 0x5fd   :  { %v4156_v0 = vpack.c.bf16 %v3622_v47, %v3616_v44  ;;  %v3939_v57 = vmul.f32 %v8888_v37, %v3357_v55  ;;  %v3453_v32 = vcvt.s32.f32 %v2877_v31  ;;  %v3945_v8 = vmul.f32 %v8888_v37, %v3363_v22  ;;  %v5885_v44 = vpop.f32.mrf.mxu2  ;;  %v9853_v47 = vpop.permute.xlu1 %6284  ;;  %v9857_v22 = vld [vmem:[#allocation5 + $0x238] sm:$0xff] }
 0x5fe   :  { %v4204_v46 = vpack.c.bf16 %v3718_v7, %v3712_v38  ;;  %v3459_v24 = vcvt.s32.f32 %v2883_v19  ;;  %v2452_v21 = vunpack.c.3.s8 %v9820_v16  ;;  %v3022_v36 = vcvt.s32.f32 %v2446_v52  ;;  %v9861_v52 = vpop.permute.xlu0 %6232  ;;  %v9881_v44 = vld [vmem:[#allocation5 + $0x118] sm:$0xff] }
 0x5ff   :  { %6135 = vmatpush.bf16.msrb.mxu2 %v4156_v0  ;;  %v4035_v49 = vmul.f32 %v8888_v37, %v3453_v32  ;;  %v2542_v33 = vunpack.c.2.s8 %v9829_v34  ;;  %v2548_v62 = vunpack.c.3.s8 %v9829_v34  ;;  %v4317_v56 = vpack.c.bf16 %v3945_v8, %v3939_v57 }
 0x600   :  { %6148 = vmatpush.bf16.msrb.mxu3 %v4204_v46  ;;  %v4041_v13 = vmul.f32 %v8888_v37, %v3459_v24  ;;  %v3028_v54 = vcvt.s32.f32 %v2452_v21  ;;  %v2769_v9 = vunpack.c.0.s8 %v9798_v58  ;;  %v3604_v35 = vmul.f32 %v9705_v17, %v3022_v36  ;;  %v9866_v21 = vld [vmem:[#allocation5 + $0x2f8] sm:$0xff] }
 0x601   :  { %v3118_v2 = vcvt.s32.f32 %v2542_v33  ;;  %v3124_v53 = vcvt.s32.f32 %v2548_v62  ;;  %v2775_v4 = vunpack.c.1.s8 %v9798_v58  ;;  %6114 = vmatpush.bf16.msra.mxu0 %v4317_v56  ;;  %v2865_v40 = vunpack.c.0.s8 %v9808_v27  ;;  %v5898_v58 = vpop.f32.mrf.mxu3 }
 0x602   :  { %v4365_v43 = vpack.c.bf16 %v4041_v13, %v4035_v49  ;;  %v3610_v63 = vmul.f32 %v9705_v17, %v3028_v54  ;;  %v3345_v20 = vcvt.s32.f32 %v2769_v9  ;;  %v2871_v28 = vunpack.c.1.s8 %v9808_v27  ;;  %v9872_v9 = vld [vmem:[#allocation5 + $0x58] sm:$0xff] }
 0x603   :  { %v3700_v51 = vmul.f32 %v9705_v17, %v3118_v2  ;;  %v3706_v45 = vmul.f32 %v9705_v17, %v3124_v53  ;;  %v3351_v29 = vcvt.s32.f32 %v2775_v4  ;;  %v3441_v38 = vcvt.s32.f32 %v2865_v40  ;;  %v5911_v4 = vpop.f32.mrf.mxu0 }
 0x604   :  { %6127 = vmatpush.bf16.msra.mxu1 %v4365_v43  ;;  %v4150_v55 = vpack.c.bf16 %v3610_v63, %v3604_v35  ;;  %v3927_v31 = vmul.f32 %v8888_v37, %v3345_v20  ;;  %v2434_v7 = vunpack.c.0.s8 %v9820_v16  ;;  %v3447_v57 = vcvt.s32.f32 %v2871_v28 }
 0x605   :  { %v4198_v19 = vpack.c.bf16 %v3706_v45, %v3700_v51  ;;  %v3933_v0 = vmul.f32 %v8888_v37, %v3351_v29  ;;  %v2440_v32 = vunpack.c.1.s8 %v9820_v16  ;;  %v4023_v27 = vmul.f32 %v8888_v37, %v3441_v38  ;;  %v5924_v51 = vpop.f32.mrf.mxu1 }
 0x606   :  { %6136 = vmatpush.bf16.msrb.mxu2 %v4150_v55  ;;  %v3010_v46 = vcvt.s32.f32 %v2434_v7  ;;  %v2530_v8 = vunpack.c.0.s8 %v9829_v34  ;;  %v2536_v24 = vunpack.c.1.s8 %v9829_v34  ;;  %v4029_v36 = vmul.f32 %v8888_v37, %v3447_v57  ;;  %v9876_v37 = vpop.permute.xlu2 %6248 }
 0x607   :  { %6149 = vmatpush.bf16.msrb.mxu3 %v4198_v19  ;;  %v4311_v49 = vpack.c.bf16 %v3933_v0, %v3927_v31  ;;  %v3016_v33 = vcvt.s32.f32 %v2440_v32  ;;  %v2662_v62 = vunpack.c.2.s8 %v9857_v22  ;;  %v2668_v54 = vunpack.c.3.s8 %v9857_v22 }
 0x608   :  { %v3592_v16 = vmul.f32 %v9705_v17, %v3010_v46  ;;  %v3106_v56 = vcvt.s32.f32 %v2530_v8  ;;  %v3112_v13 = vcvt.s32.f32 %v2536_v24  ;;  %v4359_v35 = vpack.c.bf16 %v4029_v36, %v4023_v27  ;;  %v9891_v27 = vpop.permute.xlu1 %6230 }
 0x609   :  { %6115 = vmatpush.bf16.msra.mxu0 %v4311_v49  ;;  %v3598_v34 = vmul.f32 %v9705_v17, %v3016_v33  ;;  %v3238_v2 = vcvt.s32.f32 %v2662_v62  ;;  %v2758_v53 = vunpack.c.2.s8 %v9866_v21  ;;  %v3244_v20 = vcvt.s32.f32 %v2668_v54 }
 0x60a   :  { %v3688_v43 = vmul.f32 %v9705_v17, %v3106_v56  ;;  %v3694_v63 = vmul.f32 %v9705_v17, %v3112_v13  ;;  %v2764_v40 = vunpack.c.3.s8 %v9866_v21  ;;  %6128 = vmatpush.bf16.msra.mxu1 %v4359_v35  ;;  %v2422_v58 = vunpack.c.2.s8 %v9872_v9  ;;  %v9898_v13 = vpop.permute.xlu0 %6266 }
 0x60b   :  { %v4144_v45 = vpack.c.bf16 %v3598_v34, %v3592_v16  ;;  %v3820_v29 = vmul.f32 %v9705_v17, %v3238_v2  ;;  %v3334_v28 = vcvt.s32.f32 %v2758_v53  ;;  %v3826_v31 = vmul.f32 %v9705_v17, %v3244_v20 }
 0x60c   :  { %v4192_v55 = vpack.c.bf16 %v3694_v63, %v3688_v43  ;;  %v3340_v38 = vcvt.s32.f32 %v2764_v40  ;;  %6116 = vmatmul.bf16.vlgmr.msra.gmra.mxu0 %v9067_v3  ;;  %v2428_v7 = vunpack.c.3.s8 %v9872_v9  ;;  %v2998_v0 = vcvt.s32.f32 %v2422_v58  ;;  %v9910_v58 = vld [vmem:[#allocation5 + $0x208] sm:$0xff] }
 0x60d   :  { %6137 = vmatpush.bf16.msrb.mxu2 %v4144_v45  ;;  %v3916_v19 = vmul.f32 %v9705_v17, %v3334_v28  ;;  %v2518_v57 = vunpack.c.2.s8 %v9881_v44  ;;  %v2524_v32 = vunpack.c.3.s8 %v9881_v44  ;;  %v4258_v46 = vpack.c.bf16 %v3826_v31, %v3820_v29  ;;  %6129 = vmatmul.bf16.vlgmr.msra.gmra.mxu1 %v9069_v5 }
 0x60e   :  { %6150 = vmatpush.bf16.msrb.mxu3 %v4192_v55  ;;  %v3922_v8 = vmul.f32 %v9705_v17, %v3340_v38  ;;  %v3004_v24 = vcvt.s32.f32 %v2428_v7  ;;  %v2650_v49 = vunpack.c.0.s8 %v9857_v22  ;;  %v3580_v36 = vmul.f32 %v9705_v17, %v2998_v0  ;;  %v9912_v55 = vpop.permute.xlu2 %6282 }
 0x60f   :  { %v3094_v33 = vcvt.s32.f32 %v2518_v57  ;;  %v3100_v62 = vcvt.s32.f32 %v2524_v32  ;;  %v2656_v16 = vunpack.c.1.s8 %v9857_v22  ;;  %6160 = vmatpush.bf16.msrb.mxu0 %v4258_v46  ;;  %v2746_v34 = vunpack.c.0.s8 %v9866_v21 }
 0x610   :  { %v4306_v56 = vpack.c.bf16 %v3922_v8, %v3916_v19  ;;  %v3586_v54 = vmul.f32 %v9705_v17, %v3004_v24  ;;  %v3226_v35 = vcvt.s32.f32 %v2650_v49  ;;  %v2752_v43 = vunpack.c.1.s8 %v9866_v21  ;;  %v9924_v24 = vld [vmem:[#allocation5 + $0x2c8] sm:$0xff] }
 0x611   :  { %v3676_v2 = vmul.f32 %v9705_v17, %v3094_v33  ;;  %v3682_v53 = vmul.f32 %v9705_v17, %v3100_v62  ;;  %v3232_v4 = vcvt.s32.f32 %v2656_v16  ;;  %v3322_v20 = vcvt.s32.f32 %v2746_v34  ;;  %v9928_v33 = vpop.permute.xlu1 %6246  ;;  %v2242_v34 = vld [vmem:[#allocation5 + $0x28] sm:$0xff] }
 0x612   :  { %6173 = vmatpush.bf16.msrb.mxu1 %v4306_v56  ;;  %v4138_v63 = vpack.c.bf16 %v3586_v54, %v3580_v36  ;;  %v3808_v22 = vmul.f32 %v9705_v17, %v3226_v35  ;;  %v5871_v40 = vadd.f32 %v9650_v10, %v9804_v59  ;;  %v3328_v29 = vcvt.s32.f32 %v2752_v43  ;;  %v9938_v43 = vpop.permute.xlu0 %6302 }
 0x613   :  { %v4186_v51 = vpack.c.bf16 %v3682_v53, %v3676_v2  ;;  %v3814_v45 = vmul.f32 %v9705_v17, %v3232_v4  ;;  %v2410_v28 = vunpack.c.0.s8 %v9872_v9  ;;  %v3904_v21 = vmul.f32 %v9705_v17, %v3322_v20  ;;  %v9935_v2 = vld [vmem:[#allocation5 + $0xe8] sm:$0xff] }
 0x614   :  { %6138 = vmatpush.bf16.msrb.mxu2 %v4138_v63  ;;  %v5884_v31 = vadd.f32 %v9812_v23, %v5871_v40  ;;  %v2416_v38 = vunpack.c.1.s8 %v9872_v9  ;;  %v2506_v7 = vunpack.c.0.s8 %v9881_v44  ;;  %v3910_v59 = vmul.f32 %v9705_v17, %v3328_v29  ;;  %v6861_v63 = vld [vmem:[%s10189_s7 + $0x10] sm:$0x7f] }
 0x615   :  { %6151 = vmatpush.bf16.msrb.mxu3 %v4186_v51  ;;  %v4252_v10 = vpack.c.bf16 %v3814_v45, %v3808_v22  ;;  %v2986_v19 = vcvt.s32.f32 %v2410_v28  ;;  %v2512_v0 = vunpack.c.1.s8 %v9881_v44  ;;  %v2638_v8 = vunpack.c.2.s8 %v9910_v58 }
 0x616   :  { %v9921_v57 = vadd.f32 %v9814_v42, %v5884_v31  ;;  %v2992_v32 = vcvt.s32.f32 %v2416_v38  ;;  %v3082_v46 = vcvt.s32.f32 %v2506_v7  ;;  %v4300_v23 = vpack.c.bf16 %v3910_v59, %v3904_v21 }
 0x617   :  { %6161 = vmatpush.bf16.msrb.mxu0 %v4252_v10  ;;  %v3568_v9 = vmul.f32 %v9705_v17, %v2986_v19  ;;  %v3088_v49 = vcvt.s32.f32 %v2512_v0  ;;  %v2644_v36 = vunpack.c.3.s8 %v9910_v58  ;;  %v3214_v62 = vcvt.s32.f32 %v2638_v8  ;;  %v9949_v19 = vpop.permute.xlu2 %6264 }
 0x618   :  { %v3574_v44 = vmul.f32 %v9705_v17, %v2992_v32  ;;  %v3664_v42 = vmul.f32 %v9705_v17, %v3082_v46  ;;  %6174 = vmatpush.bf16.msrb.mxu1 %v4300_v23  ;;  %v2734_v54 = vunpack.c.2.s8 %v9924_v24  ;;  %v2740_v35 = vunpack.c.3.s8 %v9924_v24 }
 0x619   :  { %v3670_v16 = vmul.f32 %v9705_v17, %v3088_v49  ;;  %v3220_v56 = vcvt.s32.f32 %v2644_v36  ;;  %v3796_v4 = vmul.f32 %v9705_v17, %v3214_v62  ;;  %v5740_v22 = vperm.slane %v6861_v63, 3 }
 0x61a   :  { %v4132_v53 = vpack.c.bf16 %v3574_v44, %v3568_v9  ;;  %v3310_v51 = vcvt.s32.f32 %v2734_v54  ;;  %v3316_v45 = vcvt.s32.f32 %v2740_v35  ;;  %v2398_v28 = vunpack.c.2.s8 %v2242_v34  ;;  %v9962_v35 = vpop.permute.xlu1 %6228 }
 0x61b   :  { %v4180_v20 = vpack.c.bf16 %v3670_v16, %v3664_v42  ;;  %v3802_v40 = vmul.f32 %v9705_v17, %v3220_v56  ;;  %v5910_v29 = vadd.f32 %v9844_v12, %v5740_v22  ;;  %v2404_v21 = vunpack.c.3.s8 %v2242_v34  ;;  %v9964_v22 = vld [vmem:[#allocation5 + $0x1d8] sm:$0xff] }
 0x61c   :  { %6139 = vmatpush.bf16.msrb.mxu2 %v4132_v53  ;;  %v2494_v31 = vunpack.c.2.s8 %v9935_v2  ;;  %v3892_v7 = vmul.f32 %v9705_v17, %v3310_v51  ;;  %v3898_v10 = vmul.f32 %v9705_v17, %v3316_v45  ;;  %v2500_v59 = vunpack.c.3.s8 %v9935_v2 }
 0x61d   :  { %6152 = vmatpush.bf16.msrb.mxu3 %v4180_v20  ;;  %v4246_v38 = vpack.c.bf16 %v3802_v40, %v3796_v4  ;;  %v9952_v0 = vadd.f32 %v9848_v18, %v5910_v29  ;;  %v2974_v32 = vcvt.s32.f32 %v2398_v28  ;;  %v2980_v46 = vcvt.s32.f32 %v2404_v21 }
 0x61e   :  { %v3070_v12 = vcvt.s32.f32 %v2494_v31  ;;  %v4294_v8 = vpack.c.bf16 %v3898_v10, %v3892_v7  ;;  %v3076_v23 = vcvt.s32.f32 %v2500_v59  ;;  %v2626_v9 = vunpack.c.0.s8 %v9910_v58  ;;  %v9970_v31 = vld [vmem:[#allocation5 + $0x298] sm:$0xff] }
 0x61f   :  { %6162 = vmatpush.bf16.msrb.mxu0 %v4246_v38  ;;  %v2632_v49 = vunpack.c.1.s8 %v9910_v58  ;;  %v3556_v36 = vmul.f32 %v9705_v17, %v2974_v32  ;;  %v3562_v44 = vmul.f32 %v9705_v17, %v2980_v46  ;;  %v2722_v62 = vunpack.c.0.s8 %v9924_v24  ;;  %v9972_v38 = vpop.permute.xlu0 %6318 }
 0x620   :  { %v3652_v42 = vmul.f32 %v9705_v17, %v3070_v12  ;;  %6175 = vmatpush.bf16.msrb.mxu1 %v4294_v8  ;;  %v3658_v18 = vmul.f32 %v9705_v17, %v3076_v23  ;;  %v3202_v16 = vcvt.s32.f32 %v2626_v9  ;;  %v2728_v54 = vunpack.c.1.s8 %v9924_v24  ;;  %v9980_v23 = vld [vmem:[#allocation5 + $0x3b8] sm:$0xff] }
 0x621   :  { %v3208_v56 = vcvt.s32.f32 %v2632_v49  ;;  %v4126_v53 = vpack.c.bf16 %v3562_v44, %v3556_v36  ;;  %v3298_v4 = vcvt.s32.f32 %v2722_v62  ;;  %v2386_v58 = vunpack.c.0.s8 %v2242_v34 }
 0x622   :  { %v2392_v63 = vunpack.c.1.s8 %v2242_v34  ;;  %v4174_v20 = vpack.c.bf16 %v3658_v18, %v3652_v42  ;;  %v3784_v40 = vmul.f32 %v9705_v17, %v3202_v16  ;;  %v3304_v45 = vcvt.s32.f32 %v2728_v54  ;;  %v9983_v42 = vld [vmem:[#allocation5 + $0x478] sm:$0xff] }
 0x623   :  { %v3790_v51 = vmul.f32 %v9705_v17, %v3208_v56  ;;  %6140 = vmatpush.bf16.msrb.mxu2 %v4126_v53  ;;  %v3880_v29 = vmul.f32 %v9705_v17, %v3298_v4  ;;  %v2962_v28 = vcvt.s32.f32 %v2386_v58  ;;  %v2482_v24 = vunpack.c.0.s8 %v9935_v2 }
 0x624   :  { %v2968_v21 = vcvt.s32.f32 %v2392_v63  ;;  %6153 = vmatpush.bf16.msrb.mxu3 %v4174_v20  ;;  %v3886_v7 = vmul.f32 %v9705_v17, %v3304_v45  ;;  %v2488_v10 = vunpack.c.1.s8 %v9935_v2  ;;  %v2614_v59 = vunpack.c.2.s8 %v9964_v22  ;;  %v9985_v2 = vpop.permute.xlu2 %6280 }
 0x625   :  { %v4240_v34 = vpack.c.bf16 %v3790_v51, %v3784_v40  ;;  %v3544_v32 = vmul.f32 %v9705_v17, %v2962_v28  ;;  %v3058_v12 = vcvt.s32.f32 %v2482_v24  ;;  %v2620_v8 = vunpack.c.3.s8 %v9964_v22  ;;  %v9997_v24 = vpop.permute.xlu1 %6244 }
 0x626   :  { %v3550_v46 = vmul.f32 %v9705_v17, %v2968_v21  ;;  %v4288_v9 = vpack.c.bf16 %v3886_v7, %v3880_v29  ;;  %v3064_v49 = vcvt.s32.f32 %v2488_v10  ;;  %v3190_v36 = vcvt.s32.f32 %v2614_v59 }
 0x627   :  { %6163 = vmatpush.bf16.msrb.mxu0 %v4240_v34  ;;  %v2710_v44 = vunpack.c.2.s8 %v9970_v31  ;;  %v3640_v18 = vmul.f32 %v9705_v17, %v3058_v12  ;;  %v3196_v16 = vcvt.s32.f32 %v2620_v8  ;;  %v2716_v56 = vunpack.c.3.s8 %v9970_v31 }
 0x628   :  { %v4120_v62 = vpack.c.bf16 %v3550_v46, %v3544_v32  ;;  %6176 = vmatpush.bf16.msrb.mxu1 %v4288_v9  ;;  %v3646_v54 = vmul.f32 %v9705_v17, %v3064_v49  ;;  %v3772_v53 = vmul.f32 %v9705_v17, %v3190_v36  ;;  %v2854_v58 = vunpack.c.2.s8 %v9980_v23  ;;  %v10004_v9 = vpop.f32.mrf.mxu2 }
 0x629   :  { %v3286_v4 = vcvt.s32.f32 %v2710_v44  ;;  %v3778_v63 = vmul.f32 %v9705_v17, %v3196_v16  ;;  %v3292_v20 = vcvt.s32.f32 %v2716_v56  ;;  %v2860_v40 = vunpack.c.3.s8 %v9980_v23  ;;  %v10011_v16 = vpop.f32.mrf.mxu3 }
 0x62a   :  { %6141 = vmatpush.bf16.msrb.mxu2 %v4120_v62  ;;  %v2950_v51 = vunpack.c.2.s8 %v9983_v42  ;;  %v4168_v45 = vpack.c.bf16 %v3646_v54, %v3640_v18  ;;  %v3430_v28 = vcvt.s32.f32 %v2854_v58  ;;  %v2956_v21 = vunpack.c.3.s8 %v9983_v42  ;;  %v10009_v18 = vpop.permute.xlu0 %6300 }
 0x62b   :  { %v3868_v29 = vmul.f32 %v9705_v17, %v3286_v4  ;;  %v4234_v34 = vpack.c.bf16 %v3778_v63, %v3772_v53  ;;  %v3874_v7 = vmul.f32 %v9705_v17, %v3292_v20  ;;  %v3436_v10 = vcvt.s32.f32 %v2860_v40  ;;  %v10018_v20 = vld [vmem:[#allocation5 + $0x1a8] sm:$0xff] }
 0x62c   :  { %v3526_v59 = vcvt.s32.f32 %v2950_v51  ;;  %6154 = vmatpush.bf16.msrb.mxu3 %v4168_v45  ;;  %v4012_v32 = vmul.f32 %v9705_v17, %v3430_v28  ;;  %v3532_v46 = vcvt.s32.f32 %v2956_v21  ;;  %v2602_v12 = vunpack.c.0.s8 %v9964_v22  ;;  %v10022_v28 = vpop.f32.mrf.mxu0  ;;  %v10026_v21 = vpop.permute.xlu2 %6262 }
 0x62d   :  { %6142 = vmatmul.bf16.vlgmr.msrb.gmra.mxu2 %v9042_v48  ;;  %v2608_v8 = vunpack.c.1.s8 %v9964_v22  ;;  %6164 = vmatpush.bf16.msrb.mxu0 %v4234_v34  ;;  %v4282_v49 = vpack.c.bf16 %v3874_v7, %v3868_v29  ;;  %v4018_v36 = vmul.f32 %v9705_v17, %v3436_v10  ;;  %v2698_v62 = vunpack.c.0.s8 %v9970_v31  ;;  %v10030_v10 = vld [vmem:[#allocation5 + $0x268] sm:$0xff] }
 0x62e   :  { %v4108_v44 = vmul.f32 %v9705_v17, %v3526_v59  ;;  %v4114_v48 = vmul.f32 %v9705_v17, %v3532_v46  ;;  %v3178_v56 = vcvt.s32.f32 %v2602_v12  ;;  %v2704_v22 = vunpack.c.1.s8 %v9970_v31  ;;  %v10024_v31 = vpop.f32.mrf.mxu1 }
 0x62f   :  { %v3184_v54 = vcvt.s32.f32 %v2608_v8  ;;  %6177 = vmatpush.bf16.msrb.mxu1 %v4282_v49  ;;  %v4354_v53 = vpack.c.bf16 %v4018_v36, %v4012_v32  ;;  %6155 = vmatmul.bf16.vlgmr.msrb.gmra.mxu3 %v9044_v14  ;;  %v3274_v4 = vcvt.s32.f32 %v2698_v62  ;;  %v2842_v58 = vunpack.c.0.s8 %v9980_v23  ;;  %v10038_v62 = vld [vmem:[#allocation5 + $0x388] sm:$0xff] }
 0x630   :  { %v2848_v63 = vunpack.c.1.s8 %v9980_v23  ;;  %v4402_v40 = vpack.c.bf16 %v4114_v48, %v4108_v44  ;;  %v3760_v51 = vmul.f32 %v9705_v17, %v3178_v56  ;;  %v3280_v29 = vcvt.s32.f32 %v2704_v22 }
 0x631   :  { %v3766_v45 = vmul.f32 %v9705_v17, %v3184_v54  ;;  %6186 = vmatpush.bf16.msra.mxu2 %v4354_v53  ;;  %v3856_v14 = vmul.f32 %v9705_v17, %v3274_v4  ;;  %v3418_v34 = vcvt.s32.f32 %v2842_v58  ;;  %v2938_v23 = vunpack.c.0.s8 %v9983_v42  ;;  %v10041_v53 = vld [vmem:[#allocation5 + $0x448] sm:$0xff]  ;;  %v10043_v4 = vpop.permute.xlu1 %6226 }
 0x632   :  { %v3424_v7 = vcvt.s32.f32 %v2848_v63  ;;  %6199 = vmatpush.bf16.msra.mxu3 %v4402_v40  ;;  %v3862_v32 = vmul.f32 %v9705_v17, %v3280_v29  ;;  %v2944_v46 = vunpack.c.1.s8 %v9983_v42  ;;  %v2590_v12 = vunpack.c.2.s8 %v10018_v20  ;;  %v5937_v42 = vpop.f32.mrf.mxu2 }
 0x633   :  { %v4228_v59 = vpack.c.bf16 %v3766_v45, %v3760_v51  ;;  %v4000_v8 = vmul.f32 %v9705_v17, %v3418_v34  ;;  %v3514_v36 = vcvt.s32.f32 %v2938_v23  ;;  %v2596_v44 = vunpack.c.3.s8 %v10018_v20  ;;  %v5950_v45 = vpop.f32.mrf.mxu3 }
 0x634   :  { %v4006_v49 = vmul.f32 %v9705_v17, %v3424_v7  ;;  %v4276_v48 = vpack.c.bf16 %v3862_v32, %v3856_v14  ;;  %v3520_v56 = vcvt.s32.f32 %v2944_v46  ;;  %v3166_v54 = vcvt.s32.f32 %v2590_v12  ;;  %v10053_v12 = vpop.permute.xlu0 %6316 }
 0x635   :  { %6165 = vmatpush.bf16.msrb.mxu0 %v4228_v59  ;;  %v2686_v22 = vunpack.c.2.s8 %v10030_v10  ;;  %v4096_v63 = vmul.f32 %v9705_v17, %v3514_v36  ;;  %v3172_v40 = vcvt.s32.f32 %v2596_v44  ;;  %v2692_v51 = vunpack.c.3.s8 %v10030_v10 }
 0x636   :  { %v4348_v58 = vpack.c.bf16 %v4006_v49, %v4000_v8  ;;  %6178 = vmatpush.bf16.msrb.mxu1 %v4276_v48  ;;  %v4102_v29 = vmul.f32 %v9705_v17, %v3520_v56  ;;  %v3748_v14 = vmul.f32 %v9705_v17, %v3166_v54  ;;  %v2830_v7 = vunpack.c.2.s8 %v10038_v62  ;;  %v5963_v48 = vpop.f32.mrf.mxu0  ;;  %v5976_v56 = vpop.f32.mrf.mxu1 }
 0x637   :  { %v3262_v34 = vcvt.s32.f32 %v2686_v22  ;;  %v3754_v23 = vmul.f32 %v9705_v17, %v3172_v40  ;;  %v3268_v59 = vcvt.s32.f32 %v2692_v51  ;;  %v2836_v32 = vunpack.c.3.s8 %v10038_v62 }
 0x638   :  { %6187 = vmatpush.bf16.msra.mxu2 %v4348_v58  ;;  %v2926_v46 = vunpack.c.2.s8 %v10041_v53  ;;  %v4396_v8 = vpack.c.bf16 %v4102_v29, %v4096_v63  ;;  %v3406_v36 = vcvt.s32.f32 %v2830_v7  ;;  %v2932_v44 = vunpack.c.3.s8 %v10041_v53  ;;  %v10061_v29 = vpop.permute.xlu2 %6278 }
 0x639   :  { %v3844_v49 = vmul.f32 %v9705_v17, %v3262_v34  ;;  %v4222_v54 = vpack.c.bf16 %v3754_v23, %v3748_v14  ;;  %v3850_v22 = vmul.f32 %v9705_v17, %v3268_v59  ;;  %v3412_v42 = vcvt.s32.f32 %v2836_v32 }
 0x63a   :  { %v3502_v58 = vcvt.s32.f32 %v2926_v46  ;;  %6200 = vmatpush.bf16.msra.mxu3 %v4396_v8  ;;  %v3988_v40 = vmul.f32 %v9705_v17, %v3406_v36  ;;  %v3508_v51 = vcvt.s32.f32 %v2932_v44  ;;  %v2578_v45 = vunpack.c.0.s8 %v10018_v20 }
 0x63b   :  { %v2584_v63 = vunpack.c.1.s8 %v10018_v20  ;;  %6166 = vmatpush.bf16.msrb.mxu0 %v4222_v54  ;;  %v4270_v34 = vpack.c.bf16 %v3850_v22, %v3844_v49  ;;  %v3994_v7 = vmul.f32 %v9705_v17, %v3412_v42  ;;  %v2674_v23 = vunpack.c.0.s8 %v10030_v10  ;;  %v2344_v49 = vld [vmem:[#allocation5 + $0x358] sm:$0xff] }
 0x63c   :  { %v4084_v14 = vmul.f32 %v9705_v17, %v3502_v58  ;;  %v4090_v59 = vmul.f32 %v9705_v17, %v3508_v51  ;;  %v3154_v32 = vcvt.s32.f32 %v2578_v45  ;;  %v2680_v8 = vunpack.c.1.s8 %v10030_v10  ;;  %v10072_v58 = vpop.permute.xlu1 %6242 }
 0x63d   :  { %v3160_v46 = vcvt.s32.f32 %v2584_v63  ;;  %6179 = vmatpush.bf16.msrb.mxu1 %v4270_v34  ;;  %v4342_v36 = vpack.c.bf16 %v3994_v7, %v3988_v40  ;;  %v3250_v44 = vcvt.s32.f32 %v2674_v23  ;;  %v2818_v20 = vunpack.c.0.s8 %v10038_v62  ;;  %v2368_v63 = vld [vmem:[#allocation5 + $0x418] sm:$0xff] }
 0x63e   :  { %v2824_v48 = vunpack.c.1.s8 %v10038_v62  ;;  %v4390_v56 = vpack.c.bf16 %v4090_v59, %v4084_v14  ;;  %v3736_v54 = vmul.f32 %v9705_v17, %v3154_v32  ;;  %v3256_v42 = vcvt.s32.f32 %v2680_v8  ;;  %v10080_v8 = vpop.permute.xlu0 %6298 }
 0x63f   :  { %v3742_v22 = vmul.f32 %v9705_v17, %v3160_v46  ;;  %6188 = vmatpush.bf16.msra.mxu2 %v4342_v36  ;;  %v3832_v51 = vmul.f32 %v9705_v17, %v3250_v44  ;;  %v3394_v10 = vcvt.s32.f32 %v2818_v20  ;;  %v2914_v40 = vunpack.c.0.s8 %v10041_v53 }
 0x640   :  { %v3400_v45 = vcvt.s32.f32 %v2824_v48  ;;  %6201 = vmatpush.bf16.msra.mxu3 %v4390_v56  ;;  %v3838_v62 = vmul.f32 %v9705_v17, %v3256_v42  ;;  %v2920_v7 = vunpack.c.1.s8 %v10041_v53  ;;  %v2806_v14 = vunpack.c.2.s8 %v2344_v49 }
 0x641   :  { %v4216_v34 = vpack.c.bf16 %v3742_v22, %v3736_v54  ;;  %v3976_v23 = vmul.f32 %v9705_v17, %v3394_v10  ;;  %v3490_v32 = vcvt.s32.f32 %v2914_v40  ;;  %v2812_v46 = vunpack.c.3.s8 %v2344_v49  ;;  %v10086_v40 = vpop.permute.xlu2 %6260 }
 0x642   :  { %v3982_v59 = vmul.f32 %v9705_v17, %v3400_v45  ;;  %v4264_v36 = vpack.c.bf16 %v3838_v62, %v3832_v51  ;;  %v3496_v44 = vcvt.s32.f32 %v2920_v7  ;;  %v3382_v20 = vcvt.s32.f32 %v2806_v14  ;;  %v2338_v14 = vld [vmem:[#allocation5 + $0x328] sm:$0xff] }
 0x643   :  { %6167 = vmatpush.bf16.msrb.mxu0 %v4216_v34  ;;  %v2902_v48 = vunpack.c.2.s8 %v2368_v63  ;;  %v4072_v54 = vmul.f32 %v9705_v17, %v3490_v32  ;;  %v3388_v53 = vcvt.s32.f32 %v2812_v46  ;;  %v2908_v22 = vunpack.c.3.s8 %v2368_v63  ;;  %v10092_v32 = vpop.f32.mrf.mxu2  ;;  %v10094_v46 = vpop.f32.mrf.mxu3 }
 0x644   :  { %v4336_v56 = vpack.c.bf16 %v3982_v59, %v3976_v23  ;;  %6180 = vmatpush.bf16.msrb.mxu1 %v4264_v36  ;;  %v4078_v42 = vmul.f32 %v9705_v17, %v3496_v44  ;;  %v3964_v10 = vmul.f32 %v9705_v17, %v3382_v20  ;;  %v2794_v62 = vunpack.c.0.s8 %v2344_v49 }
 0x645   :  { %v3478_v45 = vcvt.s32.f32 %v2902_v48  ;;  %v3970_v51 = vmul.f32 %v9705_v17, %v3388_v53  ;;  %v3484_v34 = vcvt.s32.f32 %v2908_v22  ;;  %v2800_v7 = vunpack.c.1.s8 %v2344_v49 }
 0x646   :  { %6189 = vmatpush.bf16.msra.mxu2 %v4336_v56  ;;  %6168 = vmatmul.bf16.vlgmr.msrb.gmra.mxu0 %v9139_v6  ;;  %v2890_v59 = vunpack.c.0.s8 %v2368_v63  ;;  %v3370_v44 = vcvt.s32.f32 %v2794_v62  ;;  %v2896_v20 = vunpack.c.1.s8 %v2368_v63  ;;  %v2782_v6 = vunpack.c.2.s8 %v2338_v14  ;;  %v2362_v56 = vld [vmem:[#allocation5 + $0x3e8] sm:$0xff]  ;;  %v10107_v63 = vpop.f32.mrf.mxu1 }
 0x647   :  { %6372 = vmatpush.bf16.msra.mxu0 %v9737_v11  ;;  %v4384_v11 = vpack.c.bf16 %v4078_v42, %v4072_v54  ;;  %v4060_v23 = vmul.f32 %v9705_v17, %v3478_v45  ;;  %6181 = vmatmul.bf16.vlgmr.msrb.gmra.mxu1 %v9144_v26  ;;  %v4330_v36 = vpack.c.bf16 %v3970_v51, %v3964_v10  ;;  %v3376_v49 = vcvt.s32.f32 %v2800_v7  ;;  %v10099_v54 = vpop.permute.xlu1 %6224  ;;  %v10105_v51 = vpop.f32.mrf.mxu0 }
 0x648   :  { %6385 = vmatpush.bf16.msra.mxu1 %v9727_v15  ;;  %v4066_v15 = vmul.f32 %v9705_v17, %v3484_v34  ;;  %v3466_v48 = vcvt.s32.f32 %v2890_v59  ;;  %v3952_v26 = vmul.f32 %v9705_v17, %v3370_v44  ;;  %v2788_v42 = vunpack.c.3.s8 %v2338_v14 }
 0x649   :  { %6202 = vmatpush.bf16.msra.mxu3 %v4384_v11  ;;  %v3958_v22 = vmul.f32 %v9705_v17, %v3376_v49  ;;  %v3472_v10 = vcvt.s32.f32 %v2896_v20  ;;  %v3358_v45 = vcvt.s32.f32 %v2782_v6  ;;  %v2878_v7 = vunpack.c.2.s8 %v2362_v56 }
 0x64a   :  { %6190 = vmatpush.bf16.msra.mxu2 %v4330_v36  ;;  %v4378_v53 = vpack.c.bf16 %v4066_v15, %v4060_v23  ;;  %v3364_v62 = vcvt.s32.f32 %v2788_v42  ;;  %v2884_v11 = vunpack.c.3.s8 %v2362_v56  ;;  %v2770_v36 = vunpack.c.0.s8 %v2338_v14  ;;  %v10116_v42 = vpop.permute.xlu2 %6276 }
 0x64b   :  { %6373 = vmatpush.bf16.msra.mxu0 %v9758_v1  ;;  %v4048_v1 = vmul.f32 %v9705_v17, %v3466_v48  ;;  %v4324_v34 = vpack.c.bf16 %v3958_v22, %v3952_v26  ;;  %v4054_v23 = vmul.f32 %v9705_v17, %v3472_v10  ;;  %v3940_v59 = vmul.f32 %v9705_v17, %v3358_v45  ;;  %v5989_v26 = vpop.f32.mrf.mxu2  ;;  %v6002_v22 = vpop.f32.mrf.mxu3 }
 0x64c   :  { %6386 = vmatpush.bf16.msra.mxu1 %v9778_v25  ;;  %v10110_v25 = vpop.permute.xlu0 %6314  ;;  %v3946_v15 = vmul.f32 %v9705_v17, %v3364_v62  ;;  %v3454_v44 = vcvt.s32.f32 %v2878_v7  ;;  %v3460_v49 = vcvt.s32.f32 %v2884_v11  ;;  %v2776_v20 = vunpack.c.1.s8 %v2338_v14 }
 0x64d   :  { %6203 = vmatpush.bf16.msra.mxu3 %v4378_v53  ;;  %v3346_v48 = vcvt.s32.f32 %v2770_v36  ;;  %v2866_v6 = vunpack.c.0.s8 %v2362_v56  ;;  %v2872_v62 = vunpack.c.1.s8 %v2362_v56 }
 0x64e   :  { %6191 = vmatpush.bf16.msra.mxu2 %v4324_v34  ;;  %v4318_v53 = vpack.c.bf16 %v3946_v15, %v3940_v59  ;;  %v4036_v10 = vmul.f32 %v9705_v17, %v3454_v44  ;;  %v4042_v45 = vmul.f32 %v9705_v17, %v3460_v49  ;;  %v6028_v36 = vpop.f32.mrf.mxu1 }
 0x64f   :  { %6374 = vmatpush.bf16.msra.mxu0 %v9793_v61  ;;  %v4372_v61 = vpack.c.bf16 %v4054_v23, %v4048_v1  ;;  %v3928_v34 = vmul.f32 %v9705_v17, %v3346_v48  ;;  %v3442_v14 = vcvt.s32.f32 %v2866_v6  ;;  %v3448_v11 = vcvt.s32.f32 %v2872_v62  ;;  %v6015_v59 = vpop.f32.mrf.mxu0  ;;  %v6241_v15 = vpop.permute.xlu1 %6240 }
 0x650   :  { %6387 = vmatpush.bf16.msra.mxu1 %v9816_v50  ;;  %v3352_v50 = vcvt.s32.f32 %v2776_v20  ;;  %v4366_v1 = vpack.c.bf16 %v4042_v45, %v4036_v10 }
 0x651   :  { %6204 = vmatpush.bf16.msra.mxu3 %v4372_v61  ;;  %v4024_v23 = vmul.f32 %v9705_v17, %v3442_v14 }
 0x652   :  { %6192 = vmatpush.bf16.msra.mxu2 %v4318_v53  ;;  %v3934_v7 = vmul.f32 %v9705_v17, %v3352_v50 }
 0x653   :  { %6375 = vmatpush.bf16.msra.mxu0 %v9861_v52  ;;  %v4030_v52 = vmul.f32 %v9705_v17, %v3448_v11  ;;  %v6052_v20 = vpop.f32.mrf.mxu3  ;;  %v6259_v17 = vpop.permute.xlu2 %6258 }
 0x654   :  { %6388 = vmatpush.bf16.msra.mxu1 %v9876_v37  ;;  %v4312_v44 = vpack.c.bf16 %v3934_v7, %v3928_v34  ;;  %v6297_v56 = vpop.permute.xlu0 %6296  ;;  %v6039_v37 = vpop.f32.mrf.mxu2 }
 0x655   :  { %6205 = vmatpush.bf16.msra.mxu3 %v4366_v1  ;;  %v4360_v49 = vpack.c.bf16 %v4030_v52, %v4024_v23 }
 0x656   :  { %6193 = vmatpush.bf16.msra.mxu2 %v4312_v44 }
 0x657   :  { %6376 = vmatpush.bf16.msra.mxu0 %v9891_v27  ;;  %v6862_v27 = vld [vmem:[%s10189_s7 + $0x18] sm:$0x7f]  ;;  %v6275_v48 = vpop.permute.xlu1 %6274 }
 0x658   :  { %6389 = vmatpush.bf16.msra.mxu1 %v9928_v33  ;;  %v5741_v61 = vperm.slane %v6862_v27, 3  ;;  %v10139_v33 = vpop.f32.mrf.mxu1  ;;  %v6864_v27 = vld [vmem:[%s10189_s7 + $0x28] sm:$0x7f] }
 0x659   :  { %6206 = vmatpush.bf16.msra.mxu3 %v4360_v49  ;;  %6194 = vmatmul.bf16.vlgmr.msra.gmra.mxu2 %v9067_v3  ;;  %v6212_v3 = vmax.f32 %v9686_v41, 0.0  ;;  %v5936_v41 = vadd.f32 %v10004_v9, %v9952_v0 }
 0x65a   :  { %6398 = vmatpush.bf16.msrb.mxu2 %v9771_v60  ;;  %v10137_v60 = vpop.f32.mrf.mxu0 }
 0x65b   :  { %6377 = vmatpush.bf16.msra.mxu0 %v9962_v35  ;;  %v5988_v35 = vadd.f32 %v10092_v32, %v5741_v61  ;;  %v6218_v6 = vpack.c.bf16 %v6212_v3, %v6212_v3  ;;  %v6295_v32 = vpop.permute.xlu2 %6294  ;;  %v5743_v61 = vperm.slane %v6864_v27, 3 }
 0x65c   :  { %6390 = vmatpush.bf16.msra.mxu1 %v9997_v24  ;;  %6207 = vmatmul.bf16.vlgmr.msra.gmra.mxu3 %v9069_v5  ;;  %v6054_v24 = vpop.f32.mrf.mxu3  ;;  %v6313_v5 = vpop.permute.xlu0 %6312 }
 0x65d   :  { %6411 = vmatpush.bf16.msrb.mxu3 %v9824_v39  ;;  %v6213_v39 = vmax.f32 %v9921_v57, 0.0 }
 0x65e   :  { %6399 = vmatpush.bf16.msrb.mxu2 %v9838_v30  ;;  %v6041_v30 = vpop.f32.mrf.mxu2 }
 0x65f   :  { %6378 = vmatpush.bf16.msra.mxu0 %v10043_v4  ;;  %v6001_v4 = vadd.f32 %v10094_v46, %v5988_v35 }
 0x660   :  { %6391 = vmatpush.bf16.msra.mxu1 %v10072_v58  ;;  %v6080_v58 = vpop.f32.mrf.mxu1 }
 0x661   :  { %6412 = vmatpush.bf16.msrb.mxu3 %v9853_v47  ;;  %v6219_v47 = vpack.c.bf16 %v6213_v39, %v6213_v39 }
 0x662   :  { %6400 = vmatpush.bf16.msrb.mxu2 %v9898_v13  ;;  %v6014_v13 = vadd.f32 %v10105_v51, %v6001_v4  ;;  %v6067_v57 = vpop.f32.mrf.mxu0  ;;  %v6863_v51 = vld [vmem:[%s10189_s7 + $0x20] sm:$0x7f]  ;;  %s6953_s7 = smov [#allocation7]  }
 0x663   :  { %6379 = vmatpush.bf16.msra.mxu0 %v10099_v54  ;;  %s6471_s28 = sshll.u32 %s6953_s7, 4  ;;  %s6472_s28 = int_to_ptr.vmem [resolvable:$true] %s6471_s28 }
 0x664   :  { %6392 = vmatpush.bf16.msra.mxu1 %v6241_v15 }
 0x665   :  { %6413 = vmatpush.bf16.msrb.mxu3 %v9912_v55  ;;  %v6027_v55 = vadd.f32 %v10107_v63, %v6014_v13  ;;  %v5742_v63 = vperm.slane %v6863_v51, 3 }
 0x666   :  { %6401 = vmatpush.bf16.msrb.mxu2 %v9949_v19  ;;  %6380 = vmatmul.bf16.vlgmr.msra.gmra.mxu0 %v6218_v6  ;;  %v6311_v19 = vpop.permute.xlu1 %6310 }
 0x667   :  { %6424 = vmatpush.bf16.msrb.mxu0 %v9938_v43  ;;  %6393 = vmatmul.bf16.vlgmr.msra.gmra.mxu1 %v6219_v47  ;;  %v5949_v43 = vadd.f32 %v10011_v16, %v5936_v41  ;;  %v6040_v9 = vadd.f32 %v6039_v37, %v6027_v55  ;;  %v6273_v16 = vpop.permute.xlu2 %6272  ;;  %v6066_v26 = vadd.f32 %v10137_v60, %v5742_v63 }
 0x668   :  { %6437 = vmatpush.bf16.msrb.mxu1 %v9972_v38  ;;  %v6257_v38 = vpop.permute.xlu0 %6256 }
 0x669   :  { %6414 = vmatpush.bf16.msrb.mxu3 %v9985_v2  ;;  %v5962_v0 = vadd.f32 %v10022_v28, %v5949_v43  ;;  %v6053_v2 = vadd.f32 %v6052_v20, %v6040_v9  ;;  %v6079_v53 = vadd.f32 %v10139_v33, %v6066_v26 }
 0x66a   :  { %6402 = vmatpush.bf16.msrb.mxu2 %v10026_v21 }
 0x66b   :  { %6425 = vmatpush.bf16.msrb.mxu0 %v10009_v18  ;;  %v5975_v18 = vadd.f32 %v10024_v31, %v5962_v0  ;;  %v6215_v21 = vmax.f32 %v6053_v2, 0.0 }
 0x66c   :  { %6438 = vmatpush.bf16.msrb.mxu1 %v10053_v12 }
 0x66d   :  { %6415 = vmatpush.bf16.msrb.mxu3 %v10061_v29  ;;  %v6214_v28 = vmax.f32 %v5975_v18, 0.0 }
 0x66e   :  { %6403 = vmatpush.bf16.msrb.mxu2 %v10086_v40  ;;  %v6309_v12 = vpop.permute.xlu1 %6308  ;;  %v6221_v40 = vpack.c.bf16 %v6215_v21, %v6215_v21 }
 0x66f   :  { %6426 = vmatpush.bf16.msrb.mxu0 %v10080_v8  ;;  %v6220_v29 = vpack.c.bf16 %v6214_v28, %v6214_v28  ;;  %v6291_v46 = vpop.permute.xlu2 %6290 }
 0x670   :  { %6439 = vmatpush.bf16.msrb.mxu1 %v10110_v25  ;;  %v6293_v8 = vpop.permute.xlu0 %6292 }
 0x671   :  { %6416 = vmatpush.bf16.msrb.mxu3 %v10116_v42 }
 0x672   :  { %6404 = vmatpush.bf16.msrb.mxu2 %v6259_v17 }
 0x673   :  { %6427 = vmatpush.bf16.msrb.mxu0 %v6297_v56 }
 0x674   :  { %6440 = vmatpush.bf16.msrb.mxu1 %v6313_v5 }
 0x675   :  { %6417 = vmatpush.bf16.msrb.mxu3 %v6275_v48 }
 0x676   :  { %6405 = vmatpush.bf16.msrb.mxu2 %v6257_v38  ;;  %v6091_v31 = vpop.f32.mrf.mxu2  ;;  %v6289_v25 = vpop.permute.xlu1 %6288 }
 0x677   :  { %6428 = vmatpush.bf16.msrb.mxu0 %v6295_v32  ;;  %v6104_v54 = vpop.f32.mrf.mxu3  ;;  %v6092_v10 = vadd.f32 %v6091_v31, %v6079_v53  ;;  %v6305_v15 = vpop.permute.xlu2 %6304 }
 0x678   :  { %6441 = vmatpush.bf16.msrb.mxu1 %v6311_v19  ;;  %v6307_v59 = vpop.permute.xlu0 %6306 }
 0x679   :  { %6406 = vmatmul.bf16.vlgmr.msrb.gmra.mxu2 %v6220_v29  ;;  %6418 = vmatpush.bf16.msrb.mxu3 %v6273_v16  ;;  %v6105_v45 = vadd.f32 %v6104_v54, %v6092_v10 }
 0x67b   :  { %6429 = vmatpush.bf16.msrb.mxu0 %v6293_v8 }
 0x67c   :  { %6442 = vmatpush.bf16.msrb.mxu1 %v6309_v12  ;;  %6419 = vmatmul.bf16.vlgmr.msrb.gmra.mxu3 %v6221_v40 }
 0x67e   :  { %v6093_v22 = vpop.f32.mrf.mxu2  ;;  %v6453_v31 = vpop.permute.xlu1 %6452 }
 0x67f   :  { %6430 = vmatpush.bf16.msrb.mxu0 %v6291_v46  ;;  %v6106_v42 = vpop.f32.mrf.mxu3  ;;  %v6457_v46 = vpop.permute.xlu2 %6456 }
 0x680   :  { %6443 = vmatpush.bf16.msrb.mxu1 %v6307_v59  ;;  %v6370_v30 = vpop.permute.xlu0 %6369 }
 0x683   :  { %6431 = vmatpush.bf16.msrb.mxu0 %v6289_v25 }
 0x684   :  { %6444 = vmatpush.bf16.msrb.mxu1 %v6305_v15 }
 0x689   :  { %v6117_v50 = vpop.f32.mrf.mxu0 }
 0x68a   :  { %v6118_v34 = vadd.f32 %v6117_v50, %v6105_v45  ;;  %v6130_v62 = vpop.f32.mrf.mxu1 }
 0x68c   :  { %v6131_v14 = vadd.f32 %v6130_v62, %v6118_v34 }
 0x68e   :  { %v6216_v1 = vmax.f32 %v6131_v14, 0.0 }
 0x690   :  { %v6222_v7 = vpack.c.bf16 %v6216_v1, %v6216_v1 }
 0x691   :  { %v6119_v11 = vpop.f32.mrf.mxu0 }
 0x692   :  { %6432 = vmatmul.bf16.vlgmr.msrb.gmra.mxu0 %v6222_v7  ;;  %v6132_v23 = vpop.f32.mrf.mxu1 }
 0x6b0   :  { %v6143_v36 = vpop.f32.mrf.mxu2 }
 0x6b1   :  { %v6144_v60 = vadd.f32 %v6143_v36, %v5743_v61 }
 0x6b2   :  { %v6156_v44 = vpop.f32.mrf.mxu3 }
 0x6b3   :  { %v6157_v33 = vadd.f32 %v6156_v44, %v6144_v60 }
 0x6b8   :  { %v6145_v52 = vpop.f32.mrf.mxu2 }
 0x6ba   :  { %v6158_v56 = vpop.f32.mrf.mxu3 }
 0x6c3   :  { %v6169_v49 = vpop.f32.mrf.mxu0 }
 0x6c4   :  { %v6182_v37 = vpop.f32.mrf.mxu1  ;;  %v6170_v3 = vadd.f32 %v6169_v49, %v6157_v33 }
 0x6c6   :  { %v6183_v35 = vadd.f32 %v6182_v37, %v6170_v3 }
 0x6cb   :  { %v6171_v20 = vpop.f32.mrf.mxu0 }
 0x6cc   :  { %v6184_v17 = vpop.f32.mrf.mxu1 }
 0x6dc   :  { %v6195_v48 = vpop.f32.mrf.mxu2 }
 0x6dd   :  { %v6196_v39 = vadd.f32 %v6195_v48, %v6183_v35 }
 0x6df   :  { %v6208_v24 = vpop.f32.mrf.mxu3 }
 0x6e0   :  { %v6209_v5 = vadd.f32 %v6208_v24, %v6196_v39 }
 0x6e2   :  { %v6217_v41 = vmax.f32 %v6209_v5, 0.0 }
 0x6e3   :  { %v6381_v6 = vpop.f32.mrf.mxu0 }
 0x6e4   :  { %v6382_v4 = vadd.f32 %v6381_v6, %v6370_v30  ;;  %v6394_v47 = vpop.f32.mrf.mxu1  ;;  %v6223_v57 = vpack.c.bf16 %v6217_v41, %v6217_v41  ;;  %v6197_v58 = vpop.f32.mrf.mxu2 }
 0x6e6   :  { %v6395_v13 = vadd.f32 %v6394_v47, %v6382_v4  ;;  %6445 = vmatmul.bf16.vlgmr.msrb.gmra.mxu1 %v6223_v57 }
 0x6e7   :  { %v6210_v32 = vpop.f32.mrf.mxu3 }
 0x6eb   :  { %v6383_v43 = vpop.f32.mrf.mxu0 }
 0x6ec   :  { %v6396_v55 = vpop.f32.mrf.mxu1 }
 0x6fc   :  { %v6407_v19 = vpop.f32.mrf.mxu2 }
 0x6fd   :  { %v6408_v0 = vadd.f32 %v6407_v19, %v6395_v13 }
 0x6ff   :  { %v6420_v9 = vpop.f32.mrf.mxu3 }
 0x700   :  { %v6421_v38 = vadd.f32 %v6420_v9, %v6408_v0 }
 0x704   :  { %v6409_v18 = vpop.f32.mrf.mxu2 }
 0x707   :  { %v6422_v2 = vpop.f32.mrf.mxu3 }
 0x70f   :  { %v6433_v16 = vpop.f32.mrf.mxu0 }
 0x710   :  { %v6434_v28 = vadd.f32 %v6433_v16, %v6421_v38 }
 0x717   :  { %v6435_v21 = vpop.f32.mrf.mxu0 }
 0x763   :  { %v6446_v12 = vpop.f32.mrf.mxu1 }
 0x764   :  { %v6447_v8 = vadd.f32 %v6446_v12, %v6434_v28 }
 0x766   :  { %6839 = vtanh.f32 %v6447_v8 }
 0x76b   :  { %v6448_v29 = vpop.f32.mrf.mxu1 }
 0x76c   :  { %v6840_v40 = vpop.eup %6839 }
 0x76d   :  { %v6460_v54 = vsel %vm6459_vm7, %v6840_v40, %v6453_v31 }
 0x76e   :  { %v6462_v51 = vsel %vm6461_vm8, %v6460_v54, %v6457_v46 }
 0x76f   :  { %v6464_v63 = vsel %vm6463_vm9, %v6462_v51, 0.0 }
 0x770   :  { %6465 = vst [vmem:[#allocation7] sm:$0xff] %v6464_v63 }
 0x771   :  { %6476 = dma.vmem_to_hbm [thread:$0]  %s6472_s28, 128, %s6474_s15, [#allocation4]  }
 0x772   :  { %6941 = dma.done.wait [#allocation4], 128  }
 0x773   :  { %6942 = vsyncadd [#allocation4], 4294967168 }
 0x774   :  { %6481 = vsyncpa [#allocation3], 1 }
 0x775   :  { %6482 = vsyncpa [#allocation6], 1 }
 0x776   :  { %6483 = vsyncpa [#allocation4], 1 }

</bundles_post_ra>
